<compile_context>
chip_gen: v7x
topology: tpu7x:2x2x1
jax: 0.10.0
libtpu: 0.0.40
codegen_flags: <defaults>
</compile_context>

<pallas_src>
import functools

import jax
import jax.numpy as jnp
from jax.experimental import pallas as pl
from jax.experimental.pallas import tpu as pltpu

EPS = 1e-5


# --------------------------------------------------------------------------------------
# Helpers
# --------------------------------------------------------------------------------------
def _compiler_params():
    # All grid axes below write disjoint output blocks -> "parallel" is legal and lets
    # v7x shard the grid over its two TensorCores.  Explicit VMEM limit leaves headroom
    # against v7x's 64 MiB physical VMEM (tiles below are sized to a few MiB).
    return pltpu.CompilerParams(
        dimension_semantics=("parallel",),
        vmem_limit_bytes=48 * 1024 * 1024,
    )


def _pick_row_tile(total_rows, row_bytes, target_bytes=2 * 1024 * 1024, max_rows=512):
    """Largest divisor of total_rows that is a multiple of 8, <= max_rows, and keeps a
    single block under ~target_bytes (so double-buffered in/out blocks fit v7x VMEM)."""
    cap = max(8, min(max_rows, target_bytes // max(int(row_bytes), 1)))
    if total_rows <= cap:
        return total_rows
    for cand in range(int(cap), 7, -1):
        if total_rows % cand == 0 and cand % 8 == 0:
            return cand
    return total_rows  # fallback: one block (always correct)


def _fold_bn(stats_partial, count, gamma, beta):
    """Fold training-mode BN (biased var) + affine into per-channel scale/shift."""
    tot = jnp.sum(stats_partial, axis=0)                      # (2, C): [sum, sum_sq]
    mean = tot[0] / count
    var = jnp.maximum(tot[1] / count - mean * mean, 0.0)      # biased variance
    scale = gamma.astype(jnp.float32) * jax.lax.rsqrt(var + EPS)
    shift = beta.astype(jnp.float32) - mean * scale
    return scale.reshape(1, -1), shift.reshape(1, -1)


# --------------------------------------------------------------------------------------
# Kernels
# --------------------------------------------------------------------------------------
def _stats_of(v):
    """Per-channel sum / sum-of-squares of a (rows, C) fp32 value -> (1, 2, C)."""
    s = jnp.sum(v, axis=0, keepdims=True)
    ss = jnp.sum(v * v, axis=0, keepdims=True)
    return jnp.concatenate([s, ss], axis=0)[None]


def stats_kernel(x_ref, stats_ref):
    """Pass 1: per-tile partial BN0 statistics of the raw input."""
    stats_ref[...] = _stats_of(x_ref[...].astype(jnp.float32))


def mm_stage_kernel(x_ref, scale_ref, shift_ref, w_ref, h_ref, stats_ref):
    """Folded BN (one FMA) -> 1x1 conv as a single MXU matmul -> partial stats."""
    xn = x_ref[...].astype(jnp.float32) * scale_ref[...] + shift_ref[...]
    h = jnp.dot(xn.astype(w_ref.dtype), w_ref[...],
                preferred_element_type=jnp.float32)            # fp32 accumulation
    stats_ref[...] = _stats_of(h)
    h_ref[...] = h.astype(h_ref.dtype)


def conv3x3_kernel(h1_ref, scale_ref, shift_ref, w_ref, h2_ref, stats_ref,
                   pad_ref, col_ref):
    """Folded BN -> 3x3/pad1 conv as ONE im2col matmul (K = 9*Cmid) -> partial stats."""
    TN, H, W, C = h1_ref.shape
    rows = TN * H * W

    out1 = h1_ref[...].astype(jnp.float32) * scale_ref[...] + shift_ref[...]

    # Padded activation lives in a VMEM scratch ref written once (no zeros +
    # dynamic_update_slice value chain); the 9 taps are plain ref reads.
    pad_ref[...] = jnp.zeros(pad_ref.shape, pad_ref.dtype)
    pad_ref[:, 1:H + 1, 1:W + 1, :] = out1

    # im2col slab built once per tile -> a single big-K MXU matmul instead of nine
    # K=Cmid matmuls with accumulator round-trips.
    for t in range(9):
        dy, dx = t // 3, t % 3
        patch = pad_ref[:, dy:dy + H, dx:dx + W, :].reshape(rows, C)
        col_ref[:, t * C:(t + 1) * C] = patch.astype(col_ref.dtype)

    h2 = jnp.dot(col_ref[...], w_ref[...], preferred_element_type=jnp.float32)
    stats_ref[...] = _stats_of(h2)
    h2_ref[...] = h2.reshape(TN, H, W, C).astype(h2_ref.dtype)


def finalize_kernel(h3_ref, x_ref, scale_ref, shift_ref, o_ref):
    """bn3 (folded scale/shift) + residual add on a lane-dense (rows, W*C) layout."""
    o_ref[...] = h3_ref[...] * scale_ref[...] + shift_ref[...] + x_ref[...]


# --------------------------------------------------------------------------------------
# Wrapper
# --------------------------------------------------------------------------------------
@functools.partial(jax.jit, static_argnames=("operand_dtype",))
def bottleneck_pallas_nhwc(x_nhwc, w1_oihw, w2_oihw, w3_oihw,
                           g0, b0, g1, b1, g2, b2, g3, b3,
                           operand_dtype=jnp.bfloat16):
    """x_nhwc: (N, H, W, Cin) fp32; weights in PyTorch OIHW. Returns NHWC fp32."""
    N, H, W, Cin = x_nhwc.shape
    Cmid = w1_oihw.shape[0]
    Cout = w3_oihw.shape[0]
    assert Cout == Cin, "no downsample: residual requires inplanes == planes*4"
    R = N * H * W
    count = float(R)
    cp = _compiler_params()
    op_dtype = operand_dtype

    # Weights in matmul-ready layouts, cast to the MXU operand dtype (bf16 by default).
    w1 = jnp.transpose(w1_oihw[:, :, 0, 0], (1, 0)).astype(op_dtype)          # (Cin, Cmid)
    w2 = jnp.transpose(w2_oihw, (2, 3, 1, 0)).reshape(9 * Cmid, Cmid).astype(op_dtype)
    w3 = jnp.transpose(w3_oihw[:, :, 0, 0], (1, 0)).astype(op_dtype)          # (Cmid, Cout)

    x2d = x_nhwc.reshape(R, Cin).astype(jnp.float32)

    TR = _pick_row_tile(R, row_bytes=4 * max(Cin, Cmid, Cout))
    nt = R // TR

    # ---- pass 1: BN0 statistics of x --------------------------------------------------
    stats0 = pl.pallas_call(
        stats_kernel,
        out_shape=jax.ShapeDtypeStruct((nt, 2, Cin), jnp.float32),
        grid=(nt,),
        in_specs=[pl.BlockSpec((TR, Cin), lambda i: (i, 0))],
        out_specs=pl.BlockSpec((1, 2, Cin), lambda i: (i, 0, 0)),
        compiler_params=cp,
    )(x2d)
    scale0, shift0 = _fold_bn(stats0, count, g0, b0)

    # ---- pass 2: bn0 -> conv1 (1x1)  (+ stats of conv1 output) -------------------------
    h1, stats1 = pl.pallas_call(
        mm_stage_kernel,
        out_shape=(jax.ShapeDtypeStruct((R, Cmid), op_dtype),
                   jax.ShapeDtypeStruct((nt, 2, Cmid), jnp.float32)),
        grid=(nt,),
        in_specs=[pl.BlockSpec((TR, Cin), lambda i: (i, 0)),
                  pl.BlockSpec((1, Cin), lambda i: (0, 0)),
                  pl.BlockSpec((1, Cin), lambda i: (0, 0)),
                  pl.BlockSpec((Cin, Cmid), lambda i: (0, 0))],
        out_specs=(pl.BlockSpec((TR, Cmid), lambda i: (i, 0)),
                   pl.BlockSpec((1, 2, Cmid), lambda i: (i, 0, 0))),
        compiler_params=cp,
    )(x2d, scale0, shift0, w1)
    scale1, shift1 = _fold_bn(stats1, count, g1, b1)

    # ---- pass 3: bn1 -> conv2 (3x3, pad 1)  (+ stats) ----------------------------------
    TN = 1  # one image per grid step: >= H*W rows per matmul, per-tile VMEM stays small
    nb = N // TN
    h1_4d = h1.reshape(N, H, W, Cmid)
    h2_4d, stats2 = pl.pallas_call(
        conv3x3_kernel,
        out_shape=(jax.ShapeDtypeStruct((N, H, W, Cmid), op_dtype),
                   jax.ShapeDtypeStruct((nb, 2, Cmid), jnp.float32)),
        grid=(nb,),
        in_specs=[pl.BlockSpec((TN, H, W, Cmid), lambda i: (i, 0, 0, 0)),
                  pl.BlockSpec((1, Cmid), lambda i: (0, 0)),
                  pl.BlockSpec((1, Cmid), lambda i: (0, 0)),
                  pl.BlockSpec((9 * Cmid, Cmid), lambda i: (0, 0))],
        out_specs=(pl.BlockSpec((TN, H, W, Cmid), lambda i: (i, 0, 0, 0)),
                   pl.BlockSpec((1, 2, Cmid), lambda i: (i, 0, 0))),
        scratch_shapes=[pltpu.VMEM((TN, H + 2, W + 2, Cmid), jnp.float32),
                        pltpu.VMEM((TN * H * W, 9 * Cmid), op_dtype)],
        compiler_params=cp,
    )(h1_4d, scale1, shift1, w2)
    scale2, shift2 = _fold_bn(stats2, count, g2, b2)

    # ---- pass 4: bn2 -> conv3 (1x1)  (+ stats) -----------------------------------------
    h2_2d = h2_4d.reshape(R, Cmid)
    h3, stats3 = pl.pallas_call(
        mm_stage_kernel,
        out_shape=(jax.ShapeDtypeStruct((R, Cout), jnp.float32),
                   jax.ShapeDtypeStruct((nt, 2, Cout), jnp.float32)),
        grid=(nt,),
        in_specs=[pl.BlockSpec((TR, Cmid), lambda i: (i, 0)),
                  pl.BlockSpec((1, Cmid), lambda i: (0, 0)),
                  pl.BlockSpec((1, Cmid), lambda i: (0, 0)),
                  pl.BlockSpec((Cmid, Cout), lambda i: (0, 0))],
        out_specs=(pl.BlockSpec((TR, Cout), lambda i: (i, 0)),
                   pl.BlockSpec((1, 2, Cout), lambda i: (i, 0, 0))),
        compiler_params=cp,
    )(h2_2d, scale2, shift2, w3)
    scale3, shift3 = _fold_bn(stats3, count, g3, b3)

    # ---- pass 5: bn3 + residual add, on a lane-dense (N*H, W*Cout) view ----------------
    rows2 = N * H
    lane = W * Cout
    TR2 = _pick_row_tile(rows2, row_bytes=4 * lane)
    nt2 = rows2 // TR2
    h3_r = h3.reshape(rows2, lane)          # contiguous reshapes: free at the XLA level
    x_r = x2d.reshape(rows2, lane)
    scale3_w = jnp.tile(scale3, (1, W))     # per-lane scale/shift (channel = lane % Cout)
    shift3_w = jnp.tile(shift3, (1, W))
    out_r = pl.pallas_call(
        finalize_kernel,
        out_shape=jax.ShapeDtypeStruct((rows2, lane), jnp.float32),
        grid=(nt2,),
        in_specs=[pl.BlockSpec((TR2, lane), lambda i: (i, 0)),
                  pl.BlockSpec((TR2, lane), lambda i: (i, 0)),
                  pl.BlockSpec((1, lane), lambda i: (0, 0)),
                  pl.BlockSpec((1, lane), lambda i: (0, 0))],
        out_specs=pl.BlockSpec((TR2, lane), lambda i: (i, 0)),
        compiler_params=cp,
    )(h3_r, x_r, scale3_w, shift3_w)
    return out_r.reshape(N, H, W, Cout)


def bottleneck_pallas_nchw(x_nchw, w1, w2, w3, g0, b0, g1, b1, g2, b2, g3, b3,
                           operand_dtype=jnp.bfloat16):
    """Layout shim for parity with the PyTorch (NCHW) interface / reference.  Production
    callers should use bottleneck_pallas_nhwc directly and keep the network in NHWC to
    avoid these two extra HBM passes."""
    x_nhwc = jnp.transpose(x_nchw, (0, 2, 3, 1))
    out = bottleneck_pallas_nhwc(x_nhwc, w1, w2, w3, g0, b0, g1, b1, g2, b2, g3, b3,
                                 operand_dtype=operand_dtype)
    return jnp.transpose(out, (0, 3, 1, 2))


# --------------------------------------------------------------------------------------
# Pure-JAX reference (NCHW, OIHW) mirroring the PyTorch training-mode forward
# --------------------------------------------------------------------------------------
def bottleneck_ref(x, w1, w2, w3, g0, b0, g1, b1, g2, b2, g3, b3):
    def bn(t, g, b):
        mean = t.mean(axis=(0, 2, 3), keepdims=True)
        var = ((t - mean) ** 2).mean(axis=(0, 2, 3), keepdims=True)
        return ((t - mean) * jax.lax.rsqrt(var + EPS)
                * g.reshape(1, -1, 1, 1) + b.reshape(1, -1, 1, 1))

    def conv(t, w, pad):
        return jax.lax.conv_general_dilated(
            t, w, (1, 1), [(pad, pad), (pad, pad)],
            dimension_numbers=('NCHW', 'OIHW', 'NCHW'))

    out = bn(x, g0, b0)
    residual = x
    out = bn(conv(out, w1, 0), g1, b1)
    out = bn(conv(out, w2, 1), g2, b2)
    out = bn(conv(out, w3, 0), g3, b3)
    return out + residual


if __name__ == "__main__":
    # Small shapes consistent with Bottleneck (expansion=4, downsample=None):
    # inplanes == planes * 4 so the residual add is valid.
    N, H, W = 4, 16, 16
    planes = 8
    inplanes = planes * 4          # 32
    outplanes = planes * 4         # 32

    key = jax.random.PRNGKey(0)
    ks = jax.random.split(key, 12)
    x = jax.random.normal(ks[0], (N, inplanes, H, W), jnp.float32)

    w1 = jax.random.normal(ks[1], (planes, inplanes, 1, 1), jnp.float32) * 0.1
    w2 = jax.random.normal(ks[2], (planes, planes, 3, 3), jnp.float32) * 0.1
    w3 = jax.random.normal(ks[3], (outplanes, planes, 1, 1), jnp.float32) * 0.1

    g0 = 1.0 + 0.1 * jax.random.normal(ks[4], (inplanes,), jnp.float32)
    b0 = 0.1 * jax.random.normal(ks[5], (inplanes,), jnp.float32)
    g1 = 1.0 + 0.1 * jax.random.normal(ks[6], (planes,), jnp.float32)
    b1 = 0.1 * jax.random.normal(ks[7], (planes,), jnp.float32)
    g2 = 1.0 + 0.1 * jax.random.normal(ks[8], (planes,), jnp.float32)
    b2 = 0.1 * jax.random.normal(ks[9], (planes,), jnp.float32)
    g3 = 1.0 + 0.1 * jax.random.normal(ks[10], (outplanes,), jnp.float32)
    b3 = 0.1 * jax.random.normal(ks[11], (outplanes,), jnp.float32)

    args = (x, w1, w2, w3, g0, b0, g1, b1, g2, b2, g3, b3)

    ref = jax.block_until_ready(bottleneck_ref(*args))

    # 1) Exact-semantics check with fp32 MXU operands / fp32 intermediates.
    out_f32 = jax.block_until_ready(
        bottleneck_pallas_nchw(*args, operand_dtype=jnp.float32))
    assert out_f32.shape == (N, outplanes, H, W)
    err32 = float(jnp.max(jnp.abs(out_f32 - ref)))
    assert err32 < 3e-3, f"fp32-path max abs err {err32}"

    # 2) Performance path: bf16 MXU operands + bf16 intermediate storage, fp32 accum.
    out_bf16 = jax.block_until_ready(
        bottleneck_pallas_nchw(*args, operand_dtype=jnp.bfloat16))
    errbf = float(jnp.max(jnp.abs(out_bf16 - ref)))
    assert errbf < 1.5e-1, f"bf16-path max abs err {errbf}"

    print("KERNEL_OK")
</pallas_src>

<mosaic_0001>
module attributes {stable_mosaic.version = 11 : i64} {
  func.func @stats_kernel(%arg0: i32, %arg1: memref<512x32xf32, #tpu.memory_space<vmem>>, %arg2: memref<1x2x32xf32, #tpu.memory_space<vmem>>) attributes {dimension_semantics = [#tpu.dimension_semantics<parallel>], iteration_bounds = array<i64: 2>, scalar_prefetch = 0 : i64, scratch_operands = 0 : i64, tpu.core_type = #tpu.core_type<tc>, window_params = [{transform_indices = @transform_0, window_bounds = array<i64: 512, 32>}, {transform_indices = @transform_1, window_bounds = array<i64: 1, 2, 32>}]} {
    %c0 = arith.constant 0 : index
    %c0_0 = arith.constant 0 : index
    %0 = vector.load %arg1[%c0, %c0_0] : memref<512x32xf32, #tpu.memory_space<vmem>>, vector<512x32xf32>
    %cst = arith.constant dense<0.000000e+00> : vector<32xf32>
    %1 = vector.multi_reduction <add>, %0, %cst [0] : vector<512x32xf32> to vector<32xf32>
    %2 = vector.shape_cast %1 : vector<32xf32> to vector<1x32xf32>
    %3 = arith.mulf %0, %0 : vector<512x32xf32>
    %cst_1 = arith.constant dense<0.000000e+00> : vector<32xf32>
    %4 = vector.multi_reduction <add>, %3, %cst_1 [0] : vector<512x32xf32> to vector<32xf32>
    %5 = vector.shape_cast %4 : vector<32xf32> to vector<1x32xf32>
    %6 = tpu.concatenate %2, %5 in 0 : vector<1x32xf32>, vector<1x32xf32> -> vector<2x32xf32>
    %7 = vector.shape_cast %6 : vector<2x32xf32> to vector<1x2x32xf32>
    %c0_2 = arith.constant 0 : index
    %c0_3 = arith.constant 0 : index
    %c0_4 = arith.constant 0 : index
    %8 = vector.load %arg2[%c0_2, %c0_3, %c0_4] : memref<1x2x32xf32, #tpu.memory_space<vmem>>, vector<1x2x32xf32>
    tpu.vector_store %arg2[%c0_2, %c0_3, %c0_4], %7 {strides = array<i32>} : memref<1x2x32xf32, #tpu.memory_space<vmem>>, vector<1x2x32xf32>,
    return
  }
  func.func @transform_0(%arg0: i32) -> (i32, i32) {
    %c0_i32 = arith.constant 0 : i32
    %c0_i32_0 = arith.constant 0 : i32
    return %arg0, %c0_i32 : i32, i32
  }
  func.func @transform_1(%arg0: i32) -> (i32, i32, i32) {
    %c0_i32 = arith.constant 0 : i32
    %c0_i32_0 = arith.constant 0 : i32
    %c0_i32_1 = arith.constant 0 : i32
    return %arg0, %c0_i32, %c0_i32_0 : i32, i32, i32
  }
}

module attributes {stable_mosaic.version = 11 : i64} {
  func.func @mm_stage_kernel(%arg0: i32, %arg1: memref<512x32xf32, #tpu.memory_space<vmem>>, %arg2: memref<1x32xf32, #tpu.memory_space<vmem>>, %arg3: memref<1x32xf32, #tpu.memory_space<vmem>>, %arg4: memref<32x8xf32, #tpu.memory_space<vmem>>, %arg5: memref<512x8xf32, #tpu.memory_space<vmem>>, %arg6: memref<1x2x8xf32, #tpu.memory_space<vmem>>) attributes {dimension_semantics = [#tpu.dimension_semantics<parallel>], iteration_bounds = array<i64: 2>, scalar_prefetch = 0 : i64, scratch_operands = 0 : i64, tpu.core_type = #tpu.core_type<tc>, window_params = [{transform_indices = @transform_0, window_bounds = array<i64: 512, 32>}, {pipeline_mode = #tpu.pipeline_mode<synchronous>, transform_indices = @transform_1, window_bounds = array<i64: 1, 32>}, {pipeline_mode = #tpu.pipeline_mode<synchronous>, transform_indices = @transform_2, window_bounds = array<i64: 1, 32>}, {pipeline_mode = #tpu.pipeline_mode<synchronous>, transform_indices = @transform_3, window_bounds = array<i64: 32, 8>}, {transform_indices = @transform_4, window_bounds = array<i64: 512, 8>}, {transform_indices = @transform_5, window_bounds = array<i64: 1, 2, 8>}]} {
    %c0 = arith.constant 0 : index
    %c0_0 = arith.constant 0 : index
    %0 = vector.load %arg1[%c0, %c0_0] : memref<512x32xf32, #tpu.memory_space<vmem>>, vector<512x32xf32>
    %c0_1 = arith.constant 0 : index
    %c0_2 = arith.constant 0 : index
    %1 = vector.load %arg2[%c0_1, %c0_2] : memref<1x32xf32, #tpu.memory_space<vmem>>, vector<1x32xf32>
    %2 = vector.broadcast %1 : vector<1x32xf32> to vector<512x32xf32>
    %3 = arith.mulf %0, %2 : vector<512x32xf32>
    %c0_3 = arith.constant 0 : index
    %c0_4 = arith.constant 0 : index
    %4 = vector.load %arg3[%c0_3, %c0_4] : memref<1x32xf32, #tpu.memory_space<vmem>>, vector<1x32xf32>
    %5 = vector.broadcast %4 : vector<1x32xf32> to vector<512x32xf32>
    %6 = arith.addf %3, %5 : vector<512x32xf32>
    %c0_5 = arith.constant 0 : index
    %c0_6 = arith.constant 0 : index
    %7 = vector.load %arg4[%c0_5, %c0_6] : memref<32x8xf32, #tpu.memory_space<vmem>>, vector<32x8xf32>
    %cst = arith.constant dense<0.000000e+00> : vector<512x8xf32>
    %8 = tpu.matmul %6, %7, %cst {dimension_numbers = #tpu.dot_dimension_numbers<[1], [0], [0], [1], [0, 0, 1, 1], [], []>} : vector<512x32xf32>, vector<32x8xf32>, vector<512x8xf32> -> vector<512x8xf32>
    %cst_7 = arith.constant dense<0.000000e+00> : vector<8xf32>
    %9 = vector.multi_reduction <add>, %8, %cst_7 [0] : vector<512x8xf32> to vector<8xf32>
    %10 = vector.shape_cast %9 : vector<8xf32> to vector<1x8xf32>
    %11 = arith.mulf %8, %8 : vector<512x8xf32>
    %cst_8 = arith.constant dense<0.000000e+00> : vector<8xf32>
    %12 = vector.multi_reduction <add>, %11, %cst_8 [0] : vector<512x8xf32> to vector<8xf32>
    %13 = vector.shape_cast %12 : vector<8xf32> to vector<1x8xf32>
    %14 = tpu.concatenate %10, %13 in 0 : vector<1x8xf32>, vector<1x8xf32> -> vector<2x8xf32>
    %15 = vector.shape_cast %14 : vector<2x8xf32> to vector<1x2x8xf32>
    %c0_9 = arith.constant 0 : index
    %c0_10 = arith.constant 0 : index
    %c0_11 = arith.constant 0 : index
    %16 = vector.load %arg6[%c0_9, %c0_10, %c0_11] : memref<1x2x8xf32, #tpu.memory_space<vmem>>, vector<1x2x8xf32>
    tpu.vector_store %arg6[%c0_9, %c0_10, %c0_11], %15 {strides = array<i32>} : memref<1x2x8xf32, #tpu.memory_space<vmem>>, vector<1x2x8xf32>,
    %c0_12 = arith.constant 0 : index
    %c0_13 = arith.constant 0 : index
    %17 = vector.load %arg5[%c0_12, %c0_13] : memref<512x8xf32, #tpu.memory_space<vmem>>, vector<512x8xf32>
    tpu.vector_store %arg5[%c0_12, %c0_13], %8 {strides = array<i32>} : memref<512x8xf32, #tpu.memory_space<vmem>>, vector<512x8xf32>,
    return
  }
  func.func @transform_0(%arg0: i32) -> (i32, i32) {
    %c0_i32 = arith.constant 0 : i32
    %c0_i32_0 = arith.constant 0 : i32
    return %arg0, %c0_i32 : i32, i32
  }
  func.func @transform_1(%arg0: i32) -> (i32, i32) {
    %c0_i32 = arith.constant 0 : i32
    %c0_i32_0 = arith.constant 0 : i32
    %c0_i32_1 = arith.constant 0 : i32
    return %c0_i32, %c0_i32_0 : i32, i32
  }
  func.func @transform_2(%arg0: i32) -> (i32, i32) {
    %c0_i32 = arith.constant 0 : i32
    %c0_i32_0 = arith.constant 0 : i32
    %c0_i32_1 = arith.constant 0 : i32
    return %c0_i32, %c0_i32_0 : i32, i32
  }
  func.func @transform_3(%arg0: i32) -> (i32, i32) {
    %c0_i32 = arith.constant 0 : i32
    %c0_i32_0 = arith.constant 0 : i32
    %c0_i32_1 = arith.constant 0 : i32
    return %c0_i32, %c0_i32_0 : i32, i32
  }
  func.func @transform_4(%arg0: i32) -> (i32, i32) {
    %c0_i32 = arith.constant 0 : i32
    %c0_i32_0 = arith.constant 0 : i32
    return %arg0, %c0_i32 : i32, i32
  }
  func.func @transform_5(%arg0: i32) -> (i32, i32, i32) {
    %c0_i32 = arith.constant 0 : i32
    %c0_i32_0 = arith.constant 0 : i32
    %c0_i32_1 = arith.constant 0 : i32
    return %arg0, %c0_i32, %c0_i32_0 : i32, i32, i32
  }
}

module attributes {stable_mosaic.version = 11 : i64} {
  func.func @conv3x3_kernel(%arg0: i32, %arg1: memref<1x16x16x8xf32, #tpu.memory_space<vmem>>, %arg2: memref<1x8xf32, #tpu.memory_space<vmem>>, %arg3: memref<1x8xf32, #tpu.memory_space<vmem>>, %arg4: memref<72x8xf32, #tpu.memory_space<vmem>>, %arg5: memref<1x16x16x8xf32, #tpu.memory_space<vmem>>, %arg6: memref<1x2x8xf32, #tpu.memory_space<vmem>>, %arg7: memref<1x18x18x8xf32, #tpu.memory_space<vmem>>, %arg8: memref<256x72xf32, #tpu.memory_space<vmem>>) attributes {dimension_semantics = [#tpu.dimension_semantics<parallel>], iteration_bounds = array<i64: 4>, scalar_prefetch = 0 : i64, scratch_operands = 2 : i64, tpu.core_type = #tpu.core_type<tc>, window_params = [{transform_indices = @transform_0, window_bounds = array<i64: 1, 16, 16, 8>}, {pipeline_mode = #tpu.pipeline_mode<synchronous>, transform_indices = @transform_1, window_bounds = array<i64: 1, 8>}, {pipeline_mode = #tpu.pipeline_mode<synchronous>, transform_indices = @transform_2, window_bounds = array<i64: 1, 8>}, {pipeline_mode = #tpu.pipeline_mode<synchronous>, transform_indices = @transform_3, window_bounds = array<i64: 72, 8>}, {transform_indices = @transform_4, window_bounds = array<i64: 1, 16, 16, 8>}, {transform_indices = @transform_5, window_bounds = array<i64: 1, 2, 8>}]} {
    %c0 = arith.constant 0 : index
    %c0_0 = arith.constant 0 : index
    %c0_1 = arith.constant 0 : index
    %c0_2 = arith.constant 0 : index
    %0 = vector.load %arg1[%c0, %c0_0, %c0_1, %c0_2] : memref<1x16x16x8xf32, #tpu.memory_space<vmem>>, vector<1x16x16x8xf32>
    %c0_3 = arith.constant 0 : index
    %c0_4 = arith.constant 0 : index
    %1 = vector.load %arg2[%c0_3, %c0_4] : memref<1x8xf32, #tpu.memory_space<vmem>>, vector<1x8xf32>
    %2 = vector.shape_cast %1 : vector<1x8xf32> to vector<1x1x1x8xf32>
    %3 = vector.broadcast %2 : vector<1x1x1x8xf32> to vector<1x16x16x8xf32>
    %4 = arith.mulf %0, %3 : vector<1x16x16x8xf32>
    %c0_5 = arith.constant 0 : index
    %c0_6 = arith.constant 0 : index
    %5 = vector.load %arg3[%c0_5, %c0_6] : memref<1x8xf32, #tpu.memory_space<vmem>>, vector<1x8xf32>
    %6 = vector.shape_cast %5 : vector<1x8xf32> to vector<1x1x1x8xf32>
    %7 = vector.broadcast %6 : vector<1x1x1x8xf32> to vector<1x16x16x8xf32>
    %8 = arith.addf %4, %7 : vector<1x16x16x8xf32>
    %cst = arith.constant 0.000000e+00 : f32
    %9 = vector.broadcast %cst : f32 to vector<1x18x18x8xf32>
    %c0_7 = arith.constant 0 : index
    %c0_8 = arith.constant 0 : index
    %c0_9 = arith.constant 0 : index
    %c0_10 = arith.constant 0 : index
    %10 = vector.load %arg7[%c0_7, %c0_8, %c0_9, %c0_10] : memref<1x18x18x8xf32, #tpu.memory_space<vmem>>, vector<1x18x18x8xf32>
    tpu.vector_store %arg7[%c0_7, %c0_8, %c0_9, %c0_10], %9 {strides = array<i32>} : memref<1x18x18x8xf32, #tpu.memory_space<vmem>>, vector<1x18x18x8xf32>,
    %c0_11 = arith.constant 0 : index
    %c1 = arith.constant 1 : index
    %c1_12 = arith.constant 1 : index
    %c0_13 = arith.constant 0 : index
    %11 = vector.load %arg7[%c0_11, %c1, %c1_12, %c0_13] : memref<1x18x18x8xf32, #tpu.memory_space<vmem>>, vector<1x16x16x8xf32>
    tpu.vector_store %arg7[%c0_11, %c1, %c1_12, %c0_13], %8 {strides = array<i32>} : memref<1x18x18x8xf32, #tpu.memory_space<vmem>>, vector<1x16x16x8xf32>,
    %c0_14 = arith.constant 0 : index
    %c0_15 = arith.constant 0 : index
    %c0_16 = arith.constant 0 : index
    %c0_17 = arith.constant 0 : index
    %12 = vector.load %arg7[%c0_14, %c0_15, %c0_16, %c0_17] : memref<1x18x18x8xf32, #tpu.memory_space<vmem>>, vector<1x16x16x8xf32>
    %13 = vector.shape_cast %12 : vector<1x16x16x8xf32> to vector<256x8xf32>
    %c0_18 = arith.constant 0 : index
    %c0_19 = arith.constant 0 : index
    %14 = vector.load %arg8[%c0_18, %c0_19] : memref<256x72xf32, #tpu.memory_space<vmem>>, vector<256x8xf32>
    tpu.vector_store %arg8[%c0_18, %c0_19], %13 {strides = array<i32>} : memref<256x72xf32, #tpu.memory_space<vmem>>, vector<256x8xf32>,
    %c0_20 = arith.constant 0 : index
    %c0_21 = arith.constant 0 : index
    %c1_22 = arith.constant 1 : index
    %c0_23 = arith.constant 0 : index
    %15 = vector.load %arg7[%c0_20, %c0_21, %c1_22, %c0_23] : memref<1x18x18x8xf32, #tpu.memory_space<vmem>>, vector<1x16x16x8xf32>
    %16 = vector.shape_cast %15 : vector<1x16x16x8xf32> to vector<256x8xf32>
    %c0_24 = arith.constant 0 : index
    %c8 = arith.constant 8 : index
    %17 = vector.load %arg8[%c0_24, %c8] : memref<256x72xf32, #tpu.memory_space<vmem>>, vector<256x8xf32>
    tpu.vector_store %arg8[%c0_24, %c8], %16 {strides = array<i32>} : memref<256x72xf32, #tpu.memory_space<vmem>>, vector<256x8xf32>,
    %c0_25 = arith.constant 0 : index
    %c0_26 = arith.constant 0 : index
    %c2 = arith.constant 2 : index
    %c0_27 = arith.constant 0 : index
    %18 = vector.load %arg7[%c0_25, %c0_26, %c2, %c0_27] : memref<1x18x18x8xf32, #tpu.memory_space<vmem>>, vector<1x16x16x8xf32>
    %19 = vector.shape_cast %18 : vector<1x16x16x8xf32> to vector<256x8xf32>
    %c0_28 = arith.constant 0 : index
    %c16 = arith.constant 16 : index
    %20 = vector.load %arg8[%c0_28, %c16] : memref<256x72xf32, #tpu.memory_space<vmem>>, vector<256x8xf32>
    tpu.vector_store %arg8[%c0_28, %c16], %19 {strides = array<i32>} : memref<256x72xf32, #tpu.memory_space<vmem>>, vector<256x8xf32>,
    %c0_29 = arith.constant 0 : index
    %c1_30 = arith.constant 1 : index
    %c0_31 = arith.constant 0 : index
    %c0_32 = arith.constant 0 : index
    %21 = vector.load %arg7[%c0_29, %c1_30, %c0_31, %c0_32] : memref<1x18x18x8xf32, #tpu.memory_space<vmem>>, vector<1x16x16x8xf32>
    %22 = vector.shape_cast %21 : vector<1x16x16x8xf32> to vector<256x8xf32>
    %c0_33 = arith.constant 0 : index
    %c24 = arith.constant 24 : index
    %23 = vector.load %arg8[%c0_33, %c24] : memref<256x72xf32, #tpu.memory_space<vmem>>, vector<256x8xf32>
    tpu.vector_store %arg8[%c0_33, %c24], %22 {strides = array<i32>} : memref<256x72xf32, #tpu.memory_space<vmem>>, vector<256x8xf32>,
    %c0_34 = arith.constant 0 : index
    %c1_35 = arith.constant 1 : index
    %c1_36 = arith.constant 1 : index
    %c0_37 = arith.constant 0 : index
    %24 = vector.load %arg7[%c0_34, %c1_35, %c1_36, %c0_37] : memref<1x18x18x8xf32, #tpu.memory_space<vmem>>, vector<1x16x16x8xf32>
    %25 = vector.shape_cast %24 : vector<1x16x16x8xf32> to vector<256x8xf32>
    %c0_38 = arith.constant 0 : index
    %c32 = arith.constant 32 : index
    %26 = vector.load %arg8[%c0_38, %c32] : memref<256x72xf32, #tpu.memory_space<vmem>>, vector<256x8xf32>
    tpu.vector_store %arg8[%c0_38, %c32], %25 {strides = array<i32>} : memref<256x72xf32, #tpu.memory_space<vmem>>, vector<256x8xf32>,
    %c0_39 = arith.constant 0 : index
    %c1_40 = arith.constant 1 : index
    %c2_41 = arith.constant 2 : index
    %c0_42 = arith.constant 0 : index
    %27 = vector.load %arg7[%c0_39, %c1_40, %c2_41, %c0_42] : memref<1x18x18x8xf32, #tpu.memory_space<vmem>>, vector<1x16x16x8xf32>
    %28 = vector.shape_cast %27 : vector<1x16x16x8xf32> to vector<256x8xf32>
    %c0_43 = arith.constant 0 : index
    %c40 = arith.constant 40 : index
    %29 = vector.load %arg8[%c0_43, %c40] : memref<256x72xf32, #tpu.memory_space<vmem>>, vector<256x8xf32>
    tpu.vector_store %arg8[%c0_43, %c40], %28 {strides = array<i32>} : memref<256x72xf32, #tpu.memory_space<vmem>>, vector<256x8xf32>,
    %c0_44 = arith.constant 0 : index
    %c2_45 = arith.constant 2 : index
    %c0_46 = arith.constant 0 : index
    %c0_47 = arith.constant 0 : index
    %30 = vector.load %arg7[%c0_44, %c2_45, %c0_46, %c0_47] : memref<1x18x18x8xf32, #tpu.memory_space<vmem>>, vector<1x16x16x8xf32>
    %31 = vector.shape_cast %30 : vector<1x16x16x8xf32> to vector<256x8xf32>
    %c0_48 = arith.constant 0 : index
    %c48 = arith.constant 48 : index
    %32 = vector.load %arg8[%c0_48, %c48] : memref<256x72xf32, #tpu.memory_space<vmem>>, vector<256x8xf32>
    tpu.vector_store %arg8[%c0_48, %c48], %31 {strides = array<i32>} : memref<256x72xf32, #tpu.memory_space<vmem>>, vector<256x8xf32>,
    %c0_49 = arith.constant 0 : index
    %c2_50 = arith.constant 2 : index
    %c1_51 = arith.constant 1 : index
    %c0_52 = arith.constant 0 : index
    %33 = vector.load %arg7[%c0_49, %c2_50, %c1_51, %c0_52] : memref<1x18x18x8xf32, #tpu.memory_space<vmem>>, vector<1x16x16x8xf32>
    %34 = vector.shape_cast %33 : vector<1x16x16x8xf32> to vector<256x8xf32>
    %c0_53 = arith.constant 0 : index
    %c56 = arith.constant 56 : index
    %35 = vector.load %arg8[%c0_53, %c56] : memref<256x72xf32, #tpu.memory_space<vmem>>, vector<256x8xf32>
    tpu.vector_store %arg8[%c0_53, %c56], %34 {strides = array<i32>} : memref<256x72xf32, #tpu.memory_space<vmem>>, vector<256x8xf32>,
    %c0_54 = arith.constant 0 : index
    %c2_55 = arith.constant 2 : index
    %c2_56 = arith.constant 2 : index
    %c0_57 = arith.constant 0 : index
    %36 = vector.load %arg7[%c0_54, %c2_55, %c2_56, %c0_57] : memref<1x18x18x8xf32, #tpu.memory_space<vmem>>, vector<1x16x16x8xf32>
    %37 = vector.shape_cast %36 : vector<1x16x16x8xf32> to vector<256x8xf32>
    %c0_58 = arith.constant 0 : index
    %c64 = arith.constant 64 : index
    %38 = vector.load %arg8[%c0_58, %c64] : memref<256x72xf32, #tpu.memory_space<vmem>>, vector<256x8xf32>
    tpu.vector_store %arg8[%c0_58, %c64], %37 {strides = array<i32>} : memref<256x72xf32, #tpu.memory_space<vmem>>, vector<256x8xf32>,
    %c0_59 = arith.constant 0 : index
    %c0_60 = arith.constant 0 : index
    %39 = vector.load %arg8[%c0_59, %c0_60] : memref<256x72xf32, #tpu.memory_space<vmem>>, vector<256x72xf32>
    %c0_61 = arith.constant 0 : index
    %c0_62 = arith.constant 0 : index
    %40 = vector.load %arg4[%c0_61, %c0_62] : memref<72x8xf32, #tpu.memory_space<vmem>>, vector<72x8xf32>
    %cst_63 = arith.constant dense<0.000000e+00> : vector<256x8xf32>
    %41 = tpu.matmul %39, %40, %cst_63 {dimension_numbers = #tpu.dot_dimension_numbers<[1], [0], [0], [1], [0, 0, 1, 1], [], []>} : vector<256x72xf32>, vector<72x8xf32>, vector<256x8xf32> -> vector<256x8xf32>
    %cst_64 = arith.constant dense<0.000000e+00> : vector<8xf32>
    %42 = vector.multi_reduction <add>, %41, %cst_64 [0] : vector<256x8xf32> to vector<8xf32>
    %43 = vector.shape_cast %42 : vector<8xf32> to vector<1x8xf32>
    %44 = arith.mulf %41, %41 : vector<256x8xf32>
    %cst_65 = arith.constant dense<0.000000e+00> : vector<8xf32>
    %45 = vector.multi_reduction <add>, %44, %cst_65 [0] : vector<256x8xf32> to vector<8xf32>
    %46 = vector.shape_cast %45 : vector<8xf32> to vector<1x8xf32>
    %47 = tpu.concatenate %43, %46 in 0 : vector<1x8xf32>, vector<1x8xf32> -> vector<2x8xf32>
    %48 = vector.shape_cast %47 : vector<2x8xf32> to vector<1x2x8xf32>
    %c0_66 = arith.constant 0 : index
    %c0_67 = arith.constant 0 : index
    %c0_68 = arith.constant 0 : index
    %49 = vector.load %arg6[%c0_66, %c0_67, %c0_68] : memref<1x2x8xf32, #tpu.memory_space<vmem>>, vector<1x2x8xf32>
    tpu.vector_store %arg6[%c0_66, %c0_67, %c0_68], %48 {strides = array<i32>} : memref<1x2x8xf32, #tpu.memory_space<vmem>>, vector<1x2x8xf32>,
    %50 = vector.shape_cast %41 : vector<256x8xf32> to vector<1x16x16x8xf32>
    %c0_69 = arith.constant 0 : index
    %c0_70 = arith.constant 0 : index
    %c0_71 = arith.constant 0 : index
    %c0_72 = arith.constant 0 : index
    %51 = vector.load %arg5[%c0_69, %c0_70, %c0_71, %c0_72] : memref<1x16x16x8xf32, #tpu.memory_space<vmem>>, vector<1x16x16x8xf32>
    tpu.vector_store %arg5[%c0_69, %c0_70, %c0_71, %c0_72], %50 {strides = array<i32>} : memref<1x16x16x8xf32, #tpu.memory_space<vmem>>, vector<1x16x16x8xf32>,
    return
  }
  func.func @transform_0(%arg0: i32) -> (i32, i32, i32, i32) {
    %c0_i32 = arith.constant 0 : i32
    %c0_i32_0 = arith.constant 0 : i32
    %c0_i32_1 = arith.constant 0 : i32
    %c0_i32_2 = arith.constant 0 : i32
    return %arg0, %c0_i32, %c0_i32_0, %c0_i32_1 : i32, i32, i32, i32
  }
  func.func @transform_1(%arg0: i32) -> (i32, i32) {
    %c0_i32 = arith.constant 0 : i32
    %c0_i32_0 = arith.constant 0 : i32
    %c0_i32_1 = arith.constant 0 : i32
    return %c0_i32, %c0_i32_0 : i32, i32
  }
  func.func @transform_2(%arg0: i32) -> (i32, i32) {
    %c0_i32 = arith.constant 0 : i32
    %c0_i32_0 = arith.constant 0 : i32
    %c0_i32_1 = arith.constant 0 : i32
    return %c0_i32, %c0_i32_0 : i32, i32
  }
  func.func @transform_3(%arg0: i32) -> (i32, i32) {
    %c0_i32 = arith.constant 0 : i32
    %c0_i32_0 = arith.constant 0 : i32
    %c0_i32_1 = arith.constant 0 : i32
    return %c0_i32, %c0_i32_0 : i32, i32
  }
  func.func @transform_4(%arg0: i32) -> (i32, i32, i32, i32) {
    %c0_i32 = arith.constant 0 : i32
    %c0_i32_0 = arith.constant 0 : i32
    %c0_i32_1 = arith.constant 0 : i32
    %c0_i32_2 = arith.constant 0 : i32
    return %arg0, %c0_i32, %c0_i32_0, %c0_i32_1 : i32, i32, i32, i32
  }
  func.func @transform_5(%arg0: i32) -> (i32, i32, i32) {
    %c0_i32 = arith.constant 0 : i32
    %c0_i32_0 = arith.constant 0 : i32
    %c0_i32_1 = arith.constant 0 : i32
    return %arg0, %c0_i32, %c0_i32_0 : i32, i32, i32
  }
}

module attributes {stable_mosaic.version = 11 : i64} {
  func.func @mm_stage_kernel(%arg0: i32, %arg1: memref<512x8xf32, #tpu.memory_space<vmem>>, %arg2: memref<1x8xf32, #tpu.memory_space<vmem>>, %arg3: memref<1x8xf32, #tpu.memory_space<vmem>>, %arg4: memref<8x32xf32, #tpu.memory_space<vmem>>, %arg5: memref<512x32xf32, #tpu.memory_space<vmem>>, %arg6: memref<1x2x32xf32, #tpu.memory_space<vmem>>) attributes {dimension_semantics = [#tpu.dimension_semantics<parallel>], iteration_bounds = array<i64: 2>, scalar_prefetch = 0 : i64, scratch_operands = 0 : i64, tpu.core_type = #tpu.core_type<tc>, window_params = [{transform_indices = @transform_0, window_bounds = array<i64: 512, 8>}, {pipeline_mode = #tpu.pipeline_mode<synchronous>, transform_indices = @transform_1, window_bounds = array<i64: 1, 8>}, {pipeline_mode = #tpu.pipeline_mode<synchronous>, transform_indices = @transform_2, window_bounds = array<i64: 1, 8>}, {pipeline_mode = #tpu.pipeline_mode<synchronous>, transform_indices = @transform_3, window_bounds = array<i64: 8, 32>}, {transform_indices = @transform_4, window_bounds = array<i64: 512, 32>}, {transform_indices = @transform_5, window_bounds = array<i64: 1, 2, 32>}]} {
    %c0 = arith.constant 0 : index
    %c0_0 = arith.constant 0 : index
    %0 = vector.load %arg1[%c0, %c0_0] : memref<512x8xf32, #tpu.memory_space<vmem>>, vector<512x8xf32>
    %c0_1 = arith.constant 0 : index
    %c0_2 = arith.constant 0 : index
    %1 = vector.load %arg2[%c0_1, %c0_2] : memref<1x8xf32, #tpu.memory_space<vmem>>, vector<1x8xf32>
    %2 = vector.broadcast %1 : vector<1x8xf32> to vector<512x8xf32>
    %3 = arith.mulf %0, %2 : vector<512x8xf32>
    %c0_3 = arith.constant 0 : index
    %c0_4 = arith.constant 0 : index
    %4 = vector.load %arg3[%c0_3, %c0_4] : memref<1x8xf32, #tpu.memory_space<vmem>>, vector<1x8xf32>
    %5 = vector.broadcast %4 : vector<1x8xf32> to vector<512x8xf32>
    %6 = arith.addf %3, %5 : vector<512x8xf32>
    %c0_5 = arith.constant 0 : index
    %c0_6 = arith.constant 0 : index
    %7 = vector.load %arg4[%c0_5, %c0_6] : memref<8x32xf32, #tpu.memory_space<vmem>>, vector<8x32xf32>
    %cst = arith.constant dense<0.000000e+00> : vector<512x32xf32>
    %8 = tpu.matmul %6, %7, %cst {dimension_numbers = #tpu.dot_dimension_numbers<[1], [0], [0], [1], [0, 0, 1, 1], [], []>} : vector<512x8xf32>, vector<8x32xf32>, vector<512x32xf32> -> vector<512x32xf32>
    %cst_7 = arith.constant dense<0.000000e+00> : vector<32xf32>
    %9 = vector.multi_reduction <add>, %8, %cst_7 [0] : vector<512x32xf32> to vector<32xf32>
    %10 = vector.shape_cast %9 : vector<32xf32> to vector<1x32xf32>
    %11 = arith.mulf %8, %8 : vector<512x32xf32>
    %cst_8 = arith.constant dense<0.000000e+00> : vector<32xf32>
    %12 = vector.multi_reduction <add>, %11, %cst_8 [0] : vector<512x32xf32> to vector<32xf32>
    %13 = vector.shape_cast %12 : vector<32xf32> to vector<1x32xf32>
    %14 = tpu.concatenate %10, %13 in 0 : vector<1x32xf32>, vector<1x32xf32> -> vector<2x32xf32>
    %15 = vector.shape_cast %14 : vector<2x32xf32> to vector<1x2x32xf32>
    %c0_9 = arith.constant 0 : index
    %c0_10 = arith.constant 0 : index
    %c0_11 = arith.constant 0 : index
    %16 = vector.load %arg6[%c0_9, %c0_10, %c0_11] : memref<1x2x32xf32, #tpu.memory_space<vmem>>, vector<1x2x32xf32>
    tpu.vector_store %arg6[%c0_9, %c0_10, %c0_11], %15 {strides = array<i32>} : memref<1x2x32xf32, #tpu.memory_space<vmem>>, vector<1x2x32xf32>,
    %c0_12 = arith.constant 0 : index
    %c0_13 = arith.constant 0 : index
    %17 = vector.load %arg5[%c0_12, %c0_13] : memref<512x32xf32, #tpu.memory_space<vmem>>, vector<512x32xf32>
    tpu.vector_store %arg5[%c0_12, %c0_13], %8 {strides = array<i32>} : memref<512x32xf32, #tpu.memory_space<vmem>>, vector<512x32xf32>,
    return
  }
  func.func @transform_0(%arg0: i32) -> (i32, i32) {
    %c0_i32 = arith.constant 0 : i32
    %c0_i32_0 = arith.constant 0 : i32
    return %arg0, %c0_i32 : i32, i32
  }
  func.func @transform_1(%arg0: i32) -> (i32, i32) {
    %c0_i32 = arith.constant 0 : i32
    %c0_i32_0 = arith.constant 0 : i32
    %c0_i32_1 = arith.constant 0 : i32
    return %c0_i32, %c0_i32_0 : i32, i32
  }
  func.func @transform_2(%arg0: i32) -> (i32, i32) {
    %c0_i32 = arith.constant 0 : i32
    %c0_i32_0 = arith.constant 0 : i32
    %c0_i32_1 = arith.constant 0 : i32
    return %c0_i32, %c0_i32_0 : i32, i32
  }
  func.func @transform_3(%arg0: i32) -> (i32, i32) {
    %c0_i32 = arith.constant 0 : i32
    %c0_i32_0 = arith.constant 0 : i32
    %c0_i32_1 = arith.constant 0 : i32
    return %c0_i32, %c0_i32_0 : i32, i32
  }
  func.func @transform_4(%arg0: i32) -> (i32, i32) {
    %c0_i32 = arith.constant 0 : i32
    %c0_i32_0 = arith.constant 0 : i32
    return %arg0, %c0_i32 : i32, i32
  }
  func.func @transform_5(%arg0: i32) -> (i32, i32, i32) {
    %c0_i32 = arith.constant 0 : i32
    %c0_i32_0 = arith.constant 0 : i32
    %c0_i32_1 = arith.constant 0 : i32
    return %arg0, %c0_i32, %c0_i32_0 : i32, i32, i32
  }
}

module attributes {stable_mosaic.version = 11 : i64} {
  func.func @finalize_kernel(%arg0: i32, %arg1: memref<64x512xf32, #tpu.memory_space<vmem>>, %arg2: memref<64x512xf32, #tpu.memory_space<vmem>>, %arg3: memref<1x512xf32, #tpu.memory_space<vmem>>, %arg4: memref<1x512xf32, #tpu.memory_space<vmem>>, %arg5: memref<64x512xf32, #tpu.memory_space<vmem>>) attributes {dimension_semantics = [#tpu.dimension_semantics<parallel>], iteration_bounds = array<i64: 1>, scalar_prefetch = 0 : i64, scratch_operands = 0 : i64, tpu.core_type = #tpu.core_type<tc>, window_params = [{transform_indices = @transform_0, window_bounds = array<i64: 64, 512>}, {transform_indices = @transform_1, window_bounds = array<i64: 64, 512>}, {pipeline_mode = #tpu.pipeline_mode<synchronous>, transform_indices = @transform_2, window_bounds = array<i64: 1, 512>}, {pipeline_mode = #tpu.pipeline_mode<synchronous>, transform_indices = @transform_3, window_bounds = array<i64: 1, 512>}, {transform_indices = @transform_4, window_bounds = array<i64: 64, 512>}]} {
    %c0 = arith.constant 0 : index
    %c0_0 = arith.constant 0 : index
    %0 = vector.load %arg1[%c0, %c0_0] : memref<64x512xf32, #tpu.memory_space<vmem>>, vector<64x512xf32>
    %c0_1 = arith.constant 0 : index
    %c0_2 = arith.constant 0 : index
    %1 = vector.load %arg3[%c0_1, %c0_2] : memref<1x512xf32, #tpu.memory_space<vmem>>, vector<1x512xf32>
    %2 = vector.broadcast %1 : vector<1x512xf32> to vector<64x512xf32>
    %3 = arith.mulf %0, %2 : vector<64x512xf32>
    %c0_3 = arith.constant 0 : index
    %c0_4 = arith.constant 0 : index
    %4 = vector.load %arg4[%c0_3, %c0_4] : memref<1x512xf32, #tpu.memory_space<vmem>>, vector<1x512xf32>
    %5 = vector.broadcast %4 : vector<1x512xf32> to vector<64x512xf32>
    %6 = arith.addf %3, %5 : vector<64x512xf32>
    %c0_5 = arith.constant 0 : index
    %c0_6 = arith.constant 0 : index
    %7 = vector.load %arg2[%c0_5, %c0_6] : memref<64x512xf32, #tpu.memory_space<vmem>>, vector<64x512xf32>
    %8 = arith.addf %6, %7 : vector<64x512xf32>
    %c0_7 = arith.constant 0 : index
    %c0_8 = arith.constant 0 : index
    %9 = vector.load %arg5[%c0_7, %c0_8] : memref<64x512xf32, #tpu.memory_space<vmem>>, vector<64x512xf32>
    tpu.vector_store %arg5[%c0_7, %c0_8], %8 {strides = array<i32>} : memref<64x512xf32, #tpu.memory_space<vmem>>, vector<64x512xf32>,
    return
  }
  func.func @transform_0(%arg0: i32) -> (i32, i32) {
    %c0_i32 = arith.constant 0 : i32
    %c0_i32_0 = arith.constant 0 : i32
    return %arg0, %c0_i32 : i32, i32
  }
  func.func @transform_1(%arg0: i32) -> (i32, i32) {
    %c0_i32 = arith.constant 0 : i32
    %c0_i32_0 = arith.constant 0 : i32
    return %arg0, %c0_i32 : i32, i32
  }
  func.func @transform_2(%arg0: i32) -> (i32, i32) {
    %c0_i32 = arith.constant 0 : i32
    %c0_i32_0 = arith.constant 0 : i32
    %c0_i32_1 = arith.constant 0 : i32
    return %c0_i32, %c0_i32_0 : i32, i32
  }
  func.func @transform_3(%arg0: i32) -> (i32, i32) {
    %c0_i32 = arith.constant 0 : i32
    %c0_i32_0 = arith.constant 0 : i32
    %c0_i32_1 = arith.constant 0 : i32
    return %c0_i32, %c0_i32_0 : i32, i32
  }
  func.func @transform_4(%arg0: i32) -> (i32, i32) {
    %c0_i32 = arith.constant 0 : i32
    %c0_i32_0 = arith.constant 0 : i32
    return %arg0, %c0_i32 : i32, i32
  }
}

</mosaic_0001>

<bundles_post_ra>
// kernel: bottleneck_pallas_nhwc.5
= control target key start
LH: loop header
LB: loop body
LE: loop exit
PB: predicated region body
PF: predicated region fallthrough
CT: control target
= control target key end

     0   :  { %6 = vsyncpa [#allocation3], 0  ;;  %s1279_s0 = inlined_call_operand.hbm [shape: f32[1024,32], index: 0, kind: input, shape index: {}]   ;;  %s1280_s1 = inlined_call_operand.vmem [shape: f32[2,2,32], index: 1, kind: output, shape index: {}]  }
   0x1   :  { %8 = vsyncpa [#allocation3 + $0x1], 0  ;;  %s732_s6 = smov 0   ;;  %s734_s7 = smov 0  }
   0x2   :  { %s736_s8 = smov 0   ;;  %s738_s9 = smov 0  }
   0x3 LB: > { %s751_s10 = sadd.s32 4294967295, %s717_s9   ;;  %s754_s11 = sadd.s32 1, %s717_s9   ;;  %s717_s9 = sphi %s738_s9, %s1287_s9   ;;  %s713_s8 = sphi %s736_s8, %s1286_s8   ;;  %s709_s7 = sphi %s734_s7, %s1285_s7   ;;  %s705_s6 = sphi %s732_s6, %s1284_s6  }
   0x4   : > { %s18_s12 = ssub.s32 %s717_s9, %s754_s11  ;;  %s21_s13 = sadd.s32 1, %s713_s8 }
   0x5   : > { %p19_p0 = scmp.eq.s32.totalorder %s18_s12, 0  ;;  %p28_p1 = scmp.ne.s32.totalorder %s713_s8, %s709_s7 }
   0x6   : > { %p29_p2 = scmp.eq.s32.totalorder %s717_s9, 0  ;;  %p34_p3 = scmp.ne.s32.totalorder %s709_s7, %s705_s6 }
   0x7   : > { %s764_s14 = scalar_select %p19_p0, %s713_s8, %s21_s13  }
   0x8   : > { %p30_p4 = por %p29_p2, %p28_p1  ;;  %p35_p5 = scmp.eq.s32.totalorder %s751_s10, 0 }
   0x9   : > { %p618_p6 = scmp.lt.s32.totalorder %s717_s9, 2  ;;  %s84_s16 = sand.u32 1, %s713_s8  }
   0xa   : > { %p768_p7 = por %p35_p5, %p34_p3  ;;  %s603_s17 = sshll.u32 %s84_s16, 9 }
   0xb   : > { %s611_s18 = sshll.u32 %s717_s9, 13  ;;  %s88_s22 = scalar_lea.vmem [#allocation2], %s603_s17 }
   0xc   : > { %s777_s21 = scalar_lea.hbm %s1279_s0, %s611_s18  ;;  %s95_s23 = sshll.u32 %s88_s22, 4  ;;  %s779_s23 = int_to_ptr.vmem [resolvable:$true] %s95_s23 }
   0xd   : > { %p781_p8 = pnand %p618_p6, %p30_p4  ;;  %s786_s25 = scalar_lea.sflag [#allocation3], %s84_s16 }
   0xe   : > { %s653_s26 = scalar_lea.hbm %s777_s21, 8192  ;;  %s658_s29 = scalar_lea.hbm %s1279_s0, 16384 }
   0xf   : > { %p654_p10 = scmp.ne.s32.totalorder %s777_s21, %s653_s26  ;;  %p655_p11 = pneg %p781_p8 }
  0x10   : > { %p659_p0 = scmp.lt.u32.totalorder %s777_s21, %s1279_s0  ;;  %p660_p1 = scmp.lt.u32.totalorder %s658_s29, %s653_s26 }
  0x11   : > { %p656_p12 = pnand %p655_p11, %p654_p10  ;;  %p662_p3 = scmp.lt.u32.totalorder %s653_s26, %s777_s21 }
  0x12   : > { %p661_p2 = por %p660_p1, %p659_p0 }
  0x13   : > { %p657_p13 = pneg %p656_p12 }
  0x14   : > { %p663_p4 = por %p662_p3, %p661_p2 }
  0x16   : > { %p664_p5 = pnand %p663_p4, %p657_p13 }
  0x18   : > { %667 = shalt.err (!%p664_p5)
}
  0x19   : > { %s668_s3 = scalar_lea.vmem %s779_s23, 8192  ;;  %s719_s4 = smov [#allocation2]  }
  0x1a   : > { %p669_p6 = scmp.ne.s32.totalorder %s779_s23, %s668_s3  ;;  %s673_s5 = sshll.u32 %s719_s4, 4  ;;  %s674_s5 = int_to_ptr.vmem [resolvable:$false] %s673_s5 }
  0x1b   : > { %s675_s6 = scalar_lea.vmem %s674_s5, 16384  ;;  %p676_p9 = scmp.lt.s32.totalorder %s779_s23, %s674_s5 }
  0x1c   : > { %p671_p10 = pnand %p669_p6, %p655_p11  ;;  %p677_p0 = scmp.lt.s32.totalorder %s675_s6, %s668_s3 }
  0x1e   : > { %p672_p12 = pneg %p671_p10  ;;  %p678_p1 = por %p677_p0, %p676_p9 }
  0x20   : > { %p679_p2 = pnand %p678_p1, %p672_p12 }
  0x22   : > { %682 = shalt.err (!%p679_p2)
}
  0x23   : > { %s720_s12 = smov 128   ;;  %s721_s13 = smov 8  }
  0x24   : > { %617 = dma.hbm_to_vmem [thread:$0]  (!%p781_p8), %s777_s21, 8192, %s779_s23, %s786_s25, %s720_s12, %s720_s12, %s721_s13  }
  0x25   : > { %p103_p11 = scmp.lt.s32.totalorder %s717_s9, 3  ;;  %p1283_p13 = scmp.ge.s32.totalorder %s717_s9, 1 }
  0x27   : > { %p104_p3 = pnand %p1283_p13, %p103_p11 }
  0x28   : > { %s109_s16 = sand.u32 (!%p104_p3), 1, %s709_s7  }
  0x29   : > { %107 = sbr.rel (%p104_p3) target bundleno = 211 (0xd3), region = 24  ;;  %s607_s17 = sshll.u32 (!%p104_p3), %s109_s16, 9 }
  0x2a   : > { %s110_s18 = scalar_lea.sflag (!%p104_p3), [#allocation3], %s109_s16  ;;  %s818_s19 = scalar_lea.vmem (!%p104_p3), [#allocation2], %s607_s17 }
  0x30   : > { %700 = dma.done.wait (%p768_p7), %s110_s18, 8192  }
  0x31   : > { %702 = vsyncadd (%p768_p7), %s110_s18, 4294959104  ;;  %vm200_vm0 = vcmask 261120   ;;  %v136_v0 = vld [vmem:[%s818_s19] sm:$0xff]  ;;  %v137_v1 = vld [vmem:[%s818_s19 + $0x8] sm:$0xff]  ;;  %p132_p7 = scmp.lt.s32.totalorder %s751_s10, 1  ;;  %vm531_vm1 = vcmask 1040384  }
  0x32   : > { %v138_v2 = vld [vmem:[%s818_s19 + $0x10] sm:$0xff]  ;;  %v201_v3 = vsel %vm200_vm0, %v136_v0, 0.0  ;;  %v202_v4 = vsel %vm200_vm0, %v137_v1, 0.0  ;;  %v139_v6 = vld [vmem:[%s818_s19 + $0x18] sm:$0xff]  ;;  %v140_v9 = vld [vmem:[%s818_s19 + $0x20] sm:$0xff]  ;;  %v334_v54 = vmul.f32 %v136_v0, %v136_v0  ;;  %v335_v55 = vmul.f32 %v137_v1, %v137_v1 }
  0x33   : > { %v204_v5 = vsel %vm200_vm0, %v138_v2, 0.0  ;;  %v203_v7 = vadd.f32 %v202_v4, %v201_v3  ;;  %v206_v8 = vsel %vm200_vm0, %v139_v6, 0.0  ;;  %v208_v11 = vsel %vm200_vm0, %v140_v9, 0.0  ;;  %v141_v12 = vld [vmem:[%s818_s19 + $0x28] sm:$0xff]  ;;  %v837_v15 = vld [vmem:[%s818_s19 + $0x30] sm:$0xff]  ;;  %v842_v18 = vld [vmem:[%s818_s19 + $0x38] sm:$0xff] }
  0x34   : > { %v210_v14 = vsel %vm200_vm0, %v141_v12, 0.0  ;;  %v212_v17 = vsel %vm200_vm0, %v837_v15, 0.0  ;;  %v214_v20 = vsel %vm200_vm0, %v842_v18, 0.0  ;;  %v847_v21 = vld [vmem:[%s818_s19 + $0x40] sm:$0xff]  ;;  %v852_v24 = vld [vmem:[%s818_s19 + $0x48] sm:$0xff]  ;;  %v857_v27 = vld [vmem:[%s818_s19 + $0x50] sm:$0xff]  ;;  %v336_v58 = vmul.f32 %v138_v2, %v138_v2 }
  0x35   : > { %v205_v10 = vadd.f32 %v204_v5, %v203_v7  ;;  %v216_v23 = vsel %vm200_vm0, %v847_v21, 0.0  ;;  %v218_v26 = vsel %vm200_vm0, %v852_v24, 0.0  ;;  %v220_v29 = vsel %vm200_vm0, %v857_v27, 0.0  ;;  %v862_v30 = vld [vmem:[%s818_s19 + $0x58] sm:$0xff]  ;;  %v867_v33 = vld [vmem:[%s818_s19 + $0x60] sm:$0xff]  ;;  %v872_v36 = vld [vmem:[%s818_s19 + $0x68] sm:$0xff] }
  0x36   : > { %v222_v32 = vsel %vm200_vm0, %v862_v30, 0.0  ;;  %v224_v35 = vsel %vm200_vm0, %v867_v33, 0.0  ;;  %v226_v38 = vsel %vm200_vm0, %v872_v36, 0.0  ;;  %v877_v39 = vld [vmem:[%s818_s19 + $0x70] sm:$0xff]  ;;  %v882_v42 = vld [vmem:[%s818_s19 + $0x78] sm:$0xff]  ;;  %v887_v45 = vld [vmem:[%s818_s19 + $0x80] sm:$0xff]  ;;  %v337_v60 = vmul.f32 %v139_v6, %v139_v6 }
  0x37   : > { %v207_v13 = vadd.f32 %v206_v8, %v205_v10  ;;  %v228_v41 = vsel %vm200_vm0, %v877_v39, 0.0  ;;  %v230_v44 = vsel %vm200_vm0, %v882_v42, 0.0  ;;  %v232_v47 = vsel %vm200_vm0, %v887_v45, 0.0  ;;  %v892_v48 = vld [vmem:[%s818_s19 + $0x88] sm:$0xff]  ;;  %v897_v51 = vld [vmem:[%s818_s19 + $0x90] sm:$0xff]  ;;  %v902_v56 = vld [vmem:[%s818_s19 + $0x98] sm:$0xff] }
  0x38   : > { %v234_v50 = vsel %vm200_vm0, %v892_v48, 0.0  ;;  %v236_v53 = vsel %vm200_vm0, %v897_v51, 0.0  ;;  %v238_v59 = vsel %vm200_vm0, %v902_v56, 0.0  ;;  %v907_v61 = vld [vmem:[%s818_s19 + $0xa0] sm:$0xff]  ;;  %v338_v3 = vmul.f32 %v140_v9, %v140_v9  ;;  %v914_v4 = vld [vmem:[%s818_s19 + $0xa8] sm:$0xff]  ;;  %s1289_s10 = smov (!%p132_p7, %s751_s10), 1 }
  0x39   : > { %v209_v16 = vadd.f32 %v208_v11, %v207_v13  ;;  %v240_v63 = vsel %vm200_vm0, %v907_v61, 0.0  ;;  %v398_v0 = vsel %vm200_vm0, %v334_v54, 0.0  ;;  %v399_v1 = vsel %vm200_vm0, %v335_v55, 0.0  ;;  %v921_v11 = vld [vmem:[%s818_s19 + $0xb0] sm:$0xff]  ;;  %v969_v55 = vld [vmem:[%s818_s19 + $0xe0] sm:$0xff]  ;;  %s608_s9 = sshll.u32 %s1289_s10, 1 }
  0x3a   : > { %v400_v5 = vadd.f32 %v399_v1, %v398_v0  ;;  %v401_v7 = vsel %vm200_vm0, %v336_v58, 0.0  ;;  %v242_v6 = vsel %vm200_vm0, %v914_v4, 0.0  ;;  %v339_v8 = vmul.f32 %v141_v12, %v141_v12  ;;  %s135_s21 = scalar_lea.vmem %s1280_s1, %s608_s9 }
  0x3b   : > { %v211_v19 = vadd.f32 %v210_v14, %v209_v16  ;;  %v403_v10 = vsel %vm200_vm0, %v337_v60, 0.0  ;;  %v244_v14 = vsel %vm200_vm0, %v921_v11, 0.0  ;;  %v340_v16 = vmul.f32 %v837_v15, %v837_v15 }
  0x3c   : > { %v402_v13 = vadd.f32 %v401_v7, %v400_v5  ;;  %v347_v0 = vmul.f32 %v872_v36, %v872_v36  ;;  %vm533_vm2 = vcmask 254976  }
  0x3d   : > { %v213_v22 = vadd.f32 %v212_v17, %v211_v19  ;;  %v405_v17 = vsel %vm200_vm0, %v338_v3, 0.0  ;;  %v929_v19 = vld [vmem:[%s818_s19 + $0xb8] sm:$0xff] }
  0x3e   : > { %v246_v12 = vsel %vm200_vm0, %v929_v19, 0.0 }
  0x3f   : > { %v215_v25 = vadd.f32 %v214_v20, %v213_v22  ;;  %v404_v22 = vadd.f32 %v403_v10, %v402_v13  ;;  %v993_v10 = vld [vmem:[%s818_s19 + $0xf8] sm:$0xff] }
  0x40   : > { %v262_v36 = vsel %vm200_vm0, %v993_v10, 0.0 }
  0x41   : > { %v217_v28 = vadd.f32 %v216_v23, %v215_v25  ;;  %v341_v23 = vmul.f32 %v842_v18, %v842_v18  ;;  %v407_v25 = vsel %vm200_vm0, %v339_v8, 0.0 }
  0x43   : > { %v219_v31 = vadd.f32 %v218_v26, %v217_v28  ;;  %v937_v26 = vld [vmem:[%s818_s19 + $0xc0] sm:$0xff] }
  0x44   : > { %v248_v15 = vsel %vm200_vm0, %v937_v26, 0.0 }
  0x45   : > { %v221_v34 = vadd.f32 %v220_v29, %v219_v31  ;;  %v406_v29 = vadd.f32 %v405_v17, %v404_v22  ;;  %v342_v31 = vmul.f32 %v847_v21, %v847_v21  ;;  %v1001_v17 = vld [vmem:[%s818_s19 + $0x100] sm:$0xff] }
  0x47   : > { %v223_v37 = vadd.f32 %v222_v32, %v221_v34  ;;  %v409_v32 = vsel %vm200_vm0, %v340_v16, 0.0  ;;  %v945_v34 = vld [vmem:[%s818_s19 + $0xc8] sm:$0xff]  ;;  %v423_v16 = vsel %vm200_vm0, %v347_v0, 0.0 }
  0x48   : > { %v250_v18 = vsel %vm200_vm0, %v945_v34, 0.0 }
  0x49   : > { %v225_v40 = vadd.f32 %v224_v35, %v223_v37  ;;  %v408_v37 = vadd.f32 %v407_v25, %v406_v29  ;;  %v1009_v25 = vld [vmem:[%s818_s19 + $0x108] sm:$0xff] }
  0x4b   : > { %v227_v43 = vadd.f32 %v226_v38, %v225_v40  ;;  %v343_v38 = vmul.f32 %v852_v24, %v852_v24  ;;  %v411_v40 = vsel %vm200_vm0, %v341_v23, 0.0 }
  0x4d   : > { %v229_v46 = vadd.f32 %v228_v41, %v227_v43  ;;  %v953_v41 = vld [vmem:[%s818_s19 + $0xd0] sm:$0xff]  ;;  %v415_v54 = vsel %vm200_vm0, %v343_v38, 0.0 }
  0x4e   : > { %v252_v21 = vsel %vm200_vm0, %v953_v41, 0.0 }
  0x4f   : > { %v231_v49 = vadd.f32 %v230_v44, %v229_v46  ;;  %v410_v44 = vadd.f32 %v409_v32, %v408_v37  ;;  %v344_v46 = vmul.f32 %v857_v27, %v857_v27  ;;  %v256_v27 = vsel %vm200_vm0, %v969_v55, 0.0  ;;  %v1017_v32 = vld [vmem:[%s818_s19 + $0x110] sm:$0xff] }
  0x51   : > { %v233_v52 = vadd.f32 %v232_v47, %v231_v49  ;;  %v413_v47 = vsel %vm200_vm0, %v342_v31, 0.0  ;;  %v961_v49 = vld [vmem:[%s818_s19 + $0xd8] sm:$0xff]  ;;  %v417_v60 = vsel %vm200_vm0, %v344_v46, 0.0 }
  0x52   : > { %v254_v24 = vsel %vm200_vm0, %v961_v49, 0.0 }
  0x53   : > { %v235_v57 = vadd.f32 %v234_v50, %v233_v52  ;;  %v412_v52 = vadd.f32 %v411_v40, %v410_v44  ;;  %v1025_v40 = vld [vmem:[%s818_s19 + $0x118] sm:$0xff] }
  0x55   : > { %v237_v62 = vadd.f32 %v236_v53, %v235_v57  ;;  %v345_v53 = vmul.f32 %v862_v30, %v862_v30  ;;  %v414_v58 = vadd.f32 %v413_v47, %v412_v52  ;;  %v1033_v47 = vld [vmem:[%s818_s19 + $0x120] sm:$0xff] }
  0x57   : > { %v239_v2 = vadd.f32 %v238_v59, %v237_v62  ;;  %v346_v59 = vmul.f32 %v867_v33, %v867_v33  ;;  %v977_v62 = vld [vmem:[%s818_s19 + $0xe8] sm:$0xff]  ;;  %v416_v3 = vadd.f32 %v415_v54, %v414_v58  ;;  %v419_v1 = vsel %vm200_vm0, %v345_v53, 0.0 }
  0x58   : > { %v258_v30 = vsel %vm200_vm0, %v977_v62, 0.0  ;;  %v1041_v54 = vld [vmem:[%s818_s19 + $0x128] sm:$0xff] }
  0x59   : > { %v241_v9 = vadd.f32 %v240_v63, %v239_v2  ;;  %v985_v2 = vld [vmem:[%s818_s19 + $0xf0] sm:$0xff]  ;;  %v418_v7 = vadd.f32 %v417_v60, %v416_v3  ;;  %v421_v8 = vsel %vm200_vm0, %v346_v59, 0.0 }
  0x5a   : > { %v260_v33 = vsel %vm200_vm0, %v985_v2, 0.0  ;;  %v1049_v60 = vld [vmem:[%s818_s19 + $0x130] sm:$0xff] }
  0x5b   : > { %v243_v20 = vadd.f32 %v242_v6, %v241_v9  ;;  %v348_v6 = vmul.f32 %v877_v39, %v877_v39  ;;  %v420_v13 = vadd.f32 %v419_v1, %v418_v7  ;;  %v264_v39 = vsel %vm200_vm0, %v1001_v17, 0.0  ;;  %v1057_v1 = vld [vmem:[%s818_s19 + $0x138] sm:$0xff] }
  0x5d   : > { %v245_v28 = vadd.f32 %v244_v14, %v243_v20  ;;  %v349_v14 = vmul.f32 %v882_v42, %v882_v42  ;;  %v422_v22 = vadd.f32 %v421_v8, %v420_v13  ;;  %v425_v23 = vsel %vm200_vm0, %v348_v6, 0.0  ;;  %v1065_v8 = vld [vmem:[%s818_s19 + $0x140] sm:$0xff] }
  0x5e   : > { %v266_v42 = vsel %vm200_vm0, %v1009_v25, 0.0 }
  0x5f   : > { %v247_v35 = vadd.f32 %v246_v12, %v245_v28  ;;  %v350_v12 = vmul.f32 %v887_v45, %v887_v45  ;;  %v424_v29 = vadd.f32 %v423_v16, %v422_v22  ;;  %v427_v31 = vsel %vm200_vm0, %v349_v14, 0.0  ;;  %v1073_v16 = vld [vmem:[%s818_s19 + $0x148] sm:$0xff] }
  0x60   : > { %v268_v45 = vsel %vm200_vm0, %v1017_v32, 0.0 }
  0x61   : > { %v249_v43 = vadd.f32 %v248_v15, %v247_v35  ;;  %v351_v15 = vmul.f32 %v892_v48, %v892_v48  ;;  %v426_v37 = vadd.f32 %v425_v23, %v424_v29  ;;  %v429_v38 = vsel %vm200_vm0, %v350_v12, 0.0  ;;  %v1081_v23 = vld [vmem:[%s818_s19 + $0x150] sm:$0xff] }
  0x62   : > { %v270_v48 = vsel %vm200_vm0, %v1025_v40, 0.0 }
  0x63   : > { %v251_v50 = vadd.f32 %v250_v18, %v249_v43  ;;  %v352_v18 = vmul.f32 %v897_v51, %v897_v51  ;;  %v428_v44 = vadd.f32 %v427_v31, %v426_v37  ;;  %v431_v46 = vsel %vm200_vm0, %v351_v15, 0.0  ;;  %v1089_v31 = vld [vmem:[%s818_s19 + $0x158] sm:$0xff] }
  0x64   : > { %v272_v51 = vsel %vm200_vm0, %v1033_v47, 0.0 }
  0x65   : > { %v253_v57 = vadd.f32 %v252_v21, %v251_v50  ;;  %v353_v21 = vmul.f32 %v902_v56, %v902_v56  ;;  %v430_v52 = vadd.f32 %v429_v38, %v428_v44  ;;  %v433_v53 = vsel %vm200_vm0, %v352_v18, 0.0  ;;  %v1097_v38 = vld [vmem:[%s818_s19 + $0x160] sm:$0xff] }
  0x66   : > { %v274_v56 = vsel %vm200_vm0, %v1041_v54, 0.0 }
  0x67   : > { %v255_v63 = vadd.f32 %v254_v24, %v253_v57  ;;  %v354_v24 = vmul.f32 %v907_v61, %v907_v61  ;;  %v432_v58 = vadd.f32 %v431_v46, %v430_v52  ;;  %v435_v59 = vsel %vm200_vm0, %v353_v21, 0.0  ;;  %v1105_v46 = vld [vmem:[%s818_s19 + $0x168] sm:$0xff] }
  0x68   : > { %v276_v61 = vsel %vm200_vm0, %v1049_v60, 0.0 }
  0x69   : > { %v257_v5 = vadd.f32 %v256_v27, %v255_v63  ;;  %v355_v27 = vmul.f32 %v914_v4, %v914_v4  ;;  %v434_v3 = vadd.f32 %v433_v53, %v432_v58  ;;  %v437_v0 = vsel %vm200_vm0, %v354_v24, 0.0  ;;  %v1113_v53 = vld [vmem:[%s818_s19 + $0x170] sm:$0xff] }
  0x6a   : > { %v278_v4 = vsel %vm200_vm0, %v1057_v1, 0.0 }
  0x6b   : > { %v259_v9 = vadd.f32 %v258_v30, %v257_v5  ;;  %v356_v30 = vmul.f32 %v921_v11, %v921_v11  ;;  %v436_v7 = vadd.f32 %v435_v59, %v434_v3  ;;  %v439_v6 = vsel %vm200_vm0, %v355_v27, 0.0  ;;  %v1121_v59 = vld [vmem:[%s818_s19 + $0x178] sm:$0xff] }
  0x6c   : > { %v280_v11 = vsel %vm200_vm0, %v1065_v8, 0.0 }
  0x6d   : > { %v261_v20 = vadd.f32 %v260_v33, %v259_v9  ;;  %v357_v33 = vmul.f32 %v929_v19, %v929_v19  ;;  %v438_v13 = vadd.f32 %v437_v0, %v436_v7  ;;  %v441_v14 = vsel %vm200_vm0, %v356_v30, 0.0  ;;  %v1129_v0 = vld [vmem:[%s818_s19 + $0x180] sm:$0xff] }
  0x6e   : > { %v282_v19 = vsel %vm200_vm0, %v1073_v16, 0.0 }
  0x6f   : > { %v263_v28 = vadd.f32 %v262_v36, %v261_v20  ;;  %v358_v36 = vmul.f32 %v937_v26, %v937_v26  ;;  %v440_v22 = vadd.f32 %v439_v6, %v438_v13  ;;  %v443_v12 = vsel %vm200_vm0, %v357_v33, 0.0  ;;  %v1137_v6 = vld [vmem:[%s818_s19 + $0x188] sm:$0xff] }
  0x70   : > { %v284_v26 = vsel %vm200_vm0, %v1081_v23, 0.0 }
  0x71   : > { %v265_v35 = vadd.f32 %v264_v39, %v263_v28  ;;  %v359_v39 = vmul.f32 %v945_v34, %v945_v34  ;;  %v442_v29 = vadd.f32 %v441_v14, %v440_v22  ;;  %v445_v15 = vsel %vm200_vm0, %v358_v36, 0.0  ;;  %v1145_v14 = vld [vmem:[%s818_s19 + $0x190] sm:$0xff] }
  0x72   : > { %v286_v34 = vsel %vm200_vm0, %v1089_v31, 0.0 }
  0x73   : > { %v267_v43 = vadd.f32 %v266_v42, %v265_v35  ;;  %v360_v42 = vmul.f32 %v953_v41, %v953_v41  ;;  %v444_v37 = vadd.f32 %v443_v12, %v442_v29  ;;  %v447_v18 = vsel %vm200_vm0, %v359_v39, 0.0  ;;  %v1153_v12 = vld [vmem:[%s818_s19 + $0x198] sm:$0xff] }
  0x74   : > { %v288_v41 = vsel %vm200_vm0, %v1097_v38, 0.0 }
  0x75   : > { %v269_v50 = vadd.f32 %v268_v45, %v267_v43  ;;  %v361_v45 = vmul.f32 %v961_v49, %v961_v49  ;;  %v446_v44 = vadd.f32 %v445_v15, %v444_v37  ;;  %v449_v21 = vsel %vm200_vm0, %v360_v42, 0.0  ;;  %v1161_v15 = vld [vmem:[%s818_s19 + $0x1a0] sm:$0xff] }
  0x76   : > { %v290_v49 = vsel %vm200_vm0, %v1105_v46, 0.0 }
  0x77   : > { %v271_v57 = vadd.f32 %v270_v48, %v269_v50  ;;  %v362_v48 = vmul.f32 %v969_v55, %v969_v55  ;;  %v448_v52 = vadd.f32 %v447_v18, %v446_v44  ;;  %v451_v24 = vsel %vm200_vm0, %v361_v45, 0.0 }
  0x78   : > { %v292_v55 = vsel %vm200_vm0, %v1113_v53, 0.0 }
  0x79   : > { %v273_v63 = vadd.f32 %v272_v51, %v271_v57  ;;  %v363_v51 = vmul.f32 %v977_v62, %v977_v62  ;;  %v450_v58 = vadd.f32 %v449_v21, %v448_v52  ;;  %v453_v27 = vsel %vm200_vm0, %v362_v48, 0.0 }
  0x7a   : > { %v294_v62 = vsel %vm200_vm0, %v1121_v59, 0.0 }
  0x7b   : > { %v275_v5 = vadd.f32 %v274_v56, %v273_v63  ;;  %v364_v56 = vmul.f32 %v985_v2, %v985_v2  ;;  %v452_v3 = vadd.f32 %v451_v24, %v450_v58  ;;  %v455_v30 = vsel %vm200_vm0, %v363_v51, 0.0  ;;  %v1183_v24 = vld [vmem:[%s818_s19 + $0x1b0] sm:$0xff] }
  0x7c   : > { %v296_v2 = vsel %vm200_vm0, %v1129_v0, 0.0  ;;  %v373_v51 = vmul.f32 %v1057_v1, %v1057_v1 }
  0x7d   : > { %v277_v9 = vadd.f32 %v276_v61, %v275_v5  ;;  %v365_v61 = vmul.f32 %v993_v10, %v993_v10  ;;  %v454_v7 = vadd.f32 %v453_v27, %v452_v3  ;;  %v457_v33 = vsel %vm200_vm0, %v364_v56, 0.0  ;;  %v191_v3 = vld [vmem:[%s818_s19 + $0x1b8] sm:$0xff] }
  0x7e   : > { %v298_v10 = vsel %vm200_vm0, %v1137_v6, 0.0  ;;  %v374_v56 = vmul.f32 %v1065_v8, %v1065_v8  ;;  %v475_v1 = vsel %vm200_vm0, %v373_v51, 0.0  ;;  %v386_v51 = vmul.f32 %v1161_v15, %v1161_v15 }
  0x7f   : > { %v279_v20 = vadd.f32 %v278_v4, %v277_v9  ;;  %v366_v4 = vmul.f32 %v1001_v17, %v1001_v17  ;;  %v456_v13 = vadd.f32 %v455_v30, %v454_v7  ;;  %v459_v36 = vsel %vm200_vm0, %v365_v61, 0.0 }
  0x80   : > { %v300_v17 = vsel %vm200_vm0, %v1145_v14, 0.0  ;;  %v310_v30 = vsel %vm200_vm0, %v191_v3, 0.0  ;;  %v477_v7 = vsel %vm200_vm0, %v374_v56, 0.0 }
  0x81   : > { %v281_v28 = vadd.f32 %v280_v11, %v279_v20  ;;  %v367_v11 = vmul.f32 %v1009_v25, %v1009_v25  ;;  %v458_v22 = vadd.f32 %v457_v33, %v456_v13  ;;  %v461_v39 = vsel %vm200_vm0, %v366_v4, 0.0 }
  0x82   : > { %v302_v25 = vsel %vm200_vm0, %v1153_v12, 0.0 }
  0x83   : > { %v283_v35 = vadd.f32 %v282_v19, %v281_v28  ;;  %v368_v19 = vmul.f32 %v1017_v32, %v1017_v32  ;;  %v460_v29 = vadd.f32 %v459_v36, %v458_v22  ;;  %v463_v42 = vsel %vm200_vm0, %v367_v11, 0.0 }
  0x84   : > { %v304_v32 = vsel %vm200_vm0, %v1161_v15, 0.0  ;;  %v379_v36 = vmul.f32 %v1105_v46, %v1105_v46  ;;  %v194_v46 = vld [vmem:[%s818_s19 + $0x1d0] sm:$0xff] }
  0x85   : > { %v285_v43 = vadd.f32 %v284_v26, %v283_v35  ;;  %v369_v26 = vmul.f32 %v1025_v40, %v1025_v40  ;;  %v462_v37 = vadd.f32 %v461_v39, %v460_v29  ;;  %v465_v45 = vsel %vm200_vm0, %v368_v19, 0.0 }
  0x86   : > { %v371_v40 = vmul.f32 %v1041_v54, %v1041_v54  ;;  %v380_v39 = vmul.f32 %v1113_v53, %v1113_v53  ;;  %v381_v29 = vmul.f32 %v1121_v59, %v1121_v59  ;;  %v195_v59 = vld [vmem:[%s818_s19 + $0x1d8] sm:$0xff] }
  0x87   : > { %v287_v50 = vadd.f32 %v286_v34, %v285_v43  ;;  %v370_v34 = vmul.f32 %v1033_v47, %v1033_v47  ;;  %v464_v43 = vadd.f32 %v463_v42, %v462_v37  ;;  %v467_v44 = vsel %vm200_vm0, %v369_v26, 0.0 }
  0x88   : > { %v372_v47 = vmul.f32 %v1049_v60, %v1049_v60  ;;  %v471_v54 = vsel %vm200_vm0, %v371_v40, 0.0  ;;  %v382_v37 = vmul.f32 %v1129_v0, %v1129_v0  ;;  %v318_v40 = vsel %vm200_vm0, %v195_v59, 0.0 }
  0x89   : > { %v289_v57 = vadd.f32 %v288_v41, %v287_v50  ;;  %v1172_v41 = vld [vmem:[%s818_s19 + $0x1a8] sm:$0xff]  ;;  %v466_v21 = vadd.f32 %v465_v45, %v464_v43  ;;  %v469_v52 = vsel %vm200_vm0, %v370_v34, 0.0  ;;  %v383_v34 = vmul.f32 %v1137_v6, %v1137_v6  ;;  %v196_v6 = vld [vmem:[%s818_s19 + $0x1e0] sm:$0xff] }
  0x8a   : > { %v306_v50 = vsel %vm200_vm0, %v1172_v41, 0.0  ;;  %v473_v60 = vsel %vm200_vm0, %v372_v47, 0.0  ;;  %v491_v45 = vsel %vm200_vm0, %v381_v29, 0.0 }
  0x8b   : > { %v291_v63 = vadd.f32 %v290_v49, %v289_v57  ;;  %v468_v49 = vadd.f32 %v467_v44, %v466_v21  ;;  %v384_v44 = vmul.f32 %v1145_v14, %v1145_v14  ;;  %v385_v21 = vmul.f32 %v1153_v12, %v1153_v12  ;;  %v197_v12 = vld [vmem:[%s818_s19 + $0x1e8] sm:$0xff] }
  0x8d   : > { %v293_v5 = vadd.f32 %v292_v55, %v291_v63  ;;  %v470_v58 = vadd.f32 %v469_v52, %v468_v49  ;;  %v308_v55 = vsel %vm200_vm0, %v1183_v24, 0.0  ;;  %v375_v63 = vmul.f32 %v1073_v16, %v1073_v16  ;;  %v192_v16 = vld [vmem:[%s818_s19 + $0x1c0] sm:$0xff] }
  0x8e   : > { %v312_v13 = vsel %vm200_vm0, %v192_v16, 0.0  ;;  %v320_v49 = vsel %vm200_vm0, %v196_v6, 0.0 }
  0x8f   : > { %v295_v9 = vadd.f32 %v294_v62, %v293_v5  ;;  %v472_v27 = vadd.f32 %v471_v54, %v470_v58  ;;  %v376_v5 = vmul.f32 %v1081_v23, %v1081_v23  ;;  %v479_v4 = vsel %vm200_vm0, %v375_v63, 0.0 }
  0x90   : > { %v497_v54 = vsel %vm200_vm0, %v384_v44, 0.0  ;;  %v499_v58 = vsel %vm200_vm0, %v385_v21, 0.0  ;;  %v501_v63 = vsel %vm200_vm0, %v386_v51, 0.0 }
  0x91   : > { %v297_v20 = vadd.f32 %v296_v2, %v295_v9  ;;  %v474_v61 = vadd.f32 %v473_v60, %v472_v27  ;;  %v377_v2 = vmul.f32 %v1089_v31, %v1089_v31  ;;  %v481_v11 = vsel %vm200_vm0, %v376_v5, 0.0  ;;  %v193_v31 = vld [vmem:[%s818_s19 + $0x1c8] sm:$0xff] }
  0x92   : > { %v314_v19 = vsel %vm200_vm0, %v193_v31, 0.0  ;;  %v322_v60 = vsel %vm200_vm0, %v197_v12, 0.0  ;;  %v388_v27 = vmul.f32 %v1183_v24, %v1183_v24 }
  0x93   : > { %v299_v28 = vadd.f32 %v298_v10, %v297_v20  ;;  %v476_v8 = vadd.f32 %v475_v1, %v474_v61  ;;  %v378_v10 = vmul.f32 %v1097_v38, %v1097_v38  ;;  %v483_v20 = vsel %vm200_vm0, %v377_v2, 0.0  ;;  %v198_v61 = vld [vmem:[%s818_s19 + $0x1f0] sm:$0xff] }
  0x94   : > { %v389_v1 = vmul.f32 %v191_v3, %v191_v3  ;;  %v324_v5 = vsel %vm200_vm0, %v198_v61, 0.0  ;;  %v392_v3 = vmul.f32 %v194_v46, %v194_v46 }
  0x95   : > { %v301_v35 = vadd.f32 %v300_v17, %v299_v28  ;;  %v478_v9 = vadd.f32 %v477_v7, %v476_v8  ;;  %v485_v28 = vsel %vm200_vm0, %v378_v10, 0.0  ;;  %v390_v7 = vmul.f32 %v192_v16, %v192_v16 }
  0x96   : > { %v505_v8 = vsel %vm200_vm0, %v388_v27, 0.0 }
  0x97   : > { %v303_v18 = vadd.f32 %v302_v25, %v301_v35  ;;  %v480_v23 = vadd.f32 %v479_v4, %v478_v9  ;;  %v487_v25 = vsel %vm200_vm0, %v379_v36, 0.0  ;;  %v316_v35 = vsel %vm200_vm0, %v194_v46, 0.0  ;;  %v199_v9 = vld [vmem:[%s818_s19 + $0x1f8] sm:$0xff] }
  0x98   : > { %v391_v4 = vmul.f32 %v193_v31, %v193_v31  ;;  %v326_v10 = vsel %vm200_vm0, %v199_v9, 0.0  ;;  %v393_v36 = vmul.f32 %v195_v59, %v195_v59 }
  0x99   : > { %v305_v48 = vadd.f32 %v304_v32, %v303_v18  ;;  %v482_v17 = vadd.f32 %v481_v11, %v480_v23  ;;  %v489_v32 = vsel %vm200_vm0, %v380_v39, 0.0  ;;  %v509_v11 = vsel %vm200_vm0, %v390_v7, 0.0 }
  0x9a   : > { %v395_v39 = vmul.f32 %v197_v12, %v197_v12 }
  0x9b   : > { %v307_v57 = vadd.f32 %v306_v50, %v305_v48  ;;  %v484_v38 = vadd.f32 %v483_v20, %v482_v17  ;;  %v493_v48 = vsel %vm200_vm0, %v382_v37, 0.0  ;;  %v495_v50 = vsel %vm200_vm0, %v383_v34, 0.0 }
  0x9c   : > { %v511_v20 = vsel %vm200_vm0, %v391_v4, 0.0  ;;  %v394_v17 = vmul.f32 %v196_v6, %v196_v6 }
  0x9d   : > { %v309_v62 = vadd.f32 %v308_v55, %v307_v57  ;;  %v486_v42 = vadd.f32 %v485_v28, %v484_v38  ;;  %v387_v57 = vmul.f32 %v1172_v41, %v1172_v41  ;;  %v515_v28 = vsel %vm200_vm0, %v393_v36, 0.0 }
  0x9e   : > { %v517_v46 = vsel %vm200_vm0, %v394_v17, 0.0 }
  0x9f   : > { %v311_v33 = vadd.f32 %v310_v30, %v309_v62  ;;  %v488_v53 = vadd.f32 %v487_v25, %v486_v42  ;;  %v503_v62 = vsel %vm200_vm0, %v387_v57, 0.0  ;;  %v396_v25 = vmul.f32 %v198_v61, %v198_v61 }
  0xa0   : > { %v397_v42 = vmul.f32 %v199_v9, %v199_v9 }
  0xa1   : > { %v313_v22 = vadd.f32 %v312_v13, %v311_v33  ;;  %v490_v43 = vadd.f32 %v489_v32, %v488_v53  ;;  %v507_v33 = vsel %vm200_vm0, %v389_v1, 0.0  ;;  %v521_v53 = vsel %vm200_vm0, %v396_v25, 0.0 }
  0xa3   : > { %v315_v26 = vadd.f32 %v314_v19, %v313_v22  ;;  %v492_v0 = vadd.f32 %v491_v45, %v490_v43  ;;  %v513_v19 = vsel %vm200_vm0, %v392_v3, 0.0  ;;  %v523_v45 = vsel %vm200_vm0, %v397_v42, 0.0 }
  0xa5   : > { %v317_v18 = vadd.f32 %v316_v35, %v315_v26  ;;  %v494_v52 = vadd.f32 %v493_v48, %v492_v0  ;;  %v519_v35 = vsel %vm200_vm0, %v395_v39, 0.0 }
  0xa7   : > { %v319_v47 = vadd.f32 %v318_v40, %v317_v18  ;;  %v496_v14 = vadd.f32 %v495_v50, %v494_v52 }
  0xa9   : > { %v321_v55 = vadd.f32 %v320_v49, %v319_v47  ;;  %v498_v56 = vadd.f32 %v497_v54, %v496_v14 }
  0xab   : > { %v500_v15 = vadd.f32 %v499_v58, %v498_v56  ;;  %v323_v30 = vadd.f32 %v322_v60, %v321_v55 }
  0xad   : > { %v502_v41 = vadd.f32 %v501_v63, %v500_v15  ;;  %v325_v24 = vadd.f32 %v324_v5, %v323_v30 }
  0xaf   : > { %v504_v2 = vadd.f32 %v503_v62, %v502_v41  ;;  %v327_v22 = vadd.f32 %v326_v10, %v325_v24 }
  0xb1   : > { %v506_v13 = vadd.f32 %v505_v8, %v504_v2  ;;  %v328_v38 = vrot.slane %v327_v22, 4 }
  0xb3   : > { %v508_v23 = vadd.f32 %v507_v33, %v506_v13  ;;  %v329_v37 = vadd.f32 %v328_v38, %v327_v22 }
  0xb5   : > { %v510_v16 = vadd.f32 %v509_v11, %v508_v23  ;;  %v330_v59 = vrot.slane %v329_v37, 2 }
  0xb7   : > { %v512_v31 = vadd.f32 %v511_v20, %v510_v16  ;;  %v331_v40 = vadd.f32 %v330_v59, %v329_v37 }
  0xb9   : > { %v514_v29 = vadd.f32 %v513_v19, %v512_v31  ;;  %v332_v0 = vrot.slane %v331_v40, 1 }
  0xbb   : > { %v516_v26 = vadd.f32 %v515_v28, %v514_v29  ;;  %v333_v6 = vadd.f32 %v332_v0, %v331_v40 }
  0xbd   : > { %v518_v32 = vadd.f32 %v517_v46, %v516_v26 }
  0xbf   : > { %v520_v34 = vadd.f32 %v519_v35, %v518_v32 }
  0xc1   : > { %v522_v18 = vadd.f32 %v521_v53, %v520_v34 }
  0xc3   : > { %v524_v43 = vadd.f32 %v523_v45, %v522_v18 }
  0xc5   : > { %v525_v44 = vrot.slane %v524_v43, 4 }
  0xc7   : > { %v526_v48 = vadd.f32 %v525_v44, %v524_v43 }
  0xc9   : > { %v527_v21 = vrot.slane %v526_v48, 2 }
  0xcb   : > { %v528_v50 = vadd.f32 %v527_v21, %v526_v48 }
  0xcd   : > { %v529_v47 = vrot.slane %v528_v50, 1 }
  0xcf   : > { %v530_v52 = vadd.f32 %v529_v47, %v528_v50 }
  0xd1   : > { %v532_v49 = vsel %vm531_vm1, %v333_v6, %v530_v52 }
  0xd2   : > { %534 = vst.msk [vmem:[%s135_s21] sm:$0x3] %vm533_vm2, %v532_v49 }
  0xd3 PF: > { %p11_p8 = scmp.ge.s32.totalorder %s754_s11, 4   ;;  %s1284_s6 = smov %s709_s7 }
  0xd4   : > { %s1285_s7 = smov %s713_s8  ;;  %s1286_s8 = smov %s764_s14 }
  0xd5   : > { %s1287_s9 = smov %s754_s11  ;;  %13 = sbr.rel (!%p11_p8) target bundleno = 3 (0x3), region = 64 }
  0xdc   :  { %554 = vsyncpa [#allocation3], 1 }
  0xdd   :  { %556 = vsyncpa [#allocation3 + $0x1], 1 }

// kernel: bottleneck_pallas_nhwc.6
= control target key start
LH: loop header
LB: loop body
LE: loop exit
PB: predicated region body
PF: predicated region fallthrough
CT: control target
= control target key end

     0   :  { %s1821_s18 = smov 0   ;;  %s2604_s0 = inlined_call_operand.vmem [shape: f32[1024,32], index: 0, kind: input, shape index: {}]   ;;  %s2605_s1 = inlined_call_operand.vmem [shape: f32[1,32], index: 1, kind: input, shape index: {}]   ;;  %s2606_s2 = inlined_call_operand.vmem [shape: f32[1,32], index: 2, kind: input, shape index: {}]   ;;  %s2607_s3 = inlined_call_operand.vmem [shape: f32[32,8], index: 3, kind: input, shape index: {}]   ;;  %s2608_s4 = inlined_call_operand.vmem [shape: f32[1024,8], index: 4, kind: output, shape index: {0}]   ;;  %s2609_s5 = inlined_call_operand.vmem [shape: f32[2,2,8], index: 5, kind: output, shape index: {1}]  }
   0x1 LB: > { %s1827_s19 = sadd.s32 4294967295, %s1789_s18   ;;  %p1517_p0 = scmp.ge.s32.totalorder %s1789_s18, 1  ;;  %s1789_s18 = sphi %s1821_s18, %s16_s18  }
   0x2   : > { %p191_p1 = scmp.lt.s32.totalorder %s1789_s18, 3 }
   0x4   : > { %p192_p2 = pnand %p1517_p0, %p191_p1 }
   0x5   : > { %v445_v0 = vld [vmem:[%s2607_s3] sm:$0xff] (!%p192_p2)  ;;  %v446_v1 = vld [vmem:[%s2607_s3 + $0x8] sm:$0xff] (!%p192_p2)  ;;  %v447_v2 = vld [vmem:[%s2607_s3 + $0x10] sm:$0xff] (!%p192_p2)  ;;  %s1518_s26 = sshll.u32 (!%p192_p2), %s1827_s19, 6  ;;  %vm449_vm0 = vcmask (!%p192_p2), 261120   ;;  %vm1027_vm1 = vcmask (!%p192_p2), 64512  }
   0x6   : > { %195 = sbr.rel (%p192_p2) target bundleno = 380 (0x17c), region = 36  ;;  %v1763_v3 = vpack.c.bf16 (!%p192_p2), %v446_v1, %v445_v0  ;;  %v448_v4 = vld [vmem:[%s2607_s3 + $0x18] sm:$0xff] (!%p192_p2)  ;;  %p224_p3 = scmp.lt.s32.totalorder (!%p192_p2), %s1518_s26, 127  ;;  %v1850_v6 = vld [vmem:[%s2605_s1] ss:$0 sm:$0xff] (!%p192_p2)  ;;  %vm1358_vm2 = vcmask (!%p192_p2), 1040384  }
   0x7   : > { %v1767_v5 = vpack.c.bf16 (!%p192_p2), %v448_v4, %v447_v2  ;;  %v1862_v7 = vld [vmem:[%s2606_s2] ss:$0 sm:$0xff] (!%p192_p2)  ;;  %p235_p4 = scmp.lt.s32.totalorder (!%p192_p2), %s1827_s19, 1  ;;  %vm1360_vm3 = vcmask (!%p192_p2), 58368  }
   0x8   : > { %1764 = vmatprep.subr.bf16.mxu0 (!%p192_p2), %v1763_v3  ;;  %1771 = vmatprep.subr.bf16.mxu1 (!%p192_p2), %v1763_v3 }
   0x9   : > { %1766 = vmatpush3.bf16.msra.mxu0 (!%p192_p2), %v1763_v3  ;;  %1773 = vmatpush3.bf16.msra.mxu1 (!%p192_p2), %v1763_v3 }
   0xa   : > { %1768 = vmatprep.subr.bf16.mxu0 (!%p192_p2), %v1767_v5  ;;  %1772 = vmatprep.subr.bf16.mxu1 (!%p192_p2), %v1767_v5 }
   0xd   : > { %s2611_s26 = smov (!%p224_p3, %s1518_s26), 127  ;;  %1770 = vmatpush3.bf16.msra.mxu0 %v1767_v5  ;;  %1774 = vmatpush3.bf16.msra.mxu1 %v1767_v5  ;;  %s2613_s19 = smov (!%p235_p4, %s1827_s19), 1 }
   0xe   : > { %s1519_s29 = sshll.u32 %s2611_s26, 3  ;;  %s1522_s15 = sshll.u32 %s2613_s19, 1 }
   0xf   : > { %s1857_s9 = scalar_lea.vmem %s2604_s0, %s1519_s29  ;;  %s2146_s14 = scalar_lea.vmem %s2608_s4, %s1519_s29 }
  0x10   : > { %v239_v8 = vld [vmem:[%s1857_s9] sm:$0xff]  ;;  %v240_v9 = vld [vmem:[%s1857_s9 + $0x8] sm:$0xff]  ;;  %v241_v10 = vld [vmem:[%s1857_s9 + $0x10] sm:$0xff]  ;;  %s238_s20 = scalar_lea.vmem %s2609_s5, %s1522_s15 }
  0x11   : > { %v310_v11 = vmul.f32 %v1850_v6, %v239_v8  ;;  %v311_v12 = vmul.f32 %v1850_v6, %v240_v9  ;;  %v312_v13 = vmul.f32 %v1850_v6, %v241_v10  ;;  %v242_v14 = vld [vmem:[%s1857_s9 + $0x18] sm:$0xff]  ;;  %v243_v15 = vld [vmem:[%s1857_s9 + $0x20] sm:$0xff]  ;;  %v244_v21 = vld [vmem:[%s1857_s9 + $0x28] sm:$0xff] }
  0x12   : > { %v313_v16 = vmul.f32 %v1850_v6, %v242_v14  ;;  %v314_v20 = vmul.f32 %v1850_v6, %v243_v15  ;;  %v245_v22 = vld [vmem:[%s1857_s9 + $0x30] sm:$0xff]  ;;  %v315_v24 = vmul.f32 %v1850_v6, %v244_v21  ;;  %v246_v27 = vld [vmem:[%s1857_s9 + $0x38] sm:$0xff]  ;;  %v247_v28 = vld [vmem:[%s1857_s9 + $0x40] sm:$0xff] }
  0x13   : > { %v381_v17 = vadd.f32 %v1862_v7, %v310_v11  ;;  %v382_v18 = vadd.f32 %v1862_v7, %v311_v12  ;;  %v383_v19 = vadd.f32 %v1862_v7, %v312_v13  ;;  %v316_v26 = vmul.f32 %v1850_v6, %v245_v22  ;;  %v248_v33 = vld [vmem:[%s1857_s9 + $0x48] sm:$0xff]  ;;  %v249_v34 = vld [vmem:[%s1857_s9 + $0x50] sm:$0xff]  ;;  %v250_v35 = vld [vmem:[%s1857_s9 + $0x58] sm:$0xff] }
  0x14   : > { %v384_v23 = vadd.f32 %v1862_v7, %v313_v16  ;;  %v385_v25 = vadd.f32 %v1862_v7, %v314_v20  ;;  %v386_v29 = vadd.f32 %v1862_v7, %v315_v24  ;;  %v317_v30 = vmul.f32 %v1850_v6, %v246_v27  ;;  %v271_v39 = vld [vmem:[%s1857_s9 + $0x100] sm:$0xff]  ;;  %v272_v40 = vld [vmem:[%s1857_s9 + $0x108] sm:$0xff]  ;;  %v273_v41 = vld [vmem:[%s1857_s9 + $0x110] sm:$0xff] }
  0x15   : > { %1667 = vmatprep.mubr.msk.f32.mxu0 %vm449_vm0, %v381_v17  ;;  %v387_v31 = vadd.f32 %v1862_v7, %v316_v26  ;;  %v318_v32 = vmul.f32 %v1850_v6, %v247_v28  ;;  %v319_v37 = vmul.f32 %v1850_v6, %v248_v33  ;;  %v320_v38 = vmul.f32 %v1850_v6, %v249_v34  ;;  %v251_v43 = vld [vmem:[%s1857_s9 + $0x60] sm:$0xff]  ;;  %v274_v44 = vld [vmem:[%s1857_s9 + $0x118] sm:$0xff]  ;;  %v252_v53 = vld [vmem:[%s1857_s9 + $0x68] sm:$0xff] }
  0x16   : > { %1668 = vmatmul.mubr.msk.f32.vlgmr.msra.gmra.mrb[0].mxu0 %vm449_vm0, %v382_v18  ;;  %v388_v36 = vadd.f32 %v1862_v7, %v317_v30  ;;  %v275_v45 = vld [vmem:[%s1857_s9 + $0x120] sm:$0xff]  ;;  %v321_v46 = vmul.f32 %v1850_v6, %v250_v35  ;;  %v342_v47 = vmul.f32 %v1850_v6, %v271_v39  ;;  %v343_v48 = vmul.f32 %v1850_v6, %v272_v40  ;;  %v253_v54 = vld [vmem:[%s1857_s9 + $0x70] sm:$0xff]  ;;  %v276_v60 = vld [vmem:[%s1857_s9 + $0x128] sm:$0xff] }
  0x17   : > { %1670 = vmatprep.mubr.msk.f32.mxu0 %vm449_vm0, %v383_v19  ;;  %v389_v42 = vadd.f32 %v1862_v7, %v318_v32  ;;  %v344_v49 = vmul.f32 %v1850_v6, %v273_v41  ;;  %v390_v50 = vadd.f32 %v1862_v7, %v319_v37  ;;  %v391_v51 = vadd.f32 %v1862_v7, %v320_v38  ;;  %v277_v61 = vld [vmem:[%s1857_s9 + $0x130] sm:$0xff]  ;;  %v254_v0 = vld [vmem:[%s1857_s9 + $0x78] sm:$0xff]  ;;  %v255_v1 = vld [vmem:[%s1857_s9 + $0x80] sm:$0xff] }
  0x18   : > { %v322_v52 = vmul.f32 %v1850_v6, %v251_v43  ;;  %v345_v55 = vmul.f32 %v1850_v6, %v274_v44  ;;  %v413_v56 = vadd.f32 %v1862_v7, %v342_v47  ;;  %v414_v57 = vadd.f32 %v1862_v7, %v343_v48  ;;  %v256_v3 = vld [vmem:[%s1857_s9 + $0x88] sm:$0xff]  ;;  %v257_v4 = vld [vmem:[%s1857_s9 + $0x90] sm:$0xff]  ;;  %v278_v12 = vld [vmem:[%s1857_s9 + $0x138] sm:$0xff] }
  0x19   : > { %v415_v58 = vadd.f32 %v1862_v7, %v344_v49  ;;  %v346_v59 = vmul.f32 %v1850_v6, %v275_v45  ;;  %v323_v62 = vmul.f32 %v1850_v6, %v252_v53  ;;  %v324_v63 = vmul.f32 %v1850_v6, %v253_v54  ;;  %v279_v15 = vld [vmem:[%s1857_s9 + $0x140] sm:$0xff]  ;;  %v258_v18 = vld [vmem:[%s1857_s9 + $0x98] sm:$0xff]  ;;  %v296_v24 = vld [vmem:[%s1857_s9 + $0x1c8] sm:$0xff] }
  0x1a   : > { %1671 = vmatmul.mubr.msk.f32.gmra.mrb[2].mxu0 %vm449_vm0, %v384_v23  ;;  %1715 = vmatprep.mubr.msk.f32.mxu1 %vm449_vm0, %v413_v56  ;;  %v392_v2 = vadd.f32 %v1862_v7, %v321_v46  ;;  %v416_v5 = vadd.f32 %v1862_v7, %v345_v55  ;;  %v347_v8 = vmul.f32 %v1850_v6, %v276_v60  ;;  %v259_v19 = vld [vmem:[%s1857_s9 + $0xa0] sm:$0xff]  ;;  %v280_v23 = vld [vmem:[%s1857_s9 + $0x148] sm:$0xff]  ;;  %v281_v28 = vld [vmem:[%s1857_s9 + $0x150] sm:$0xff] }
  0x1b   : > { %1673 = vmatprep.mubr.msk.f32.mxu0 %vm449_vm0, %v385_v25  ;;  %1716 = vmatmul.mubr.msk.f32.vlgmr.msra.gmra.mrb[0].mxu1 %vm449_vm0, %v414_v57  ;;  %v393_v9 = vadd.f32 %v1862_v7, %v322_v52  ;;  %v417_v10 = vadd.f32 %v1862_v7, %v346_v59  ;;  %v348_v11 = vmul.f32 %v1850_v6, %v277_v61  ;;  %v282_v34 = vld [vmem:[%s1857_s9 + $0x158] sm:$0xff]  ;;  %v283_v35 = vld [vmem:[%s1857_s9 + $0x160] sm:$0xff]  ;;  %v300_v45 = vld [vmem:[%s1857_s9 + $0x1e8] sm:$0xff] }
  0x1c   : > { %1718 = vmatprep.mubr.msk.f32.mxu1 %vm449_vm0, %v415_v58  ;;  %v325_v13 = vmul.f32 %v1850_v6, %v254_v0  ;;  %v326_v14 = vmul.f32 %v1850_v6, %v255_v1  ;;  %v327_v16 = vmul.f32 %v1850_v6, %v256_v3  ;;  %v328_v17 = vmul.f32 %v1850_v6, %v257_v4  ;;  %v298_v40 = vld [vmem:[%s1857_s9 + $0x1d8] sm:$0xff]  ;;  %v299_v41 = vld [vmem:[%s1857_s9 + $0x1e0] sm:$0xff]  ;;  %v301_v46 = vld [vmem:[%s1857_s9 + $0x1f0] sm:$0xff] }
  0x1d   : > { %v394_v20 = vadd.f32 %v1862_v7, %v323_v62  ;;  %v418_v21 = vadd.f32 %v1862_v7, %v347_v8  ;;  %v349_v22 = vmul.f32 %v1850_v6, %v278_v12  ;;  %v395_v25 = vadd.f32 %v1862_v7, %v324_v63  ;;  %v302_v47 = vld [vmem:[%s1857_s9 + $0x1f8] sm:$0xff]  ;;  %v260_v59 = vld [vmem:[%s1857_s9 + $0xa8] sm:$0xff]  ;;  %v261_v60 = vld [vmem:[%s1857_s9 + $0xb0] sm:$0xff] }
  0x1e   : > { %1674 = vmatmul.mubr.msk.f32.gmra.mrb[4].mxu0 %vm449_vm0, %v386_v29  ;;  %v419_v26 = vadd.f32 %v1862_v7, %v348_v11  ;;  %v350_v27 = vmul.f32 %v1850_v6, %v279_v15  ;;  %v297_v29 = vld [vmem:[%s1857_s9 + $0x1d0] sm:$0xff]  ;;  %v396_v30 = vadd.f32 %v1862_v7, %v325_v13  ;;  %v329_v32 = vmul.f32 %v1850_v6, %v258_v18  ;;  %v284_v0 = vld [vmem:[%s1857_s9 + $0x168] sm:$0xff]  ;;  %v287_v18 = vld [vmem:[%s1857_s9 + $0x180] sm:$0xff] }
  0x1f   : > { %1676 = vmatprep.mubr.msk.f32.mxu0 %vm449_vm0, %v387_v31  ;;  %1719 = vmatmul.mubr.msk.f32.gmra.mrb[2].mxu1 %vm449_vm0, %v416_v5  ;;  %v397_v31 = vadd.f32 %v1862_v7, %v326_v14  ;;  %v330_v33 = vmul.f32 %v1850_v6, %v259_v19  ;;  %v399_v37 = vadd.f32 %v1862_v7, %v328_v17  ;;  %v285_v4 = vld [vmem:[%s1857_s9 + $0x170] sm:$0xff]  ;;  %v263_v17 = vld [vmem:[%s1857_s9 + $0xc0] sm:$0xff] }
  0x20   : > { %1721 = vmatprep.mubr.msk.f32.mxu1 %vm449_vm0, %v417_v10  ;;  %v351_v38 = vmul.f32 %v1850_v6, %v280_v23  ;;  %v367_v39 = vmul.f32 %v1850_v6, %v296_v24  ;;  %v352_v43 = vmul.f32 %v1850_v6, %v281_v28  ;;  %v368_v44 = vmul.f32 %v1850_v6, %v297_v29  ;;  %v262_v10 = vld [vmem:[%s1857_s9 + $0xb8] sm:$0xff]  ;;  %v265_v23 = vld [vmem:[%s1857_s9 + $0xd0] sm:$0xff]  ;;  %v288_v29 = vld [vmem:[%s1857_s9 + $0x188] sm:$0xff] }
  0x21   : > { %v421_v48 = vadd.f32 %v1862_v7, %v350_v27  ;;  %v353_v49 = vmul.f32 %v1850_v6, %v282_v34  ;;  %v369_v53 = vmul.f32 %v1850_v6, %v298_v40  ;;  %v370_v54 = vmul.f32 %v1850_v6, %v299_v41  ;;  %v266_v34 = vld [vmem:[%s1857_s9 + $0xd8] sm:$0xff] }
  0x22   : > { %1677 = vmatmul.mubr.msk.f32.gmra.mrb[6].mxu0 %vm449_vm0, %v388_v36  ;;  %v398_v36 = vadd.f32 %v1862_v7, %v327_v16  ;;  %v1995_v52 = vadd.f32 %v1862_v7, %v368_v44  ;;  %v422_v55 = vadd.f32 %v1862_v7, %v351_v38  ;;  %v371_v56 = vmul.f32 %v1850_v6, %v300_v45  ;;  %v286_v16 = vld [vmem:[%s1857_s9 + $0x178] sm:$0xff] }
  0x23   : > { %1679 = vmatprep.mubr.msk.f32.mxu0 %vm449_vm0, %v389_v42  ;;  %1722 = vmatmul.mubr.msk.f32.gmra.mrb[4].mxu1 %vm449_vm0, %v418_v21  ;;  %v420_v42 = vadd.f32 %v1862_v7, %v349_v22  ;;  %v372_v57 = vmul.f32 %v1850_v6, %v301_v46  ;;  %v373_v58 = vmul.f32 %v1850_v6, %v302_v47  ;;  %v264_v22 = vld [vmem:[%s1857_s9 + $0xc8] sm:$0xff]  ;;  %v290_v41 = vld [vmem:[%s1857_s9 + $0x198] sm:$0xff]  ;;  %v269_v47 = vld [vmem:[%s1857_s9 + $0xf0] sm:$0xff] }
  0x24   : > { %1724 = vmatprep.mubr.msk.f32.mxu1 %vm449_vm0, %v419_v26  ;;  %v423_v61 = vadd.f32 %v1862_v7, %v352_v43  ;;  %v2009_v62 = vadd.f32 %v1862_v7, %v369_v53  ;;  %v2012_v63 = vadd.f32 %v1862_v7, %v370_v54  ;;  %v2018_v1 = vadd.f32 %v1862_v7, %v371_v56  ;;  %v268_v46 = vld [vmem:[%s1857_s9 + $0xe8] sm:$0xff]  ;;  %v293_v56 = vld [vmem:[%s1857_s9 + $0x1b0] sm:$0xff] }
  0x25   : > { %v2024_v3 = vadd.f32 %v1862_v7, %v373_v58  ;;  %v331_v5 = vmul.f32 %v1850_v6, %v260_v59  ;;  %v332_v8 = vmul.f32 %v1850_v6, %v261_v60  ;;  %v424_v11 = vadd.f32 %v1862_v7, %v353_v49 }
  0x26   : > { %1680 = vmatmul.mubr.msk.f32.gmra.mrb[8].mxu0 %vm449_vm0, %v390_v50  ;;  %v354_v50 = vmul.f32 %v1850_v6, %v283_v35  ;;  %v355_v12 = vmul.f32 %v1850_v6, %v284_v0  ;;  %v401_v13 = vadd.f32 %v1862_v7, %v330_v33  ;;  %v356_v15 = vmul.f32 %v1850_v6, %v285_v4  ;;  %v267_v35 = vld [vmem:[%s1857_s9 + $0xe0] sm:$0xff]  ;;  %v270_v4 = vld [vmem:[%s1857_s9 + $0xf8] sm:$0xff] }
  0x27   : > { %1682 = vmatprep.mubr.msk.f32.mxu0 %vm449_vm0, %v391_v51  ;;  %v1992_v51 = vadd.f32 %v1862_v7, %v367_v39  ;;  %1725 = vmatmul.mubr.msk.f32.gmra.mrb[6].mxu1 %vm449_vm0, %v420_v42  ;;  %v402_v19 = vadd.f32 %v1862_v7, %v331_v5  ;;  %v403_v21 = vadd.f32 %v1862_v7, %v332_v8  ;;  %v291_v42 = vld [vmem:[%s1857_s9 + $0x1a0] sm:$0xff] }
  0x28   : > { %1727 = vmatprep.mubr.msk.f32.mxu1 %vm449_vm0, %v421_v48  ;;  %v425_v14 = vadd.f32 %v1862_v7, %v354_v50  ;;  %v426_v24 = vadd.f32 %v1862_v7, %v355_v12  ;;  %v334_v26 = vmul.f32 %v1850_v6, %v263_v17  ;;  %v427_v27 = vadd.f32 %v1862_v7, %v356_v15 }
  0x29   : > { %v358_v28 = vmul.f32 %v1850_v6, %v287_v18  ;;  %v337_v43 = vmul.f32 %v1850_v6, %v266_v34  ;;  %v338_v44 = vmul.f32 %v1850_v6, %v267_v35  ;;  %v361_v49 = vmul.f32 %v1850_v6, %v290_v41 }
  0x2a   : > { %1683 = vmatmul.mubr.msk.f32.gmra.mrb[10].mxu0 %vm449_vm0, %v392_v2  ;;  %v2021_v2 = vadd.f32 %v1862_v7, %v372_v57  ;;  %v405_v38 = vadd.f32 %v1862_v7, %v334_v26  ;;  %v362_v54 = vmul.f32 %v1850_v6, %v291_v42  ;;  %v339_v57 = vmul.f32 %v1850_v6, %v268_v46 }
  0x2b   : > { %1685 = vmatprep.mubr.msk.f32.mxu0 %vm449_vm0, %v393_v9  ;;  %v400_v9 = vadd.f32 %v1862_v7, %v329_v32  ;;  %1728 = vmatmul.mubr.msk.f32.gmra.mrb[8].mxu1 %vm449_vm0, %v422_v55  ;;  %v336_v32 = vmul.f32 %v1850_v6, %v265_v23  ;;  %v429_v39 = vadd.f32 %v1862_v7, %v358_v28  ;;  %v292_v55 = vld [vmem:[%s1857_s9 + $0x1a8] sm:$0xff] }
  0x2c   : > { %1730 = vmatprep.mubr.msk.f32.mxu1 %vm449_vm0, %v423_v61  ;;  %v340_v58 = vmul.f32 %v1850_v6, %v269_v47  ;;  %v408_v59 = vadd.f32 %v1862_v7, %v337_v43  ;;  %v432_v60 = vadd.f32 %v1862_v7, %v361_v49  ;;  %v363_v61 = vmul.f32 %v1850_v6, %v292_v55 }
  0x2d   : > { %v407_v50 = vadd.f32 %v1862_v7, %v336_v32  ;;  %v409_v0 = vadd.f32 %v1862_v7, %v338_v44  ;;  %v433_v5 = vadd.f32 %v1862_v7, %v362_v54  ;;  %v364_v8 = vmul.f32 %v1850_v6, %v293_v56 }
  0x2e   : > { %1686 = vmatmul.mubr.msk.f32.gmra.mrb[12].mxu0 %vm449_vm0, %v394_v20  ;;  %v333_v20 = vmul.f32 %v1850_v6, %v262_v10  ;;  %v295_v10 = vld [vmem:[%s1857_s9 + $0x1c0] sm:$0xff]  ;;  %v341_v12 = vmul.f32 %v1850_v6, %v270_v4  ;;  %v411_v15 = vadd.f32 %v1862_v7, %v340_v58 }
  0x2f   : > { %1688 = vmatprep.mubr.msk.f32.mxu0 %vm449_vm0, %v395_v25  ;;  %1731 = vmatmul.mubr.msk.f32.gmra.mrb[10].mxu1 %vm449_vm0, %v424_v11  ;;  %v357_v25 = vmul.f32 %v1850_v6, %v286_v16  ;;  %v410_v11 = vadd.f32 %v1862_v7, %v339_v57  ;;  %v435_v16 = vadd.f32 %v1862_v7, %v364_v8 }
  0x30   : > { %1733 = vmatprep.mubr.msk.f32.mxu1 %vm449_vm0, %v425_v14  ;;  %v404_v33 = vadd.f32 %v1862_v7, %v333_v20  ;;  %v366_v17 = vmul.f32 %v1850_v6, %v295_v10  ;;  %v412_v18 = vadd.f32 %v1862_v7, %v341_v12 }
  0x32   : > { %1689 = vmatmul.mubr.msk.f32.gmra.mrb[14].mxu0 %vm449_vm0, %v396_v30  ;;  %v289_v30 = vld [vmem:[%s1857_s9 + $0x190] sm:$0xff]  ;;  %v437_v20 = vadd.f32 %v1862_v7, %v366_v17 }
  0x33   : > { %1691 = vmatprep.mubr.msk.f32.mxu0 %vm449_vm0, %v397_v31  ;;  %v335_v31 = vmul.f32 %v1850_v6, %v264_v22  ;;  %1734 = vmatmul.mubr.msk.f32.gmra.mrb[12].mxu1 %vm449_vm0, %v426_v24  ;;  %v360_v40 = vmul.f32 %v1850_v6, %v289_v30 }
  0x34   : > { %1736 = vmatprep.mubr.msk.f32.mxu1 %vm449_vm0, %v427_v27 }
  0x35   : > { %v406_v45 = vadd.f32 %v1862_v7, %v335_v31  ;;  %v431_v53 = vadd.f32 %v1862_v7, %v360_v40 }
  0x36   : > { %1692 = vmatmul.mubr.msk.f32.gmra.mrb[16].mxu0 %vm449_vm0, %v398_v36  ;;  %v428_v36 = vadd.f32 %v1862_v7, %v357_v25 }
  0x37   : > { %1694 = vmatprep.mubr.msk.f32.mxu0 %vm449_vm0, %v399_v37  ;;  %v359_v37 = vmul.f32 %v1850_v6, %v288_v29 }
  0x38   : > { %1737 = vmatmul.mubr.msk.f32.gmra.mrb[14].mxu1 %vm449_vm0, %v428_v36 }
  0x39   : > { %v430_v48 = vadd.f32 %v1862_v7, %v359_v37  ;;  %1739 = vmatprep.mubr.msk.f32.mxu1 %vm449_vm0, %v429_v39 }
  0x3a   : > { %1695 = vmatmul.mubr.msk.f32.gmra.mrb[18].mxu0 %vm449_vm0, %v400_v9  ;;  %v294_v9 = vld [vmem:[%s1857_s9 + $0x1b8] sm:$0xff] }
  0x3b   : > { %1697 = vmatprep.mubr.msk.f32.mxu0 %vm449_vm0, %v401_v13  ;;  %v434_v13 = vadd.f32 %v1862_v7, %v363_v61  ;;  %v365_v14 = vmul.f32 %v1850_v6, %v294_v9 }
  0x3c   : > { %1740 = vmatmul.mubr.msk.f32.gmra.mrb[16].mxu1 %vm449_vm0, %v430_v48 }
  0x3d   : > { %1742 = vmatprep.mubr.msk.f32.mxu1 %vm449_vm0, %v431_v53 }
  0x3e   : > { %1698 = vmatmul.mubr.msk.f32.gmra.mrb[20].mxu0 %vm449_vm0, %v402_v19  ;;  %v436_v19 = vadd.f32 %v1862_v7, %v365_v14 }
  0x3f   : > { %1700 = vmatprep.mubr.msk.f32.mxu0 %vm449_vm0, %v403_v21 }
  0x40   : > { %1743 = vmatmul.mubr.msk.f32.gmra.mrb[18].mxu1 %vm449_vm0, %v432_v60 }
  0x41   : > { %1745 = vmatprep.mubr.msk.f32.mxu1 %vm449_vm0, %v433_v5 }
  0x42   : > { %1701 = vmatmul.mubr.msk.f32.gmra.mrb[22].mxu0 %vm449_vm0, %v404_v33 }
  0x43   : > { %1703 = vmatprep.mubr.msk.f32.mxu0 %vm449_vm0, %v405_v38 }
  0x44   : > { %1746 = vmatmul.mubr.msk.f32.gmra.mrb[20].mxu1 %vm449_vm0, %v434_v13 }
  0x45   : > { %1748 = vmatprep.mubr.msk.f32.mxu1 %vm449_vm0, %v435_v16 }
  0x46   : > { %1704 = vmatmul.mubr.msk.f32.gmra.mrb[24].mxu0 %vm449_vm0, %v406_v45 }
  0x47   : > { %1706 = vmatprep.mubr.msk.f32.mxu0 %vm449_vm0, %v407_v50 }
  0x48   : > { %1749 = vmatmul.mubr.msk.f32.gmra.mrb[22].mxu1 %vm449_vm0, %v436_v19 }
  0x49   : > { %1751 = vmatprep.mubr.msk.f32.mxu1 %vm449_vm0, %v437_v20 }
  0x4a   : > { %1707 = vmatmul.mubr.msk.f32.gmra.mrb[26].mxu0 %vm449_vm0, %v408_v59 }
  0x4b   : > { %1709 = vmatprep.mubr.msk.f32.mxu0 %vm449_vm0, %v409_v0 }
  0x4c   : > { %1752 = vmatmul.mubr.msk.f32.gmra.mrb[24].mxu1 %vm449_vm0, %v1992_v51 }
  0x4d   : > { %1754 = vmatprep.mubr.msk.f32.mxu1 %vm449_vm0, %v1995_v52 }
  0x4e   : > { %1710 = vmatmul.mubr.msk.f32.gmra.mrb[28].mxu0 %vm449_vm0, %v410_v11 }
  0x4f   : > { %1712 = vmatprep.mubr.msk.f32.mxu0 %vm449_vm0, %v411_v15 }
  0x50   : > { %1755 = vmatmul.mubr.msk.f32.gmra.mrb[26].mxu1 %vm449_vm0, %v2009_v62 }
  0x51   : > { %1757 = vmatprep.mubr.msk.f32.mxu1 %vm449_vm0, %v2012_v63 }
  0x52   : > { %1713 = vmatmul.mubr.msk.f32.gmra.mrb[30].mxu0 %vm449_vm0, %v412_v18 }
  0x54   : > { %1758 = vmatmul.mubr.msk.f32.gmra.mrb[28].mxu1 %vm449_vm0, %v2018_v1 }
  0x55   : > { %1760 = vmatprep.mubr.msk.f32.mxu1 %vm449_vm0, %v2021_v2 }
  0x58   : > { %1761 = vmatmul.mubr.msk.f32.gmra.mrb[30].mxu1 %vm449_vm0, %v2024_v3 }
  0xe9   : > { %v1669_v6 = vpop.f32.mrb[0].mxu0 }
  0xea   : > { %v1029_v7 = vsel %vm1027_vm1, %v1669_v6, 0.0  ;;  %v1162_v51 = vmul.f32 %v1669_v6, %v1669_v6  ;;  %1363 = vst.msk [vmem:[%s2146_s14 + $0x8] sm:$0xff] %vm1027_vm1, %v1669_v6  ;;  %v708_v52 = vpop.f32.mrb[1].mxu0 }
  0xeb   : > { %v1028_v62 = vsel %vm1027_vm1, %v708_v52, 0.0  ;;  %v1161_v63 = vmul.f32 %v708_v52, %v708_v52  ;;  %1362 = vst.msk [vmem:[%s2146_s14] sm:$0xff] %vm1027_vm1, %v708_v52 }
  0xec   : > { %v1226_v1 = vsel %vm1027_vm1, %v1162_v51, 0.0  ;;  %v1030_v2 = vadd.f32 %v1029_v7, %v1028_v62 }
  0xed   : > { %v1225_v3 = vsel %vm1027_vm1, %v1161_v63, 0.0  ;;  %v1672_v21 = vpop.f32.mrb[2].mxu0 }
  0xee   : > { %v1227_v22 = vadd.f32 %v1226_v1, %v1225_v3  ;;  %1365 = vst.msk [vmem:[%s2146_s14 + $0x18] sm:$0xff] %vm1027_vm1, %v1672_v21  ;;  %v718_v23 = vpop.f32.mrb[3].mxu0  ;;  %v1164_v24 = vmul.f32 %v1672_v21, %v1672_v21  ;;  %v1033_v28 = vsel %vm1027_vm1, %v1672_v21, 0.0  ;;  %v2179_v57 = vpop.f32.mrb[0].mxu1 }
  0xef   : > { %v1031_v25 = vsel %vm1027_vm1, %v718_v23, 0.0  ;;  %v1163_v26 = vmul.f32 %v718_v23, %v718_v23  ;;  %1364 = vst.msk [vmem:[%s2146_s14 + $0x10] sm:$0xff] %vm1027_vm1, %v718_v23  ;;  %1395 = vst.msk [vmem:[%s2146_s14 + $0x108] sm:$0xff] %vm1027_vm1, %v2179_v57  ;;  %v2186_v61 = vpop.f32.mrb[1].mxu1 }
  0xf0   : > { %v1032_v27 = vadd.f32 %v1031_v25, %v1030_v2  ;;  %v1230_v34 = vsel %vm1027_vm1, %v1164_v24, 0.0  ;;  %1394 = vst.msk [vmem:[%s2146_s14 + $0x100] sm:$0xff] %vm1027_vm1, %v2186_v61 }
  0xf1   : > { %v1228_v29 = vsel %vm1027_vm1, %v1163_v26, 0.0  ;;  %v1675_v30 = vpop.f32.mrb[4].mxu0 }
  0xf2   : > { %v1229_v31 = vadd.f32 %v1228_v29, %v1227_v22  ;;  %1367 = vst.msk [vmem:[%s2146_s14 + $0x28] sm:$0xff] %vm1027_vm1, %v1675_v30  ;;  %v728_v32 = vpop.f32.mrb[5].mxu0  ;;  %v1034_v33 = vadd.f32 %v1033_v28, %v1032_v27  ;;  %v1166_v35 = vmul.f32 %v1675_v30, %v1675_v30  ;;  %v1037_v40 = vsel %vm1027_vm1, %v1675_v30, 0.0  ;;  %v2197_v14 = vpop.f32.mrb[2].mxu1 }
  0xf3   : > { %v1035_v36 = vsel %vm1027_vm1, %v728_v32, 0.0  ;;  %v1165_v37 = vmul.f32 %v728_v32, %v728_v32  ;;  %1366 = vst.msk [vmem:[%s2146_s14 + $0x20] sm:$0xff] %vm1027_vm1, %v728_v32  ;;  %1397 = vst.msk [vmem:[%s2146_s14 + $0x118] sm:$0xff] %vm1027_vm1, %v2197_v14  ;;  %v2204_v18 = vpop.f32.mrb[3].mxu1 }
  0xf4   : > { %v1036_v38 = vadd.f32 %v1035_v36, %v1034_v33  ;;  %v1231_v39 = vadd.f32 %v1230_v34, %v1229_v31  ;;  %v1234_v46 = vsel %vm1027_vm1, %v1166_v35, 0.0  ;;  %1396 = vst.msk [vmem:[%s2146_s14 + $0x110] sm:$0xff] %vm1027_vm1, %v2204_v18 }
  0xf5   : > { %v1232_v41 = vsel %vm1027_vm1, %v1165_v37, 0.0  ;;  %v1678_v42 = vpop.f32.mrb[6].mxu0 }
  0xf6   : > { %v1233_v43 = vadd.f32 %v1232_v41, %v1231_v39  ;;  %1369 = vst.msk [vmem:[%s2146_s14 + $0x38] sm:$0xff] %vm1027_vm1, %v1678_v42  ;;  %v738_v44 = vpop.f32.mrb[7].mxu0  ;;  %v1038_v45 = vadd.f32 %v1037_v40, %v1036_v38  ;;  %v1168_v47 = vmul.f32 %v1678_v42, %v1678_v42  ;;  %v1041_v54 = vsel %vm1027_vm1, %v1678_v42, 0.0  ;;  %v2215_v2 = vpop.f32.mrb[4].mxu1 }
  0xf7   : > { %v1039_v48 = vsel %vm1027_vm1, %v738_v44, 0.0  ;;  %v1167_v49 = vmul.f32 %v738_v44, %v738_v44  ;;  %1368 = vst.msk [vmem:[%s2146_s14 + $0x30] sm:$0xff] %vm1027_vm1, %v738_v44  ;;  %1399 = vst.msk [vmem:[%s2146_s14 + $0x128] sm:$0xff] %vm1027_vm1, %v2215_v2  ;;  %v2222_v23 = vpop.f32.mrb[5].mxu1 }
  0xf8   : > { %v1040_v50 = vadd.f32 %v1039_v48, %v1038_v45  ;;  %v1235_v53 = vadd.f32 %v1234_v46, %v1233_v43  ;;  %v1238_v0 = vsel %vm1027_vm1, %v1168_v47, 0.0  ;;  %1398 = vst.msk [vmem:[%s2146_s14 + $0x120] sm:$0xff] %vm1027_vm1, %v2222_v23 }
  0xf9   : > { %v1236_v55 = vsel %vm1027_vm1, %v1167_v49, 0.0  ;;  %v1681_v56 = vpop.f32.mrb[8].mxu0 }
  0xfa   : > { %v1237_v58 = vadd.f32 %v1236_v55, %v1235_v53  ;;  %1371 = vst.msk [vmem:[%s2146_s14 + $0x48] sm:$0xff] %vm1027_vm1, %v1681_v56  ;;  %v748_v59 = vpop.f32.mrb[9].mxu0  ;;  %v1042_v60 = vadd.f32 %v1041_v54, %v1040_v50  ;;  %v1170_v4 = vmul.f32 %v1681_v56, %v1681_v56  ;;  %v1045_v11 = vsel %vm1027_vm1, %v1681_v56, 0.0  ;;  %v2233_v33 = vpop.f32.mrb[6].mxu1 }
  0xfb   : > { %v1043_v5 = vsel %vm1027_vm1, %v748_v59, 0.0  ;;  %v1169_v8 = vmul.f32 %v748_v59, %v748_v59  ;;  %1370 = vst.msk [vmem:[%s2146_s14 + $0x40] sm:$0xff] %vm1027_vm1, %v748_v59  ;;  %1401 = vst.msk [vmem:[%s2146_s14 + $0x138] sm:$0xff] %vm1027_vm1, %v2233_v33  ;;  %v2240_v37 = vpop.f32.mrb[7].mxu1 }
  0xfc   : > { %v1044_v9 = vadd.f32 %v1043_v5, %v1042_v60  ;;  %v1239_v10 = vadd.f32 %v1238_v0, %v1237_v58  ;;  %v1242_v19 = vsel %vm1027_vm1, %v1170_v4, 0.0  ;;  %1400 = vst.msk [vmem:[%s2146_s14 + $0x130] sm:$0xff] %vm1027_vm1, %v2240_v37 }
  0xfd   : > { %v1240_v12 = vsel %vm1027_vm1, %v1169_v8, 0.0  ;;  %v1684_v13 = vpop.f32.mrb[10].mxu0 }
  0xfe   : > { %v1241_v15 = vadd.f32 %v1240_v12, %v1239_v10  ;;  %1373 = vst.msk [vmem:[%s2146_s14 + $0x58] sm:$0xff] %vm1027_vm1, %v1684_v13  ;;  %v758_v16 = vpop.f32.mrb[11].mxu0  ;;  %v1046_v17 = vadd.f32 %v1045_v11, %v1044_v9  ;;  %v1172_v20 = vmul.f32 %v1684_v13, %v1684_v13  ;;  %v1049_v62 = vsel %vm1027_vm1, %v1684_v13, 0.0  ;;  %v2251_v47 = vpop.f32.mrb[8].mxu1 }
  0xff   : > { %v1047_v6 = vsel %vm1027_vm1, %v758_v16, 0.0  ;;  %v1171_v7 = vmul.f32 %v758_v16, %v758_v16  ;;  %1372 = vst.msk [vmem:[%s2146_s14 + $0x50] sm:$0xff] %vm1027_vm1, %v758_v16  ;;  %1403 = vst.msk [vmem:[%s2146_s14 + $0x148] sm:$0xff] %vm1027_vm1, %v2251_v47  ;;  %v2258_v53 = vpop.f32.mrb[9].mxu1 }
 0x100   : > { %v1048_v51 = vadd.f32 %v1047_v6, %v1046_v17  ;;  %v1243_v52 = vadd.f32 %v1242_v19, %v1241_v15  ;;  %v1246_v24 = vsel %vm1027_vm1, %v1172_v20, 0.0  ;;  %1402 = vst.msk [vmem:[%s2146_s14 + $0x140] sm:$0xff] %vm1027_vm1, %v2258_v53 }
 0x101   : > { %v1244_v63 = vsel %vm1027_vm1, %v1171_v7, 0.0  ;;  %v1687_v1 = vpop.f32.mrb[12].mxu0 }
 0x102   : > { %v1245_v3 = vadd.f32 %v1244_v63, %v1243_v52  ;;  %1375 = vst.msk [vmem:[%s2146_s14 + $0x68] sm:$0xff] %vm1027_vm1, %v1687_v1  ;;  %v768_v21 = vpop.f32.mrb[13].mxu0  ;;  %v1050_v22 = vadd.f32 %v1049_v62, %v1048_v51  ;;  %v1174_v25 = vmul.f32 %v1687_v1, %v1687_v1  ;;  %v1053_v30 = vsel %vm1027_vm1, %v1687_v1, 0.0  ;;  %v2269_v8 = vpop.f32.mrb[10].mxu1 }
 0x103   : > { %v1051_v26 = vsel %vm1027_vm1, %v768_v21, 0.0  ;;  %v1173_v27 = vmul.f32 %v768_v21, %v768_v21  ;;  %1374 = vst.msk [vmem:[%s2146_s14 + $0x60] sm:$0xff] %vm1027_vm1, %v768_v21  ;;  %1405 = vst.msk [vmem:[%s2146_s14 + $0x158] sm:$0xff] %vm1027_vm1, %v2269_v8  ;;  %v2276_v12 = vpop.f32.mrb[11].mxu1 }
 0x104   : > { %v1052_v28 = vadd.f32 %v1051_v26, %v1050_v22  ;;  %v1247_v29 = vadd.f32 %v1246_v24, %v1245_v3  ;;  %v1250_v38 = vsel %vm1027_vm1, %v1174_v25, 0.0  ;;  %1404 = vst.msk [vmem:[%s2146_s14 + $0x150] sm:$0xff] %vm1027_vm1, %v2276_v12 }
 0x105   : > { %v1248_v31 = vsel %vm1027_vm1, %v1173_v27, 0.0  ;;  %v1690_v32 = vpop.f32.mrb[14].mxu0 }
 0x106   : > { %v1249_v34 = vadd.f32 %v1248_v31, %v1247_v29  ;;  %1377 = vst.msk [vmem:[%s2146_s14 + $0x78] sm:$0xff] %vm1027_vm1, %v1690_v32  ;;  %v778_v35 = vpop.f32.mrb[15].mxu0  ;;  %v1054_v36 = vadd.f32 %v1053_v30, %v1052_v28  ;;  %v1176_v39 = vmul.f32 %v1690_v32, %v1690_v32  ;;  %v1057_v44 = vsel %vm1027_vm1, %v1690_v32, 0.0  ;;  %v2287_v52 = vpop.f32.mrb[12].mxu1 }
 0x107   : > { %v1055_v40 = vsel %vm1027_vm1, %v778_v35, 0.0  ;;  %v1175_v41 = vmul.f32 %v778_v35, %v778_v35  ;;  %1376 = vst.msk [vmem:[%s2146_s14 + $0x70] sm:$0xff] %vm1027_vm1, %v778_v35  ;;  %1407 = vst.msk [vmem:[%s2146_s14 + $0x168] sm:$0xff] %vm1027_vm1, %v2287_v52  ;;  %v2294_v3 = vpop.f32.mrb[13].mxu1 }
 0x108   : > { %v1056_v42 = vadd.f32 %v1055_v40, %v1054_v36  ;;  %v1251_v43 = vadd.f32 %v1250_v38, %v1249_v34  ;;  %v1254_v54 = vsel %vm1027_vm1, %v1176_v39, 0.0  ;;  %1406 = vst.msk [vmem:[%s2146_s14 + $0x160] sm:$0xff] %vm1027_vm1, %v2294_v3 }
 0x109   : > { %v1252_v45 = vsel %vm1027_vm1, %v1175_v41, 0.0  ;;  %v1693_v46 = vpop.f32.mrb[16].mxu0 }
 0x10a   : > { %v1253_v48 = vadd.f32 %v1252_v45, %v1251_v43  ;;  %1379 = vst.msk [vmem:[%s2146_s14 + $0x88] sm:$0xff] %vm1027_vm1, %v1693_v46  ;;  %v788_v49 = vpop.f32.mrb[17].mxu0  ;;  %v1058_v50 = vadd.f32 %v1057_v44, %v1056_v42  ;;  %v1178_v55 = vmul.f32 %v1693_v46, %v1693_v46  ;;  %v1061_v0 = vsel %vm1027_vm1, %v1693_v46, 0.0 }
 0x10b   : > { %v1059_v56 = vsel %vm1027_vm1, %v788_v49, 0.0  ;;  %v1177_v58 = vmul.f32 %v788_v49, %v788_v49  ;;  %1378 = vst.msk [vmem:[%s2146_s14 + $0x80] sm:$0xff] %vm1027_vm1, %v788_v49  ;;  %v2305_v31 = vpop.f32.mrb[14].mxu1 }
 0x10c   : > { %v1060_v59 = vadd.f32 %v1059_v56, %v1058_v50  ;;  %v1255_v60 = vadd.f32 %v1254_v54, %v1253_v48  ;;  %v1258_v13 = vsel %vm1027_vm1, %v1178_v55, 0.0  ;;  %1409 = vst.msk [vmem:[%s2146_s14 + $0x178] sm:$0xff] %vm1027_vm1, %v2305_v31  ;;  %v2312_v36 = vpop.f32.mrb[15].mxu1 }
 0x10d   : > { %v1256_v4 = vsel %vm1027_vm1, %v1177_v58, 0.0  ;;  %v1696_v5 = vpop.f32.mrb[18].mxu0  ;;  %1408 = vst.msk [vmem:[%s2146_s14 + $0x170] sm:$0xff] %vm1027_vm1, %v2312_v36 }
 0x10e   : > { %v1257_v9 = vadd.f32 %v1256_v4, %v1255_v60  ;;  %1381 = vst.msk [vmem:[%s2146_s14 + $0x98] sm:$0xff] %vm1027_vm1, %v1696_v5  ;;  %v798_v10 = vpop.f32.mrb[19].mxu0  ;;  %v1062_v11 = vadd.f32 %v1061_v0, %v1060_v59  ;;  %v1180_v15 = vmul.f32 %v1696_v5, %v1696_v5  ;;  %v1065_v6 = vsel %vm1027_vm1, %v1696_v5, 0.0 }
 0x10f   : > { %v1063_v16 = vsel %vm1027_vm1, %v798_v10, 0.0  ;;  %v1179_v17 = vmul.f32 %v798_v10, %v798_v10  ;;  %1380 = vst.msk [vmem:[%s2146_s14 + $0x90] sm:$0xff] %vm1027_vm1, %v798_v10  ;;  %v2323_v48 = vpop.f32.mrb[16].mxu1 }
 0x110   : > { %v1064_v19 = vadd.f32 %v1063_v16, %v1062_v11  ;;  %v1259_v20 = vadd.f32 %v1258_v13, %v1257_v9  ;;  %v1262_v21 = vsel %vm1027_vm1, %v1180_v15, 0.0  ;;  %1411 = vst.msk [vmem:[%s2146_s14 + $0x188] sm:$0xff] %vm1027_vm1, %v2323_v48  ;;  %v2330_v55 = vpop.f32.mrb[17].mxu1 }
 0x111   : > { %v1260_v7 = vsel %vm1027_vm1, %v1179_v17, 0.0  ;;  %v1699_v51 = vpop.f32.mrb[20].mxu0  ;;  %1410 = vst.msk [vmem:[%s2146_s14 + $0x180] sm:$0xff] %vm1027_vm1, %v2330_v55 }
 0x112   : > { %v1261_v62 = vadd.f32 %v1260_v7, %v1259_v20  ;;  %1383 = vst.msk [vmem:[%s2146_s14 + $0xa8] sm:$0xff] %vm1027_vm1, %v1699_v51  ;;  %v808_v63 = vpop.f32.mrb[21].mxu0  ;;  %v1066_v1 = vadd.f32 %v1065_v6, %v1064_v19  ;;  %v1182_v22 = vmul.f32 %v1699_v51, %v1699_v51  ;;  %v1069_v28 = vsel %vm1027_vm1, %v1699_v51, 0.0 }
 0x113   : > { %v1067_v24 = vsel %vm1027_vm1, %v808_v63, 0.0  ;;  %v1181_v25 = vmul.f32 %v808_v63, %v808_v63  ;;  %1382 = vst.msk [vmem:[%s2146_s14 + $0xa0] sm:$0xff] %vm1027_vm1, %v808_v63  ;;  %v2341_v11 = vpop.f32.mrb[18].mxu1 }
 0x114   : > { %v1068_v26 = vadd.f32 %v1067_v24, %v1066_v1  ;;  %v1263_v27 = vadd.f32 %v1262_v21, %v1261_v62  ;;  %v1266_v38 = vsel %vm1027_vm1, %v1182_v22, 0.0  ;;  %1413 = vst.msk [vmem:[%s2146_s14 + $0x198] sm:$0xff] %vm1027_vm1, %v2341_v11  ;;  %v2348_v17 = vpop.f32.mrb[19].mxu1 }
 0x115   : > { %v1264_v29 = vsel %vm1027_vm1, %v1181_v25, 0.0  ;;  %v1702_v30 = vpop.f32.mrb[22].mxu0  ;;  %1412 = vst.msk [vmem:[%s2146_s14 + $0x190] sm:$0xff] %vm1027_vm1, %v2348_v17 }
 0x116   : > { %v1265_v32 = vadd.f32 %v1264_v29, %v1263_v27  ;;  %1385 = vst.msk [vmem:[%s2146_s14 + $0xb8] sm:$0xff] %vm1027_vm1, %v1702_v30  ;;  %v818_v34 = vpop.f32.mrb[23].mxu0  ;;  %v1070_v35 = vadd.f32 %v1069_v28, %v1068_v26  ;;  %v1184_v39 = vmul.f32 %v1702_v30, %v1702_v30  ;;  %v1073_v44 = vsel %vm1027_vm1, %v1702_v30, 0.0 }
 0x117   : > { %v1071_v40 = vsel %vm1027_vm1, %v818_v34, 0.0  ;;  %v1183_v41 = vmul.f32 %v818_v34, %v818_v34  ;;  %1384 = vst.msk [vmem:[%s2146_s14 + $0xb0] sm:$0xff] %vm1027_vm1, %v818_v34  ;;  %v2359_v22 = vpop.f32.mrb[20].mxu1 }
 0x118   : > { %v1072_v42 = vadd.f32 %v1071_v40, %v1070_v35  ;;  %v1267_v43 = vadd.f32 %v1266_v38, %v1265_v32  ;;  %v1270_v56 = vsel %vm1027_vm1, %v1184_v39, 0.0  ;;  %1415 = vst.msk [vmem:[%s2146_s14 + $0x1a8] sm:$0xff] %vm1027_vm1, %v2359_v22  ;;  %v2366_v27 = vpop.f32.mrb[21].mxu1 }
 0x119   : > { %v1268_v45 = vsel %vm1027_vm1, %v1183_v41, 0.0  ;;  %v1705_v46 = vpop.f32.mrb[24].mxu0  ;;  %1414 = vst.msk [vmem:[%s2146_s14 + $0x1a0] sm:$0xff] %vm1027_vm1, %v2366_v27 }
 0x11a   : > { %v1269_v49 = vadd.f32 %v1268_v45, %v1267_v43  ;;  %1387 = vst.msk [vmem:[%s2146_s14 + $0xc8] sm:$0xff] %vm1027_vm1, %v1705_v46  ;;  %v828_v50 = vpop.f32.mrb[25].mxu0  ;;  %v1074_v54 = vadd.f32 %v1073_v44, %v1072_v42  ;;  %v1186_v58 = vmul.f32 %v1705_v46, %v1705_v46  ;;  %v1077_v5 = vsel %vm1027_vm1, %v1705_v46, 0.0 }
 0x11b   : > { %v1075_v59 = vsel %vm1027_vm1, %v828_v50, 0.0  ;;  %v1185_v60 = vmul.f32 %v828_v50, %v828_v50  ;;  %1386 = vst.msk [vmem:[%s2146_s14 + $0xc0] sm:$0xff] %vm1027_vm1, %v828_v50  ;;  %v2377_v41 = vpop.f32.mrb[22].mxu1  ;;  %v1193_v45 = vmul.f32 %v2186_v61, %v2186_v61 }
 0x11c   : > { %v1076_v0 = vadd.f32 %v1075_v59, %v1074_v54  ;;  %v1271_v4 = vadd.f32 %v1270_v56, %v1269_v49  ;;  %v1274_v19 = vsel %vm1027_vm1, %v1186_v58, 0.0  ;;  %1417 = vst.msk [vmem:[%s2146_s14 + $0x1b8] sm:$0xff] %vm1027_vm1, %v2377_v41  ;;  %v2386_v46 = vpop.f32.mrb[23].mxu1 }
 0x11d   : > { %v1272_v9 = vsel %vm1027_vm1, %v1185_v60, 0.0  ;;  %v1708_v10 = vpop.f32.mrb[26].mxu0  ;;  %1416 = vst.msk [vmem:[%s2146_s14 + $0x1b0] sm:$0xff] %vm1027_vm1, %v2386_v46 }
 0x11e   : > { %v1273_v13 = vadd.f32 %v1272_v9, %v1271_v4  ;;  %1389 = vst.msk [vmem:[%s2146_s14 + $0xd8] sm:$0xff] %vm1027_vm1, %v1708_v10  ;;  %v838_v15 = vpop.f32.mrb[27].mxu0  ;;  %v1078_v16 = vadd.f32 %v1077_v5, %v1076_v0  ;;  %v1188_v20 = vmul.f32 %v1708_v10, %v1708_v10  ;;  %v1081_v63 = vsel %vm1027_vm1, %v1708_v10, 0.0 }
 0x11f   : > { %v1079_v6 = vsel %vm1027_vm1, %v838_v15, 0.0  ;;  %v1187_v7 = vmul.f32 %v838_v15, %v838_v15  ;;  %1388 = vst.msk [vmem:[%s2146_s14 + $0xd0] sm:$0xff] %vm1027_vm1, %v838_v15  ;;  %v1091_v4 = vsel %vm1027_vm1, %v2186_v61, 0.0  ;;  %v2399_v5 = vpop.f32.mrb[24].mxu1  ;;  %v1195_v61 = vmul.f32 %v2204_v18, %v2204_v18 }
 0x120   : > { %v1080_v51 = vadd.f32 %v1079_v6, %v1078_v16  ;;  %v1275_v62 = vadd.f32 %v1274_v19, %v1273_v13  ;;  %v1278_v28 = vsel %vm1027_vm1, %v1188_v20, 0.0  ;;  %1419 = vst.msk [vmem:[%s2146_s14 + $0x1c8] sm:$0xff] %vm1027_vm1, %v2399_v5  ;;  %v2404_v13 = vpop.f32.mrb[25].mxu1  ;;  %v1194_v16 = vmul.f32 %v2179_v57, %v2179_v57 }
 0x121   : > { %v1276_v1 = vsel %vm1027_vm1, %v1187_v7, 0.0  ;;  %v1711_v21 = vpop.f32.mrb[28].mxu0  ;;  %v1288_v19 = vsel %vm1027_vm1, %v1193_v45, 0.0  ;;  %1418 = vst.msk [vmem:[%s2146_s14 + $0x1c0] sm:$0xff] %vm1027_vm1, %v2404_v13  ;;  %v1093_v7 = vsel %vm1027_vm1, %v2179_v57, 0.0  ;;  %v1292_v57 = vsel %vm1027_vm1, %v1195_v61, 0.0 }
 0x122   : > { %v1277_v24 = vadd.f32 %v1276_v1, %v1275_v62  ;;  %1391 = vst.msk [vmem:[%s2146_s14 + $0xe8] sm:$0xff] %vm1027_vm1, %v1711_v21  ;;  %v848_v25 = vpop.f32.mrb[29].mxu0  ;;  %v1082_v26 = vadd.f32 %v1081_v63, %v1080_v51  ;;  %v1190_v29 = vmul.f32 %v1711_v21, %v1711_v21  ;;  %v1085_v38 = vsel %vm1027_vm1, %v1711_v21, 0.0 }
 0x123   : > { %v1083_v30 = vsel %vm1027_vm1, %v848_v25, 0.0  ;;  %v1189_v32 = vmul.f32 %v848_v25, %v848_v25  ;;  %1390 = vst.msk [vmem:[%s2146_s14 + $0xe0] sm:$0xff] %vm1027_vm1, %v848_v25  ;;  %v1095_v51 = vsel %vm1027_vm1, %v2204_v18, 0.0  ;;  %v2419_v62 = vpop.f32.mrb[26].mxu1  ;;  %v1196_v25 = vmul.f32 %v2197_v14, %v2197_v14 }
 0x124   : > { %v1084_v34 = vadd.f32 %v1083_v30, %v1082_v26  ;;  %v1279_v35 = vadd.f32 %v1278_v28, %v1277_v24  ;;  %v1282_v49 = vsel %vm1027_vm1, %v1190_v29, 0.0  ;;  %1421 = vst.msk [vmem:[%s2146_s14 + $0x1d8] sm:$0xff] %vm1027_vm1, %v2419_v62  ;;  %v2424_v21 = vpop.f32.mrb[27].mxu1  ;;  %v1290_v24 = vsel %vm1027_vm1, %v1194_v16, 0.0 }
 0x125   : > { %v1280_v39 = vsel %vm1027_vm1, %v1189_v32, 0.0  ;;  %v1714_v40 = vpop.f32.mrb[30].mxu0  ;;  %v1197_v18 = vmul.f32 %v2222_v23, %v2222_v23  ;;  %1420 = vst.msk [vmem:[%s2146_s14 + $0x1d0] sm:$0xff] %vm1027_vm1, %v2424_v21  ;;  %v1097_v29 = vsel %vm1027_vm1, %v2197_v14, 0.0  ;;  %v1099_v30 = vsel %vm1027_vm1, %v2222_v23, 0.0 }
 0x126   : > { %v1281_v42 = vadd.f32 %v1280_v39, %v1279_v35  ;;  %1393 = vst.msk [vmem:[%s2146_s14 + $0xf8] sm:$0xff] %vm1027_vm1, %v1714_v40  ;;  %v858_v43 = vpop.f32.mrb[31].mxu0  ;;  %v1086_v44 = vadd.f32 %v1085_v38, %v1084_v34  ;;  %v1192_v50 = vmul.f32 %v1714_v40, %v1714_v40  ;;  %v1089_v60 = vsel %vm1027_vm1, %v1714_v40, 0.0 }
 0x127   : > { %v1087_v54 = vsel %vm1027_vm1, %v858_v43, 0.0  ;;  %v1191_v56 = vmul.f32 %v858_v43, %v858_v43  ;;  %1392 = vst.msk [vmem:[%s2146_s14 + $0xf0] sm:$0xff] %vm1027_vm1, %v858_v43  ;;  %v2439_v32 = vpop.f32.mrb[28].mxu1  ;;  %v1294_v39 = vsel %vm1027_vm1, %v1196_v25, 0.0  ;;  %v1198_v40 = vmul.f32 %v2215_v2, %v2215_v2 }
 0x128   : > { %v1088_v58 = vadd.f32 %v1087_v54, %v1086_v44  ;;  %v1283_v59 = vadd.f32 %v1282_v49, %v1281_v42  ;;  %v1286_v15 = vsel %vm1027_vm1, %v1192_v50, 0.0  ;;  %1423 = vst.msk [vmem:[%s2146_s14 + $0x1e8] sm:$0xff] %vm1027_vm1, %v2439_v32  ;;  %v2444_v38 = vpop.f32.mrb[29].mxu1  ;;  %v1296_v14 = vsel %vm1027_vm1, %v1197_v18, 0.0 }
 0x129   : > { %v1284_v0 = vsel %vm1027_vm1, %v1191_v56, 0.0  ;;  %v1199_v23 = vmul.f32 %v2240_v37, %v2240_v37  ;;  %1422 = vst.msk [vmem:[%s2146_s14 + $0x1e0] sm:$0xff] %vm1027_vm1, %v2444_v38  ;;  %v1101_v44 = vsel %vm1027_vm1, %v2215_v2, 0.0  ;;  %v1103_v45 = vsel %vm1027_vm1, %v2240_v37, 0.0 }
 0x12a   : > { %v1090_v9 = vadd.f32 %v1089_v60, %v1088_v58  ;;  %v1285_v10 = vadd.f32 %v1284_v0, %v1283_v59  ;;  %v1298_v58 = vsel %vm1027_vm1, %v1198_v40, 0.0  ;;  %v1200_v59 = vmul.f32 %v2233_v33, %v2233_v33 }
 0x12b   : > { %v2459_v49 = vpop.f32.mrb[30].mxu1  ;;  %v1300_v60 = vsel %vm1027_vm1, %v1199_v23, 0.0  ;;  %v1201_v2 = vmul.f32 %v2258_v53, %v2258_v53 }
 0x12c   : > { %v1287_v20 = vadd.f32 %v1286_v15, %v1285_v10  ;;  %v1092_v6 = vadd.f32 %v1091_v4, %v1090_v9  ;;  %1425 = vst.msk [vmem:[%s2146_s14 + $0x1f8] sm:$0xff] %vm1027_vm1, %v2459_v49  ;;  %v2464_v56 = vpop.f32.mrb[31].mxu1  ;;  %v1105_v4 = vsel %vm1027_vm1, %v2233_v33, 0.0  ;;  %v1107_v9 = vsel %vm1027_vm1, %v2258_v53, 0.0 }
 0x12d   : > { %1424 = vst.msk [vmem:[%s2146_s14 + $0x1f0] sm:$0xff] %vm1027_vm1, %v2464_v56  ;;  %v1302_v16 = vsel %vm1027_vm1, %v1200_v59, 0.0  ;;  %v1304_v61 = vsel %vm1027_vm1, %v1201_v2, 0.0  ;;  %v1109_v33 = vsel %vm1027_vm1, %v2251_v47, 0.0  ;;  %v1111_v53 = vsel %vm1027_vm1, %v2276_v12, 0.0 }
 0x12e   : > { %v1289_v63 = vadd.f32 %v1288_v19, %v1287_v20  ;;  %v1094_v1 = vadd.f32 %v1093_v7, %v1092_v6  ;;  %v1202_v19 = vmul.f32 %v2251_v47, %v2251_v47  ;;  %v1203_v20 = vmul.f32 %v2276_v12, %v2276_v12 }
 0x12f   : > { %v1113_v47 = vsel %vm1027_vm1, %v2269_v8, 0.0  ;;  %v1115_v12 = vsel %vm1027_vm1, %v2294_v3, 0.0 }
 0x130   : > { %v1096_v26 = vadd.f32 %v1095_v51, %v1094_v1  ;;  %v1291_v28 = vadd.f32 %v1290_v24, %v1289_v63  ;;  %v1306_v1 = vsel %vm1027_vm1, %v1202_v19, 0.0  ;;  %v1204_v24 = vmul.f32 %v2269_v8, %v2269_v8 }
 0x131   : > { %v1308_v25 = vsel %vm1027_vm1, %v1203_v20, 0.0  ;;  %v1117_v8 = vsel %vm1027_vm1, %v2287_v52, 0.0 }
 0x132   : > { %v1293_v34 = vadd.f32 %v1292_v57, %v1291_v28  ;;  %v1098_v35 = vadd.f32 %v1097_v29, %v1096_v26  ;;  %v1205_v57 = vmul.f32 %v2294_v3, %v2294_v3  ;;  %v1119_v3 = vsel %vm1027_vm1, %v2312_v36, 0.0 }
 0x134   : > { %v1100_v42 = vadd.f32 %v1099_v30, %v1098_v35  ;;  %v1295_v43 = vadd.f32 %v1294_v39, %v1293_v34  ;;  %v1310_v30 = vsel %vm1027_vm1, %v1204_v24, 0.0  ;;  %v1206_v34 = vmul.f32 %v2287_v52, %v2287_v52 }
 0x135   : > { %v1312_v35 = vsel %vm1027_vm1, %v1205_v57, 0.0  ;;  %v1207_v39 = vmul.f32 %v2312_v36, %v2312_v36  ;;  %v1121_v52 = vsel %vm1027_vm1, %v2305_v31, 0.0  ;;  %v1123_v36 = vsel %vm1027_vm1, %v2330_v55, 0.0 }
 0x136   : > { %v1297_v50 = vadd.f32 %v1296_v14, %v1295_v43  ;;  %v1102_v54 = vadd.f32 %v1101_v44, %v1100_v42  ;;  %v1314_v43 = vsel %vm1027_vm1, %v1206_v34, 0.0  ;;  %v1208_v44 = vmul.f32 %v2305_v31, %v2305_v31 }
 0x137   : > { %v1125_v31 = vsel %vm1027_vm1, %v2323_v48, 0.0 }
 0x138   : > { %v1104_v37 = vadd.f32 %v1103_v45, %v1102_v54  ;;  %v1299_v0 = vadd.f32 %v1298_v58, %v1297_v50  ;;  %v1316_v45 = vsel %vm1027_vm1, %v1207_v39, 0.0  ;;  %v1209_v50 = vmul.f32 %v2330_v55, %v2330_v55 }
 0x139   : > { %v1318_v2 = vsel %vm1027_vm1, %v1208_v44, 0.0  ;;  %v1127_v55 = vsel %vm1027_vm1, %v2348_v17, 0.0 }
 0x13a   : > { %v1301_v10 = vadd.f32 %v1300_v60, %v1299_v0  ;;  %v1106_v15 = vadd.f32 %v1105_v4, %v1104_v37  ;;  %v1210_v37 = vmul.f32 %v2323_v48, %v2323_v48  ;;  %v1320_v0 = vsel %vm1027_vm1, %v1209_v50, 0.0 }
 0x13b   : > { %v1211_v4 = vmul.f32 %v2348_v17, %v2348_v17  ;;  %v1129_v48 = vsel %vm1027_vm1, %v2341_v11, 0.0  ;;  %v1131_v17 = vsel %vm1027_vm1, %v2366_v27, 0.0 }
 0x13c   : > { %v1108_v6 = vadd.f32 %v1107_v9, %v1106_v15  ;;  %v1303_v7 = vadd.f32 %v1302_v16, %v1301_v10  ;;  %v1322_v19 = vsel %vm1027_vm1, %v1210_v37, 0.0 }
 0x13d   : > { %v1324_v20 = vsel %vm1027_vm1, %v1211_v4, 0.0 }
 0x13e   : > { %v1305_v51 = vadd.f32 %v1304_v61, %v1303_v7  ;;  %v1110_v63 = vadd.f32 %v1109_v33, %v1108_v6  ;;  %v1212_v61 = vmul.f32 %v2341_v11, %v2341_v11  ;;  %v1213_v6 = vmul.f32 %v2366_v27, %v2366_v27 }
 0x13f   : > { %v1133_v11 = vsel %vm1027_vm1, %v2359_v22, 0.0  ;;  %v1135_v27 = vsel %vm1027_vm1, %v2386_v46, 0.0 }
 0x140   : > { %v1112_v18 = vadd.f32 %v1111_v53, %v1110_v63  ;;  %v1307_v26 = vadd.f32 %v1306_v1, %v1305_v51  ;;  %v1326_v63 = vsel %vm1027_vm1, %v1212_v61, 0.0  ;;  %v1214_v1 = vmul.f32 %v2359_v22, %v2359_v22 }
 0x141   : > { %v1328_v24 = vsel %vm1027_vm1, %v1213_v6, 0.0  ;;  %v1137_v22 = vsel %vm1027_vm1, %v2377_v41, 0.0 }
 0x142   : > { %v1309_v28 = vadd.f32 %v1308_v25, %v1307_v26  ;;  %v1114_v29 = vadd.f32 %v1113_v47, %v1112_v18  ;;  %v1215_v25 = vmul.f32 %v2386_v46, %v2386_v46  ;;  %v1139_v46 = vsel %vm1027_vm1, %v2404_v13, 0.0 }
 0x144   : > { %v1116_v40 = vadd.f32 %v1115_v12, %v1114_v29  ;;  %v1311_v14 = vadd.f32 %v1310_v30, %v1309_v28  ;;  %v1330_v12 = vsel %vm1027_vm1, %v1214_v1, 0.0  ;;  %v1216_v28 = vmul.f32 %v2377_v41, %v2377_v41 }
 0x145   : > { %v1332_v29 = vsel %vm1027_vm1, %v1215_v25, 0.0  ;;  %v1217_v30 = vmul.f32 %v2404_v13, %v2404_v13  ;;  %v1141_v41 = vsel %vm1027_vm1, %v2399_v5, 0.0  ;;  %v1143_v13 = vsel %vm1027_vm1, %v2424_v21, 0.0 }
 0x146   : > { %v1313_v23 = vadd.f32 %v1312_v35, %v1311_v14  ;;  %v1118_v42 = vadd.f32 %v1117_v8, %v1116_v40  ;;  %v1334_v14 = vsel %vm1027_vm1, %v1216_v28, 0.0  ;;  %v1218_v8 = vmul.f32 %v2399_v5, %v2399_v5 }
 0x147   : > { %v1145_v5 = vsel %vm1027_vm1, %v2419_v62, 0.0 }
 0x148   : > { %v1120_v54 = vadd.f32 %v1119_v3, %v1118_v42  ;;  %v1315_v58 = vadd.f32 %v1314_v43, %v1313_v23  ;;  %v1336_v3 = vsel %vm1027_vm1, %v1217_v30, 0.0  ;;  %v1219_v23 = vmul.f32 %v2424_v21, %v2424_v21 }
 0x149   : > { %v1338_v50 = vsel %vm1027_vm1, %v1218_v8, 0.0  ;;  %v1147_v21 = vsel %vm1027_vm1, %v2444_v38, 0.0 }
 0x14a   : > { %v1317_v59 = vadd.f32 %v1316_v45, %v1315_v58  ;;  %v1122_v60 = vadd.f32 %v1121_v52, %v1120_v54  ;;  %v1220_v54 = vmul.f32 %v2419_v62, %v2419_v62  ;;  %v1340_v58 = vsel %vm1027_vm1, %v1219_v23, 0.0 }
 0x14b   : > { %v1221_v52 = vmul.f32 %v2444_v38, %v2444_v38  ;;  %v1149_v62 = vsel %vm1027_vm1, %v2439_v32, 0.0  ;;  %v1151_v38 = vsel %vm1027_vm1, %v2464_v56, 0.0 }
 0x14c   : > { %v1124_v9 = vadd.f32 %v1123_v36, %v1122_v60  ;;  %v1319_v10 = vadd.f32 %v1318_v2, %v1317_v59  ;;  %v1342_v37 = vsel %vm1027_vm1, %v1220_v54, 0.0 }
 0x14d   : > { %v1344_v4 = vsel %vm1027_vm1, %v1221_v52, 0.0 }
 0x14e   : > { %v1321_v15 = vadd.f32 %v1320_v0, %v1319_v10  ;;  %v1126_v16 = vadd.f32 %v1125_v31, %v1124_v9  ;;  %v1222_v0 = vmul.f32 %v2439_v32, %v2439_v32  ;;  %v1223_v9 = vmul.f32 %v2464_v56, %v2464_v56 }
 0x150   : > { %v1128_v7 = vadd.f32 %v1127_v55, %v1126_v16  ;;  %v1323_v33 = vadd.f32 %v1322_v19, %v1321_v15  ;;  %v1346_v16 = vsel %vm1027_vm1, %v1222_v0, 0.0  ;;  %v1224_v19 = vmul.f32 %v2459_v49, %v2459_v49 }
 0x151   : > { %v1348_v61 = vsel %vm1027_vm1, %v1223_v9, 0.0 }
 0x152   : > { %v1325_v53 = vadd.f32 %v1324_v20, %v1323_v33  ;;  %v1130_v51 = vadd.f32 %v1129_v48, %v1128_v7  ;;  %v1153_v7 = vsel %vm1027_vm1, %v2459_v49, 0.0  ;;  %v1350_v48 = vsel %vm1027_vm1, %v1224_v19, 0.0 }
 0x154   : > { %v1132_v57 = vadd.f32 %v1131_v17, %v1130_v51  ;;  %v1327_v18 = vadd.f32 %v1326_v63, %v1325_v53 }
 0x156   : > { %v1329_v26 = vadd.f32 %v1328_v24, %v1327_v18  ;;  %v1134_v47 = vadd.f32 %v1133_v11, %v1132_v57 }
 0x158   : > { %v1136_v34 = vadd.f32 %v1135_v27, %v1134_v47  ;;  %v1331_v35 = vadd.f32 %v1330_v12, %v1329_v26 }
 0x15a   : > { %v1333_v39 = vadd.f32 %v1332_v29, %v1331_v35  ;;  %v1138_v40 = vadd.f32 %v1137_v22, %v1136_v34 }
 0x15c   : > { %v1140_v42 = vadd.f32 %v1139_v46, %v1138_v40  ;;  %v1335_v43 = vadd.f32 %v1334_v14, %v1333_v39 }
 0x15e   : > { %v1337_v44 = vadd.f32 %v1336_v3, %v1335_v43  ;;  %v1142_v45 = vadd.f32 %v1141_v41, %v1140_v42 }
 0x160   : > { %v1144_v36 = vadd.f32 %v1143_v13, %v1142_v45  ;;  %v1339_v59 = vadd.f32 %v1338_v50, %v1337_v44 }
 0x162   : > { %v1341_v60 = vadd.f32 %v1340_v58, %v1339_v59  ;;  %v1146_v2 = vadd.f32 %v1145_v5, %v1144_v36 }
 0x164   : > { %v1148_v10 = vadd.f32 %v1147_v21, %v1146_v2  ;;  %v1343_v31 = vadd.f32 %v1342_v37, %v1341_v60 }
 0x166   : > { %v1345_v55 = vadd.f32 %v1344_v4, %v1343_v31  ;;  %v1150_v15 = vadd.f32 %v1149_v62, %v1148_v10 }
 0x168   : > { %v1152_v20 = vadd.f32 %v1151_v38, %v1150_v15  ;;  %v1347_v6 = vadd.f32 %v1346_v16, %v1345_v55 }
 0x16a   : > { %v1154_v33 = vadd.f32 %v1153_v7, %v1152_v20  ;;  %v1349_v32 = vadd.f32 %v1348_v61, %v1347_v6 }
 0x16c   : > { %v1155_v56 = vrot.slane %v1154_v33, 4  ;;  %v1351_v17 = vadd.f32 %v1350_v48, %v1349_v32 }
 0x16e   : > { %v1156_v53 = vadd.f32 %v1155_v56, %v1154_v33  ;;  %v1352_v51 = vrot.slane %v1351_v17, 4 }
 0x170   : > { %v1157_v63 = vrot.slane %v1156_v53, 2  ;;  %v1353_v1 = vadd.f32 %v1352_v51, %v1351_v17 }
 0x172   : > { %v1158_v24 = vadd.f32 %v1157_v63, %v1156_v53  ;;  %v1354_v25 = vrot.slane %v1353_v1, 2 }
 0x174   : > { %v1159_v57 = vrot.slane %v1158_v24, 1  ;;  %v1355_v18 = vadd.f32 %v1354_v25, %v1353_v1 }
 0x176   : > { %v1356_v11 = vrot.slane %v1355_v18, 1  ;;  %v1160_v49 = vadd.f32 %v1159_v57, %v1158_v24 }
 0x178   : > { %v1357_v27 = vadd.f32 %v1356_v11, %v1355_v18 }
 0x17a   : > { %v1359_v26 = vsel %vm1358_vm2, %v1160_v49, %v1357_v27 }
 0x17b   : > { %1361 = vst.msk [vmem:[%s238_s20] sm:$0x3] %vm1360_vm3, %v1359_v26 }
 0x17c PF: > { %s16_s18 = sadd.s32 1, %s1789_s18  }
 0x17d   : > { %p13_p5 = scmp.ge.s32.totalorder %s16_s18, 4  }
 0x17f   :  { %15 = sbr.rel (!%p13_p5) target bundleno = 1 (0x1), region = 78 }

// kernel: bottleneck_pallas_nhwc.8
= control target key start
LH: loop header
LB: loop body
LE: loop exit
PB: predicated region body
PF: predicated region fallthrough
CT: control target
= control target key end

     0   :  { %s1799_s18 = smov 0   ;;  %s2573_s0 = inlined_call_operand.vmem [shape: f32[1024,8], index: 0, kind: input, shape index: {}]   ;;  %s2574_s1 = inlined_call_operand.vmem [shape: f32[1,8], index: 1, kind: input, shape index: {}]   ;;  %s2575_s2 = inlined_call_operand.vmem [shape: f32[1,8], index: 2, kind: input, shape index: {}]   ;;  %s2576_s3 = inlined_call_operand.vmem [shape: f32[8,32], index: 3, kind: input, shape index: {}]   ;;  %s2577_s4 = inlined_call_operand.vmem [shape: f32[1024,32], index: 4, kind: output, shape index: {0}]   ;;  %s2578_s5 = inlined_call_operand.vmem [shape: f32[2,2,32], index: 5, kind: output, shape index: {1}]  }
   0x1 LB: > { %s1805_s19 = sadd.s32 4294967295, %s1767_s18   ;;  %p1514_p0 = scmp.ge.s32.totalorder %s1767_s18, 1  ;;  %s1767_s18 = sphi %s1799_s18, %s16_s18  }
   0x2   : > { %p191_p1 = scmp.lt.s32.totalorder %s1767_s18, 3 }
   0x4   : > { %p192_p2 = pnand %p1514_p0, %p191_p1 }
   0x5   : > { %v445_v0 = vld [vmem:[%s2576_s3] sm:$0xff] (!%p192_p2)  ;;  %s1515_s22 = sshll.u32 (!%p192_p2), %s1805_s19, 6  ;;  %vm446_vm0 = vcmask (!%p192_p2), 64512   ;;  %vm1024_vm1 = vcmask (!%p192_p2), 261120   ;;  %p235_p4 = scmp.lt.s32.totalorder (!%p192_p2), %s1805_s19, 1  ;;  %vm1355_vm2 = vcmask (!%p192_p2), 1040384  }
   0x6   : > { %195 = sbr.rel (%p192_p2) target bundleno = 380 (0x17c), region = 36  ;;  %1653 = vmatprep.subr.mxu0 (!%p192_p2), %v445_v0  ;;  %p224_p3 = scmp.lt.s32.totalorder (!%p192_p2), %s1515_s22, 127  ;;  %1751 = vmatprep.subr.mxu1 (!%p192_p2), %v445_v0  ;;  %v1819_v1 = vld [vmem:[%s2574_s1] ss:$0 sm:$0xff] (!%p192_p2)  ;;  %vm1357_vm3 = vcmask (!%p192_p2), 254976  }
   0x7   : > { %1654 = vmatpush3.msra.mxu0 (!%p192_p2), %v445_v0  ;;  %1752 = vmatpush3.msra.mxu1 (!%p192_p2), %v445_v0  ;;  %v1831_v2 = vld [vmem:[%s2575_s2] ss:$0 sm:$0xff] (!%p192_p2) }
   0xd   : > { %s2580_s22 = smov (!%p224_p3, %s1515_s22), 127  ;;  %s2582_s19 = smov (!%p235_p4, %s1805_s19), 1 }
   0xe   : > { %s1516_s23 = sshll.u32 %s2580_s22, 3  ;;  %s1519_s9 = sshll.u32 %s2582_s19, 1 }
   0xf   : > { %s1826_s28 = scalar_lea.vmem %s2573_s0, %s1516_s23  ;;  %s2115_s8 = scalar_lea.vmem %s2577_s4, %s1516_s23 }
  0x10   : > { %v239_v3 = vld [vmem:[%s1826_s28] sm:$0xff]  ;;  %v240_v4 = vld [vmem:[%s1826_s28 + $0x8] sm:$0xff]  ;;  %v241_v5 = vld [vmem:[%s1826_s28 + $0x10] sm:$0xff]  ;;  %s238_s12 = scalar_lea.vmem %s2578_s5, %s1519_s9 }
  0x11   : > { %v310_v6 = vmul.f32 %v1819_v1, %v239_v3  ;;  %v311_v7 = vmul.f32 %v1819_v1, %v240_v4  ;;  %v312_v8 = vmul.f32 %v1819_v1, %v241_v5  ;;  %v242_v9 = vld [vmem:[%s1826_s28 + $0x18] sm:$0xff]  ;;  %v243_v10 = vld [vmem:[%s1826_s28 + $0x20] sm:$0xff]  ;;  %v244_v16 = vld [vmem:[%s1826_s28 + $0x28] sm:$0xff] }
  0x12   : > { %v313_v11 = vmul.f32 %v1819_v1, %v242_v9  ;;  %v314_v15 = vmul.f32 %v1819_v1, %v243_v10  ;;  %v245_v17 = vld [vmem:[%s1826_s28 + $0x30] sm:$0xff]  ;;  %v315_v19 = vmul.f32 %v1819_v1, %v244_v16  ;;  %v246_v22 = vld [vmem:[%s1826_s28 + $0x38] sm:$0xff]  ;;  %v247_v23 = vld [vmem:[%s1826_s28 + $0x40] sm:$0xff] }
  0x13   : > { %v381_v12 = vadd.f32 %v1831_v2, %v310_v6  ;;  %v382_v13 = vadd.f32 %v1831_v2, %v311_v7  ;;  %v383_v14 = vadd.f32 %v1831_v2, %v312_v8  ;;  %v316_v21 = vmul.f32 %v1819_v1, %v245_v17  ;;  %v248_v28 = vld [vmem:[%s1826_s28 + $0x48] sm:$0xff]  ;;  %v249_v29 = vld [vmem:[%s1826_s28 + $0x50] sm:$0xff]  ;;  %v250_v30 = vld [vmem:[%s1826_s28 + $0x58] sm:$0xff] }
  0x14   : > { %v384_v18 = vadd.f32 %v1831_v2, %v313_v11  ;;  %v385_v20 = vadd.f32 %v1831_v2, %v314_v15  ;;  %v386_v24 = vadd.f32 %v1831_v2, %v315_v19  ;;  %v317_v25 = vmul.f32 %v1819_v1, %v246_v22  ;;  %v271_v34 = vld [vmem:[%s1826_s28 + $0x100] sm:$0xff]  ;;  %v272_v35 = vld [vmem:[%s1826_s28 + $0x108] sm:$0xff]  ;;  %v273_v36 = vld [vmem:[%s1826_s28 + $0x110] sm:$0xff] }
  0x15   : > { %1655 = vmatprep.mubr.msk.f32.mxu0 %vm446_vm0, %v381_v12  ;;  %v387_v26 = vadd.f32 %v1831_v2, %v316_v21  ;;  %v318_v27 = vmul.f32 %v1819_v1, %v247_v23  ;;  %v319_v32 = vmul.f32 %v1819_v1, %v248_v28  ;;  %v320_v33 = vmul.f32 %v1819_v1, %v249_v29  ;;  %v251_v38 = vld [vmem:[%s1826_s28 + $0x60] sm:$0xff]  ;;  %v274_v39 = vld [vmem:[%s1826_s28 + $0x118] sm:$0xff]  ;;  %v252_v48 = vld [vmem:[%s1826_s28 + $0x68] sm:$0xff] }
  0x16   : > { %1656 = vmatmul.mubr.msk.f32.vlgmr.msra.gmra.mrb[0].mxu0 %vm446_vm0, %v382_v13  ;;  %v388_v31 = vadd.f32 %v1831_v2, %v317_v25  ;;  %v275_v40 = vld [vmem:[%s1826_s28 + $0x120] sm:$0xff]  ;;  %v321_v41 = vmul.f32 %v1819_v1, %v250_v30  ;;  %v342_v42 = vmul.f32 %v1819_v1, %v271_v34  ;;  %v343_v43 = vmul.f32 %v1819_v1, %v272_v35  ;;  %v253_v49 = vld [vmem:[%s1826_s28 + $0x70] sm:$0xff]  ;;  %v276_v55 = vld [vmem:[%s1826_s28 + $0x128] sm:$0xff] }
  0x17   : > { %1658 = vmatprep.mubr.msk.f32.mxu0 %vm446_vm0, %v383_v14  ;;  %v389_v37 = vadd.f32 %v1831_v2, %v318_v27  ;;  %v344_v44 = vmul.f32 %v1819_v1, %v273_v36  ;;  %v390_v45 = vadd.f32 %v1831_v2, %v319_v32  ;;  %v391_v46 = vadd.f32 %v1831_v2, %v320_v33  ;;  %v277_v56 = vld [vmem:[%s1826_s28 + $0x130] sm:$0xff]  ;;  %v254_v59 = vld [vmem:[%s1826_s28 + $0x78] sm:$0xff]  ;;  %v255_v60 = vld [vmem:[%s1826_s28 + $0x80] sm:$0xff] }
  0x18   : > { %v322_v47 = vmul.f32 %v1819_v1, %v251_v38  ;;  %v345_v50 = vmul.f32 %v1819_v1, %v274_v39  ;;  %v413_v51 = vadd.f32 %v1831_v2, %v342_v42  ;;  %v414_v52 = vadd.f32 %v1831_v2, %v343_v43  ;;  %v256_v62 = vld [vmem:[%s1826_s28 + $0x88] sm:$0xff]  ;;  %v257_v63 = vld [vmem:[%s1826_s28 + $0x90] sm:$0xff]  ;;  %v278_v7 = vld [vmem:[%s1826_s28 + $0x138] sm:$0xff] }
  0x19   : > { %v415_v53 = vadd.f32 %v1831_v2, %v344_v44  ;;  %v346_v54 = vmul.f32 %v1819_v1, %v275_v40  ;;  %v323_v57 = vmul.f32 %v1819_v1, %v252_v48  ;;  %v324_v58 = vmul.f32 %v1819_v1, %v253_v49  ;;  %v279_v10 = vld [vmem:[%s1826_s28 + $0x140] sm:$0xff]  ;;  %v258_v13 = vld [vmem:[%s1826_s28 + $0x98] sm:$0xff]  ;;  %v296_v19 = vld [vmem:[%s1826_s28 + $0x1c8] sm:$0xff] }
  0x1a   : > { %1659 = vmatmul.mubr.msk.f32.gmra.mrb[2].mxu0 %vm446_vm0, %v384_v18  ;;  %1703 = vmatprep.mubr.msk.f32.mxu1 %vm446_vm0, %v413_v51  ;;  %v392_v61 = vadd.f32 %v1831_v2, %v321_v41  ;;  %v416_v0 = vadd.f32 %v1831_v2, %v345_v50  ;;  %v347_v3 = vmul.f32 %v1819_v1, %v276_v55  ;;  %v259_v14 = vld [vmem:[%s1826_s28 + $0xa0] sm:$0xff]  ;;  %v280_v18 = vld [vmem:[%s1826_s28 + $0x148] sm:$0xff]  ;;  %v281_v23 = vld [vmem:[%s1826_s28 + $0x150] sm:$0xff] }
  0x1b   : > { %1661 = vmatprep.mubr.msk.f32.mxu0 %vm446_vm0, %v385_v20  ;;  %1704 = vmatmul.mubr.msk.f32.vlgmr.msra.gmra.mrb[0].mxu1 %vm446_vm0, %v414_v52  ;;  %v393_v4 = vadd.f32 %v1831_v2, %v322_v47  ;;  %v417_v5 = vadd.f32 %v1831_v2, %v346_v54  ;;  %v348_v6 = vmul.f32 %v1819_v1, %v277_v56  ;;  %v282_v29 = vld [vmem:[%s1826_s28 + $0x158] sm:$0xff]  ;;  %v283_v30 = vld [vmem:[%s1826_s28 + $0x160] sm:$0xff]  ;;  %v300_v40 = vld [vmem:[%s1826_s28 + $0x1e8] sm:$0xff] }
  0x1c   : > { %1706 = vmatprep.mubr.msk.f32.mxu1 %vm446_vm0, %v415_v53  ;;  %v325_v8 = vmul.f32 %v1819_v1, %v254_v59  ;;  %v326_v9 = vmul.f32 %v1819_v1, %v255_v60  ;;  %v327_v11 = vmul.f32 %v1819_v1, %v256_v62  ;;  %v328_v12 = vmul.f32 %v1819_v1, %v257_v63  ;;  %v298_v35 = vld [vmem:[%s1826_s28 + $0x1d8] sm:$0xff]  ;;  %v299_v36 = vld [vmem:[%s1826_s28 + $0x1e0] sm:$0xff]  ;;  %v301_v41 = vld [vmem:[%s1826_s28 + $0x1f0] sm:$0xff] }
  0x1d   : > { %v394_v15 = vadd.f32 %v1831_v2, %v323_v57  ;;  %v418_v16 = vadd.f32 %v1831_v2, %v347_v3  ;;  %v349_v17 = vmul.f32 %v1819_v1, %v278_v7  ;;  %v395_v20 = vadd.f32 %v1831_v2, %v324_v58  ;;  %v302_v42 = vld [vmem:[%s1826_s28 + $0x1f8] sm:$0xff]  ;;  %v260_v54 = vld [vmem:[%s1826_s28 + $0xa8] sm:$0xff]  ;;  %v261_v55 = vld [vmem:[%s1826_s28 + $0xb0] sm:$0xff] }
  0x1e   : > { %1662 = vmatmul.mubr.msk.f32.gmra.mrb[4].mxu0 %vm446_vm0, %v386_v24  ;;  %v419_v21 = vadd.f32 %v1831_v2, %v348_v6  ;;  %v350_v22 = vmul.f32 %v1819_v1, %v279_v10  ;;  %v297_v24 = vld [vmem:[%s1826_s28 + $0x1d0] sm:$0xff]  ;;  %v396_v25 = vadd.f32 %v1831_v2, %v325_v8  ;;  %v329_v27 = vmul.f32 %v1819_v1, %v258_v13  ;;  %v284_v59 = vld [vmem:[%s1826_s28 + $0x168] sm:$0xff]  ;;  %v287_v13 = vld [vmem:[%s1826_s28 + $0x180] sm:$0xff] }
  0x1f   : > { %1664 = vmatprep.mubr.msk.f32.mxu0 %vm446_vm0, %v387_v26  ;;  %1707 = vmatmul.mubr.msk.f32.gmra.mrb[2].mxu1 %vm446_vm0, %v416_v0  ;;  %v397_v26 = vadd.f32 %v1831_v2, %v326_v9  ;;  %v330_v28 = vmul.f32 %v1819_v1, %v259_v14  ;;  %v399_v32 = vadd.f32 %v1831_v2, %v328_v12  ;;  %v285_v63 = vld [vmem:[%s1826_s28 + $0x170] sm:$0xff]  ;;  %v263_v12 = vld [vmem:[%s1826_s28 + $0xc0] sm:$0xff] }
  0x20   : > { %1709 = vmatprep.mubr.msk.f32.mxu1 %vm446_vm0, %v417_v5  ;;  %v351_v33 = vmul.f32 %v1819_v1, %v280_v18  ;;  %v367_v34 = vmul.f32 %v1819_v1, %v296_v19  ;;  %v352_v38 = vmul.f32 %v1819_v1, %v281_v23  ;;  %v368_v39 = vmul.f32 %v1819_v1, %v297_v24  ;;  %v262_v5 = vld [vmem:[%s1826_s28 + $0xb8] sm:$0xff]  ;;  %v265_v18 = vld [vmem:[%s1826_s28 + $0xd0] sm:$0xff]  ;;  %v288_v24 = vld [vmem:[%s1826_s28 + $0x188] sm:$0xff] }
  0x21   : > { %v421_v43 = vadd.f32 %v1831_v2, %v350_v22  ;;  %v353_v44 = vmul.f32 %v1819_v1, %v282_v29  ;;  %v369_v48 = vmul.f32 %v1819_v1, %v298_v35  ;;  %v370_v49 = vmul.f32 %v1819_v1, %v299_v36  ;;  %v266_v29 = vld [vmem:[%s1826_s28 + $0xd8] sm:$0xff] }
  0x22   : > { %1665 = vmatmul.mubr.msk.f32.gmra.mrb[6].mxu0 %vm446_vm0, %v388_v31  ;;  %v398_v31 = vadd.f32 %v1831_v2, %v327_v11  ;;  %v1964_v47 = vadd.f32 %v1831_v2, %v368_v39  ;;  %v422_v50 = vadd.f32 %v1831_v2, %v351_v33  ;;  %v371_v51 = vmul.f32 %v1819_v1, %v300_v40  ;;  %v286_v11 = vld [vmem:[%s1826_s28 + $0x178] sm:$0xff] }
  0x23   : > { %1667 = vmatprep.mubr.msk.f32.mxu0 %vm446_vm0, %v389_v37  ;;  %1710 = vmatmul.mubr.msk.f32.gmra.mrb[4].mxu1 %vm446_vm0, %v418_v16  ;;  %v420_v37 = vadd.f32 %v1831_v2, %v349_v17  ;;  %v372_v52 = vmul.f32 %v1819_v1, %v301_v41  ;;  %v373_v53 = vmul.f32 %v1819_v1, %v302_v42  ;;  %v264_v17 = vld [vmem:[%s1826_s28 + $0xc8] sm:$0xff]  ;;  %v290_v36 = vld [vmem:[%s1826_s28 + $0x198] sm:$0xff]  ;;  %v269_v42 = vld [vmem:[%s1826_s28 + $0xf0] sm:$0xff] }
  0x24   : > { %1712 = vmatprep.mubr.msk.f32.mxu1 %vm446_vm0, %v419_v21  ;;  %v423_v56 = vadd.f32 %v1831_v2, %v352_v38  ;;  %v1978_v57 = vadd.f32 %v1831_v2, %v369_v48  ;;  %v1981_v58 = vadd.f32 %v1831_v2, %v370_v49  ;;  %v1987_v60 = vadd.f32 %v1831_v2, %v371_v51  ;;  %v268_v41 = vld [vmem:[%s1826_s28 + $0xe8] sm:$0xff]  ;;  %v293_v51 = vld [vmem:[%s1826_s28 + $0x1b0] sm:$0xff] }
  0x25   : > { %v1993_v62 = vadd.f32 %v1831_v2, %v373_v53  ;;  %v331_v0 = vmul.f32 %v1819_v1, %v260_v54  ;;  %v332_v3 = vmul.f32 %v1819_v1, %v261_v55  ;;  %v424_v6 = vadd.f32 %v1831_v2, %v353_v44 }
  0x26   : > { %1668 = vmatmul.mubr.msk.f32.gmra.mrb[8].mxu0 %vm446_vm0, %v390_v45  ;;  %v354_v45 = vmul.f32 %v1819_v1, %v283_v30  ;;  %v355_v7 = vmul.f32 %v1819_v1, %v284_v59  ;;  %v401_v8 = vadd.f32 %v1831_v2, %v330_v28  ;;  %v356_v10 = vmul.f32 %v1819_v1, %v285_v63  ;;  %v267_v30 = vld [vmem:[%s1826_s28 + $0xe0] sm:$0xff]  ;;  %v270_v63 = vld [vmem:[%s1826_s28 + $0xf8] sm:$0xff] }
  0x27   : > { %1670 = vmatprep.mubr.msk.f32.mxu0 %vm446_vm0, %v391_v46  ;;  %v1961_v46 = vadd.f32 %v1831_v2, %v367_v34  ;;  %1713 = vmatmul.mubr.msk.f32.gmra.mrb[6].mxu1 %vm446_vm0, %v420_v37  ;;  %v402_v14 = vadd.f32 %v1831_v2, %v331_v0  ;;  %v403_v16 = vadd.f32 %v1831_v2, %v332_v3  ;;  %v291_v37 = vld [vmem:[%s1826_s28 + $0x1a0] sm:$0xff] }
  0x28   : > { %1715 = vmatprep.mubr.msk.f32.mxu1 %vm446_vm0, %v421_v43  ;;  %v425_v9 = vadd.f32 %v1831_v2, %v354_v45  ;;  %v426_v19 = vadd.f32 %v1831_v2, %v355_v7  ;;  %v334_v21 = vmul.f32 %v1819_v1, %v263_v12  ;;  %v427_v22 = vadd.f32 %v1831_v2, %v356_v10 }
  0x29   : > { %v358_v23 = vmul.f32 %v1819_v1, %v287_v13  ;;  %v337_v38 = vmul.f32 %v1819_v1, %v266_v29  ;;  %v338_v39 = vmul.f32 %v1819_v1, %v267_v30  ;;  %v361_v44 = vmul.f32 %v1819_v1, %v290_v36 }
  0x2a   : > { %1671 = vmatmul.mubr.msk.f32.gmra.mrb[10].mxu0 %vm446_vm0, %v392_v61  ;;  %v1990_v61 = vadd.f32 %v1831_v2, %v372_v52  ;;  %v405_v33 = vadd.f32 %v1831_v2, %v334_v21  ;;  %v362_v49 = vmul.f32 %v1819_v1, %v291_v37  ;;  %v339_v52 = vmul.f32 %v1819_v1, %v268_v41 }
  0x2b   : > { %1673 = vmatprep.mubr.msk.f32.mxu0 %vm446_vm0, %v393_v4  ;;  %v400_v4 = vadd.f32 %v1831_v2, %v329_v27  ;;  %1716 = vmatmul.mubr.msk.f32.gmra.mrb[8].mxu1 %vm446_vm0, %v422_v50  ;;  %v336_v27 = vmul.f32 %v1819_v1, %v265_v18  ;;  %v429_v34 = vadd.f32 %v1831_v2, %v358_v23  ;;  %v292_v50 = vld [vmem:[%s1826_s28 + $0x1a8] sm:$0xff] }
  0x2c   : > { %1718 = vmatprep.mubr.msk.f32.mxu1 %vm446_vm0, %v423_v56  ;;  %v340_v53 = vmul.f32 %v1819_v1, %v269_v42  ;;  %v408_v54 = vadd.f32 %v1831_v2, %v337_v38  ;;  %v432_v55 = vadd.f32 %v1831_v2, %v361_v44  ;;  %v363_v56 = vmul.f32 %v1819_v1, %v292_v50 }
  0x2d   : > { %v407_v45 = vadd.f32 %v1831_v2, %v336_v27  ;;  %v409_v59 = vadd.f32 %v1831_v2, %v338_v39  ;;  %v433_v0 = vadd.f32 %v1831_v2, %v362_v49  ;;  %v364_v3 = vmul.f32 %v1819_v1, %v293_v51 }
  0x2e   : > { %1674 = vmatmul.mubr.msk.f32.gmra.mrb[12].mxu0 %vm446_vm0, %v394_v15  ;;  %v333_v15 = vmul.f32 %v1819_v1, %v262_v5  ;;  %v295_v5 = vld [vmem:[%s1826_s28 + $0x1c0] sm:$0xff]  ;;  %v341_v7 = vmul.f32 %v1819_v1, %v270_v63  ;;  %v411_v10 = vadd.f32 %v1831_v2, %v340_v53 }
  0x2f   : > { %1676 = vmatprep.mubr.msk.f32.mxu0 %vm446_vm0, %v395_v20  ;;  %1719 = vmatmul.mubr.msk.f32.gmra.mrb[10].mxu1 %vm446_vm0, %v424_v6  ;;  %v357_v20 = vmul.f32 %v1819_v1, %v286_v11  ;;  %v410_v6 = vadd.f32 %v1831_v2, %v339_v52  ;;  %v435_v11 = vadd.f32 %v1831_v2, %v364_v3 }
  0x30   : > { %1721 = vmatprep.mubr.msk.f32.mxu1 %vm446_vm0, %v425_v9  ;;  %v404_v28 = vadd.f32 %v1831_v2, %v333_v15  ;;  %v366_v12 = vmul.f32 %v1819_v1, %v295_v5  ;;  %v412_v13 = vadd.f32 %v1831_v2, %v341_v7 }
  0x32   : > { %1677 = vmatmul.mubr.msk.f32.gmra.mrb[14].mxu0 %vm446_vm0, %v396_v25  ;;  %v289_v25 = vld [vmem:[%s1826_s28 + $0x190] sm:$0xff]  ;;  %v437_v15 = vadd.f32 %v1831_v2, %v366_v12 }
  0x33   : > { %1679 = vmatprep.mubr.msk.f32.mxu0 %vm446_vm0, %v397_v26  ;;  %v335_v26 = vmul.f32 %v1819_v1, %v264_v17  ;;  %1722 = vmatmul.mubr.msk.f32.gmra.mrb[12].mxu1 %vm446_vm0, %v426_v19  ;;  %v360_v35 = vmul.f32 %v1819_v1, %v289_v25 }
  0x34   : > { %1724 = vmatprep.mubr.msk.f32.mxu1 %vm446_vm0, %v427_v22 }
  0x35   : > { %v406_v40 = vadd.f32 %v1831_v2, %v335_v26  ;;  %v431_v48 = vadd.f32 %v1831_v2, %v360_v35 }
  0x36   : > { %1680 = vmatmul.mubr.msk.f32.gmra.mrb[16].mxu0 %vm446_vm0, %v398_v31  ;;  %v428_v31 = vadd.f32 %v1831_v2, %v357_v20 }
  0x37   : > { %1682 = vmatprep.mubr.msk.f32.mxu0 %vm446_vm0, %v399_v32  ;;  %v359_v32 = vmul.f32 %v1819_v1, %v288_v24 }
  0x38   : > { %1725 = vmatmul.mubr.msk.f32.gmra.mrb[14].mxu1 %vm446_vm0, %v428_v31 }
  0x39   : > { %v430_v43 = vadd.f32 %v1831_v2, %v359_v32  ;;  %1727 = vmatprep.mubr.msk.f32.mxu1 %vm446_vm0, %v429_v34 }
  0x3a   : > { %1683 = vmatmul.mubr.msk.f32.gmra.mrb[18].mxu0 %vm446_vm0, %v400_v4  ;;  %v294_v4 = vld [vmem:[%s1826_s28 + $0x1b8] sm:$0xff] }
  0x3b   : > { %1685 = vmatprep.mubr.msk.f32.mxu0 %vm446_vm0, %v401_v8  ;;  %v434_v8 = vadd.f32 %v1831_v2, %v363_v56  ;;  %v365_v9 = vmul.f32 %v1819_v1, %v294_v4 }
  0x3c   : > { %1728 = vmatmul.mubr.msk.f32.gmra.mrb[16].mxu1 %vm446_vm0, %v430_v43 }
  0x3d   : > { %1730 = vmatprep.mubr.msk.f32.mxu1 %vm446_vm0, %v431_v48 }
  0x3e   : > { %1686 = vmatmul.mubr.msk.f32.gmra.mrb[20].mxu0 %vm446_vm0, %v402_v14  ;;  %v436_v14 = vadd.f32 %v1831_v2, %v365_v9 }
  0x3f   : > { %1688 = vmatprep.mubr.msk.f32.mxu0 %vm446_vm0, %v403_v16 }
  0x40   : > { %1731 = vmatmul.mubr.msk.f32.gmra.mrb[18].mxu1 %vm446_vm0, %v432_v55 }
  0x41   : > { %1733 = vmatprep.mubr.msk.f32.mxu1 %vm446_vm0, %v433_v0 }
  0x42   : > { %1689 = vmatmul.mubr.msk.f32.gmra.mrb[22].mxu0 %vm446_vm0, %v404_v28 }
  0x43   : > { %1691 = vmatprep.mubr.msk.f32.mxu0 %vm446_vm0, %v405_v33 }
  0x44   : > { %1734 = vmatmul.mubr.msk.f32.gmra.mrb[20].mxu1 %vm446_vm0, %v434_v8 }
  0x45   : > { %1736 = vmatprep.mubr.msk.f32.mxu1 %vm446_vm0, %v435_v11 }
  0x46   : > { %1692 = vmatmul.mubr.msk.f32.gmra.mrb[24].mxu0 %vm446_vm0, %v406_v40 }
  0x47   : > { %1694 = vmatprep.mubr.msk.f32.mxu0 %vm446_vm0, %v407_v45 }
  0x48   : > { %1737 = vmatmul.mubr.msk.f32.gmra.mrb[22].mxu1 %vm446_vm0, %v436_v14 }
  0x49   : > { %1739 = vmatprep.mubr.msk.f32.mxu1 %vm446_vm0, %v437_v15 }
  0x4a   : > { %1695 = vmatmul.mubr.msk.f32.gmra.mrb[26].mxu0 %vm446_vm0, %v408_v54 }
  0x4b   : > { %1697 = vmatprep.mubr.msk.f32.mxu0 %vm446_vm0, %v409_v59 }
  0x4c   : > { %1740 = vmatmul.mubr.msk.f32.gmra.mrb[24].mxu1 %vm446_vm0, %v1961_v46 }
  0x4d   : > { %1742 = vmatprep.mubr.msk.f32.mxu1 %vm446_vm0, %v1964_v47 }
  0x4e   : > { %1698 = vmatmul.mubr.msk.f32.gmra.mrb[28].mxu0 %vm446_vm0, %v410_v6 }
  0x4f   : > { %1700 = vmatprep.mubr.msk.f32.mxu0 %vm446_vm0, %v411_v10 }
  0x50   : > { %1743 = vmatmul.mubr.msk.f32.gmra.mrb[26].mxu1 %vm446_vm0, %v1978_v57 }
  0x51   : > { %1745 = vmatprep.mubr.msk.f32.mxu1 %vm446_vm0, %v1981_v58 }
  0x52   : > { %1701 = vmatmul.mubr.msk.f32.gmra.mrb[30].mxu0 %vm446_vm0, %v412_v13 }
  0x54   : > { %1746 = vmatmul.mubr.msk.f32.gmra.mrb[28].mxu1 %vm446_vm0, %v1987_v60 }
  0x55   : > { %1748 = vmatprep.mubr.msk.f32.mxu1 %vm446_vm0, %v1990_v61 }
  0x58   : > { %1749 = vmatmul.mubr.msk.f32.gmra.mrb[30].mxu1 %vm446_vm0, %v1993_v62 }
  0xe9   : > { %v1657_v1 = vpop.f32.mrb[0].mxu0 }
  0xea   : > { %v1026_v2 = vsel %vm1024_vm1, %v1657_v1, 0.0  ;;  %v1159_v46 = vmul.f32 %v1657_v1, %v1657_v1  ;;  %1360 = vst.msk [vmem:[%s2115_s8 + $0x8] sm:$0xff] %vm1024_vm1, %v1657_v1  ;;  %v705_v47 = vpop.f32.mrb[1].mxu0 }
  0xeb   : > { %v1025_v57 = vsel %vm1024_vm1, %v705_v47, 0.0  ;;  %v1158_v58 = vmul.f32 %v705_v47, %v705_v47  ;;  %1359 = vst.msk [vmem:[%s2115_s8] sm:$0xff] %vm1024_vm1, %v705_v47 }
  0xec   : > { %v1223_v60 = vsel %vm1024_vm1, %v1159_v46, 0.0  ;;  %v1027_v61 = vadd.f32 %v1026_v2, %v1025_v57 }
  0xed   : > { %v1222_v62 = vsel %vm1024_vm1, %v1158_v58, 0.0  ;;  %v1660_v16 = vpop.f32.mrb[2].mxu0 }
  0xee   : > { %v1224_v17 = vadd.f32 %v1223_v60, %v1222_v62  ;;  %1362 = vst.msk [vmem:[%s2115_s8 + $0x18] sm:$0xff] %vm1024_vm1, %v1660_v16  ;;  %v715_v18 = vpop.f32.mrb[3].mxu0  ;;  %v1161_v19 = vmul.f32 %v1660_v16, %v1660_v16  ;;  %v1030_v23 = vsel %vm1024_vm1, %v1660_v16, 0.0  ;;  %v2148_v52 = vpop.f32.mrb[0].mxu1 }
  0xef   : > { %v1028_v20 = vsel %vm1024_vm1, %v715_v18, 0.0  ;;  %v1160_v21 = vmul.f32 %v715_v18, %v715_v18  ;;  %1361 = vst.msk [vmem:[%s2115_s8 + $0x10] sm:$0xff] %vm1024_vm1, %v715_v18  ;;  %1392 = vst.msk [vmem:[%s2115_s8 + $0x108] sm:$0xff] %vm1024_vm1, %v2148_v52  ;;  %v2155_v56 = vpop.f32.mrb[1].mxu1 }
  0xf0   : > { %v1029_v22 = vadd.f32 %v1028_v20, %v1027_v61  ;;  %v1227_v29 = vsel %vm1024_vm1, %v1161_v19, 0.0  ;;  %1391 = vst.msk [vmem:[%s2115_s8 + $0x100] sm:$0xff] %vm1024_vm1, %v2155_v56 }
  0xf1   : > { %v1225_v24 = vsel %vm1024_vm1, %v1160_v21, 0.0  ;;  %v1663_v25 = vpop.f32.mrb[4].mxu0 }
  0xf2   : > { %v1226_v26 = vadd.f32 %v1225_v24, %v1224_v17  ;;  %1364 = vst.msk [vmem:[%s2115_s8 + $0x28] sm:$0xff] %vm1024_vm1, %v1663_v25  ;;  %v725_v27 = vpop.f32.mrb[5].mxu0  ;;  %v1031_v28 = vadd.f32 %v1030_v23, %v1029_v22  ;;  %v1163_v30 = vmul.f32 %v1663_v25, %v1663_v25  ;;  %v1034_v35 = vsel %vm1024_vm1, %v1663_v25, 0.0  ;;  %v2166_v9 = vpop.f32.mrb[2].mxu1 }
  0xf3   : > { %v1032_v31 = vsel %vm1024_vm1, %v725_v27, 0.0  ;;  %v1162_v32 = vmul.f32 %v725_v27, %v725_v27  ;;  %1363 = vst.msk [vmem:[%s2115_s8 + $0x20] sm:$0xff] %vm1024_vm1, %v725_v27  ;;  %1394 = vst.msk [vmem:[%s2115_s8 + $0x118] sm:$0xff] %vm1024_vm1, %v2166_v9  ;;  %v2173_v13 = vpop.f32.mrb[3].mxu1 }
  0xf4   : > { %v1033_v33 = vadd.f32 %v1032_v31, %v1031_v28  ;;  %v1228_v34 = vadd.f32 %v1227_v29, %v1226_v26  ;;  %v1231_v41 = vsel %vm1024_vm1, %v1163_v30, 0.0  ;;  %1393 = vst.msk [vmem:[%s2115_s8 + $0x110] sm:$0xff] %vm1024_vm1, %v2173_v13 }
  0xf5   : > { %v1229_v36 = vsel %vm1024_vm1, %v1162_v32, 0.0  ;;  %v1666_v37 = vpop.f32.mrb[6].mxu0 }
  0xf6   : > { %v1230_v38 = vadd.f32 %v1229_v36, %v1228_v34  ;;  %1366 = vst.msk [vmem:[%s2115_s8 + $0x38] sm:$0xff] %vm1024_vm1, %v1666_v37  ;;  %v735_v39 = vpop.f32.mrb[7].mxu0  ;;  %v1035_v40 = vadd.f32 %v1034_v35, %v1033_v33  ;;  %v1165_v42 = vmul.f32 %v1666_v37, %v1666_v37  ;;  %v1038_v49 = vsel %vm1024_vm1, %v1666_v37, 0.0  ;;  %v2184_v61 = vpop.f32.mrb[4].mxu1 }
  0xf7   : > { %v1036_v43 = vsel %vm1024_vm1, %v735_v39, 0.0  ;;  %v1164_v44 = vmul.f32 %v735_v39, %v735_v39  ;;  %1365 = vst.msk [vmem:[%s2115_s8 + $0x30] sm:$0xff] %vm1024_vm1, %v735_v39  ;;  %1396 = vst.msk [vmem:[%s2115_s8 + $0x128] sm:$0xff] %vm1024_vm1, %v2184_v61  ;;  %v2191_v18 = vpop.f32.mrb[5].mxu1 }
  0xf8   : > { %v1037_v45 = vadd.f32 %v1036_v43, %v1035_v40  ;;  %v1232_v48 = vadd.f32 %v1231_v41, %v1230_v38  ;;  %v1235_v59 = vsel %vm1024_vm1, %v1165_v42, 0.0  ;;  %1395 = vst.msk [vmem:[%s2115_s8 + $0x120] sm:$0xff] %vm1024_vm1, %v2191_v18 }
  0xf9   : > { %v1233_v50 = vsel %vm1024_vm1, %v1164_v44, 0.0  ;;  %v1669_v51 = vpop.f32.mrb[8].mxu0 }
  0xfa   : > { %v1234_v53 = vadd.f32 %v1233_v50, %v1232_v48  ;;  %1368 = vst.msk [vmem:[%s2115_s8 + $0x48] sm:$0xff] %vm1024_vm1, %v1669_v51  ;;  %v745_v54 = vpop.f32.mrb[9].mxu0  ;;  %v1039_v55 = vadd.f32 %v1038_v49, %v1037_v45  ;;  %v1167_v63 = vmul.f32 %v1669_v51, %v1669_v51  ;;  %v1042_v6 = vsel %vm1024_vm1, %v1669_v51, 0.0  ;;  %v2202_v28 = vpop.f32.mrb[6].mxu1 }
  0xfb   : > { %v1040_v0 = vsel %vm1024_vm1, %v745_v54, 0.0  ;;  %v1166_v3 = vmul.f32 %v745_v54, %v745_v54  ;;  %1367 = vst.msk [vmem:[%s2115_s8 + $0x40] sm:$0xff] %vm1024_vm1, %v745_v54  ;;  %1398 = vst.msk [vmem:[%s2115_s8 + $0x138] sm:$0xff] %vm1024_vm1, %v2202_v28  ;;  %v2209_v32 = vpop.f32.mrb[7].mxu1 }
  0xfc   : > { %v1041_v4 = vadd.f32 %v1040_v0, %v1039_v55  ;;  %v1236_v5 = vadd.f32 %v1235_v59, %v1234_v53  ;;  %v1239_v14 = vsel %vm1024_vm1, %v1167_v63, 0.0  ;;  %1397 = vst.msk [vmem:[%s2115_s8 + $0x130] sm:$0xff] %vm1024_vm1, %v2209_v32 }
  0xfd   : > { %v1237_v7 = vsel %vm1024_vm1, %v1166_v3, 0.0  ;;  %v1672_v8 = vpop.f32.mrb[10].mxu0 }
  0xfe   : > { %v1238_v10 = vadd.f32 %v1237_v7, %v1236_v5  ;;  %1370 = vst.msk [vmem:[%s2115_s8 + $0x58] sm:$0xff] %vm1024_vm1, %v1672_v8  ;;  %v755_v11 = vpop.f32.mrb[11].mxu0  ;;  %v1043_v12 = vadd.f32 %v1042_v6, %v1041_v4  ;;  %v1169_v15 = vmul.f32 %v1672_v8, %v1672_v8  ;;  %v1046_v57 = vsel %vm1024_vm1, %v1672_v8, 0.0  ;;  %v2220_v42 = vpop.f32.mrb[8].mxu1 }
  0xff   : > { %v1044_v1 = vsel %vm1024_vm1, %v755_v11, 0.0  ;;  %v1168_v2 = vmul.f32 %v755_v11, %v755_v11  ;;  %1369 = vst.msk [vmem:[%s2115_s8 + $0x50] sm:$0xff] %vm1024_vm1, %v755_v11  ;;  %1400 = vst.msk [vmem:[%s2115_s8 + $0x148] sm:$0xff] %vm1024_vm1, %v2220_v42  ;;  %v2227_v48 = vpop.f32.mrb[9].mxu1 }
 0x100   : > { %v1045_v46 = vadd.f32 %v1044_v1, %v1043_v12  ;;  %v1240_v47 = vadd.f32 %v1239_v14, %v1238_v10  ;;  %v1243_v19 = vsel %vm1024_vm1, %v1169_v15, 0.0  ;;  %1399 = vst.msk [vmem:[%s2115_s8 + $0x140] sm:$0xff] %vm1024_vm1, %v2227_v48 }
 0x101   : > { %v1241_v58 = vsel %vm1024_vm1, %v1168_v2, 0.0  ;;  %v1675_v60 = vpop.f32.mrb[12].mxu0 }
 0x102   : > { %v1242_v62 = vadd.f32 %v1241_v58, %v1240_v47  ;;  %1372 = vst.msk [vmem:[%s2115_s8 + $0x68] sm:$0xff] %vm1024_vm1, %v1675_v60  ;;  %v765_v16 = vpop.f32.mrb[13].mxu0  ;;  %v1047_v17 = vadd.f32 %v1046_v57, %v1045_v46  ;;  %v1171_v20 = vmul.f32 %v1675_v60, %v1675_v60  ;;  %v1050_v25 = vsel %vm1024_vm1, %v1675_v60, 0.0  ;;  %v2238_v3 = vpop.f32.mrb[10].mxu1 }
 0x103   : > { %v1048_v21 = vsel %vm1024_vm1, %v765_v16, 0.0  ;;  %v1170_v22 = vmul.f32 %v765_v16, %v765_v16  ;;  %1371 = vst.msk [vmem:[%s2115_s8 + $0x60] sm:$0xff] %vm1024_vm1, %v765_v16  ;;  %1402 = vst.msk [vmem:[%s2115_s8 + $0x158] sm:$0xff] %vm1024_vm1, %v2238_v3  ;;  %v2245_v7 = vpop.f32.mrb[11].mxu1 }
 0x104   : > { %v1049_v23 = vadd.f32 %v1048_v21, %v1047_v17  ;;  %v1244_v24 = vadd.f32 %v1243_v19, %v1242_v62  ;;  %v1247_v33 = vsel %vm1024_vm1, %v1171_v20, 0.0  ;;  %1401 = vst.msk [vmem:[%s2115_s8 + $0x150] sm:$0xff] %vm1024_vm1, %v2245_v7 }
 0x105   : > { %v1245_v26 = vsel %vm1024_vm1, %v1170_v22, 0.0  ;;  %v1678_v27 = vpop.f32.mrb[14].mxu0 }
 0x106   : > { %v1246_v29 = vadd.f32 %v1245_v26, %v1244_v24  ;;  %1374 = vst.msk [vmem:[%s2115_s8 + $0x78] sm:$0xff] %vm1024_vm1, %v1678_v27  ;;  %v775_v30 = vpop.f32.mrb[15].mxu0  ;;  %v1051_v31 = vadd.f32 %v1050_v25, %v1049_v23  ;;  %v1173_v34 = vmul.f32 %v1678_v27, %v1678_v27  ;;  %v1054_v39 = vsel %vm1024_vm1, %v1678_v27, 0.0  ;;  %v2256_v47 = vpop.f32.mrb[12].mxu1 }
 0x107   : > { %v1052_v35 = vsel %vm1024_vm1, %v775_v30, 0.0  ;;  %v1172_v36 = vmul.f32 %v775_v30, %v775_v30  ;;  %1373 = vst.msk [vmem:[%s2115_s8 + $0x70] sm:$0xff] %vm1024_vm1, %v775_v30  ;;  %1404 = vst.msk [vmem:[%s2115_s8 + $0x168] sm:$0xff] %vm1024_vm1, %v2256_v47  ;;  %v2263_v62 = vpop.f32.mrb[13].mxu1 }
 0x108   : > { %v1053_v37 = vadd.f32 %v1052_v35, %v1051_v31  ;;  %v1248_v38 = vadd.f32 %v1247_v33, %v1246_v29  ;;  %v1251_v49 = vsel %vm1024_vm1, %v1173_v34, 0.0  ;;  %1403 = vst.msk [vmem:[%s2115_s8 + $0x160] sm:$0xff] %vm1024_vm1, %v2263_v62 }
 0x109   : > { %v1249_v40 = vsel %vm1024_vm1, %v1172_v36, 0.0  ;;  %v1681_v41 = vpop.f32.mrb[16].mxu0 }
 0x10a   : > { %v1250_v43 = vadd.f32 %v1249_v40, %v1248_v38  ;;  %1376 = vst.msk [vmem:[%s2115_s8 + $0x88] sm:$0xff] %vm1024_vm1, %v1681_v41  ;;  %v785_v44 = vpop.f32.mrb[17].mxu0  ;;  %v1055_v45 = vadd.f32 %v1054_v39, %v1053_v37  ;;  %v1175_v50 = vmul.f32 %v1681_v41, %v1681_v41  ;;  %v1058_v59 = vsel %vm1024_vm1, %v1681_v41, 0.0 }
 0x10b   : > { %v1056_v51 = vsel %vm1024_vm1, %v785_v44, 0.0  ;;  %v1174_v53 = vmul.f32 %v785_v44, %v785_v44  ;;  %1375 = vst.msk [vmem:[%s2115_s8 + $0x80] sm:$0xff] %vm1024_vm1, %v785_v44  ;;  %v2274_v26 = vpop.f32.mrb[14].mxu1 }
 0x10c   : > { %v1057_v54 = vadd.f32 %v1056_v51, %v1055_v45  ;;  %v1252_v55 = vadd.f32 %v1251_v49, %v1250_v43  ;;  %v1255_v8 = vsel %vm1024_vm1, %v1175_v50, 0.0  ;;  %1406 = vst.msk [vmem:[%s2115_s8 + $0x178] sm:$0xff] %vm1024_vm1, %v2274_v26  ;;  %v2281_v31 = vpop.f32.mrb[15].mxu1 }
 0x10d   : > { %v1253_v63 = vsel %vm1024_vm1, %v1174_v53, 0.0  ;;  %v1684_v0 = vpop.f32.mrb[18].mxu0  ;;  %1405 = vst.msk [vmem:[%s2115_s8 + $0x170] sm:$0xff] %vm1024_vm1, %v2281_v31 }
 0x10e   : > { %v1254_v4 = vadd.f32 %v1253_v63, %v1252_v55  ;;  %1378 = vst.msk [vmem:[%s2115_s8 + $0x98] sm:$0xff] %vm1024_vm1, %v1684_v0  ;;  %v795_v5 = vpop.f32.mrb[19].mxu0  ;;  %v1059_v6 = vadd.f32 %v1058_v59, %v1057_v54  ;;  %v1177_v10 = vmul.f32 %v1684_v0, %v1684_v0  ;;  %v1062_v1 = vsel %vm1024_vm1, %v1684_v0, 0.0 }
 0x10f   : > { %v1060_v11 = vsel %vm1024_vm1, %v795_v5, 0.0  ;;  %v1176_v12 = vmul.f32 %v795_v5, %v795_v5  ;;  %1377 = vst.msk [vmem:[%s2115_s8 + $0x90] sm:$0xff] %vm1024_vm1, %v795_v5  ;;  %v2292_v43 = vpop.f32.mrb[16].mxu1 }
 0x110   : > { %v1061_v14 = vadd.f32 %v1060_v11, %v1059_v6  ;;  %v1256_v15 = vadd.f32 %v1255_v8, %v1254_v4  ;;  %v1259_v16 = vsel %vm1024_vm1, %v1177_v10, 0.0  ;;  %1408 = vst.msk [vmem:[%s2115_s8 + $0x188] sm:$0xff] %vm1024_vm1, %v2292_v43  ;;  %v2299_v50 = vpop.f32.mrb[17].mxu1 }
 0x111   : > { %v1257_v2 = vsel %vm1024_vm1, %v1176_v12, 0.0  ;;  %v1687_v46 = vpop.f32.mrb[20].mxu0  ;;  %1407 = vst.msk [vmem:[%s2115_s8 + $0x180] sm:$0xff] %vm1024_vm1, %v2299_v50 }
 0x112   : > { %v1258_v57 = vadd.f32 %v1257_v2, %v1256_v15  ;;  %1380 = vst.msk [vmem:[%s2115_s8 + $0xa8] sm:$0xff] %vm1024_vm1, %v1687_v46  ;;  %v805_v58 = vpop.f32.mrb[21].mxu0  ;;  %v1063_v60 = vadd.f32 %v1062_v1, %v1061_v14  ;;  %v1179_v17 = vmul.f32 %v1687_v46, %v1687_v46  ;;  %v1066_v23 = vsel %vm1024_vm1, %v1687_v46, 0.0 }
 0x113   : > { %v1064_v19 = vsel %vm1024_vm1, %v805_v58, 0.0  ;;  %v1178_v20 = vmul.f32 %v805_v58, %v805_v58  ;;  %1379 = vst.msk [vmem:[%s2115_s8 + $0xa0] sm:$0xff] %vm1024_vm1, %v805_v58  ;;  %v2310_v6 = vpop.f32.mrb[18].mxu1 }
 0x114   : > { %v1065_v21 = vadd.f32 %v1064_v19, %v1063_v60  ;;  %v1260_v22 = vadd.f32 %v1259_v16, %v1258_v57  ;;  %v1263_v33 = vsel %vm1024_vm1, %v1179_v17, 0.0  ;;  %1410 = vst.msk [vmem:[%s2115_s8 + $0x198] sm:$0xff] %vm1024_vm1, %v2310_v6  ;;  %v2317_v12 = vpop.f32.mrb[19].mxu1 }
 0x115   : > { %v1261_v24 = vsel %vm1024_vm1, %v1178_v20, 0.0  ;;  %v1690_v25 = vpop.f32.mrb[22].mxu0  ;;  %1409 = vst.msk [vmem:[%s2115_s8 + $0x190] sm:$0xff] %vm1024_vm1, %v2317_v12 }
 0x116   : > { %v1262_v27 = vadd.f32 %v1261_v24, %v1260_v22  ;;  %1382 = vst.msk [vmem:[%s2115_s8 + $0xb8] sm:$0xff] %vm1024_vm1, %v1690_v25  ;;  %v815_v29 = vpop.f32.mrb[23].mxu0  ;;  %v1067_v30 = vadd.f32 %v1066_v23, %v1065_v21  ;;  %v1181_v34 = vmul.f32 %v1690_v25, %v1690_v25  ;;  %v1070_v39 = vsel %vm1024_vm1, %v1690_v25, 0.0 }
 0x117   : > { %v1068_v35 = vsel %vm1024_vm1, %v815_v29, 0.0  ;;  %v1180_v36 = vmul.f32 %v815_v29, %v815_v29  ;;  %1381 = vst.msk [vmem:[%s2115_s8 + $0xb0] sm:$0xff] %vm1024_vm1, %v815_v29  ;;  %v2328_v17 = vpop.f32.mrb[20].mxu1 }
 0x118   : > { %v1069_v37 = vadd.f32 %v1068_v35, %v1067_v30  ;;  %v1264_v38 = vadd.f32 %v1263_v33, %v1262_v27  ;;  %v1267_v51 = vsel %vm1024_vm1, %v1181_v34, 0.0  ;;  %1412 = vst.msk [vmem:[%s2115_s8 + $0x1a8] sm:$0xff] %vm1024_vm1, %v2328_v17  ;;  %v2335_v22 = vpop.f32.mrb[21].mxu1 }
 0x119   : > { %v1265_v40 = vsel %vm1024_vm1, %v1180_v36, 0.0  ;;  %v1693_v41 = vpop.f32.mrb[24].mxu0  ;;  %1411 = vst.msk [vmem:[%s2115_s8 + $0x1a0] sm:$0xff] %vm1024_vm1, %v2335_v22 }
 0x11a   : > { %v1266_v44 = vadd.f32 %v1265_v40, %v1264_v38  ;;  %1384 = vst.msk [vmem:[%s2115_s8 + $0xc8] sm:$0xff] %vm1024_vm1, %v1693_v41  ;;  %v825_v45 = vpop.f32.mrb[25].mxu0  ;;  %v1071_v49 = vadd.f32 %v1070_v39, %v1069_v37  ;;  %v1183_v53 = vmul.f32 %v1693_v41, %v1693_v41  ;;  %v1074_v0 = vsel %vm1024_vm1, %v1693_v41, 0.0 }
 0x11b   : > { %v1072_v54 = vsel %vm1024_vm1, %v825_v45, 0.0  ;;  %v1182_v55 = vmul.f32 %v825_v45, %v825_v45  ;;  %1383 = vst.msk [vmem:[%s2115_s8 + $0xc0] sm:$0xff] %vm1024_vm1, %v825_v45  ;;  %v2346_v36 = vpop.f32.mrb[22].mxu1  ;;  %v1190_v40 = vmul.f32 %v2155_v56, %v2155_v56 }
 0x11c   : > { %v1073_v59 = vadd.f32 %v1072_v54, %v1071_v49  ;;  %v1268_v63 = vadd.f32 %v1267_v51, %v1266_v44  ;;  %v1271_v14 = vsel %vm1024_vm1, %v1183_v53, 0.0  ;;  %1414 = vst.msk [vmem:[%s2115_s8 + $0x1b8] sm:$0xff] %vm1024_vm1, %v2346_v36  ;;  %v2355_v41 = vpop.f32.mrb[23].mxu1 }
 0x11d   : > { %v1269_v4 = vsel %vm1024_vm1, %v1182_v55, 0.0  ;;  %v1696_v5 = vpop.f32.mrb[26].mxu0  ;;  %1413 = vst.msk [vmem:[%s2115_s8 + $0x1b0] sm:$0xff] %vm1024_vm1, %v2355_v41 }
 0x11e   : > { %v1270_v8 = vadd.f32 %v1269_v4, %v1268_v63  ;;  %1386 = vst.msk [vmem:[%s2115_s8 + $0xd8] sm:$0xff] %vm1024_vm1, %v1696_v5  ;;  %v835_v10 = vpop.f32.mrb[27].mxu0  ;;  %v1075_v11 = vadd.f32 %v1074_v0, %v1073_v59  ;;  %v1185_v15 = vmul.f32 %v1696_v5, %v1696_v5  ;;  %v1078_v58 = vsel %vm1024_vm1, %v1696_v5, 0.0 }
 0x11f   : > { %v1076_v1 = vsel %vm1024_vm1, %v835_v10, 0.0  ;;  %v1184_v2 = vmul.f32 %v835_v10, %v835_v10  ;;  %1385 = vst.msk [vmem:[%s2115_s8 + $0xd0] sm:$0xff] %vm1024_vm1, %v835_v10  ;;  %v1088_v63 = vsel %vm1024_vm1, %v2155_v56, 0.0  ;;  %v2368_v0 = vpop.f32.mrb[24].mxu1  ;;  %v1192_v56 = vmul.f32 %v2173_v13, %v2173_v13 }
 0x120   : > { %v1077_v46 = vadd.f32 %v1076_v1, %v1075_v11  ;;  %v1272_v57 = vadd.f32 %v1271_v14, %v1270_v8  ;;  %v1275_v23 = vsel %vm1024_vm1, %v1185_v15, 0.0  ;;  %1416 = vst.msk [vmem:[%s2115_s8 + $0x1c8] sm:$0xff] %vm1024_vm1, %v2368_v0  ;;  %v2373_v8 = vpop.f32.mrb[25].mxu1  ;;  %v1191_v11 = vmul.f32 %v2148_v52, %v2148_v52 }
 0x121   : > { %v1273_v60 = vsel %vm1024_vm1, %v1184_v2, 0.0  ;;  %v1699_v16 = vpop.f32.mrb[28].mxu0  ;;  %v1285_v14 = vsel %vm1024_vm1, %v1190_v40, 0.0  ;;  %1415 = vst.msk [vmem:[%s2115_s8 + $0x1c0] sm:$0xff] %vm1024_vm1, %v2373_v8  ;;  %v1090_v2 = vsel %vm1024_vm1, %v2148_v52, 0.0  ;;  %v1289_v52 = vsel %vm1024_vm1, %v1192_v56, 0.0 }
 0x122   : > { %v1274_v19 = vadd.f32 %v1273_v60, %v1272_v57  ;;  %1388 = vst.msk [vmem:[%s2115_s8 + $0xe8] sm:$0xff] %vm1024_vm1, %v1699_v16  ;;  %v845_v20 = vpop.f32.mrb[29].mxu0  ;;  %v1079_v21 = vadd.f32 %v1078_v58, %v1077_v46  ;;  %v1187_v24 = vmul.f32 %v1699_v16, %v1699_v16  ;;  %v1082_v33 = vsel %vm1024_vm1, %v1699_v16, 0.0 }
 0x123   : > { %v1080_v25 = vsel %vm1024_vm1, %v845_v20, 0.0  ;;  %v1186_v27 = vmul.f32 %v845_v20, %v845_v20  ;;  %1387 = vst.msk [vmem:[%s2115_s8 + $0xe0] sm:$0xff] %vm1024_vm1, %v845_v20  ;;  %v1092_v46 = vsel %vm1024_vm1, %v2173_v13, 0.0  ;;  %v2388_v57 = vpop.f32.mrb[26].mxu1  ;;  %v1193_v20 = vmul.f32 %v2166_v9, %v2166_v9 }
 0x124   : > { %v1081_v29 = vadd.f32 %v1080_v25, %v1079_v21  ;;  %v1276_v30 = vadd.f32 %v1275_v23, %v1274_v19  ;;  %v1279_v44 = vsel %vm1024_vm1, %v1187_v24, 0.0  ;;  %1418 = vst.msk [vmem:[%s2115_s8 + $0x1d8] sm:$0xff] %vm1024_vm1, %v2388_v57  ;;  %v2393_v16 = vpop.f32.mrb[27].mxu1  ;;  %v1287_v19 = vsel %vm1024_vm1, %v1191_v11, 0.0 }
 0x125   : > { %v1277_v34 = vsel %vm1024_vm1, %v1186_v27, 0.0  ;;  %v1702_v35 = vpop.f32.mrb[30].mxu0  ;;  %v1194_v13 = vmul.f32 %v2191_v18, %v2191_v18  ;;  %1417 = vst.msk [vmem:[%s2115_s8 + $0x1d0] sm:$0xff] %vm1024_vm1, %v2393_v16  ;;  %v1094_v24 = vsel %vm1024_vm1, %v2166_v9, 0.0  ;;  %v1096_v25 = vsel %vm1024_vm1, %v2191_v18, 0.0 }
 0x126   : > { %v1278_v37 = vadd.f32 %v1277_v34, %v1276_v30  ;;  %1390 = vst.msk [vmem:[%s2115_s8 + $0xf8] sm:$0xff] %vm1024_vm1, %v1702_v35  ;;  %v855_v38 = vpop.f32.mrb[31].mxu0  ;;  %v1083_v39 = vadd.f32 %v1082_v33, %v1081_v29  ;;  %v1189_v45 = vmul.f32 %v1702_v35, %v1702_v35  ;;  %v1086_v55 = vsel %vm1024_vm1, %v1702_v35, 0.0 }
 0x127   : > { %v1084_v49 = vsel %vm1024_vm1, %v855_v38, 0.0  ;;  %v1188_v51 = vmul.f32 %v855_v38, %v855_v38  ;;  %1389 = vst.msk [vmem:[%s2115_s8 + $0xf0] sm:$0xff] %vm1024_vm1, %v855_v38  ;;  %v2408_v27 = vpop.f32.mrb[28].mxu1  ;;  %v1291_v34 = vsel %vm1024_vm1, %v1193_v20, 0.0  ;;  %v1195_v35 = vmul.f32 %v2184_v61, %v2184_v61 }
 0x128   : > { %v1085_v53 = vadd.f32 %v1084_v49, %v1083_v39  ;;  %v1280_v54 = vadd.f32 %v1279_v44, %v1278_v37  ;;  %v1283_v10 = vsel %vm1024_vm1, %v1189_v45, 0.0  ;;  %1420 = vst.msk [vmem:[%s2115_s8 + $0x1e8] sm:$0xff] %vm1024_vm1, %v2408_v27  ;;  %v2413_v33 = vpop.f32.mrb[29].mxu1  ;;  %v1293_v9 = vsel %vm1024_vm1, %v1194_v13, 0.0 }
 0x129   : > { %v1281_v59 = vsel %vm1024_vm1, %v1188_v51, 0.0  ;;  %v1196_v18 = vmul.f32 %v2209_v32, %v2209_v32  ;;  %1419 = vst.msk [vmem:[%s2115_s8 + $0x1e0] sm:$0xff] %vm1024_vm1, %v2413_v33  ;;  %v1098_v39 = vsel %vm1024_vm1, %v2184_v61, 0.0  ;;  %v1100_v40 = vsel %vm1024_vm1, %v2209_v32, 0.0 }
 0x12a   : > { %v1087_v4 = vadd.f32 %v1086_v55, %v1085_v53  ;;  %v1282_v5 = vadd.f32 %v1281_v59, %v1280_v54  ;;  %v1295_v53 = vsel %vm1024_vm1, %v1195_v35, 0.0  ;;  %v1197_v54 = vmul.f32 %v2202_v28, %v2202_v28 }
 0x12b   : > { %v2428_v44 = vpop.f32.mrb[30].mxu1  ;;  %v1297_v55 = vsel %vm1024_vm1, %v1196_v18, 0.0  ;;  %v1198_v61 = vmul.f32 %v2227_v48, %v2227_v48 }
 0x12c   : > { %v1284_v15 = vadd.f32 %v1283_v10, %v1282_v5  ;;  %v1089_v1 = vadd.f32 %v1088_v63, %v1087_v4  ;;  %1422 = vst.msk [vmem:[%s2115_s8 + $0x1f8] sm:$0xff] %vm1024_vm1, %v2428_v44  ;;  %v2433_v51 = vpop.f32.mrb[31].mxu1  ;;  %v1102_v63 = vsel %vm1024_vm1, %v2202_v28, 0.0  ;;  %v1104_v4 = vsel %vm1024_vm1, %v2227_v48, 0.0 }
 0x12d   : > { %1421 = vst.msk [vmem:[%s2115_s8 + $0x1f0] sm:$0xff] %vm1024_vm1, %v2433_v51  ;;  %v1299_v11 = vsel %vm1024_vm1, %v1197_v54, 0.0  ;;  %v1301_v56 = vsel %vm1024_vm1, %v1198_v61, 0.0  ;;  %v1106_v28 = vsel %vm1024_vm1, %v2220_v42, 0.0  ;;  %v1108_v48 = vsel %vm1024_vm1, %v2245_v7, 0.0 }
 0x12e   : > { %v1286_v58 = vadd.f32 %v1285_v14, %v1284_v15  ;;  %v1091_v60 = vadd.f32 %v1090_v2, %v1089_v1  ;;  %v1199_v14 = vmul.f32 %v2220_v42, %v2220_v42  ;;  %v1200_v15 = vmul.f32 %v2245_v7, %v2245_v7 }
 0x12f   : > { %v1110_v42 = vsel %vm1024_vm1, %v2238_v3, 0.0  ;;  %v1112_v7 = vsel %vm1024_vm1, %v2263_v62, 0.0 }
 0x130   : > { %v1093_v21 = vadd.f32 %v1092_v46, %v1091_v60  ;;  %v1288_v23 = vadd.f32 %v1287_v19, %v1286_v58  ;;  %v1303_v60 = vsel %vm1024_vm1, %v1199_v14, 0.0  ;;  %v1201_v19 = vmul.f32 %v2238_v3, %v2238_v3 }
 0x131   : > { %v1305_v20 = vsel %vm1024_vm1, %v1200_v15, 0.0  ;;  %v1114_v3 = vsel %vm1024_vm1, %v2256_v47, 0.0 }
 0x132   : > { %v1290_v29 = vadd.f32 %v1289_v52, %v1288_v23  ;;  %v1095_v30 = vadd.f32 %v1094_v24, %v1093_v21  ;;  %v1202_v52 = vmul.f32 %v2263_v62, %v2263_v62  ;;  %v1116_v62 = vsel %vm1024_vm1, %v2281_v31, 0.0 }
 0x134   : > { %v1097_v37 = vadd.f32 %v1096_v25, %v1095_v30  ;;  %v1292_v38 = vadd.f32 %v1291_v34, %v1290_v29  ;;  %v1307_v25 = vsel %vm1024_vm1, %v1201_v19, 0.0  ;;  %v1203_v29 = vmul.f32 %v2256_v47, %v2256_v47 }
 0x135   : > { %v1309_v30 = vsel %vm1024_vm1, %v1202_v52, 0.0  ;;  %v1204_v34 = vmul.f32 %v2281_v31, %v2281_v31  ;;  %v1118_v47 = vsel %vm1024_vm1, %v2274_v26, 0.0  ;;  %v1120_v31 = vsel %vm1024_vm1, %v2299_v50, 0.0 }
 0x136   : > { %v1294_v45 = vadd.f32 %v1293_v9, %v1292_v38  ;;  %v1099_v49 = vadd.f32 %v1098_v39, %v1097_v37  ;;  %v1311_v38 = vsel %vm1024_vm1, %v1203_v29, 0.0  ;;  %v1205_v39 = vmul.f32 %v2274_v26, %v2274_v26 }
 0x137   : > { %v1122_v26 = vsel %vm1024_vm1, %v2292_v43, 0.0 }
 0x138   : > { %v1101_v32 = vadd.f32 %v1100_v40, %v1099_v49  ;;  %v1296_v59 = vadd.f32 %v1295_v53, %v1294_v45  ;;  %v1313_v40 = vsel %vm1024_vm1, %v1204_v34, 0.0  ;;  %v1206_v45 = vmul.f32 %v2299_v50, %v2299_v50 }
 0x139   : > { %v1315_v61 = vsel %vm1024_vm1, %v1205_v39, 0.0  ;;  %v1124_v50 = vsel %vm1024_vm1, %v2317_v12, 0.0 }
 0x13a   : > { %v1298_v5 = vadd.f32 %v1297_v55, %v1296_v59  ;;  %v1103_v10 = vadd.f32 %v1102_v63, %v1101_v32  ;;  %v1207_v32 = vmul.f32 %v2292_v43, %v2292_v43  ;;  %v1317_v59 = vsel %vm1024_vm1, %v1206_v45, 0.0 }
 0x13b   : > { %v1208_v63 = vmul.f32 %v2317_v12, %v2317_v12  ;;  %v1126_v43 = vsel %vm1024_vm1, %v2310_v6, 0.0  ;;  %v1128_v12 = vsel %vm1024_vm1, %v2335_v22, 0.0 }
 0x13c   : > { %v1105_v1 = vadd.f32 %v1104_v4, %v1103_v10  ;;  %v1300_v2 = vadd.f32 %v1299_v11, %v1298_v5  ;;  %v1319_v14 = vsel %vm1024_vm1, %v1207_v32, 0.0 }
 0x13d   : > { %v1321_v15 = vsel %vm1024_vm1, %v1208_v63, 0.0 }
 0x13e   : > { %v1302_v46 = vadd.f32 %v1301_v56, %v1300_v2  ;;  %v1107_v58 = vadd.f32 %v1106_v28, %v1105_v1  ;;  %v1209_v56 = vmul.f32 %v2310_v6, %v2310_v6  ;;  %v1210_v1 = vmul.f32 %v2335_v22, %v2335_v22 }
 0x13f   : > { %v1130_v6 = vsel %vm1024_vm1, %v2328_v17, 0.0  ;;  %v1132_v22 = vsel %vm1024_vm1, %v2355_v41, 0.0 }
 0x140   : > { %v1109_v13 = vadd.f32 %v1108_v48, %v1107_v58  ;;  %v1304_v21 = vadd.f32 %v1303_v60, %v1302_v46  ;;  %v1323_v58 = vsel %vm1024_vm1, %v1209_v56, 0.0  ;;  %v1211_v60 = vmul.f32 %v2328_v17, %v2328_v17 }
 0x141   : > { %v1325_v19 = vsel %vm1024_vm1, %v1210_v1, 0.0  ;;  %v1134_v17 = vsel %vm1024_vm1, %v2346_v36, 0.0 }
 0x142   : > { %v1306_v23 = vadd.f32 %v1305_v20, %v1304_v21  ;;  %v1111_v24 = vadd.f32 %v1110_v42, %v1109_v13  ;;  %v1212_v20 = vmul.f32 %v2355_v41, %v2355_v41  ;;  %v1136_v41 = vsel %vm1024_vm1, %v2373_v8, 0.0 }
 0x144   : > { %v1113_v35 = vadd.f32 %v1112_v7, %v1111_v24  ;;  %v1308_v9 = vadd.f32 %v1307_v25, %v1306_v23  ;;  %v1327_v7 = vsel %vm1024_vm1, %v1211_v60, 0.0  ;;  %v1213_v23 = vmul.f32 %v2346_v36, %v2346_v36 }
 0x145   : > { %v1329_v24 = vsel %vm1024_vm1, %v1212_v20, 0.0  ;;  %v1214_v25 = vmul.f32 %v2373_v8, %v2373_v8  ;;  %v1138_v36 = vsel %vm1024_vm1, %v2368_v0, 0.0  ;;  %v1140_v8 = vsel %vm1024_vm1, %v2393_v16, 0.0 }
 0x146   : > { %v1310_v18 = vadd.f32 %v1309_v30, %v1308_v9  ;;  %v1115_v37 = vadd.f32 %v1114_v3, %v1113_v35  ;;  %v1331_v9 = vsel %vm1024_vm1, %v1213_v23, 0.0  ;;  %v1215_v3 = vmul.f32 %v2368_v0, %v2368_v0 }
 0x147   : > { %v1142_v0 = vsel %vm1024_vm1, %v2388_v57, 0.0 }
 0x148   : > { %v1117_v49 = vadd.f32 %v1116_v62, %v1115_v37  ;;  %v1312_v53 = vadd.f32 %v1311_v38, %v1310_v18  ;;  %v1333_v62 = vsel %vm1024_vm1, %v1214_v25, 0.0  ;;  %v1216_v18 = vmul.f32 %v2393_v16, %v2393_v16 }
 0x149   : > { %v1335_v45 = vsel %vm1024_vm1, %v1215_v3, 0.0  ;;  %v1144_v16 = vsel %vm1024_vm1, %v2413_v33, 0.0 }
 0x14a   : > { %v1314_v54 = vadd.f32 %v1313_v40, %v1312_v53  ;;  %v1119_v55 = vadd.f32 %v1118_v47, %v1117_v49  ;;  %v1217_v49 = vmul.f32 %v2388_v57, %v2388_v57  ;;  %v1337_v53 = vsel %vm1024_vm1, %v1216_v18, 0.0 }
 0x14b   : > { %v1218_v47 = vmul.f32 %v2413_v33, %v2413_v33  ;;  %v1146_v57 = vsel %vm1024_vm1, %v2408_v27, 0.0  ;;  %v1148_v33 = vsel %vm1024_vm1, %v2433_v51, 0.0 }
 0x14c   : > { %v1121_v4 = vadd.f32 %v1120_v31, %v1119_v55  ;;  %v1316_v5 = vadd.f32 %v1315_v61, %v1314_v54  ;;  %v1339_v32 = vsel %vm1024_vm1, %v1217_v49, 0.0 }
 0x14d   : > { %v1341_v63 = vsel %vm1024_vm1, %v1218_v47, 0.0 }
 0x14e   : > { %v1318_v10 = vadd.f32 %v1317_v59, %v1316_v5  ;;  %v1123_v11 = vadd.f32 %v1122_v26, %v1121_v4  ;;  %v1219_v59 = vmul.f32 %v2408_v27, %v2408_v27  ;;  %v1220_v4 = vmul.f32 %v2433_v51, %v2433_v51 }
 0x150   : > { %v1125_v2 = vadd.f32 %v1124_v50, %v1123_v11  ;;  %v1320_v28 = vadd.f32 %v1319_v14, %v1318_v10  ;;  %v1343_v11 = vsel %vm1024_vm1, %v1219_v59, 0.0  ;;  %v1221_v14 = vmul.f32 %v2428_v44, %v2428_v44 }
 0x151   : > { %v1345_v56 = vsel %vm1024_vm1, %v1220_v4, 0.0 }
 0x152   : > { %v1322_v48 = vadd.f32 %v1321_v15, %v1320_v28  ;;  %v1127_v46 = vadd.f32 %v1126_v43, %v1125_v2  ;;  %v1150_v2 = vsel %vm1024_vm1, %v2428_v44, 0.0  ;;  %v1347_v43 = vsel %vm1024_vm1, %v1221_v14, 0.0 }
 0x154   : > { %v1129_v52 = vadd.f32 %v1128_v12, %v1127_v46  ;;  %v1324_v13 = vadd.f32 %v1323_v58, %v1322_v48 }
 0x156   : > { %v1326_v21 = vadd.f32 %v1325_v19, %v1324_v13  ;;  %v1131_v42 = vadd.f32 %v1130_v6, %v1129_v52 }
 0x158   : > { %v1133_v29 = vadd.f32 %v1132_v22, %v1131_v42  ;;  %v1328_v30 = vadd.f32 %v1327_v7, %v1326_v21 }
 0x15a   : > { %v1330_v34 = vadd.f32 %v1329_v24, %v1328_v30  ;;  %v1135_v35 = vadd.f32 %v1134_v17, %v1133_v29 }
 0x15c   : > { %v1137_v37 = vadd.f32 %v1136_v41, %v1135_v35  ;;  %v1332_v38 = vadd.f32 %v1331_v9, %v1330_v34 }
 0x15e   : > { %v1334_v39 = vadd.f32 %v1333_v62, %v1332_v38  ;;  %v1139_v40 = vadd.f32 %v1138_v36, %v1137_v37 }
 0x160   : > { %v1141_v31 = vadd.f32 %v1140_v8, %v1139_v40  ;;  %v1336_v54 = vadd.f32 %v1335_v45, %v1334_v39 }
 0x162   : > { %v1338_v55 = vadd.f32 %v1337_v53, %v1336_v54  ;;  %v1143_v61 = vadd.f32 %v1142_v0, %v1141_v31 }
 0x164   : > { %v1145_v5 = vadd.f32 %v1144_v16, %v1143_v61  ;;  %v1340_v26 = vadd.f32 %v1339_v32, %v1338_v55 }
 0x166   : > { %v1342_v50 = vadd.f32 %v1341_v63, %v1340_v26  ;;  %v1147_v10 = vadd.f32 %v1146_v57, %v1145_v5 }
 0x168   : > { %v1149_v15 = vadd.f32 %v1148_v33, %v1147_v10  ;;  %v1344_v1 = vadd.f32 %v1343_v11, %v1342_v50 }
 0x16a   : > { %v1151_v28 = vadd.f32 %v1150_v2, %v1149_v15  ;;  %v1346_v27 = vadd.f32 %v1345_v56, %v1344_v1 }
 0x16c   : > { %v1152_v51 = vrot.slane %v1151_v28, 4  ;;  %v1348_v12 = vadd.f32 %v1347_v43, %v1346_v27 }
 0x16e   : > { %v1153_v48 = vadd.f32 %v1152_v51, %v1151_v28  ;;  %v1349_v46 = vrot.slane %v1348_v12, 4 }
 0x170   : > { %v1154_v58 = vrot.slane %v1153_v48, 2  ;;  %v1350_v60 = vadd.f32 %v1349_v46, %v1348_v12 }
 0x172   : > { %v1155_v19 = vadd.f32 %v1154_v58, %v1153_v48  ;;  %v1351_v20 = vrot.slane %v1350_v60, 2 }
 0x174   : > { %v1156_v52 = vrot.slane %v1155_v19, 1  ;;  %v1352_v13 = vadd.f32 %v1351_v20, %v1350_v60 }
 0x176   : > { %v1353_v6 = vrot.slane %v1352_v13, 1  ;;  %v1157_v44 = vadd.f32 %v1156_v52, %v1155_v19 }
 0x178   : > { %v1354_v22 = vadd.f32 %v1353_v6, %v1352_v13 }
 0x17a   : > { %v1356_v21 = vsel %vm1355_vm2, %v1157_v44, %v1354_v22 }
 0x17b   : > { %1358 = vst.msk [vmem:[%s238_s12] sm:$0x3] %vm1357_vm3, %v1356_v21 }
 0x17c PF: > { %s16_s18 = sadd.s32 1, %s1767_s18  }
 0x17d   : > { %p13_p5 = scmp.ge.s32.totalorder %s16_s18, 4  }
 0x17f   :  { %15 = sbr.rel (!%p13_p5) target bundleno = 1 (0x1), region = 78 }

// kernel: bottleneck_pallas_nhwc.7
= control target key start
LH: loop header
LB: loop body
LE: loop exit
PB: predicated region body
PF: predicated region fallthrough
CT: control target
= control target key end

     0   :  { %s2945_s18 = smov 0   ;;  %s4165_s0 = inlined_call_operand.vmem [shape: f32[4,16,16,8], index: 0, kind: input, shape index: {}]   ;;  %s4166_s1 = inlined_call_operand.vmem [shape: f32[1,8], index: 1, kind: input, shape index: {}]   ;;  %s4167_s2 = inlined_call_operand.vmem [shape: f32[1,8], index: 2, kind: input, shape index: {}]   ;;  %s4168_s3 = inlined_call_operand.vmem [shape: f32[72,8], index: 3, kind: input, shape index: {}]   ;;  %s4169_s4 = inlined_call_operand.vmem [shape: f32[4,16,16,8], index: 4, kind: output, shape index: {0}]   ;;  %s4170_s5 = inlined_call_operand.vmem [shape: f32[4,2,8], index: 5, kind: output, shape index: {1}]  }
   0x1 LB: > { %s2698_s19 = sadd.s32 4294967295, %s2904_s18   ;;  %p2702_p0 = scmp.ge.s32.totalorder %s2904_s18, 1  ;;  %s2904_s18 = sphi %s2945_s18, %s16_s18  }
   0x2   : > { %p190_p1 = scmp.lt.s32.totalorder %s2904_s18, 5 }
   0x4   : > { %p191_p2 = pnand %p2702_p0, %p190_p1 }
   0x5   : > { %vm346_vm0 = vcmask (!%p191_p2), 64512   ;;  %vm349_vm1 = vcmask (!%p191_p2), 58368   ;;  %p2955_p3 = scmp.lt.s32.totalorder (!%p191_p2), %s2698_s19, 3  ;;  %v2906_v0 = vmov (!%p191_p2), 0.0   ;;  %v3023_v1 = vld [vmem:[%s4166_s1] ss:$0 sm:$0xff] (!%p191_p2) }
   0x6   : > { %194 = sbr.rel (%p191_p2) target bundleno = 906 (0x38a), region = 36  ;;  %347 = vst.msk [vmem:[#allocation2] sm:$0xff] (!%p191_p2), %vm346_vm0, %v2906_v0  ;;  %348 = vst.msk [vmem:[#allocation2 + $0x8] sm:$0xff] (!%p191_p2), %vm346_vm0, %v2906_v0  ;;  %v3035_v2 = vld [vmem:[%s4167_s2] ss:$0 sm:$0xff] (!%p191_p2)  ;;  %s2907_s29 = smov (!%p191_p2), 8  }
   0x7   : > { %351 = vst.msk [vmem:[#allocation2 + $0x18] sm:$0xff] (!%p191_p2), %vm346_vm0, %v2906_v0  ;;  %352 = vst.msk [vmem:[#allocation2 + $0x20] sm:$0xff] (!%p191_p2), %vm346_vm0, %v2906_v0  ;;  %s2908_s30 = smov (!%p191_p2), 16   ;;  %vm659_vm2 = vcmask (!%p191_p2), 130112   ;;  %s2909_s6 = smov (!%p191_p2), 24   ;;  %vm852_vm3 = vcmask (!%p191_p2), 195712  }
   0x8   : > { %354 = vst.msk [vmem:[#allocation2 + $0x30] sm:$0xff] (!%p191_p2), %vm346_vm0, %v2906_v0  ;;  %355 = vst.msk [vmem:[#allocation2 + $0x38] sm:$0xff] (!%p191_p2), %vm346_vm0, %v2906_v0  ;;  %s2910_s7 = smov (!%p191_p2), 32   ;;  %s2911_s8 = smov (!%p191_p2), 40   ;;  %vm1045_vm4 = vcmask (!%p191_p2), 261312   ;;  %vm1238_vm5 = vcmask (!%p191_p2), 326912  }
   0x9   : > { %357 = vst.msk [vmem:[#allocation2 + $0x48] sm:$0xff] (!%p191_p2), %vm346_vm0, %v2906_v0  ;;  %358 = vst.msk [vmem:[#allocation2 + $0x50] sm:$0xff] (!%p191_p2), %vm346_vm0, %v2906_v0  ;;  %s2912_s13 = smov (!%p191_p2), 48   ;;  %s2913_s20 = smov (!%p191_p2), 56   ;;  %vm1431_vm6 = vcmask (!%p191_p2), 392512   ;;  %vm1625_vm7 = vcmask (!%p191_p2), 458112  }
   0xa   : > { %360 = vst.msk [vmem:[#allocation2 + $0x60] sm:$0xff] (!%p191_p2), %vm346_vm0, %v2906_v0  ;;  %361 = vst.msk [vmem:[#allocation2 + $0x68] sm:$0xff] (!%p191_p2), %vm346_vm0, %v2906_v0  ;;  %s2914_s11 = smov (!%p191_p2), 64   ;;  %vm1818_vm8 = vcmask (!%p191_p2), 523712   ;;  %vm2011_vm9 = vcmask (!%p191_p2), 589312   ;;  %vm2085_vm10 = vcmask (!%p191_p2), 588800  }
   0xb   : > { %363 = vst.msk [vmem:[#allocation2 + $0x78] sm:$0xff] (!%p191_p2), %vm346_vm0, %v2906_v0  ;;  %364 = vst.msk [vmem:[#allocation2 + $0x80] sm:$0xff] (!%p191_p2), %vm346_vm0, %v2906_v0  ;;  %vm2577_vm11 = vcmask (!%p191_p2), 1040384  }
   0xc   : > { %366 = vst.msk [vmem:[#allocation2 + $0x90] sm:$0xff] (!%p191_p2), %vm346_vm0, %v2906_v0  ;;  %367 = vst.msk [vmem:[#allocation2 + $0x98] sm:$0xff] (!%p191_p2), %vm346_vm0, %v2906_v0 }
   0xd   : > { %369 = vst.msk [vmem:[#allocation2 + $0xa8] sm:$0xff] %vm346_vm0, %v2906_v0  ;;  %370 = vst.msk [vmem:[#allocation2 + $0xb0] sm:$0xff] %vm346_vm0, %v2906_v0  ;;  %s4173_s19 = smov (!%p2955_p3, %s2698_s19), 3  ;;  %v499_v12 = vld [vmem:[#allocation2 + $0x1] sm:$0xff] }
   0xe   : > { %372 = vst.msk [vmem:[#allocation2 + $0xc0] sm:$0xff] %vm346_vm0, %v2906_v0  ;;  %373 = vst.msk [vmem:[#allocation2 + $0xc8] sm:$0xff] %vm346_vm0, %v2906_v0  ;;  %s2744_s21 = sshll.u32 %s4173_s19, 8  ;;  %563 = vrot.lane.b32.xlu0 %v499_v12, %s2907_s29 }
   0xf   : > { %375 = vst.msk [vmem:[#allocation2 + $0xd8] sm:$0xff] %vm346_vm0, %v2906_v0  ;;  %376 = vst.msk [vmem:[#allocation2 + $0xe0] sm:$0xff] %vm346_vm0, %v2906_v0  ;;  %s3030_s26 = scalar_lea.vmem %s4165_s0, %s2744_s21 }
  0x10   : > { %378 = vst.msk [vmem:[#allocation2 + $0xf0] sm:$0xff] %vm346_vm0, %v2906_v0  ;;  %379 = vst.msk [vmem:[#allocation2 + $0xf8] sm:$0xff] %vm346_vm0, %v2906_v0  ;;  %v236_v3 = vld [vmem:[%s3030_s26] sm:$0xff]  ;;  %v238_v4 = vld [vmem:[%s3030_s26 + $0x10] sm:$0xff] }
  0x11   : > { %381 = vst.msk [vmem:[#allocation2 + $0x108] sm:$0xff] %vm346_vm0, %v2906_v0  ;;  %382 = vst.msk [vmem:[#allocation2 + $0x110] sm:$0xff] %vm346_vm0, %v2906_v0  ;;  %v237_v5 = vld [vmem:[%s3030_s26 + $0x8] sm:$0xff]  ;;  %v275_v6 = vmul.f32 %v3023_v1, %v236_v3  ;;  %v277_v7 = vmul.f32 %v3023_v1, %v238_v4  ;;  %v240_v9 = vld [vmem:[%s3030_s26 + $0x20] sm:$0xff] }
  0x12   : > { %384 = vst.msk [vmem:[#allocation2 + $0x120] sm:$0xff] %vm346_vm0, %v2906_v0  ;;  %385 = vst.msk [vmem:[#allocation2 + $0x128] sm:$0xff] %vm346_vm0, %v2906_v0  ;;  %v276_v8 = vmul.f32 %v3023_v1, %v237_v5  ;;  %v239_v10 = vld [vmem:[%s3030_s26 + $0x18] sm:$0xff]  ;;  %v242_v11 = vld [vmem:[%s3030_s26 + $0x30] sm:$0xff]  ;;  %v279_v14 = vmul.f32 %v3023_v1, %v240_v9 }
  0x13   : > { %387 = vst.msk [vmem:[#allocation2 + $0x138] sm:$0xff] %vm346_vm0, %v2906_v0  ;;  %388 = vst.msk [vmem:[#allocation2 + $0x140] sm:$0xff] %vm346_vm0, %v2906_v0  ;;  %v278_v15 = vmul.f32 %v3023_v1, %v239_v10  ;;  %v281_v16 = vmul.f32 %v3023_v1, %v242_v11  ;;  %v241_v17 = vld [vmem:[%s3030_s26 + $0x28] sm:$0xff]  ;;  %v314_v18 = vadd.f32 %v3035_v2, %v275_v6  ;;  %v244_v22 = vld [vmem:[%s3030_s26 + $0x40] sm:$0xff] }
  0x14   : > { %390 = vst.msk [vmem:[#allocation2 + $0x150] sm:$0xff] %vm346_vm0, %v2906_v0  ;;  %391 = vst.msk [vmem:[#allocation2 + $0x158] sm:$0xff] %vm346_vm0, %v2906_v0  ;;  %v316_v19 = vadd.f32 %v3035_v2, %v277_v7  ;;  %v315_v20 = vadd.f32 %v3035_v2, %v276_v8  ;;  %v280_v21 = vmul.f32 %v3023_v1, %v241_v17  ;;  %v243_v23 = vld [vmem:[%s3030_s26 + $0x38] sm:$0xff]  ;;  %v246_v24 = vld [vmem:[%s3030_s26 + $0x50] sm:$0xff] }
  0x15   : > { %393 = vst.msk [vmem:[#allocation2 + $0x168] sm:$0xff] %vm346_vm0, %v2906_v0  ;;  %394 = vst.msk [vmem:[#allocation2 + $0x170] sm:$0xff] %vm346_vm0, %v2906_v0  ;;  %v318_v25 = vadd.f32 %v3035_v2, %v279_v14  ;;  %v317_v26 = vadd.f32 %v3035_v2, %v278_v15  ;;  %v320_v27 = vadd.f32 %v3035_v2, %v281_v16  ;;  %v245_v29 = vld [vmem:[%s3030_s26 + $0x48] sm:$0xff]  ;;  %v248_v30 = vld [vmem:[%s3030_s26 + $0x60] sm:$0xff] }
  0x16   : > { %396 = vst.msk [vmem:[#allocation2 + $0x180] sm:$0xff] %vm346_vm0, %v2906_v0  ;;  %397 = vst.msk [vmem:[#allocation2 + $0x188] sm:$0xff] %vm346_vm0, %v2906_v0  ;;  %v283_v28 = vmul.f32 %v3023_v1, %v244_v22  ;;  %v247_v31 = vld [vmem:[%s3030_s26 + $0x58] sm:$0xff]  ;;  %v319_v32 = vadd.f32 %v3035_v2, %v280_v21  ;;  %v282_v33 = vmul.f32 %v3023_v1, %v243_v23  ;;  %v250_v36 = vld [vmem:[%s3030_s26 + $0x70] sm:$0xff] }
  0x17   : > { %399 = vst.msk [vmem:[#allocation2 + $0x198] sm:$0xff] %vm346_vm0, %v2906_v0  ;;  %400 = vst.msk [vmem:[#allocation2 + $0x1a0] sm:$0xff] %vm346_vm0, %v2906_v0  ;;  %v285_v34 = vmul.f32 %v3023_v1, %v246_v24  ;;  %v284_v35 = vmul.f32 %v3023_v1, %v245_v29  ;;  %v249_v37 = vld [vmem:[%s3030_s26 + $0x68] sm:$0xff]  ;;  %v252_v38 = vld [vmem:[%s3030_s26 + $0x80] sm:$0xff]  ;;  %v287_v40 = vmul.f32 %v3023_v1, %v248_v30 }
  0x18   : > { %350 = vst.msk [vmem:[#allocation2 + $0x10] sm:$0x3] %vm349_vm1, %v2906_v0  ;;  %353 = vst.msk [vmem:[#allocation2 + $0x28] sm:$0x3] %vm349_vm1, %v2906_v0  ;;  %v322_v39 = vadd.f32 %v3035_v2, %v283_v28  ;;  %v286_v41 = vmul.f32 %v3023_v1, %v247_v31  ;;  %v289_v42 = vmul.f32 %v3023_v1, %v250_v36  ;;  %v251_v43 = vld [vmem:[%s3030_s26 + $0x78] sm:$0xff]  ;;  %v254_v44 = vld [vmem:[%s3030_s26 + $0x90] sm:$0xff] }
  0x19   : > { %356 = vst.msk [vmem:[#allocation2 + $0x40] sm:$0x3] %vm349_vm1, %v2906_v0  ;;  %359 = vst.msk [vmem:[#allocation2 + $0x58] sm:$0x3] %vm349_vm1, %v2906_v0  ;;  %v253_v45 = vld [vmem:[%s3030_s26 + $0x88] sm:$0xff]  ;;  %v321_v46 = vadd.f32 %v3035_v2, %v282_v33  ;;  %v324_v47 = vadd.f32 %v3035_v2, %v285_v34  ;;  %v323_v48 = vadd.f32 %v3035_v2, %v284_v35  ;;  %v256_v50 = vld [vmem:[%s3030_s26 + $0xa0] sm:$0xff] }
  0x1a   : > { %362 = vst.msk [vmem:[#allocation2 + $0x70] sm:$0x3] %vm349_vm1, %v2906_v0  ;;  %365 = vst.msk [vmem:[#allocation2 + $0x88] sm:$0x3] %vm349_vm1, %v2906_v0  ;;  %v288_v49 = vmul.f32 %v3023_v1, %v249_v37  ;;  %v255_v51 = vld [vmem:[%s3030_s26 + $0x98] sm:$0xff]  ;;  %v258_v52 = vld [vmem:[%s3030_s26 + $0xb0] sm:$0xff]  ;;  %v326_v53 = vadd.f32 %v3035_v2, %v287_v40  ;;  %v325_v54 = vadd.f32 %v3035_v2, %v286_v41 }
  0x1b   : > { %368 = vst.msk [vmem:[#allocation2 + $0xa0] sm:$0x3] %vm349_vm1, %v2906_v0  ;;  %371 = vst.msk [vmem:[#allocation2 + $0xb8] sm:$0x3] %vm349_vm1, %v2906_v0  ;;  %v328_v55 = vadd.f32 %v3035_v2, %v289_v42  ;;  %v291_v56 = vmul.f32 %v3023_v1, %v252_v38  ;;  %v257_v57 = vld [vmem:[%s3030_s26 + $0xa8] sm:$0xff]  ;;  %v290_v59 = vmul.f32 %v3023_v1, %v251_v43  ;;  %v260_v62 = vld [vmem:[%s3030_s26 + $0xc0] sm:$0xff] }
  0x1c   : > { %374 = vst.msk [vmem:[#allocation2 + $0xd0] sm:$0x3] %vm349_vm1, %v2906_v0  ;;  %377 = vst.msk [vmem:[#allocation2 + $0xe8] sm:$0x3] %vm349_vm1, %v2906_v0  ;;  %v327_v58 = vadd.f32 %v3035_v2, %v288_v49  ;;  %v293_v60 = vmul.f32 %v3023_v1, %v254_v44  ;;  %v292_v61 = vmul.f32 %v3023_v1, %v253_v45  ;;  %v259_v63 = vld [vmem:[%s3030_s26 + $0xb8] sm:$0xff]  ;;  %v262_v6 = vld [vmem:[%s3030_s26 + $0xd0] sm:$0xff] }
  0x1d   : > { %380 = vst.msk [vmem:[#allocation2 + $0x100] sm:$0x3] %vm349_vm1, %v2906_v0  ;;  %383 = vst.msk [vmem:[#allocation2 + $0x118] sm:$0x3] %vm349_vm1, %v2906_v0  ;;  %v295_v3 = vmul.f32 %v3023_v1, %v256_v50  ;;  %v294_v4 = vmul.f32 %v3023_v1, %v255_v51  ;;  %v297_v5 = vmul.f32 %v3023_v1, %v258_v52  ;;  %v261_v7 = vld [vmem:[%s3030_s26 + $0xc8] sm:$0xff]  ;;  %v264_v8 = vld [vmem:[%s3030_s26 + $0xe0] sm:$0xff] }
  0x1e   : > { %386 = vst.msk [vmem:[#allocation2 + $0x130] sm:$0x3] %vm349_vm1, %v2906_v0  ;;  %389 = vst.msk [vmem:[#allocation2 + $0x148] sm:$0x3] %vm349_vm1, %v2906_v0  ;;  %v329_v9 = vadd.f32 %v3035_v2, %v290_v59  ;;  %v332_v10 = vadd.f32 %v3035_v2, %v293_v60  ;;  %v331_v11 = vadd.f32 %v3035_v2, %v292_v61  ;;  %v435_v14 = vld [vmem:[#allocation2] sm:$0xff]  ;;  %v436_v15 = vld [vmem:[#allocation2 + $0x8] sm:$0xff] }
  0x1f   : > { %392 = vst.msk [vmem:[#allocation2 + $0x160] sm:$0x3] %vm349_vm1, %v2906_v0  ;;  %395 = vst.msk [vmem:[#allocation2 + $0x178] sm:$0x3] %vm349_vm1, %v2906_v0  ;;  %v500_v13 = vld [vmem:[#allocation2 + $0x9] sm:$0xff]  ;;  %v296_v12 = vmul.f32 %v3023_v1, %v257_v57  ;;  %v299_v21 = vmul.f32 %v3023_v1, %v260_v62  ;;  %v298_v24 = vmul.f32 %v3023_v1, %v259_v63 }
  0x20   : > { %398 = vst.msk [vmem:[#allocation2 + $0x190] sm:$0x3] %vm349_vm1, %v2906_v0  ;;  %401 = vst.msk [vmem:[#allocation2 + $0x1a8] sm:$0x3] %vm349_vm1, %v2906_v0  ;;  %565 = vrot.lane.b32.xlu0 %v500_v13, %s2907_s29  ;;  %v330_v0 = vadd.f32 %v3035_v2, %v291_v56  ;;  %v263_v13 = vld [vmem:[%s3030_s26 + $0xd8] sm:$0xff]  ;;  %v265_v22 = vld [vmem:[%s3030_s26 + $0xe8] sm:$0xff]  ;;  %v300_v29 = vmul.f32 %v3023_v1, %v261_v7  ;;  %v303_v30 = vmul.f32 %v3023_v1, %v264_v8 }
  0x21   : > { %403 = vst.msk [vmem:[#allocation2 + $0x19] sm:$0xff] %vm346_vm0, %v314_v18  ;;  %405 = vst.msk [vmem:[#allocation2 + $0x31] sm:$0xff] %vm346_vm0, %v316_v19  ;;  %v334_v18 = vadd.f32 %v3035_v2, %v295_v3  ;;  %v333_v19 = vadd.f32 %v3035_v2, %v294_v4  ;;  %v335_v23 = vadd.f32 %v3035_v2, %v296_v12 }
  0x22   : > { %404 = vst.msk [vmem:[#allocation2 + $0x21] sm:$0xff] %vm346_vm0, %v315_v20  ;;  %407 = vst.msk [vmem:[#allocation2 + $0x49] sm:$0xff] %vm346_vm0, %v318_v25  ;;  %v336_v20 = vadd.f32 %v3035_v2, %v297_v5  ;;  %v301_v25 = vmul.f32 %v3023_v1, %v262_v6  ;;  %v338_v28 = vadd.f32 %v3035_v2, %v299_v21 }
  0x23   : > { %406 = vst.msk [vmem:[#allocation2 + $0x39] sm:$0xff] %vm346_vm0, %v317_v26  ;;  %409 = vst.msk [vmem:[#allocation2 + $0x61] sm:$0xff] %vm346_vm0, %v320_v27  ;;  %v302_v31 = vmul.f32 %v3023_v1, %v263_v13  ;;  %v304_v34 = vmul.f32 %v3023_v1, %v265_v22  ;;  %v339_v35 = vadd.f32 %v3035_v2, %v300_v29 }
  0x24   : > { %408 = vst.msk [vmem:[#allocation2 + $0x51] sm:$0xff] %vm346_vm0, %v319_v32  ;;  %411 = vst.msk [vmem:[#allocation2 + $0x79] sm:$0xff] %vm346_vm0, %v322_v39  ;;  %v337_v32 = vadd.f32 %v3035_v2, %v298_v24  ;;  %v340_v33 = vadd.f32 %v3035_v2, %v301_v25  ;;  %v342_v36 = vadd.f32 %v3035_v2, %v303_v30 }
  0x25   : > { %410 = vst.msk [vmem:[#allocation2 + $0x69] sm:$0xff] %vm346_vm0, %v321_v46  ;;  %413 = vst.msk [vmem:[#allocation2 + $0x91] sm:$0xff] %vm346_vm0, %v324_v47  ;;  %v341_v37 = vadd.f32 %v3035_v2, %v302_v31  ;;  %v343_v1 = vadd.f32 %v3035_v2, %v304_v34  ;;  %v692_v34 = vld [vmem:[#allocation2 + $0x2] sm:$0xff] }
  0x26   : > { %412 = vst.msk [vmem:[#allocation2 + $0x81] sm:$0xff] %vm346_vm0, %v323_v48  ;;  %415 = vst.msk [vmem:[#allocation2 + $0xa9] sm:$0xff] %vm346_vm0, %v326_v53 }
  0x27   : > { %414 = vst.msk [vmem:[#allocation2 + $0x99] sm:$0xff] %vm346_vm0, %v325_v54  ;;  %417 = vst.msk [vmem:[#allocation2 + $0xc1] sm:$0xff] %vm346_vm0, %v328_v55 }
  0x28   : > { %416 = vst.msk [vmem:[#allocation2 + $0xb1] sm:$0xff] %vm346_vm0, %v327_v58  ;;  %v3125_v16 = vld [vmem:[#allocation2 + $0x19] sm:$0xff]  ;;  %v3127_v17 = vld [vmem:[#allocation2 + $0x31] sm:$0xff]  ;;  %419 = vst.msk [vmem:[#allocation2 + $0xd9] sm:$0xff] %vm346_vm0, %v330_v0 }
  0x29   : > { %467 = vst.msk [vmem:[#allocation3] sm:$0xff] %vm346_vm0, %v435_v14  ;;  %468 = vst.msk [vmem:[#allocation3 + $0x8] sm:$0xff] %vm346_vm0, %v436_v15  ;;  %567 = vrot.lane.b32.xlu1 %v3125_v16, %s2907_s29  ;;  %571 = vrot.lane.b32.xlu0 %v3127_v17, %s2907_s29  ;;  %v3147_v26 = vld [vmem:[#allocation2 + $0x21] sm:$0xff]  ;;  %v3149_v27 = vld [vmem:[#allocation2 + $0x49] sm:$0xff] }
  0x2a   : > { %418 = vst.msk [vmem:[#allocation2 + $0xc9] sm:$0xff] %vm346_vm0, %v329_v9  ;;  %421 = vst.msk [vmem:[#allocation2 + $0xf1] sm:$0xff] %vm346_vm0, %v332_v10  ;;  %v3173_v38 = vld [vmem:[#allocation2 + $0x39] sm:$0xff]  ;;  %v3175_v39 = vld [vmem:[#allocation2 + $0x61] sm:$0xff] }
  0x2b   : > { %420 = vst.msk [vmem:[#allocation2 + $0xe1] sm:$0xff] %vm346_vm0, %v331_v11  ;;  %423 = vst.msk [vmem:[#allocation2 + $0x109] sm:$0xff] %vm346_vm0, %v334_v18  ;;  %v3185_v40 = vld [vmem:[#allocation2 + $0x51] sm:$0xff]  ;;  %v3187_v2 = vld [vmem:[#allocation2 + $0x79] sm:$0xff] }
  0x2c   : > { %422 = vst.msk [vmem:[#allocation2 + $0xf9] sm:$0xff] %vm346_vm0, %v333_v19  ;;  %425 = vst.msk [vmem:[#allocation2 + $0x121] sm:$0xff] %vm346_vm0, %v336_v20  ;;  %v3193_v41 = vld [vmem:[#allocation2 + $0x69] sm:$0xff]  ;;  %v3195_v42 = vld [vmem:[#allocation2 + $0x91] sm:$0xff] }
  0x2d   : > { %424 = vst.msk [vmem:[#allocation2 + $0x111] sm:$0xff] %vm346_vm0, %v335_v23  ;;  %427 = vst.msk [vmem:[#allocation2 + $0x139] sm:$0xff] %vm346_vm0, %v338_v28  ;;  %569 = vrot.lane.b32.xlu1 %v3147_v26, %s2907_s29  ;;  %575 = vrot.lane.b32.xlu0 %v3149_v27, %s2907_s29  ;;  %v3201_v43 = vld [vmem:[#allocation2 + $0x81] sm:$0xff]  ;;  %v513_v44 = vld [vmem:[#allocation2 + $0xa9] sm:$0xff] }
  0x2e   : > { %426 = vst.msk [vmem:[#allocation2 + $0x129] sm:$0xff] %vm346_vm0, %v337_v32  ;;  %429 = vst.msk [vmem:[#allocation2 + $0x151] sm:$0xff] %vm346_vm0, %v340_v33  ;;  %v3203_v45 = vld [vmem:[#allocation2 + $0x18] sm:$0xff]  ;;  %v3207_v46 = vld [vmem:[#allocation2 + $0x30] sm:$0xff] }
  0x2f   : > { %428 = vst.msk [vmem:[#allocation2 + $0x141] sm:$0xff] %vm346_vm0, %v339_v35  ;;  %431 = vst.msk [vmem:[#allocation2 + $0x169] sm:$0xff] %vm346_vm0, %v342_v36  ;;  %v3209_v47 = vld [vmem:[#allocation2 + $0x99] sm:$0xff]  ;;  %v3215_v49 = vld [vmem:[#allocation2 + $0x48] sm:$0xff] }
  0x30   : > { %430 = vst.msk [vmem:[#allocation2 + $0x159] sm:$0xff] %vm346_vm0, %v341_v37  ;;  %432 = vst.msk [vmem:[#allocation2 + $0x171] sm:$0xff] %vm346_vm0, %v343_v1  ;;  %v3213_v48 = vld [vmem:[#allocation2 + $0x20] sm:$0xff]  ;;  %v3224_v51 = vld [vmem:[#allocation2 + $0x38] sm:$0xff] }
  0x31   : > { %573 = vrot.lane.b32.xlu1 %v3173_v38, %s2907_s29  ;;  %579 = vrot.lane.b32.xlu0 %v3175_v39, %s2907_s29  ;;  %469 = vst.msk [vmem:[#allocation3 + $0x10] sm:$0xff] %vm346_vm0, %v3203_v45  ;;  %471 = vst.msk [vmem:[#allocation3 + $0x20] sm:$0xff] %vm346_vm0, %v3207_v46  ;;  %v515_v50 = vld [vmem:[#allocation2 + $0xc1] sm:$0xff]  ;;  %v3232_v53 = vld [vmem:[#allocation2 + $0x50] sm:$0xff] }
  0x32   : > { %470 = vst.msk [vmem:[#allocation3 + $0x18] sm:$0xff] %vm346_vm0, %v3213_v48  ;;  %473 = vst.msk [vmem:[#allocation3 + $0x30] sm:$0xff] %vm346_vm0, %v3215_v49  ;;  %v3226_v52 = vld [vmem:[#allocation2 + $0x60] sm:$0xff]  ;;  %v3234_v54 = vld [vmem:[#allocation2 + $0x78] sm:$0xff] }
  0x33   : > { %472 = vst.msk [vmem:[#allocation3 + $0x28] sm:$0xff] %vm346_vm0, %v3224_v51  ;;  %475 = vst.msk [vmem:[#allocation3 + $0x40] sm:$0xff] %vm346_vm0, %v3226_v52  ;;  %v3236_v55 = vld [vmem:[#allocation2 + $0x68] sm:$0xff]  ;;  %v3244_v56 = vld [vmem:[#allocation2 + $0x90] sm:$0xff] }
  0x34   : > { %474 = vst.msk [vmem:[#allocation3 + $0x38] sm:$0xff] %vm346_vm0, %v3232_v53  ;;  %477 = vst.msk [vmem:[#allocation3 + $0x50] sm:$0xff] %vm346_vm0, %v3234_v54  ;;  %v3246_v57 = vld [vmem:[#allocation2 + $0x80] sm:$0xff]  ;;  %v3248_v58 = vld [vmem:[#allocation2 + $0xa8] sm:$0xff] }
  0x35   : > { %577 = vrot.lane.b32.xlu1 %v3185_v40, %s2907_s29  ;;  %583 = vrot.lane.b32.xlu0 %v3187_v2, %s2907_s29  ;;  %476 = vst.msk [vmem:[#allocation3 + $0x48] sm:$0xff] %vm346_vm0, %v3236_v55  ;;  %v514_v59 = vld [vmem:[#allocation2 + $0xb1] sm:$0xff]  ;;  %v517_v60 = vld [vmem:[#allocation2 + $0xd9] sm:$0xff]  ;;  %479 = vst.msk [vmem:[#allocation3 + $0x60] sm:$0xff] %vm346_vm0, %v3244_v56 }
  0x36   : > { %478 = vst.msk [vmem:[#allocation3 + $0x58] sm:$0xff] %vm346_vm0, %v3246_v57  ;;  %481 = vst.msk [vmem:[#allocation3 + $0x70] sm:$0xff] %vm346_vm0, %v3248_v58  ;;  %v3256_v61 = vld [vmem:[#allocation2 + $0x98] sm:$0xff]  ;;  %v3258_v62 = vld [vmem:[#allocation2 + $0xc0] sm:$0xff] }
  0x37   : > { %v3260_v63 = vld [vmem:[#allocation2 + $0xb0] sm:$0xff]  ;;  %480 = vst.msk [vmem:[#allocation3 + $0x68] sm:$0xff] %vm346_vm0, %v3256_v61  ;;  %483 = vst.msk [vmem:[#allocation3 + $0x80] sm:$0xff] %vm346_vm0, %v3258_v62  ;;  %v3271_v0 = vld [vmem:[#allocation2 + $0xd8] sm:$0xff] }
  0x38   : > { %482 = vst.msk [vmem:[#allocation3 + $0x78] sm:$0xff] %vm346_vm0, %v3260_v63  ;;  %v3273_v3 = vld [vmem:[#allocation2 + $0xc8] sm:$0xff]  ;;  %v3275_v4 = vld [vmem:[#allocation2 + $0xf0] sm:$0xff]  ;;  %485 = vst.msk [vmem:[#allocation3 + $0x90] sm:$0xff] %vm346_vm0, %v3271_v0 }
  0x39   : > { %581 = vrot.lane.b32.xlu1 %v3193_v41, %s2907_s29  ;;  %587 = vrot.lane.b32.xlu0 %v3195_v42, %s2907_s29  ;;  %484 = vst.msk [vmem:[#allocation3 + $0x88] sm:$0xff] %vm346_vm0, %v3273_v3  ;;  %487 = vst.msk [vmem:[#allocation3 + $0xa0] sm:$0xff] %vm346_vm0, %v3275_v4  ;;  %v3283_v5 = vld [vmem:[#allocation2 + $0xe0] sm:$0xff]  ;;  %v3285_v6 = vld [vmem:[#allocation2 + $0x108] sm:$0xff] }
  0x3a   : > { %v3287_v7 = vld [vmem:[#allocation2 + $0xf8] sm:$0xff]  ;;  %486 = vst.msk [vmem:[#allocation3 + $0x98] sm:$0xff] %vm346_vm0, %v3283_v5  ;;  %489 = vst.msk [vmem:[#allocation3 + $0xb0] sm:$0xff] %vm346_vm0, %v3285_v6  ;;  %v3295_v8 = vld [vmem:[#allocation2 + $0x120] sm:$0xff] }
  0x3b   : > { %488 = vst.msk [vmem:[#allocation3 + $0xa8] sm:$0xff] %vm346_vm0, %v3287_v7  ;;  %491 = vst.msk [vmem:[#allocation3 + $0xc0] sm:$0xff] %vm346_vm0, %v3295_v8  ;;  %v3301_v9 = vld [vmem:[#allocation2 + $0x110] sm:$0xff]  ;;  %v461_v12 = vld [vmem:[#allocation2 + $0x138] sm:$0xff] }
  0x3c   : > { %v516_v10 = vld [vmem:[#allocation2 + $0xc9] sm:$0xff]  ;;  %v519_v11 = vld [vmem:[#allocation2 + $0xf1] sm:$0xff]  ;;  %490 = vst.msk [vmem:[#allocation3 + $0xb8] sm:$0xff] %vm346_vm0, %v3301_v9  ;;  %493 = vst.msk [vmem:[#allocation3 + $0xd0] sm:$0xff] %vm346_vm0, %v461_v12 }
  0x3d   : > { %585 = vrot.lane.b32.xlu1 %v3201_v43, %s2907_s29  ;;  %591 = vrot.lane.b32.xlu0 %v513_v44, %s2907_s29  ;;  %v3308_v13 = vld [vmem:[#allocation2 + $0x128] sm:$0xff]  ;;  %v463_v18 = vld [vmem:[#allocation2 + $0x150] sm:$0xff]  ;;  %v462_v19 = vld [vmem:[#allocation2 + $0x140] sm:$0xff] }
  0x3e   : > { %v518_v14 = vld [vmem:[#allocation2 + $0xe1] sm:$0xff]  ;;  %v521_v15 = vld [vmem:[#allocation2 + $0x109] sm:$0xff]  ;;  %492 = vst.msk [vmem:[#allocation3 + $0xc8] sm:$0xff] %vm346_vm0, %v3308_v13  ;;  %495 = vst.msk [vmem:[#allocation3 + $0xe0] sm:$0xff] %vm346_vm0, %v463_v18 }
  0x3f   : > { %v520_v20 = vld [vmem:[#allocation2 + $0xf9] sm:$0xff]  ;;  %v523_v21 = vld [vmem:[#allocation2 + $0x121] sm:$0xff]  ;;  %494 = vst.msk [vmem:[#allocation3 + $0xd8] sm:$0xff] %vm346_vm0, %v462_v19  ;;  %v522_v24 = vld [vmem:[#allocation2 + $0x111] sm:$0xff] }
  0x40   : > { %v465_v22 = vld [vmem:[#allocation2 + $0x168] sm:$0xff]  ;;  %v464_v23 = vld [vmem:[#allocation2 + $0x158] sm:$0xff]  ;;  %v466_v28 = vld [vmem:[#allocation2 + $0x170] sm:$0xff] }
  0x41   : > { %589 = vrot.lane.b32.xlu1 %v3209_v47, %s2907_s29  ;;  %595 = vrot.lane.b32.xlu0 %v515_v50, %s2907_s29  ;;  %497 = vst.msk [vmem:[#allocation3 + $0xf0] sm:$0xff] %vm346_vm0, %v465_v22  ;;  %v525_v25 = vld [vmem:[#allocation2 + $0x139] sm:$0xff]  ;;  %496 = vst.msk [vmem:[#allocation3 + $0xe8] sm:$0xff] %vm346_vm0, %v464_v23  ;;  %v524_v29 = vld [vmem:[#allocation2 + $0x129] sm:$0xff] }
  0x42   : > { %v527_v30 = vld [vmem:[#allocation2 + $0x151] sm:$0xff]  ;;  %498 = vst.msk [vmem:[#allocation3 + $0xf8] sm:$0xff] %vm346_vm0, %v466_v28  ;;  %v526_v31 = vld [vmem:[#allocation2 + $0x141] sm:$0xff]  ;;  %v529_v32 = vld [vmem:[#allocation2 + $0x169] sm:$0xff] }
  0x43   : > { %v528_v33 = vld [vmem:[#allocation2 + $0x159] sm:$0xff]  ;;  %v530_v35 = vld [vmem:[#allocation2 + $0x171] sm:$0xff]  ;;  %v3339_v44 = vld [vmem:[#allocation2 + $0x22] sm:$0xff] }
  0x44   : > { %v3329_v36 = vld [vmem:[#allocation2 + $0x1a] sm:$0xff]  ;;  %v693_v37 = vld [vmem:[#allocation2 + $0xa] sm:$0xff]  ;;  %v3334_v1 = vld [vmem:[#allocation2 + $0x32] sm:$0xff] }
  0x45   : > { %593 = vrot.lane.b32.xlu1 %v514_v59, %s2907_s29  ;;  %599 = vrot.lane.b32.xlu0 %v517_v60, %s2907_s29  ;;  %v3341_v50 = vld [vmem:[#allocation2 + $0x4a] sm:$0xff]  ;;  %v3347_v59 = vld [vmem:[#allocation2 + $0x3a] sm:$0xff]  ;;  %v3349_v60 = vld [vmem:[#allocation2 + $0x62] sm:$0xff] }
  0x46   : > { %v3363_v12 = vld [vmem:[#allocation2 + $0x6a] sm:$0xff]  ;;  %v3379_v19 = vld [vmem:[#allocation2 + $0x9a] sm:$0xff] }
  0x47   : > { %v3373_v18 = vld [vmem:[#allocation2 + $0xaa] sm:$0xff]  ;;  %v710_v22 = vld [vmem:[#allocation2 + $0xda] sm:$0xff] }
  0x48   : > { %v3392_v23 = vld [vmem:[#allocation2 + $0xca] sm:$0xff] }
  0x49   : > { %597 = vrot.lane.b32.xlu1 %v516_v10, %s2907_s29  ;;  %603 = vrot.lane.b32.xlu0 %v519_v11, %s2907_s29  ;;  %v3355_v10 = vld [vmem:[#allocation2 + $0x52] sm:$0xff]  ;;  %v3357_v11 = vld [vmem:[#allocation2 + $0x7a] sm:$0xff]  ;;  %v714_v28 = vld [vmem:[#allocation2 + $0x10a] sm:$0xff] }
  0x4d   : > { %601 = vrot.lane.b32.xlu1 %v518_v14, %s2907_s29  ;;  %607 = vrot.lane.b32.xlu0 %v521_v15, %s2907_s29  ;;  %v3365_v14 = vld [vmem:[#allocation2 + $0x92] sm:$0xff]  ;;  %v3371_v15 = vld [vmem:[#allocation2 + $0x82] sm:$0xff] }
  0x51   : > { %605 = vrot.lane.b32.xlu1 %v520_v20, %s2907_s29  ;;  %611 = vrot.lane.b32.xlu0 %v523_v21, %s2907_s29  ;;  %v3381_v20 = vld [vmem:[#allocation2 + $0xc2] sm:$0xff]  ;;  %v3387_v21 = vld [vmem:[#allocation2 + $0xb2] sm:$0xff] }
  0x55   : > { %609 = vrot.lane.b32.xlu1 %v522_v24, %s2907_s29  ;;  %615 = vrot.lane.b32.xlu0 %v525_v25, %s2907_s29  ;;  %v712_v24 = vld [vmem:[#allocation2 + $0xf2] sm:$0xff]  ;;  %v711_v25 = vld [vmem:[#allocation2 + $0xe2] sm:$0xff] }
  0x59   : > { %613 = vrot.lane.b32.xlu1 %v524_v29, %s2907_s29  ;;  %619 = vrot.lane.b32.xlu0 %v527_v30, %s2907_s29  ;;  %v713_v29 = vld [vmem:[#allocation2 + $0xfa] sm:$0xff]  ;;  %v716_v30 = vld [vmem:[#allocation2 + $0x122] sm:$0xff] }
  0x5d   : > { %617 = vrot.lane.b32.xlu1 %v526_v31, %s2907_s29  ;;  %623 = vrot.lane.b32.xlu0 %v529_v32, %s2907_s29  ;;  %v715_v32 = vld [vmem:[#allocation2 + $0x112] sm:$0xff] }
  0x61   : > { %621 = vrot.lane.b32.xlu1 %v528_v33, %s2907_s29  ;;  %756 = vrot.lane.b32.xlu0 %v692_v34, %s2908_s30  ;;  %v718_v33 = vld [vmem:[#allocation2 + $0x13a] sm:$0xff] }
  0x65   : > { %625 = vrot.lane.b32.xlu1 %v530_v35, %s2907_s29  ;;  %760 = vrot.lane.b32.xlu0 %v3329_v36, %s2908_s30  ;;  %v717_v35 = vld [vmem:[#allocation2 + $0x12a] sm:$0xff] }
  0x69   : > { %758 = vrot.lane.b32.xlu1 %v693_v37, %s2908_s30  ;;  %764 = vrot.lane.b32.xlu0 %v3334_v1, %s2908_s30  ;;  %v720_v37 = vld [vmem:[#allocation2 + $0x152] sm:$0xff] }
  0x6d   : > { %762 = vrot.lane.b32.xlu1 %v3339_v44, %s2908_s30  ;;  %768 = vrot.lane.b32.xlu0 %v3341_v50, %s2908_s30 }
  0x71   : > { %766 = vrot.lane.b32.xlu1 %v3347_v59, %s2908_s30  ;;  %772 = vrot.lane.b32.xlu0 %v3349_v60, %s2908_s30 }
  0x75   : > { %770 = vrot.lane.b32.xlu1 %v3355_v10, %s2908_s30  ;;  %776 = vrot.lane.b32.xlu0 %v3357_v11, %s2908_s30 }
  0x79   : > { %774 = vrot.lane.b32.xlu1 %v3363_v12, %s2908_s30  ;;  %780 = vrot.lane.b32.xlu0 %v3365_v14, %s2908_s30 }
  0x7d   : > { %778 = vrot.lane.b32.xlu1 %v3371_v15, %s2908_s30  ;;  %784 = vrot.lane.b32.xlu0 %v3373_v18, %s2908_s30 }
  0x80   : > { %v564_v31 = vpop.permute.xlu0 %563 }
  0x81   : > { %782 = vrot.lane.b32.xlu1 %v3379_v19, %s2908_s30  ;;  %788 = vrot.lane.b32.xlu0 %v3381_v20, %s2908_s30  ;;  %660 = vst.msk [vmem:[#allocation3] sm:$0xff] %vm659_vm2, %v564_v31 }
  0x85   : > { %786 = vrot.lane.b32.xlu1 %v3387_v21, %s2908_s30  ;;  %792 = vrot.lane.b32.xlu0 %v710_v22, %s2908_s30  ;;  %v719_v22 = vld [vmem:[#allocation2 + $0x142] sm:$0xff] }
  0x89   : > { %790 = vrot.lane.b32.xlu1 %v3392_v23, %s2908_s30  ;;  %796 = vrot.lane.b32.xlu0 %v712_v24, %s2908_s30  ;;  %v722_v24 = vld [vmem:[#allocation2 + $0x16a] sm:$0xff] }
  0x8d   : > { %794 = vrot.lane.b32.xlu1 %v711_v25, %s2908_s30  ;;  %800 = vrot.lane.b32.xlu0 %v714_v28, %s2908_s30 }
  0x91   : > { %798 = vrot.lane.b32.xlu1 %v713_v29, %s2908_s30  ;;  %804 = vrot.lane.b32.xlu0 %v716_v30, %s2908_s30  ;;  %v721_v29 = vld [vmem:[#allocation2 + $0x15a] sm:$0xff] }
  0x92   : > { %v566_v34 = vpop.permute.xlu0 %565 }
  0x93   : > { %661 = vst.msk [vmem:[#allocation3 + $0x8] sm:$0xff] %vm659_vm2, %v566_v34 }
  0x95   : > { %802 = vrot.lane.b32.xlu1 %v715_v32, %s2908_s30  ;;  %808 = vrot.lane.b32.xlu0 %v718_v33, %s2908_s30  ;;  %v723_v32 = vld [vmem:[#allocation2 + $0x172] sm:$0xff] }
  0x99   : > { %806 = vrot.lane.b32.xlu1 %v717_v35, %s2908_s30  ;;  %812 = vrot.lane.b32.xlu0 %v720_v37, %s2908_s30 }
  0x9b   : > { %v568_v25 = vpop.permute.xlu1 %567  ;;  %v572_v28 = vpop.permute.xlu0 %571 }
  0x9c   : > { %662 = vst.msk [vmem:[#allocation3 + $0x10] sm:$0xff] %vm659_vm2, %v568_v25  ;;  %664 = vst.msk [vmem:[#allocation3 + $0x20] sm:$0xff] %vm659_vm2, %v572_v28 }
  0x9d   : > { %810 = vrot.lane.b32.xlu1 %v719_v22, %s2908_s30  ;;  %816 = vrot.lane.b32.xlu0 %v722_v24, %s2908_s30 }
  0x9f   : > { %v570_v30 = vpop.permute.xlu1 %569  ;;  %v576_v31 = vpop.permute.xlu0 %575 }
  0xa0   : > { %663 = vst.msk [vmem:[#allocation3 + $0x18] sm:$0xff] %vm659_vm2, %v570_v30  ;;  %666 = vst.msk [vmem:[#allocation3 + $0x30] sm:$0xff] %vm659_vm2, %v576_v31  ;;  %v2076_v31 = vld [vmem:[%s4168_s3] sm:$0xff] }
  0xa1   : > { %814 = vrot.lane.b32.xlu1 %v721_v29, %s2908_s30  ;;  %949 = vrot.lane.b32.xlu0 %v3203_v45, %s2909_s6 }
  0xa3   : > { %v574_v33 = vpop.permute.xlu1 %573  ;;  %v580_v34 = vpop.permute.xlu0 %579 }
  0xa4   : > { %665 = vst.msk [vmem:[#allocation3 + $0x28] sm:$0xff] %vm659_vm2, %v574_v33  ;;  %668 = vst.msk [vmem:[#allocation3 + $0x40] sm:$0xff] %vm659_vm2, %v580_v34 }
  0xa5   : > { %818 = vrot.lane.b32.xlu1 %v723_v32, %s2908_s30  ;;  %953 = vrot.lane.b32.xlu0 %v3207_v46, %s2909_s6 }
  0xa7   : > { %v578_v35 = vpop.permute.xlu1 %577  ;;  %v584_v37 = vpop.permute.xlu0 %583 }
  0xa8   : > { %667 = vst.msk [vmem:[#allocation3 + $0x38] sm:$0xff] %vm659_vm2, %v578_v35  ;;  %670 = vst.msk [vmem:[#allocation3 + $0x50] sm:$0xff] %vm659_vm2, %v584_v37  ;;  %v2079_v35 = vld [vmem:[%s4168_s3 + $0x18] sm:$0xff] }
  0xa9   : > { %951 = vrot.lane.b32.xlu1 %v3213_v48, %s2909_s6  ;;  %957 = vrot.lane.b32.xlu0 %v3215_v49, %s2909_s6 }
  0xab   : > { %v582_v45 = vpop.permute.xlu1 %581  ;;  %v588_v22 = vpop.permute.xlu0 %587 }
  0xac   : > { %669 = vst.msk [vmem:[#allocation3 + $0x48] sm:$0xff] %vm659_vm2, %v582_v45  ;;  %672 = vst.msk [vmem:[#allocation3 + $0x60] sm:$0xff] %vm659_vm2, %v588_v22 }
  0xad   : > { %955 = vrot.lane.b32.xlu1 %v3224_v51, %s2909_s6  ;;  %961 = vrot.lane.b32.xlu0 %v3226_v52, %s2909_s6 }
  0xaf   : > { %v586_v24 = vpop.permute.xlu1 %585  ;;  %v592_v25 = vpop.permute.xlu0 %591 }
  0xb0   : > { %671 = vst.msk [vmem:[#allocation3 + $0x58] sm:$0xff] %vm659_vm2, %v586_v24  ;;  %674 = vst.msk [vmem:[#allocation3 + $0x70] sm:$0xff] %vm659_vm2, %v592_v25 }
  0xb1   : > { %959 = vrot.lane.b32.xlu1 %v3232_v53, %s2909_s6  ;;  %965 = vrot.lane.b32.xlu0 %v3234_v54, %s2909_s6 }
  0xb3   : > { %v590_v48 = vpop.permute.xlu1 %589  ;;  %v596_v28 = vpop.permute.xlu0 %595 }
  0xb4   : > { %673 = vst.msk [vmem:[#allocation3 + $0x68] sm:$0xff] %vm659_vm2, %v590_v48  ;;  %676 = vst.msk [vmem:[#allocation3 + $0x80] sm:$0xff] %vm659_vm2, %v596_v28  ;;  %v2083_v28 = vld [vmem:[%s4168_s3 + $0x38] sm:$0xff] }
  0xb5   : > { %963 = vrot.lane.b32.xlu1 %v3236_v55, %s2909_s6  ;;  %1142 = vrot.lane.b32.xlu0 %v3125_v16, %s2910_s7  ;;  %v2077_v16 = vld [vmem:[%s4168_s3 + $0x8] sm:$0xff] }
  0xb6   : > { %v2853_v32 = vpack.c.bf16 %v2077_v16, %v2076_v31 }
  0xb7   : > { %v594_v29 = vpop.permute.xlu1 %593  ;;  %v600_v30 = vpop.permute.xlu0 %599 }
  0xb8   : > { %675 = vst.msk [vmem:[#allocation3 + $0x78] sm:$0xff] %vm659_vm2, %v594_v29  ;;  %678 = vst.msk [vmem:[#allocation3 + $0x90] sm:$0xff] %vm659_vm2, %v600_v30  ;;  %2854 = vmatprep.subr.bf16.mxu0 %v2853_v32  ;;  %2869 = vmatprep.subr.bf16.mxu1 %v2853_v32 }
  0xb9   : > { %967 = vrot.lane.b32.xlu1 %v3246_v57, %s2909_s6  ;;  %1335 = vrot.lane.b32.xlu0 %v3329_v36, %s2911_s8  ;;  %v2078_v36 = vld [vmem:[%s4168_s3 + $0x10] sm:$0xff] }
  0xba   : > { %2856 = vmatpush3.bf16.msra.mxu0 %v2853_v32  ;;  %v2857_v37 = vpack.c.bf16 %v2079_v35, %v2078_v36  ;;  %2874 = vmatpush3.bf16.msra.mxu1 %v2853_v32  ;;  %v2084_v32 = vld [vmem:[%s4168_s3 + $0x40] sm:$0xff] }
  0xbb   : > { %v598_v33 = vpop.permute.xlu1 %597  ;;  %v604_v34 = vpop.permute.xlu0 %603 }
  0xbc   : > { %677 = vst.msk [vmem:[#allocation3 + $0x88] sm:$0xff] %vm659_vm2, %v598_v33  ;;  %680 = vst.msk [vmem:[#allocation3 + $0xa0] sm:$0xff] %vm659_vm2, %v604_v34  ;;  %2858 = vmatprep.subr.bf16.mxu0 %v2857_v37  ;;  %2870 = vmatprep.subr.bf16.mxu1 %v2857_v37 }
  0xbd   : > { %1144 = vrot.lane.b32.xlu1 %v3147_v26, %s2910_s7  ;;  %1529 = vrot.lane.b32.xlu0 %v3207_v46, %s2912_s13  ;;  %v2080_v26 = vld [vmem:[%s4168_s3 + $0x20] sm:$0xff]  ;;  %v2081_v46 = vld [vmem:[%s4168_s3 + $0x28] sm:$0xff] }
  0xbe   : > { %2860 = vmatpush3.bf16.msra.mxu0 %v2857_v37  ;;  %v2861_v24 = vpack.c.bf16 %v2081_v46, %v2080_v26  ;;  %2875 = vmatpush3.bf16.msra.mxu1 %v2857_v37 }
  0xbf   : > { %v602_v45 = vpop.permute.xlu1 %601  ;;  %v608_v22 = vpop.permute.xlu0 %607 }
  0xc0   : > { %679 = vst.msk [vmem:[#allocation3 + $0x98] sm:$0xff] %vm659_vm2, %v602_v45  ;;  %682 = vst.msk [vmem:[#allocation3 + $0xb0] sm:$0xff] %vm659_vm2, %v608_v22  ;;  %2862 = vmatprep.subr.bf16.mxu0 %v2861_v24  ;;  %2871 = vmatprep.subr.bf16.mxu1 %v2861_v24 }
  0xc1   : > { %1337 = vrot.lane.b32.xlu1 %v3339_v44, %s2911_s8  ;;  %1722 = vrot.lane.b32.xlu0 %v3127_v17, %s2913_s20  ;;  %v2082_v44 = vld [vmem:[%s4168_s3 + $0x30] sm:$0xff] }
  0xc2   : > { %2864 = vmatpush3.bf16.msra.mxu0 %v2861_v24  ;;  %v2865_v29 = vpack.c.bf16 %v2083_v28, %v2082_v44  ;;  %2876 = vmatpush3.bf16.msra.mxu1 %v2861_v24 }
  0xc3   : > { %v606_v25 = vpop.permute.xlu1 %605  ;;  %v612_v48 = vpop.permute.xlu0 %611 }
  0xc4   : > { %681 = vst.msk [vmem:[#allocation3 + $0xa8] sm:$0xff] %vm659_vm2, %v606_v25  ;;  %684 = vst.msk [vmem:[#allocation3 + $0xc0] sm:$0xff] %vm659_vm2, %v612_v48  ;;  %2866 = vmatprep.subr.bf16.mxu0 %v2865_v29  ;;  %2872 = vmatprep.subr.bf16.mxu1 %v2865_v29 }
  0xc5   : > { %1531 = vrot.lane.b32.xlu1 %v3224_v51, %s2912_s13  ;;  %1724 = vrot.lane.b32.xlu0 %v3173_v38, %s2913_s20 }
  0xc6   : > { %2868 = vmatpush3.bf16.msra.mxu0 %v2865_v29  ;;  %2877 = vmatpush3.bf16.msra.mxu1 %v2865_v29 }
  0xc7   : > { %v610_v30 = vpop.permute.xlu1 %609  ;;  %v616_v31 = vpop.permute.xlu0 %615  ;;  %2803 = vmatprep.subr.mxu0 %v2084_v32  ;;  %2873 = vmatprep.subr.mxu1 %v2084_v32 }
  0xc8   : > { %683 = vst.msk [vmem:[#allocation3 + $0xb8] sm:$0xff] %vm659_vm2, %v610_v30  ;;  %686 = vst.msk [vmem:[#allocation3 + $0xd0] sm:$0xff] %vm659_vm2, %v616_v31 }
  0xc9   : > { %1146 = vrot.lane.b32.xlu1 %v3127_v17, %s2910_s7  ;;  %1148 = vrot.lane.b32.xlu0 %v3173_v38, %s2910_s7 }
  0xca   : > { %2804 = vmatpush3.msra.mxu0 %v2084_v32  ;;  %2878 = vmatpush3.msra.mxu1 %v2084_v32 }
  0xcb   : > { %v614_v51 = vpop.permute.xlu1 %613  ;;  %v620_v16 = vpop.permute.xlu0 %619 }
  0xcc   : > { %685 = vst.msk [vmem:[#allocation3 + $0xc8] sm:$0xff] %vm659_vm2, %v614_v51  ;;  %688 = vst.msk [vmem:[#allocation3 + $0xe0] sm:$0xff] %vm659_vm2, %v620_v16 }
  0xcd   : > { %1915 = vrot.lane.b32.xlu1 %v3334_v1, %s2914_s11  ;;  %1917 = vrot.lane.b32.xlu0 %v3347_v59, %s2914_s11 }
  0xcf   : > { %v618_v17 = vpop.permute.xlu1 %617  ;;  %v624_v38 = vpop.permute.xlu0 %623 }
  0xd0   : > { %687 = vst.msk [vmem:[#allocation3 + $0xd8] sm:$0xff] %vm659_vm2, %v618_v17  ;;  %690 = vst.msk [vmem:[#allocation3 + $0xf0] sm:$0xff] %vm659_vm2, %v624_v38 }
  0xd1   : > { %1339 = vrot.lane.b32.xlu1 %v3334_v1, %s2911_s8  ;;  %1533 = vrot.lane.b32.xlu0 %v3215_v49, %s2912_s13 }
  0xd3   : > { %v622_v33 = vpop.permute.xlu1 %621  ;;  %v757_v34 = vpop.permute.xlu0 %756 }
  0xd4   : > { %689 = vst.msk [vmem:[#allocation3 + $0xe8] sm:$0xff] %vm659_vm2, %v622_v33 }
  0xd5   : > { %853 = vst.msk [vmem:[#allocation3] sm:$0xff] %vm852_vm3, %v757_v34  ;;  %1341 = vrot.lane.b32.xlu1 %v3347_v59, %s2911_s8  ;;  %1726 = vrot.lane.b32.xlu0 %v3149_v27, %s2913_s20  ;;  %v1669_v34 = vld [vmem:[#allocation2 + $0xb1] sm:$0xff] }
  0xd7   : > { %v626_v36 = vpop.permute.xlu1 %625  ;;  %v761_v35 = vpop.permute.xlu0 %760 }
  0xd8   : > { %691 = vst.msk [vmem:[#allocation3 + $0xf8] sm:$0xff] %vm659_vm2, %v626_v36 }
  0xd9   : > { %855 = vst.msk [vmem:[#allocation3 + $0x10] sm:$0xff] %vm852_vm3, %v761_v35  ;;  %1535 = vrot.lane.b32.xlu1 %v3232_v53, %s2912_s13  ;;  %1728 = vrot.lane.b32.xlu0 %v3185_v40, %s2913_s20 }
  0xdb   : > { %v759_v49 = vpop.permute.xlu1 %758  ;;  %v765_v1 = vpop.permute.xlu0 %764 }
  0xdc   : > { %854 = vst.msk [vmem:[#allocation3 + $0x8] sm:$0xff] %vm852_vm3, %v759_v49  ;;  %857 = vst.msk [vmem:[#allocation3 + $0x20] sm:$0xff] %vm852_vm3, %v765_v1 }
  0xdd   : > { %1150 = vrot.lane.b32.xlu1 %v3149_v27, %s2910_s7  ;;  %1152 = vrot.lane.b32.xlu0 %v3185_v40, %s2910_s7 }
  0xdf   : > { %v763_v59 = vpop.permute.xlu1 %762  ;;  %v769_v37 = vpop.permute.xlu0 %768 }
  0xe0   : > { %856 = vst.msk [vmem:[#allocation3 + $0x18] sm:$0xff] %vm852_vm3, %v763_v59  ;;  %859 = vst.msk [vmem:[#allocation3 + $0x30] sm:$0xff] %vm852_vm3, %v769_v37 }
  0xe1   : > { %1919 = vrot.lane.b32.xlu1 %v3341_v50, %s2914_s11  ;;  %1921 = vrot.lane.b32.xlu0 %v3355_v10, %s2914_s11 }
  0xe3   : > { %v767_v53 = vpop.permute.xlu1 %766  ;;  %v773_v45 = vpop.permute.xlu0 %772 }
  0xe4   : > { %858 = vst.msk [vmem:[#allocation3 + $0x28] sm:$0xff] %vm852_vm3, %v767_v53  ;;  %861 = vst.msk [vmem:[#allocation3 + $0x40] sm:$0xff] %vm852_vm3, %v773_v45 }
  0xe5   : > { %1343 = vrot.lane.b32.xlu1 %v3341_v50, %s2911_s8  ;;  %1537 = vrot.lane.b32.xlu0 %v3226_v52, %s2912_s13 }
  0xe7   : > { %v771_v27 = vpop.permute.xlu1 %770  ;;  %v777_v40 = vpop.permute.xlu0 %776 }
  0xe8   : > { %860 = vst.msk [vmem:[#allocation3 + $0x38] sm:$0xff] %vm852_vm3, %v771_v27  ;;  %863 = vst.msk [vmem:[#allocation3 + $0x50] sm:$0xff] %vm852_vm3, %v777_v40  ;;  %v1671_v40 = vld [vmem:[#allocation2 + $0xc9] sm:$0xff] }
  0xe9   : > { %1345 = vrot.lane.b32.xlu1 %v3355_v10, %s2911_s8  ;;  %1730 = vrot.lane.b32.xlu0 %v3175_v39, %s2913_s20 }
  0xeb   : > { %v775_v22 = vpop.permute.xlu1 %774  ;;  %v781_v26 = vpop.permute.xlu0 %780 }
  0xec   : > { %862 = vst.msk [vmem:[#allocation3 + $0x48] sm:$0xff] %vm852_vm3, %v775_v22  ;;  %865 = vst.msk [vmem:[#allocation3 + $0x60] sm:$0xff] %vm852_vm3, %v781_v26 }
  0xed   : > { %1539 = vrot.lane.b32.xlu1 %v3236_v55, %s2912_s13  ;;  %1732 = vrot.lane.b32.xlu0 %v3193_v41, %s2913_s20 }
  0xef   : > { %v779_v52 = vpop.permute.xlu1 %778  ;;  %v785_v50 = vpop.permute.xlu0 %784 }
  0xf0   : > { %864 = vst.msk [vmem:[#allocation3 + $0x58] sm:$0xff] %vm852_vm3, %v779_v52  ;;  %867 = vst.msk [vmem:[#allocation3 + $0x70] sm:$0xff] %vm852_vm3, %v785_v50 }
  0xf1   : > { %1154 = vrot.lane.b32.xlu1 %v3175_v39, %s2910_s7  ;;  %1156 = vrot.lane.b32.xlu0 %v3193_v41, %s2910_s7 }
  0xf3   : > { %v783_v10 = vpop.permute.xlu1 %782  ;;  %v789_v46 = vpop.permute.xlu0 %788 }
  0xf4   : > { %866 = vst.msk [vmem:[#allocation3 + $0x68] sm:$0xff] %vm852_vm3, %v783_v10  ;;  %869 = vst.msk [vmem:[#allocation3 + $0x80] sm:$0xff] %vm852_vm3, %v789_v46 }
  0xf5   : > { %1923 = vrot.lane.b32.xlu1 %v3349_v60, %s2914_s11  ;;  %1925 = vrot.lane.b32.xlu0 %v3363_v12, %s2914_s11 }
  0xf7   : > { %v787_v55 = vpop.permute.xlu1 %786  ;;  %v793_v24 = vpop.permute.xlu0 %792 }
  0xf8   : > { %868 = vst.msk [vmem:[#allocation3 + $0x78] sm:$0xff] %vm852_vm3, %v787_v55  ;;  %871 = vst.msk [vmem:[#allocation3 + $0x90] sm:$0xff] %vm852_vm3, %v793_v24 }
  0xf9   : > { %1347 = vrot.lane.b32.xlu1 %v3349_v60, %s2911_s8  ;;  %1541 = vrot.lane.b32.xlu0 %v3234_v54, %s2912_s13 }
  0xfb   : > { %v791_v39 = vpop.permute.xlu1 %790  ;;  %v797_v41 = vpop.permute.xlu0 %796 }
  0xfc   : > { %870 = vst.msk [vmem:[#allocation3 + $0x88] sm:$0xff] %vm852_vm3, %v791_v39  ;;  %873 = vst.msk [vmem:[#allocation3 + $0xa0] sm:$0xff] %vm852_vm3, %v797_v41 }
  0xfd   : > { %1349 = vrot.lane.b32.xlu1 %v3363_v12, %s2911_s8  ;;  %1734 = vrot.lane.b32.xlu0 %v3187_v2, %s2913_s20 }
  0xff   : > { %v795_v25 = vpop.permute.xlu1 %794  ;;  %v801_v48 = vpop.permute.xlu0 %800 }
 0x100   : > { %872 = vst.msk [vmem:[#allocation3 + $0x98] sm:$0xff] %vm852_vm3, %v795_v25  ;;  %875 = vst.msk [vmem:[#allocation3 + $0xb0] sm:$0xff] %vm852_vm3, %v801_v48 }
 0x101   : > { %1543 = vrot.lane.b32.xlu1 %v3246_v57, %s2912_s13  ;;  %1736 = vrot.lane.b32.xlu0 %v3201_v43, %s2913_s20 }
 0x103   : > { %v799_v54 = vpop.permute.xlu1 %798  ;;  %v805_v60 = vpop.permute.xlu0 %804 }
 0x104   : > { %874 = vst.msk [vmem:[#allocation3 + $0xa8] sm:$0xff] %vm852_vm3, %v799_v54  ;;  %877 = vst.msk [vmem:[#allocation3 + $0xc0] sm:$0xff] %vm852_vm3, %v805_v60 }
 0x105   : > { %1158 = vrot.lane.b32.xlu1 %v3187_v2, %s2910_s7  ;;  %1160 = vrot.lane.b32.xlu0 %v3201_v43, %s2910_s7 }
 0x107   : > { %v803_v12 = vpop.permute.xlu1 %802  ;;  %v809_v44 = vpop.permute.xlu0 %808 }
 0x108   : > { %876 = vst.msk [vmem:[#allocation3 + $0xb8] sm:$0xff] %vm852_vm3, %v803_v12  ;;  %879 = vst.msk [vmem:[#allocation3 + $0xd0] sm:$0xff] %vm852_vm3, %v809_v44  ;;  %v1673_v12 = vld [vmem:[#allocation2 + $0xe1] sm:$0xff] }
 0x109   : > { %1927 = vrot.lane.b32.xlu1 %v3357_v11, %s2914_s11  ;;  %1929 = vrot.lane.b32.xlu0 %v3371_v15, %s2914_s11 }
 0x10b   : > { %v807_v57 = vpop.permute.xlu1 %806  ;;  %v813_v28 = vpop.permute.xlu0 %812 }
 0x10c   : > { %878 = vst.msk [vmem:[#allocation3 + $0xc8] sm:$0xff] %vm852_vm3, %v807_v57  ;;  %881 = vst.msk [vmem:[#allocation3 + $0xe0] sm:$0xff] %vm852_vm3, %v813_v28 }
 0x10d   : > { %1351 = vrot.lane.b32.xlu1 %v3357_v11, %s2911_s8  ;;  %1545 = vrot.lane.b32.xlu0 %v3244_v56, %s2912_s13 }
 0x10f   : > { %v811_v2 = vpop.permute.xlu1 %810  ;;  %v817_v43 = vpop.permute.xlu0 %816 }
 0x110   : > { %880 = vst.msk [vmem:[#allocation3 + $0xd8] sm:$0xff] %vm852_vm3, %v811_v2  ;;  %883 = vst.msk [vmem:[#allocation3 + $0xf0] sm:$0xff] %vm852_vm3, %v817_v43  ;;  %v1866_v2 = vld [vmem:[#allocation2 + $0xe2] sm:$0xff] }
 0x111   : > { %1353 = vrot.lane.b32.xlu1 %v3371_v15, %s2911_s8  ;;  %1547 = vrot.lane.b32.xlu0 %v3256_v61, %s2912_s13  ;;  %v1088_v15 = vld [vmem:[#allocation2 + $0x91] sm:$0xff] }
 0x113   : > { %v815_v29 = vpop.permute.xlu1 %814  ;;  %v950_v30 = vpop.permute.xlu0 %949 }
 0x114   : > { %882 = vst.msk [vmem:[#allocation3 + $0xe8] sm:$0xff] %vm852_vm3, %v815_v29 }
 0x115   : > { %1046 = vst.msk [vmem:[#allocation3] sm:$0xff] %vm1045_vm4, %v950_v30  ;;  %969 = vrot.lane.b32.xlu1 %v3244_v56, %s2909_s6  ;;  %971 = vrot.lane.b32.xlu0 %v3256_v61, %s2909_s6 }
 0x117   : > { %v819_v11 = vpop.permute.xlu1 %818  ;;  %v954_v31 = vpop.permute.xlu0 %953 }
 0x118   : > { %884 = vst.msk [vmem:[#allocation3 + $0xf8] sm:$0xff] %vm852_vm3, %v819_v11 }
 0x119   : > { %1048 = vst.msk [vmem:[#allocation3 + $0x10] sm:$0xff] %vm1045_vm4, %v954_v31  ;;  %1738 = vrot.lane.b32.xlu1 %v3195_v42, %s2913_s20  ;;  %1740 = vrot.lane.b32.xlu0 %v3209_v47, %s2913_s20 }
 0x11b   : > { %v952_v51 = vpop.permute.xlu1 %951  ;;  %v958_v16 = vpop.permute.xlu0 %957 }
 0x11c   : > { %1047 = vst.msk [vmem:[#allocation3 + $0x8] sm:$0xff] %vm1045_vm4, %v952_v51  ;;  %1050 = vst.msk [vmem:[#allocation3 + $0x20] sm:$0xff] %vm1045_vm4, %v958_v16  ;;  %v266_v51 = vld [vmem:[%s3030_s26 + $0xf0] sm:$0xff]  ;;  %v2896_v16 = vld [vmem:[%s4166_s1] ss:$0 sm:$0xff] }
 0x11d   : > { %1162 = vrot.lane.b32.xlu1 %v1088_v15, %s2910_s7  ;;  %1164 = vrot.lane.b32.xlu0 %v3209_v47, %s2910_s7 }
 0x11f   : > { %v956_v56 = vpop.permute.xlu1 %955  ;;  %v962_v61 = vpop.permute.xlu0 %961 }
 0x120   : > { %1049 = vst.msk [vmem:[#allocation3 + $0x18] sm:$0xff] %vm1045_vm4, %v956_v56  ;;  %1052 = vst.msk [vmem:[#allocation3 + $0x30] sm:$0xff] %vm1045_vm4, %v962_v61  ;;  %v305_v56 = vmul.f32 %v2896_v16, %v266_v51  ;;  %v1488_v51 = vld [vmem:[#allocation2 + $0x140] sm:$0xff] }
 0x121   : > { %1931 = vrot.lane.b32.xlu1 %v3365_v14, %s2914_s11  ;;  %1933 = vrot.lane.b32.xlu0 %v3379_v19, %s2914_s11 }
 0x123   : > { %v960_v42 = vpop.permute.xlu1 %959  ;;  %v966_v32 = vpop.permute.xlu0 %965 }
 0x124   : > { %1051 = vst.msk [vmem:[#allocation3 + $0x28] sm:$0xff] %vm1045_vm4, %v960_v42  ;;  %1054 = vst.msk [vmem:[#allocation3 + $0x40] sm:$0xff] %vm1045_vm4, %v966_v32  ;;  %v2897_v32 = vld [vmem:[%s4167_s2] ss:$0 sm:$0xff] }
 0x125   : > { %1355 = vrot.lane.b32.xlu1 %v3365_v14, %s2911_s8  ;;  %1549 = vrot.lane.b32.xlu0 %v3248_v58, %s2912_s13  ;;  %v1668_v14 = vld [vmem:[#allocation2 + $0xa9] sm:$0xff] }
 0x127   : > { %v964_v47 = vpop.permute.xlu1 %963  ;;  %v1143_v17 = vpop.permute.xlu0 %1142 }
 0x128   : > { %1053 = vst.msk [vmem:[#allocation3 + $0x38] sm:$0xff] %vm1045_vm4, %v964_v47  ;;  %v344_v47 = vadd.f32 %v2897_v32, %v305_v56 }
 0x129   : > { %1239 = vst.msk [vmem:[#allocation3] sm:$0xff] %vm1238_vm5, %v1143_v17  ;;  %1357 = vrot.lane.b32.xlu1 %v3379_v19, %s2911_s8  ;;  %1551 = vrot.lane.b32.xlu0 %v3260_v63, %s2912_s13  ;;  %v267_v17 = vld [vmem:[%s3030_s26 + $0xf8] sm:$0xff] }
 0x12a   : > { %433 = vst.msk [vmem:[#allocation2 + $0x181] sm:$0xff] %vm346_vm0, %v344_v47  ;;  %v1681_v47 = vld [vmem:[#allocation2 + $0x141] sm:$0xff] }
 0x12b   : > { %v968_v38 = vpop.permute.xlu1 %967  ;;  %v1336_v33 = vpop.permute.xlu0 %1335 }
 0x12c   : > { %1055 = vst.msk [vmem:[#allocation3 + $0x48] sm:$0xff] %vm1045_vm4, %v968_v38  ;;  %v1674_v38 = vld [vmem:[#allocation2 + $0xf1] sm:$0xff] }
 0x12d   : > { %1432 = vst.msk [vmem:[#allocation3] sm:$0xff] %vm1431_vm6, %v1336_v33  ;;  %973 = vrot.lane.b32.xlu1 %v3248_v58, %s2909_s6  ;;  %975 = vrot.lane.b32.xlu0 %v3260_v63, %s2909_s6  ;;  %v306_v33 = vmul.f32 %v2896_v16, %v267_v17 }
 0x12f   : > { %v1145_v19 = vpop.permute.xlu1 %1144  ;;  %v1530_v36 = vpop.permute.xlu0 %1529 }
 0x130   : > { %1240 = vst.msk [vmem:[#allocation3 + $0x8] sm:$0xff] %vm1238_vm5, %v1145_v19  ;;  %v1675_v19 = vld [vmem:[#allocation2 + $0xf9] sm:$0xff] }
 0x131   : > { %1626 = vst.msk [vmem:[#allocation3] sm:$0xff] %vm1625_vm7, %v1530_v36  ;;  %1742 = vrot.lane.b32.xlu1 %v1668_v14, %s2913_s20  ;;  %1744 = vrot.lane.b32.xlu0 %v1669_v34, %s2913_s20  ;;  %v345_v36 = vadd.f32 %v2897_v32, %v306_v33  ;;  %v1873_v33 = vld [vmem:[#allocation2 + $0x13a] sm:$0xff] }
 0x133   : > { %v1338_v35 = vpop.permute.xlu1 %1337  ;;  %v1723_v49 = vpop.permute.xlu0 %1722  ;;  %434 = vst.msk [vmem:[#allocation2 + $0x189] sm:$0xff] %vm346_vm0, %v345_v36 }
 0x134   : > { %1433 = vst.msk [vmem:[#allocation3 + $0x8] sm:$0xff] %vm1431_vm6, %v1338_v35  ;;  %v1867_v35 = vld [vmem:[#allocation2 + $0xf2] sm:$0xff] }
 0x135   : > { %1819 = vst.msk [vmem:[#allocation3] sm:$0xff] %vm1818_vm8, %v1723_v49  ;;  %1166 = vrot.lane.b32.xlu1 %v1668_v14, %s2910_s7  ;;  %1168 = vrot.lane.b32.xlu0 %v1669_v34, %s2910_s7 }
 0x137   : > { %v1532_v58 = vpop.permute.xlu1 %1531  ;;  %v1725_v63 = vpop.permute.xlu0 %1724 }
 0x138   : > { %1627 = vst.msk [vmem:[#allocation3 + $0x8] sm:$0xff] %vm1625_vm7, %v1532_v58 }
 0x139   : > { %1820 = vst.msk [vmem:[#allocation3 + $0x8] sm:$0xff] %vm1818_vm8, %v1725_v63  ;;  %1935 = vrot.lane.b32.xlu1 %v3373_v18, %s2914_s11  ;;  %1937 = vrot.lane.b32.xlu0 %v3387_v21, %s2914_s11  ;;  %v1868_v63 = vld [vmem:[#allocation2 + $0xfa] sm:$0xff] }
 0x13b   : > { %v1147_v1 = vpop.permute.xlu1 %1146  ;;  %v1149_v59 = vpop.permute.xlu0 %1148 }
 0x13c   : > { %1241 = vst.msk [vmem:[#allocation3 + $0x10] sm:$0xff] %vm1238_vm5, %v1147_v1  ;;  %1242 = vst.msk [vmem:[#allocation3 + $0x18] sm:$0xff] %vm1238_vm5, %v1149_v59 }
 0x13d   : > { %1359 = vrot.lane.b32.xlu1 %v3373_v18, %s2911_s8  ;;  %1553 = vrot.lane.b32.xlu0 %v3258_v62, %s2912_s13  ;;  %v1670_v18 = vld [vmem:[#allocation2 + $0xc1] sm:$0xff] }
 0x13f   : > { %v1916_v37 = vpop.permute.xlu1 %1915  ;;  %v1918_v53 = vpop.permute.xlu0 %1917 }
 0x140   : > { %2012 = vst.msk [vmem:[#allocation3] sm:$0xff] %vm2011_vm9, %v1916_v37  ;;  %2013 = vst.msk [vmem:[#allocation3 + $0x8] sm:$0xff] %vm2011_vm9, %v1918_v53 }
 0x141   : > { %1361 = vrot.lane.b32.xlu1 %v3387_v21, %s2911_s8  ;;  %1555 = vrot.lane.b32.xlu0 %v3273_v3, %s2912_s13 }
 0x143   : > { %v1340_v45 = vpop.permute.xlu1 %1339  ;;  %v1534_v27 = vpop.permute.xlu0 %1533 }
 0x144   : > { %1434 = vst.msk [vmem:[#allocation3 + $0x10] sm:$0xff] %vm1431_vm6, %v1340_v45 }
 0x145   : > { %1628 = vst.msk [vmem:[#allocation3 + $0x10] sm:$0xff] %vm1625_vm7, %v1534_v27  ;;  %977 = vrot.lane.b32.xlu1 %v3258_v62, %s2909_s6  ;;  %979 = vrot.lane.b32.xlu0 %v3273_v3, %s2909_s6 }
 0x147   : > { %v1342_v22 = vpop.permute.xlu1 %1341  ;;  %v1727_v21 = vpop.permute.xlu0 %1726  ;;  %v2044_v26 = vld [vmem:[#allocation3] sm:$0xff]  ;;  %v2045_v52 = vld [vmem:[#allocation3 + $0x8] sm:$0xff] }
 0x148   : > { %1435 = vst.msk [vmem:[#allocation3 + $0x18] sm:$0xff] %vm1431_vm6, %v1342_v22  ;;  %2805 = vmatprep.mubr.msk.f32.mxu0 %vm2085_vm10, %v2044_v26  ;;  %v1676_v22 = vld [vmem:[#allocation2 + $0x109] sm:$0xff] }
 0x149   : > { %1821 = vst.msk [vmem:[#allocation3 + $0x10] sm:$0xff] %vm1818_vm8, %v1727_v21  ;;  %1746 = vrot.lane.b32.xlu1 %v1670_v18, %s2913_s20  ;;  %1748 = vrot.lane.b32.xlu0 %v1671_v40, %s2913_s20 }
 0x14a   : > { %2806 = vmatmul.mubr.msk.f32.vlgmr.msra.gmra.mrb[0].mxu0 %vm2085_vm10, %v2045_v52  ;;  %v1677_v52 = vld [vmem:[#allocation2 + $0x111] sm:$0xff] }
 0x14b   : > { %v1536_v62 = vpop.permute.xlu1 %1535  ;;  %v1729_v3 = vpop.permute.xlu0 %1728 }
 0x14c   : > { %1629 = vst.msk [vmem:[#allocation3 + $0x18] sm:$0xff] %vm1625_vm7, %v1536_v62 }
 0x14d   : > { %1822 = vst.msk [vmem:[#allocation3 + $0x18] sm:$0xff] %vm1818_vm8, %v1729_v3  ;;  %1170 = vrot.lane.b32.xlu1 %v1670_v18, %s2910_s7  ;;  %1172 = vrot.lane.b32.xlu0 %v1671_v40, %s2910_s7 }
 0x14f   : > { %v1151_v50 = vpop.permute.xlu1 %1150  ;;  %v1153_v10 = vpop.permute.xlu0 %1152 }
 0x150   : > { %1243 = vst.msk [vmem:[#allocation3 + $0x20] sm:$0xff] %vm1238_vm5, %v1151_v50  ;;  %1244 = vst.msk [vmem:[#allocation3 + $0x28] sm:$0xff] %vm1238_vm5, %v1153_v10  ;;  %v1870_v10 = vld [vmem:[#allocation2 + $0x112] sm:$0xff] }
 0x151   : > { %1939 = vrot.lane.b32.xlu1 %v3381_v20, %s2914_s11  ;;  %1941 = vrot.lane.b32.xlu0 %v3392_v23, %s2914_s11 }
 0x153   : > { %v1920_v46 = vpop.permute.xlu1 %1919  ;;  %v1922_v55 = vpop.permute.xlu0 %1921 }
 0x154   : > { %2014 = vst.msk [vmem:[#allocation3 + $0x10] sm:$0xff] %vm2011_vm9, %v1920_v46  ;;  %2015 = vst.msk [vmem:[#allocation3 + $0x18] sm:$0xff] %vm2011_vm9, %v1922_v55 }
 0x155   : > { %1363 = vrot.lane.b32.xlu1 %v3381_v20, %s2911_s8  ;;  %1557 = vrot.lane.b32.xlu0 %v3271_v0, %s2912_s13  ;;  %v1672_v20 = vld [vmem:[#allocation2 + $0xd9] sm:$0xff] }
 0x157   : > { %v1344_v24 = vpop.permute.xlu1 %1343  ;;  %v1538_v39 = vpop.permute.xlu0 %1537 }
 0x158   : > { %1436 = vst.msk [vmem:[#allocation3 + $0x20] sm:$0xff] %vm1431_vm6, %v1344_v24 }
 0x159   : > { %1630 = vst.msk [vmem:[#allocation3 + $0x20] sm:$0xff] %vm1625_vm7, %v1538_v39  ;;  %1365 = vrot.lane.b32.xlu1 %v3392_v23, %s2911_s8  ;;  %1559 = vrot.lane.b32.xlu0 %v3283_v5, %s2912_s13 }
 0x15b   : > { %v1346_v41 = vpop.permute.xlu1 %1345  ;;  %v1731_v25 = vpop.permute.xlu0 %1730  ;;  %v2046_v48 = vld [vmem:[#allocation3 + $0x10] sm:$0xff]  ;;  %v2047_v54 = vld [vmem:[#allocation3 + $0x18] sm:$0xff] }
 0x15c   : > { %1437 = vst.msk [vmem:[#allocation3 + $0x28] sm:$0xff] %vm1431_vm6, %v1346_v41  ;;  %2808 = vmatprep.mubr.msk.f32.mxu0 %vm2085_vm10, %v2046_v48  ;;  %v907_v48 = vld [vmem:[#allocation2 + $0x120] sm:$0xff] }
 0x15d   : > { %1823 = vst.msk [vmem:[#allocation3 + $0x20] sm:$0xff] %vm1818_vm8, %v1731_v25  ;;  %981 = vrot.lane.b32.xlu1 %v3271_v0, %s2909_s6  ;;  %2809 = vmatmul.mubr.msk.f32.gmra.mrb[2].mxu0 %vm2085_vm10, %v2047_v54  ;;  %v1865_v0 = vld [vmem:[#allocation2 + $0xda] sm:$0xff] }
 0x15e   : > { %983 = vrot.lane.b32.xlu0 %v3283_v5, %s2909_s6 }
 0x15f   : > { %v1540_v23 = vpop.permute.xlu1 %1539  ;;  %v1733_v60 = vpop.permute.xlu0 %1732 }
 0x160   : > { %1631 = vst.msk [vmem:[#allocation3 + $0x28] sm:$0xff] %vm1625_vm7, %v1540_v23 }
 0x161   : > { %1824 = vst.msk [vmem:[#allocation3 + $0x28] sm:$0xff] %vm1818_vm8, %v1733_v60  ;;  %1750 = vrot.lane.b32.xlu1 %v1672_v20, %s2913_s20 }
 0x162   : > { %1752 = vrot.lane.b32.xlu0 %v1673_v12, %s2913_s20 }
 0x163   : > { %v1155_v44 = vpop.permute.xlu1 %1154  ;;  %v1157_v57 = vpop.permute.xlu0 %1156 }
 0x164   : > { %1245 = vst.msk [vmem:[#allocation3 + $0x30] sm:$0xff] %vm1238_vm5, %v1155_v44  ;;  %1246 = vst.msk [vmem:[#allocation3 + $0x38] sm:$0xff] %vm1238_vm5, %v1157_v57 }
 0x165   : > { %1174 = vrot.lane.b32.xlu1 %v1672_v20, %s2910_s7 }
 0x166   : > { %1176 = vrot.lane.b32.xlu0 %v1673_v12, %s2910_s7  ;;  %v1679_v12 = vld [vmem:[#allocation2 + $0x129] sm:$0xff] }
 0x167   : > { %v1924_v5 = vpop.permute.xlu1 %1923  ;;  %v1926_v28 = vpop.permute.xlu0 %1925 }
 0x168   : > { %2016 = vst.msk [vmem:[#allocation3 + $0x20] sm:$0xff] %vm2011_vm9, %v1924_v5  ;;  %2017 = vst.msk [vmem:[#allocation3 + $0x28] sm:$0xff] %vm2011_vm9, %v1926_v28  ;;  %v1872_v28 = vld [vmem:[#allocation2 + $0x12a] sm:$0xff] }
 0x169   : > { %1943 = vrot.lane.b32.xlu1 %v1865_v0, %s2914_s11 }
 0x16a   : > { %1945 = vrot.lane.b32.xlu0 %v1866_v2, %s2914_s11 }
 0x16b   : > { %v1348_v43 = vpop.permute.xlu1 %1347  ;;  %v1542_v29 = vpop.permute.xlu0 %1541 }
 0x16c   : > { %1438 = vst.msk [vmem:[#allocation3 + $0x30] sm:$0xff] %vm1431_vm6, %v1348_v43 }
 0x16d   : > { %1632 = vst.msk [vmem:[#allocation3 + $0x30] sm:$0xff] %vm1625_vm7, %v1542_v29  ;;  %1367 = vrot.lane.b32.xlu1 %v1865_v0, %s2911_s8 }
 0x16e   : > { %1561 = vrot.lane.b32.xlu0 %v3275_v4, %s2912_s13 }
 0x16f   : > { %v1350_v30 = vpop.permute.xlu1 %1349  ;;  %v1735_v11 = vpop.permute.xlu0 %1734  ;;  %v2048_v31 = vld [vmem:[#allocation3 + $0x20] sm:$0xff]  ;;  %v2049_v15 = vld [vmem:[#allocation3 + $0x28] sm:$0xff] }
 0x170   : > { %1439 = vst.msk [vmem:[#allocation3 + $0x38] sm:$0xff] %vm1431_vm6, %v1350_v30  ;;  %2811 = vmatprep.mubr.msk.f32.mxu0 %vm2085_vm10, %v2048_v31 }
 0x171   : > { %1825 = vst.msk [vmem:[#allocation3 + $0x30] sm:$0xff] %vm1818_vm8, %v1735_v11  ;;  %1369 = vrot.lane.b32.xlu1 %v1866_v2, %s2911_s8  ;;  %2812 = vmatmul.mubr.msk.f32.gmra.mrb[4].mxu0 %vm2085_vm10, %v2049_v15  ;;  %v1487_v11 = vld [vmem:[#allocation2 + $0x138] sm:$0xff] }
 0x172   : > { %1563 = vrot.lane.b32.xlu0 %v3287_v7, %s2912_s13 }
 0x173   : > { %v1544_v61 = vpop.permute.xlu1 %1543  ;;  %v1737_v42 = vpop.permute.xlu0 %1736 }
 0x174   : > { %1633 = vst.msk [vmem:[#allocation3 + $0x38] sm:$0xff] %vm1625_vm7, %v1544_v61  ;;  %v1680_v61 = vld [vmem:[#allocation2 + $0x139] sm:$0xff] }
 0x175   : > { %1826 = vst.msk [vmem:[#allocation3 + $0x38] sm:$0xff] %vm1818_vm8, %v1737_v42  ;;  %985 = vrot.lane.b32.xlu1 %v3275_v4, %s2909_s6 }
 0x176   : > { %987 = vrot.lane.b32.xlu0 %v3287_v7, %s2909_s6 }
 0x177   : > { %v1159_v14 = vpop.permute.xlu1 %1158  ;;  %v1161_v34 = vpop.permute.xlu0 %1160 }
 0x178   : > { %1247 = vst.msk [vmem:[#allocation3 + $0x40] sm:$0xff] %vm1238_vm5, %v1159_v14  ;;  %1248 = vst.msk [vmem:[#allocation3 + $0x48] sm:$0xff] %vm1238_vm5, %v1161_v34 }
 0x179   : > { %1754 = vrot.lane.b32.xlu1 %v1674_v38, %s2913_s20 }
 0x17a   : > { %1756 = vrot.lane.b32.xlu0 %v1675_v19, %s2913_s20 }
 0x17b   : > { %v1928_v4 = vpop.permute.xlu1 %1927  ;;  %v1930_v7 = vpop.permute.xlu0 %1929 }
 0x17c   : > { %2018 = vst.msk [vmem:[#allocation3 + $0x30] sm:$0xff] %vm2011_vm9, %v1928_v4  ;;  %2019 = vst.msk [vmem:[#allocation3 + $0x38] sm:$0xff] %vm2011_vm9, %v1930_v7 }
 0x17d   : > { %1178 = vrot.lane.b32.xlu1 %v1674_v38, %s2910_s7 }
 0x17e   : > { %1180 = vrot.lane.b32.xlu0 %v1675_v19, %s2910_s7  ;;  %v1874_v19 = vld [vmem:[#allocation2 + $0x142] sm:$0xff] }
 0x17f   : > { %v1352_v49 = vpop.permute.xlu1 %1351  ;;  %v1546_v58 = vpop.permute.xlu0 %1545 }
 0x180   : > { %1440 = vst.msk [vmem:[#allocation3 + $0x40] sm:$0xff] %vm1431_vm6, %v1352_v49  ;;  %v1489_v49 = vld [vmem:[#allocation2 + $0x150] sm:$0xff] }
 0x181   : > { %1634 = vst.msk [vmem:[#allocation3 + $0x40] sm:$0xff] %vm1625_vm7, %v1546_v58  ;;  %1947 = vrot.lane.b32.xlu1 %v1867_v35, %s2914_s11 }
 0x182   : > { %1949 = vrot.lane.b32.xlu0 %v1868_v63, %s2914_s11 }
 0x183   : > { %v1354_v1 = vpop.permute.xlu1 %1353  ;;  %v1548_v59 = vpop.permute.xlu0 %1547  ;;  %v2050_v37 = vld [vmem:[#allocation3 + $0x30] sm:$0xff]  ;;  %v2051_v53 = vld [vmem:[#allocation3 + $0x38] sm:$0xff] }
 0x184   : > { %1441 = vst.msk [vmem:[#allocation3 + $0x48] sm:$0xff] %vm1431_vm6, %v1354_v1  ;;  %2814 = vmatprep.mubr.msk.f32.mxu0 %vm2085_vm10, %v2050_v37 }
 0x185   : > { %1635 = vst.msk [vmem:[#allocation3 + $0x48] sm:$0xff] %vm1625_vm7, %v1548_v59  ;;  %1371 = vrot.lane.b32.xlu1 %v1867_v35, %s2911_s8  ;;  %2815 = vmatmul.mubr.msk.f32.gmra.mrb[6].mxu0 %vm2085_vm10, %v2051_v53  ;;  %v1682_v53 = vld [vmem:[#allocation2 + $0x151] sm:$0xff] }
 0x186   : > { %1565 = vrot.lane.b32.xlu0 %v3285_v6, %s2912_s13 }
 0x187   : > { %v970_v45 = vpop.permute.xlu1 %969  ;;  %v972_v27 = vpop.permute.xlu0 %971 }
 0x188   : > { %1056 = vst.msk [vmem:[#allocation3 + $0x50] sm:$0xff] %vm1045_vm4, %v970_v45  ;;  %1057 = vst.msk [vmem:[#allocation3 + $0x58] sm:$0xff] %vm1045_vm4, %v972_v27  ;;  %v1683_v27 = vld [vmem:[#allocation2 + $0x159] sm:$0xff] }
 0x189   : > { %1373 = vrot.lane.b32.xlu1 %v1868_v63, %s2911_s8  ;;  %v1490_v63 = vld [vmem:[#allocation2 + $0x158] sm:$0xff] }
 0x18a   : > { %1567 = vrot.lane.b32.xlu0 %v3301_v9, %s2912_s13 }
 0x18b   : > { %v1739_v18 = vpop.permute.xlu1 %1738  ;;  %v1741_v40 = vpop.permute.xlu0 %1740 }
 0x18c   : > { %1827 = vst.msk [vmem:[#allocation3 + $0x40] sm:$0xff] %vm1818_vm8, %v1739_v18  ;;  %1828 = vst.msk [vmem:[#allocation3 + $0x48] sm:$0xff] %vm1818_vm8, %v1741_v40 }
 0x18d   : > { %989 = vrot.lane.b32.xlu1 %v3285_v6, %s2909_s6  ;;  %v1869_v6 = vld [vmem:[#allocation2 + $0x10a] sm:$0xff] }
 0x18e   : > { %991 = vrot.lane.b32.xlu0 %v3301_v9, %s2909_s6 }
 0x18f   : > { %v1163_v21 = vpop.permute.xlu1 %1162  ;;  %v1165_v26 = vpop.permute.xlu0 %1164 }
 0x190   : > { %1249 = vst.msk [vmem:[#allocation3 + $0x50] sm:$0xff] %vm1238_vm5, %v1163_v21  ;;  %1250 = vst.msk [vmem:[#allocation3 + $0x58] sm:$0xff] %vm1238_vm5, %v1165_v26  ;;  %v1875_v21 = vld [vmem:[#allocation2 + $0x152] sm:$0xff] }
 0x191   : > { %1758 = vrot.lane.b32.xlu1 %v1676_v22, %s2913_s20 }
 0x192   : > { %1760 = vrot.lane.b32.xlu0 %v1677_v52, %s2913_s20 }
 0x193   : > { %v1932_v62 = vpop.permute.xlu1 %1931  ;;  %v1934_v3 = vpop.permute.xlu0 %1933 }
 0x194   : > { %2020 = vst.msk [vmem:[#allocation3 + $0x40] sm:$0xff] %vm2011_vm9, %v1932_v62  ;;  %2021 = vst.msk [vmem:[#allocation3 + $0x48] sm:$0xff] %vm2011_vm9, %v1934_v3 }
 0x195   : > { %1182 = vrot.lane.b32.xlu1 %v1676_v22, %s2910_s7 }
 0x196   : > { %1184 = vrot.lane.b32.xlu0 %v1677_v52, %s2910_s7  ;;  %v1876_v52 = vld [vmem:[#allocation2 + $0x15a] sm:$0xff] }
 0x197   : > { %v1356_v9 = vpop.permute.xlu1 %1355  ;;  %v1550_v50 = vpop.permute.xlu0 %1549 }
 0x198   : > { %1442 = vst.msk [vmem:[#allocation3 + $0x50] sm:$0xff] %vm1431_vm6, %v1356_v9  ;;  %v1491_v9 = vld [vmem:[#allocation2 + $0x168] sm:$0xff] }
 0x199   : > { %1636 = vst.msk [vmem:[#allocation3 + $0x50] sm:$0xff] %vm1625_vm7, %v1550_v50  ;;  %1951 = vrot.lane.b32.xlu1 %v1869_v6, %s2914_s11 }
 0x19a   : > { %1953 = vrot.lane.b32.xlu0 %v1870_v10, %s2914_s11 }
 0x19b   : > { %v1358_v46 = vpop.permute.xlu1 %1357  ;;  %v1552_v55 = vpop.permute.xlu0 %1551  ;;  %v2052_v24 = vld [vmem:[#allocation3 + $0x40] sm:$0xff]  ;;  %v2053_v39 = vld [vmem:[#allocation3 + $0x48] sm:$0xff] }
 0x19c   : > { %1443 = vst.msk [vmem:[#allocation3 + $0x58] sm:$0xff] %vm1431_vm6, %v1358_v46  ;;  %2817 = vmatprep.mubr.msk.f32.mxu0 %vm2085_vm10, %v2052_v24 }
 0x19d   : > { %1637 = vst.msk [vmem:[#allocation3 + $0x58] sm:$0xff] %vm1625_vm7, %v1552_v55  ;;  %1375 = vrot.lane.b32.xlu1 %v1869_v6, %s2911_s8  ;;  %2818 = vmatmul.mubr.msk.f32.gmra.mrb[8].mxu0 %vm2085_vm10, %v2053_v39  ;;  %v1492_v55 = vld [vmem:[#allocation2 + $0x170] sm:$0xff] }
 0x19e   : > { %1569 = vrot.lane.b32.xlu0 %v3295_v8, %s2912_s13  ;;  %v1678_v8 = vld [vmem:[#allocation2 + $0x121] sm:$0xff] }
 0x19f   : > { %v974_v41 = vpop.permute.xlu1 %973  ;;  %v976_v25 = vpop.permute.xlu0 %975 }
 0x1a0   : > { %1058 = vst.msk [vmem:[#allocation3 + $0x60] sm:$0xff] %vm1045_vm4, %v974_v41  ;;  %1059 = vst.msk [vmem:[#allocation3 + $0x68] sm:$0xff] %vm1045_vm4, %v976_v25  ;;  %v1684_v25 = vld [vmem:[#allocation2 + $0x169] sm:$0xff] }
 0x1a1   : > { %1377 = vrot.lane.b32.xlu1 %v1870_v10, %s2911_s8 }
 0x1a2   : > { %1571 = vrot.lane.b32.xlu0 %v3308_v13, %s2912_s13 }
 0x1a3   : > { %v1743_v54 = vpop.permute.xlu1 %1742  ;;  %v1745_v20 = vpop.permute.xlu0 %1744 }
 0x1a4   : > { %1829 = vst.msk [vmem:[#allocation3 + $0x50] sm:$0xff] %vm1818_vm8, %v1743_v54  ;;  %1830 = vst.msk [vmem:[#allocation3 + $0x58] sm:$0xff] %vm1818_vm8, %v1745_v20  ;;  %v1685_v54 = vld [vmem:[#allocation2 + $0x171] sm:$0xff] }
 0x1a5   : > { %993 = vrot.lane.b32.xlu1 %v907_v48, %s2909_s6 }
 0x1a6   : > { %995 = vrot.lane.b32.xlu0 %v3308_v13, %s2909_s6  ;;  %v1871_v13 = vld [vmem:[#allocation2 + $0x122] sm:$0xff] }
 0x1a7   : > { %v1167_v23 = vpop.permute.xlu1 %1166  ;;  %v1169_v60 = vpop.permute.xlu0 %1168 }
 0x1a8   : > { %1251 = vst.msk [vmem:[#allocation3 + $0x60] sm:$0xff] %vm1238_vm5, %v1167_v23  ;;  %1252 = vst.msk [vmem:[#allocation3 + $0x68] sm:$0xff] %vm1238_vm5, %v1169_v60  ;;  %v1877_v60 = vld [vmem:[#allocation2 + $0x16a] sm:$0xff] }
 0x1a9   : > { %1762 = vrot.lane.b32.xlu1 %v1678_v8, %s2913_s20 }
 0x1aa   : > { %1764 = vrot.lane.b32.xlu0 %v1679_v12, %s2913_s20 }
 0x1ab   : > { %v1936_v44 = vpop.permute.xlu1 %1935  ;;  %v1938_v57 = vpop.permute.xlu0 %1937 }
 0x1ac   : > { %2022 = vst.msk [vmem:[#allocation3 + $0x50] sm:$0xff] %vm2011_vm9, %v1936_v44  ;;  %2023 = vst.msk [vmem:[#allocation3 + $0x58] sm:$0xff] %vm2011_vm9, %v1938_v57  ;;  %v1878_v44 = vld [vmem:[#allocation2 + $0x172] sm:$0xff] }
 0x1ad   : > { %1186 = vrot.lane.b32.xlu1 %v1678_v8, %s2910_s7 }
 0x1ae   : > { %1188 = vrot.lane.b32.xlu0 %v1679_v12, %s2910_s7 }
 0x1af   : > { %v1360_v0 = vpop.permute.xlu1 %1359  ;;  %v1554_v5 = vpop.permute.xlu0 %1553 }
 0x1b0   : > { %1444 = vst.msk [vmem:[#allocation3 + $0x60] sm:$0xff] %vm1431_vm6, %v1360_v0 }
 0x1b1   : > { %1638 = vst.msk [vmem:[#allocation3 + $0x60] sm:$0xff] %vm1625_vm7, %v1554_v5  ;;  %1955 = vrot.lane.b32.xlu1 %v1871_v13, %s2914_s11  ;;  %v1493_v5 = vld [vmem:[#allocation2 + $0x180] sm:$0xff] }
 0x1b2   : > { %1957 = vrot.lane.b32.xlu0 %v1872_v28, %s2914_s11 }
 0x1b3   : > { %v1362_v2 = vpop.permute.xlu1 %1361  ;;  %v1556_v43 = vpop.permute.xlu0 %1555  ;;  %v2054_v29 = vld [vmem:[#allocation3 + $0x50] sm:$0xff]  ;;  %v2055_v30 = vld [vmem:[#allocation3 + $0x58] sm:$0xff] }
 0x1b4   : > { %1445 = vst.msk [vmem:[#allocation3 + $0x68] sm:$0xff] %vm1431_vm6, %v1362_v2  ;;  %2820 = vmatprep.mubr.msk.f32.mxu0 %vm2085_vm10, %v2054_v29  ;;  %v1494_v29 = vld [vmem:[#allocation2 + $0x188] sm:$0xff] }
 0x1b5   : > { %1639 = vst.msk [vmem:[#allocation3 + $0x68] sm:$0xff] %vm1625_vm7, %v1556_v43  ;;  %1379 = vrot.lane.b32.xlu1 %v1871_v13, %s2911_s8  ;;  %2821 = vmatmul.mubr.msk.f32.gmra.mrb[10].mxu0 %vm2085_vm10, %v2055_v30 }
 0x1b6   : > { %1573 = vrot.lane.b32.xlu0 %v1487_v11, %s2912_s13 }
 0x1b7   : > { %v978_v31 = vpop.permute.xlu1 %977  ;;  %v980_v15 = vpop.permute.xlu0 %979 }
 0x1b8   : > { %1060 = vst.msk [vmem:[#allocation3 + $0x70] sm:$0xff] %vm1045_vm4, %v978_v31  ;;  %1061 = vst.msk [vmem:[#allocation3 + $0x78] sm:$0xff] %vm1045_vm4, %v980_v15  ;;  %v1686_v15 = vld [vmem:[#allocation2 + $0x181] sm:$0xff] }
 0x1b9   : > { %1381 = vrot.lane.b32.xlu1 %v1872_v28, %s2911_s8 }
 0x1ba   : > { %1575 = vrot.lane.b32.xlu0 %v1488_v51, %s2912_s13 }
 0x1bb   : > { %v1747_v16 = vpop.permute.xlu1 %1746  ;;  %v1749_v56 = vpop.permute.xlu0 %1748 }
 0x1bc   : > { %1831 = vst.msk [vmem:[#allocation3 + $0x60] sm:$0xff] %vm1818_vm8, %v1747_v16  ;;  %1832 = vst.msk [vmem:[#allocation3 + $0x68] sm:$0xff] %vm1818_vm8, %v1749_v56  ;;  %v1687_v16 = vld [vmem:[#allocation2 + $0x189] sm:$0xff] }
 0x1bd   : > { %997 = vrot.lane.b32.xlu1 %v1487_v11, %s2909_s6 }
 0x1be   : > { %999 = vrot.lane.b32.xlu0 %v1488_v51, %s2909_s6 }
 0x1bf   : > { %v1171_v42 = vpop.permute.xlu1 %1170  ;;  %v1173_v32 = vpop.permute.xlu0 %1172 }
 0x1c0   : > { %1253 = vst.msk [vmem:[#allocation3 + $0x70] sm:$0xff] %vm1238_vm5, %v1171_v42  ;;  %1254 = vst.msk [vmem:[#allocation3 + $0x78] sm:$0xff] %vm1238_vm5, %v1173_v32  ;;  %v1879_v32 = vld [vmem:[#allocation2 + $0x182] sm:$0xff] }
 0x1c1   : > { %1766 = vrot.lane.b32.xlu1 %v1680_v61, %s2913_s20 }
 0x1c2   : > { %1768 = vrot.lane.b32.xlu0 %v1681_v47, %s2913_s20 }
 0x1c3   : > { %v1940_v17 = vpop.permute.xlu1 %1939  ;;  %v1942_v38 = vpop.permute.xlu0 %1941 }
 0x1c4   : > { %2024 = vst.msk [vmem:[#allocation3 + $0x60] sm:$0xff] %vm2011_vm9, %v1940_v17  ;;  %2025 = vst.msk [vmem:[#allocation3 + $0x68] sm:$0xff] %vm2011_vm9, %v1942_v38  ;;  %v1880_v17 = vld [vmem:[#allocation2 + $0x18a] sm:$0xff] }
 0x1c5   : > { %1190 = vrot.lane.b32.xlu1 %v1680_v61, %s2910_s7 }
 0x1c6   : > { %1192 = vrot.lane.b32.xlu0 %v1681_v47, %s2910_s7 }
 0x1c7   : > { %v1364_v14 = vpop.permute.xlu1 %1363  ;;  %v1558_v34 = vpop.permute.xlu0 %1557 }
 0x1c8   : > { %1446 = vst.msk [vmem:[#allocation3 + $0x70] sm:$0xff] %vm1431_vm6, %v1364_v14 }
 0x1c9   : > { %1640 = vst.msk [vmem:[#allocation3 + $0x70] sm:$0xff] %vm1625_vm7, %v1558_v34  ;;  %1959 = vrot.lane.b32.xlu1 %v1873_v33, %s2914_s11  ;;  %v1495_v34 = vld [vmem:[#allocation2 + $0x198] sm:$0xff] }
 0x1ca   : > { %1961 = vrot.lane.b32.xlu0 %v1874_v19, %s2914_s11 }
 0x1cb   : > { %v1366_v36 = vpop.permute.xlu1 %1365  ;;  %v1560_v4 = vpop.permute.xlu0 %1559  ;;  %v2056_v7 = vld [vmem:[#allocation3 + $0x60] sm:$0xff]  ;;  %v2057_v35 = vld [vmem:[#allocation3 + $0x68] sm:$0xff] }
 0x1cc   : > { %1447 = vst.msk [vmem:[#allocation3 + $0x78] sm:$0xff] %vm1431_vm6, %v1366_v36  ;;  %2823 = vmatprep.mubr.msk.f32.mxu0 %vm2085_vm10, %v2056_v7  ;;  %v1688_v7 = vld [vmem:[#allocation2 + $0x199] sm:$0xff] }
 0x1cd   : > { %1641 = vst.msk [vmem:[#allocation3 + $0x78] sm:$0xff] %vm1625_vm7, %v1560_v4  ;;  %1383 = vrot.lane.b32.xlu1 %v1873_v33, %s2911_s8  ;;  %2824 = vmatmul.mubr.msk.f32.gmra.mrb[12].mxu0 %vm2085_vm10, %v2057_v35 }
 0x1ce   : > { %1577 = vrot.lane.b32.xlu0 %v1489_v49, %s2912_s13 }
 0x1cf   : > { %v982_v58 = vpop.permute.xlu1 %981 }
 0x1d0   : > { %1062 = vst.msk [vmem:[#allocation3 + $0x80] sm:$0xff] %vm1045_vm4, %v982_v58  ;;  %v984_v1 = vpop.permute.xlu0 %983 }
 0x1d1   : > { %1063 = vst.msk [vmem:[#allocation3 + $0x88] sm:$0xff] %vm1045_vm4, %v984_v1  ;;  %1385 = vrot.lane.b32.xlu1 %v1874_v19, %s2911_s8 }
 0x1d2   : > { %1579 = vrot.lane.b32.xlu0 %v1490_v63, %s2912_s13 }
 0x1d3   : > { %v1751_v59 = vpop.permute.xlu1 %1750 }
 0x1d4   : > { %1833 = vst.msk [vmem:[#allocation3 + $0x70] sm:$0xff] %vm1818_vm8, %v1751_v59  ;;  %v1753_v37 = vpop.permute.xlu0 %1752 }
 0x1d5   : > { %1834 = vst.msk [vmem:[#allocation3 + $0x78] sm:$0xff] %vm1818_vm8, %v1753_v37  ;;  %1001 = vrot.lane.b32.xlu1 %v1489_v49, %s2909_s6  ;;  %v1496_v49 = vld [vmem:[#allocation2 + $0x1a0] sm:$0xff] }
 0x1d6   : > { %1003 = vrot.lane.b32.xlu0 %v1490_v63, %s2909_s6  ;;  %v1881_v63 = vld [vmem:[#allocation2 + $0x19a] sm:$0xff] }
 0x1d7   : > { %v1175_v45 = vpop.permute.xlu1 %1174 }
 0x1d8   : > { %1255 = vst.msk [vmem:[#allocation3 + $0x80] sm:$0xff] %vm1238_vm5, %v1175_v45  ;;  %v1177_v18 = vpop.permute.xlu0 %1176  ;;  %v1689_v45 = vld [vmem:[#allocation2 + $0x1a1] sm:$0xff] }
 0x1d9   : > { %1256 = vst.msk [vmem:[#allocation3 + $0x88] sm:$0xff] %vm1238_vm5, %v1177_v18  ;;  %1770 = vrot.lane.b32.xlu1 %v1682_v53, %s2913_s20 }
 0x1da   : > { %1772 = vrot.lane.b32.xlu0 %v1683_v27, %s2913_s20 }
 0x1db   : > { %v1944_v40 = vpop.permute.xlu1 %1943 }
 0x1dc   : > { %2026 = vst.msk [vmem:[#allocation3 + $0x70] sm:$0xff] %vm2011_vm9, %v1944_v40  ;;  %v1946_v22 = vpop.permute.xlu0 %1945 }
 0x1dd   : > { %2027 = vst.msk [vmem:[#allocation3 + $0x78] sm:$0xff] %vm2011_vm9, %v1946_v22  ;;  %1194 = vrot.lane.b32.xlu1 %v1682_v53, %s2910_s7 }
 0x1de   : > { %1196 = vrot.lane.b32.xlu0 %v1683_v27, %s2910_s7 }
 0x1df   : > { %v1368_v26 = vpop.permute.xlu1 %1367 }
 0x1e0   : > { %1448 = vst.msk [vmem:[#allocation3 + $0x80] sm:$0xff] %vm1431_vm6, %v1368_v26  ;;  %v1562_v62 = vpop.permute.xlu0 %1561 }
 0x1e1   : > { %1642 = vst.msk [vmem:[#allocation3 + $0x80] sm:$0xff] %vm1625_vm7, %v1562_v62  ;;  %1963 = vrot.lane.b32.xlu1 %v1875_v21, %s2914_s11 }
 0x1e2   : > { %1965 = vrot.lane.b32.xlu0 %v1876_v52, %s2914_s11 }
 0x1e3   : > { %v1370_v3 = vpop.permute.xlu1 %1369  ;;  %v2058_v6 = vld [vmem:[#allocation3 + $0x70] sm:$0xff] }
 0x1e4   : > { %1449 = vst.msk [vmem:[#allocation3 + $0x88] sm:$0xff] %vm1431_vm6, %v1370_v3  ;;  %v1564_v50 = vpop.permute.xlu0 %1563  ;;  %2826 = vmatprep.mubr.msk.f32.mxu0 %vm2085_vm10, %v2058_v6  ;;  %v2059_v10 = vld [vmem:[#allocation3 + $0x78] sm:$0xff] }
 0x1e5   : > { %1643 = vst.msk [vmem:[#allocation3 + $0x88] sm:$0xff] %vm1625_vm7, %v1564_v50  ;;  %1387 = vrot.lane.b32.xlu1 %v1875_v21, %s2911_s8  ;;  %2827 = vmatmul.mubr.msk.f32.gmra.mrb[14].mxu0 %vm2085_vm10, %v2059_v10  ;;  %v1882_v6 = vld [vmem:[#allocation2 + $0x1a2] sm:$0xff] }
 0x1e6   : > { %1581 = vrot.lane.b32.xlu0 %v1491_v9, %s2912_s13 }
 0x1e7   : > { %v986_v46 = vpop.permute.xlu1 %985 }
 0x1e8   : > { %1064 = vst.msk [vmem:[#allocation3 + $0x90] sm:$0xff] %vm1045_vm4, %v986_v46  ;;  %v988_v24 = vpop.permute.xlu0 %987 }
 0x1e9   : > { %1065 = vst.msk [vmem:[#allocation3 + $0x98] sm:$0xff] %vm1045_vm4, %v988_v24  ;;  %1389 = vrot.lane.b32.xlu1 %v1876_v52, %s2911_s8 }
 0x1ea   : > { %1583 = vrot.lane.b32.xlu0 %v1492_v55, %s2912_s13 }
 0x1eb   : > { %v1755_v39 = vpop.permute.xlu1 %1754 }
 0x1ec   : > { %1835 = vst.msk [vmem:[#allocation3 + $0x80] sm:$0xff] %vm1818_vm8, %v1755_v39  ;;  %v1757_v41 = vpop.permute.xlu0 %1756 }
 0x1ed   : > { %1836 = vst.msk [vmem:[#allocation3 + $0x88] sm:$0xff] %vm1818_vm8, %v1757_v41  ;;  %1005 = vrot.lane.b32.xlu1 %v1491_v9, %s2909_s6 }
 0x1ee   : > { %1007 = vrot.lane.b32.xlu0 %v1492_v55, %s2909_s6 }
 0x1ef   : > { %v1179_v48 = vpop.permute.xlu1 %1178 }
 0x1f0   : > { %1257 = vst.msk [vmem:[#allocation3 + $0x90] sm:$0xff] %vm1238_vm5, %v1179_v48  ;;  %v1181_v20 = vpop.permute.xlu0 %1180 }
 0x1f1   : > { %1258 = vst.msk [vmem:[#allocation3 + $0x98] sm:$0xff] %vm1238_vm5, %v1181_v20  ;;  %1774 = vrot.lane.b32.xlu1 %v1684_v25, %s2913_s20 }
 0x1f2   : > { %1776 = vrot.lane.b32.xlu0 %v1685_v54, %s2913_s20 }
 0x1f3   : > { %v1948_v8 = vpop.permute.xlu1 %1947 }
 0x1f4   : > { %2028 = vst.msk [vmem:[#allocation3 + $0x80] sm:$0xff] %vm2011_vm9, %v1948_v8  ;;  %v1950_v23 = vpop.permute.xlu0 %1949 }
 0x1f5   : > { %2029 = vst.msk [vmem:[#allocation3 + $0x88] sm:$0xff] %vm2011_vm9, %v1950_v23  ;;  %1198 = vrot.lane.b32.xlu1 %v1684_v25, %s2910_s7 }
 0x1f6   : > { %1200 = vrot.lane.b32.xlu0 %v1685_v54, %s2910_s7 }
 0x1f7   : > { %v1372_v12 = vpop.permute.xlu1 %1371 }
 0x1f8   : > { %1450 = vst.msk [vmem:[#allocation3 + $0x90] sm:$0xff] %vm1431_vm6, %v1372_v12  ;;  %v1566_v57 = vpop.permute.xlu0 %1565 }
 0x1f9   : > { %1644 = vst.msk [vmem:[#allocation3 + $0x90] sm:$0xff] %vm1625_vm7, %v1566_v57  ;;  %1967 = vrot.lane.b32.xlu1 %v1877_v60, %s2914_s11 }
 0x1fa   : > { %1969 = vrot.lane.b32.xlu0 %v1878_v44, %s2914_s11 }
 0x1fb   : > { %v1374_v13 = vpop.permute.xlu1 %1373  ;;  %v2060_v0 = vld [vmem:[#allocation3 + $0x80] sm:$0xff] }
 0x1fc   : > { %1451 = vst.msk [vmem:[#allocation3 + $0x98] sm:$0xff] %vm1431_vm6, %v1374_v13  ;;  %v1568_v28 = vpop.permute.xlu0 %1567  ;;  %2829 = vmatprep.mubr.msk.f32.mxu1 %vm2085_vm10, %v2060_v0  ;;  %v2061_v2 = vld [vmem:[#allocation3 + $0x88] sm:$0xff] }
 0x1fd   : > { %1645 = vst.msk [vmem:[#allocation3 + $0x98] sm:$0xff] %vm1625_vm7, %v1568_v28  ;;  %1391 = vrot.lane.b32.xlu1 %v1877_v60, %s2911_s8  ;;  %2830 = vmatmul.mubr.msk.f32.vlgmr.msra.gmra.mrb[0].mxu1 %vm2085_vm10, %v2061_v2 }
 0x1fe   : > { %1585 = vrot.lane.b32.xlu0 %v1493_v5, %s2912_s13 }
 0x1ff   : > { %v990_v43 = vpop.permute.xlu1 %989 }
 0x200   : > { %1066 = vst.msk [vmem:[#allocation3 + $0xa0] sm:$0xff] %vm1045_vm4, %v990_v43  ;;  %v992_v30 = vpop.permute.xlu0 %991 }
 0x201   : > { %1067 = vst.msk [vmem:[#allocation3 + $0xa8] sm:$0xff] %vm1045_vm4, %v992_v30  ;;  %1393 = vrot.lane.b32.xlu1 %v1878_v44, %s2911_s8 }
 0x202   : > { %1587 = vrot.lane.b32.xlu0 %v1494_v29, %s2912_s13 }
 0x203   : > { %v1759_v11 = vpop.permute.xlu1 %1758 }
 0x204   : > { %1837 = vst.msk [vmem:[#allocation3 + $0x90] sm:$0xff] %vm1818_vm8, %v1759_v11  ;;  %v1761_v31 = vpop.permute.xlu0 %1760 }
 0x205   : > { %1838 = vst.msk [vmem:[#allocation3 + $0x98] sm:$0xff] %vm1818_vm8, %v1761_v31  ;;  %1009 = vrot.lane.b32.xlu1 %v1493_v5, %s2909_s6 }
 0x206   : > { %1011 = vrot.lane.b32.xlu0 %v1494_v29, %s2909_s6 }
 0x207   : > { %v1183_v51 = vpop.permute.xlu1 %1182 }
 0x208   : > { %1259 = vst.msk [vmem:[#allocation3 + $0xa0] sm:$0xff] %vm1238_vm5, %v1183_v51  ;;  %v1185_v56 = vpop.permute.xlu0 %1184 }
 0x209   : > { %1260 = vst.msk [vmem:[#allocation3 + $0xa8] sm:$0xff] %vm1238_vm5, %v1185_v56  ;;  %1778 = vrot.lane.b32.xlu1 %v1686_v15, %s2913_s20 }
 0x20a   : > { %1780 = vrot.lane.b32.xlu0 %v1687_v16, %s2913_s20 }
 0x20b   : > { %v1952_v61 = vpop.permute.xlu1 %1951 }
 0x20c   : > { %2030 = vst.msk [vmem:[#allocation3 + $0x90] sm:$0xff] %vm2011_vm9, %v1952_v61  ;;  %v1954_v42 = vpop.permute.xlu0 %1953 }
 0x20d   : > { %2031 = vst.msk [vmem:[#allocation3 + $0x98] sm:$0xff] %vm2011_vm9, %v1954_v42  ;;  %1202 = vrot.lane.b32.xlu1 %v1686_v15, %s2910_s7 }
 0x20e   : > { %1204 = vrot.lane.b32.xlu0 %v1687_v16, %s2910_s7  ;;  %s3949_s7 = scalar_lea.vmem %s4169_s4, %s2744_s21  ;;  %s2707_s21 = sshll.u32 %s4173_s19, 1 }
 0x20f   : > { %v1376_v47 = vpop.permute.xlu1 %1375  ;;  %s235_s17 = scalar_lea.vmem %s4170_s5, %s2707_s21 }
 0x210   : > { %1452 = vst.msk [vmem:[#allocation3 + $0xa0] sm:$0xff] %vm1431_vm6, %v1376_v47  ;;  %v1570_v38 = vpop.permute.xlu0 %1569 }
 0x211   : > { %1646 = vst.msk [vmem:[#allocation3 + $0xa0] sm:$0xff] %vm1625_vm7, %v1570_v38  ;;  %1971 = vrot.lane.b32.xlu1 %v1879_v32, %s2914_s11 }
 0x212   : > { %1973 = vrot.lane.b32.xlu0 %v1880_v17, %s2914_s11 }
 0x213   : > { %v1378_v33 = vpop.permute.xlu1 %1377  ;;  %v2062_v14 = vld [vmem:[#allocation3 + $0x90] sm:$0xff] }
 0x214   : > { %1453 = vst.msk [vmem:[#allocation3 + $0xa8] sm:$0xff] %vm1431_vm6, %v1378_v33  ;;  %v1572_v19 = vpop.permute.xlu0 %1571  ;;  %2832 = vmatprep.mubr.msk.f32.mxu1 %vm2085_vm10, %v2062_v14  ;;  %v2063_v36 = vld [vmem:[#allocation3 + $0x98] sm:$0xff] }
 0x215   : > { %1647 = vst.msk [vmem:[#allocation3 + $0xa8] sm:$0xff] %vm1625_vm7, %v1572_v19  ;;  %1395 = vrot.lane.b32.xlu1 %v1879_v32, %s2911_s8  ;;  %2833 = vmatmul.mubr.msk.f32.gmra.mrb[2].mxu1 %vm2085_vm10, %v2063_v36 }
 0x216   : > { %1589 = vrot.lane.b32.xlu0 %v1495_v34, %s2912_s13 }
 0x217   : > { %v994_v4 = vpop.permute.xlu1 %993 }
 0x218   : > { %1068 = vst.msk [vmem:[#allocation3 + $0xb0] sm:$0xff] %vm1045_vm4, %v994_v4  ;;  %v996_v35 = vpop.permute.xlu0 %995 }
 0x219   : > { %1069 = vst.msk [vmem:[#allocation3 + $0xb8] sm:$0xff] %vm1045_vm4, %v996_v35  ;;  %1397 = vrot.lane.b32.xlu1 %v1880_v17, %s2911_s8 }
 0x21a   : > { %1782 = vrot.lane.b32.xlu0 %v1688_v7, %s2913_s20 }
 0x21b   : > { %v1763_v58 = vpop.permute.xlu1 %1762 }
 0x21c   : > { %1839 = vst.msk [vmem:[#allocation3 + $0xa0] sm:$0xff] %vm1818_vm8, %v1763_v58  ;;  %v1765_v1 = vpop.permute.xlu0 %1764 }
 0x21d   : > { %1840 = vst.msk [vmem:[#allocation3 + $0xa8] sm:$0xff] %vm1818_vm8, %v1765_v1  ;;  %1591 = vrot.lane.b32.xlu1 %v1496_v49, %s2912_s13  ;;  %v2807_v59 = vpop.f32.mrb[0].mxu0 }
 0x21e   : > { %v2408_v37 = vsel %vm346_vm0, %v2807_v59, 0.0  ;;  %v2477_v53 = vmul.f32 %v2807_v59, %v2807_v59  ;;  %2581 = vst.msk [vmem:[%s3949_s7 + $0x8] sm:$0xff] %vm346_vm0, %v2807_v59  ;;  %v2248_v27 = vpop.f32.mrb[1].mxu0  ;;  %1975 = vrot.lane.b32.xlu0 %v1881_v63, %s2914_s11 }
 0x21f   : > { %v1187_v18 = vpop.permute.xlu1 %1186  ;;  %v2407_v40 = vsel %vm346_vm0, %v2248_v27, 0.0  ;;  %v2476_v22 = vmul.f32 %v2248_v27, %v2248_v27  ;;  %2580 = vst.msk [vmem:[%s3949_s7] sm:$0xff] %vm346_vm0, %v2248_v27 }
 0x220   : > { %1261 = vst.msk [vmem:[#allocation3 + $0xb0] sm:$0xff] %vm1238_vm5, %v1187_v18  ;;  %v1189_v21 = vpop.permute.xlu0 %1188  ;;  %v2509_v26 = vsel %vm346_vm0, %v2477_v53, 0.0  ;;  %v2409_v52 = vadd.f32 %v2408_v37, %v2407_v40 }
 0x221   : > { %1262 = vst.msk [vmem:[#allocation3 + $0xb8] sm:$0xff] %vm1238_vm5, %v1189_v21  ;;  %1784 = vrot.lane.b32.xlu1 %v1689_v45, %s2913_s20  ;;  %v2508_v62 = vsel %vm346_vm0, %v2476_v22, 0.0 }
 0x222   : > { %v2510_v3 = vadd.f32 %v2509_v26, %v2508_v62 }
 0x223   : > { %v1956_v9 = vpop.permute.xlu1 %1955 }
 0x224   : > { %2032 = vst.msk [vmem:[#allocation3 + $0xa0] sm:$0xff] %vm2011_vm9, %v1956_v9  ;;  %v1958_v50 = vpop.permute.xlu0 %1957 }
 0x225   : > { %2033 = vst.msk [vmem:[#allocation3 + $0xa8] sm:$0xff] %vm2011_vm9, %v1958_v50  ;;  %1977 = vrot.lane.b32.xlu1 %v1882_v6, %s2914_s11 }
 0x227   : > { %v1380_v10 = vpop.permute.xlu1 %1379 }
 0x228   : > { %1454 = vst.msk [vmem:[#allocation3 + $0xb0] sm:$0xff] %vm1431_vm6, %v1380_v10  ;;  %v1574_v46 = vpop.permute.xlu0 %1573 }
 0x229   : > { %1648 = vst.msk [vmem:[#allocation3 + $0xb0] sm:$0xff] %vm1625_vm7, %v1574_v46 }
 0x22b   : > { %v1382_v55 = vpop.permute.xlu1 %1381  ;;  %v2064_v24 = vld [vmem:[#allocation3 + $0xa0] sm:$0xff] }
 0x22c   : > { %1455 = vst.msk [vmem:[#allocation3 + $0xb8] sm:$0xff] %vm1431_vm6, %v1382_v55  ;;  %v1576_v39 = vpop.permute.xlu0 %1575  ;;  %2835 = vmatprep.mubr.msk.f32.mxu1 %vm2085_vm10, %v2064_v24  ;;  %v2065_v41 = vld [vmem:[#allocation3 + $0xa8] sm:$0xff] }
 0x22d   : > { %1649 = vst.msk [vmem:[#allocation3 + $0xb8] sm:$0xff] %vm1625_vm7, %v1576_v39  ;;  %2836 = vmatmul.mubr.msk.f32.gmra.mrb[4].mxu1 %vm2085_vm10, %v2065_v41 }
 0x22f   : > { %v998_v25 = vpop.permute.xlu1 %997 }
 0x230   : > { %1070 = vst.msk [vmem:[#allocation3 + $0xc0] sm:$0xff] %vm1045_vm4, %v998_v25  ;;  %v1000_v48 = vpop.permute.xlu0 %999  ;;  %v2810_v54 = vpop.f32.mrb[2].mxu0 }
 0x231   : > { %1071 = vst.msk [vmem:[#allocation3 + $0xc8] sm:$0xff] %vm1045_vm4, %v1000_v48  ;;  %v2479_v20 = vmul.f32 %v2810_v54, %v2810_v54  ;;  %v2258_v8 = vpop.f32.mrb[3].mxu0  ;;  %v2412_v23 = vsel %vm346_vm0, %v2810_v54, 0.0 }
 0x232   : > { %2583 = vst.msk [vmem:[%s3949_s7 + $0x18] sm:$0xff] %vm346_vm0, %v2810_v54  ;;  %v2410_v60 = vsel %vm346_vm0, %v2258_v8, 0.0  ;;  %v2478_v12 = vmul.f32 %v2258_v8, %v2258_v8  ;;  %2582 = vst.msk [vmem:[%s3949_s7 + $0x10] sm:$0xff] %vm346_vm0, %v2258_v8 }
 0x233   : > { %v2411_v44 = vadd.f32 %v2410_v60, %v2409_v52  ;;  %v1767_v57 = vpop.permute.xlu1 %1766  ;;  %v2513_v13 = vsel %vm346_vm0, %v2479_v20, 0.0 }
 0x234   : > { %v2511_v0 = vsel %vm346_vm0, %v2478_v12, 0.0  ;;  %1841 = vst.msk [vmem:[#allocation3 + $0xb0] sm:$0xff] %vm1818_vm8, %v1767_v57  ;;  %v1769_v5 = vpop.permute.xlu0 %1768 }
 0x235   : > { %v2512_v28 = vadd.f32 %v2511_v0, %v2510_v3  ;;  %1842 = vst.msk [vmem:[#allocation3 + $0xb8] sm:$0xff] %vm1818_vm8, %v1769_v5  ;;  %v2413_v2 = vadd.f32 %v2412_v23, %v2411_v44 }
 0x237   : > { %v1191_v43 = vpop.permute.xlu1 %1190  ;;  %v2514_v29 = vadd.f32 %v2513_v13, %v2512_v28 }
 0x238   : > { %1263 = vst.msk [vmem:[#allocation3 + $0xc0] sm:$0xff] %vm1238_vm5, %v1191_v43  ;;  %v1193_v30 = vpop.permute.xlu0 %1192 }
 0x239   : > { %1264 = vst.msk [vmem:[#allocation3 + $0xc8] sm:$0xff] %vm1238_vm5, %v1193_v30 }
 0x23b   : > { %v1960_v11 = vpop.permute.xlu1 %1959 }
 0x23c   : > { %2034 = vst.msk [vmem:[#allocation3 + $0xb0] sm:$0xff] %vm2011_vm9, %v1960_v11  ;;  %v1962_v31 = vpop.permute.xlu0 %1961 }
 0x23d   : > { %2035 = vst.msk [vmem:[#allocation3 + $0xb8] sm:$0xff] %vm2011_vm9, %v1962_v31 }
 0x23f   : > { %v1384_v15 = vpop.permute.xlu1 %1383 }
 0x240   : > { %1456 = vst.msk [vmem:[#allocation3 + $0xc0] sm:$0xff] %vm1431_vm6, %v1384_v15  ;;  %v1578_v51 = vpop.permute.xlu0 %1577 }
 0x241   : > { %1650 = vst.msk [vmem:[#allocation3 + $0xc0] sm:$0xff] %vm1625_vm7, %v1578_v51 }
 0x243   : > { %v1386_v16 = vpop.permute.xlu1 %1385  ;;  %v2066_v56 = vld [vmem:[#allocation3 + $0xb0] sm:$0xff] }
 0x244   : > { %1457 = vst.msk [vmem:[#allocation3 + $0xc8] sm:$0xff] %vm1431_vm6, %v1386_v16  ;;  %v1580_v61 = vpop.permute.xlu0 %1579  ;;  %v2813_v42 = vpop.f32.mrb[4].mxu0  ;;  %2838 = vmatprep.mubr.msk.f32.mxu1 %vm2085_vm10, %v2066_v56  ;;  %v2067_v32 = vld [vmem:[#allocation3 + $0xb8] sm:$0xff] }
 0x245   : > { %1651 = vst.msk [vmem:[#allocation3 + $0xc8] sm:$0xff] %vm1625_vm7, %v1580_v61  ;;  %v2481_v47 = vmul.f32 %v2813_v42, %v2813_v42  ;;  %v2268_v17 = vpop.f32.mrb[5].mxu0  ;;  %2839 = vmatmul.mubr.msk.f32.gmra.mrb[6].mxu1 %vm2085_vm10, %v2067_v32  ;;  %v2416_v38 = vsel %vm346_vm0, %v2813_v42, 0.0 }
 0x246   : > { %2585 = vst.msk [vmem:[%s3949_s7 + $0x28] sm:$0xff] %vm346_vm0, %v2813_v42  ;;  %v2414_v33 = vsel %vm346_vm0, %v2268_v17, 0.0  ;;  %v2480_v14 = vmul.f32 %v2268_v17, %v2268_v17  ;;  %2584 = vst.msk [vmem:[%s3949_s7 + $0x20] sm:$0xff] %vm346_vm0, %v2268_v17 }
 0x247   : > { %v2415_v34 = vadd.f32 %v2414_v33, %v2413_v2  ;;  %v1002_v19 = vpop.permute.xlu1 %1001  ;;  %v2517_v36 = vsel %vm346_vm0, %v2481_v47, 0.0 }
 0x248   : > { %v2515_v4 = vsel %vm346_vm0, %v2480_v14, 0.0  ;;  %1072 = vst.msk [vmem:[#allocation3 + $0xd0] sm:$0xff] %vm1045_vm4, %v1002_v19  ;;  %v1004_v7 = vpop.permute.xlu0 %1003 }
 0x249   : > { %v2516_v35 = vadd.f32 %v2515_v4, %v2514_v29  ;;  %1073 = vst.msk [vmem:[#allocation3 + $0xd8] sm:$0xff] %vm1045_vm4, %v1004_v7  ;;  %v2417_v49 = vadd.f32 %v2416_v38, %v2415_v34 }
 0x24b   : > { %v1771_v58 = vpop.permute.xlu1 %1770  ;;  %v2518_v63 = vadd.f32 %v2517_v36, %v2516_v35 }
 0x24c   : > { %1843 = vst.msk [vmem:[#allocation3 + $0xc0] sm:$0xff] %vm1818_vm8, %v1771_v58  ;;  %v1773_v1 = vpop.permute.xlu0 %1772 }
 0x24d   : > { %1844 = vst.msk [vmem:[#allocation3 + $0xc8] sm:$0xff] %vm1818_vm8, %v1773_v1 }
 0x24f   : > { %v1195_v59 = vpop.permute.xlu1 %1194 }
 0x250   : > { %1265 = vst.msk [vmem:[#allocation3 + $0xd0] sm:$0xff] %vm1238_vm5, %v1195_v59  ;;  %v1197_v37 = vpop.permute.xlu0 %1196 }
 0x251   : > { %1266 = vst.msk [vmem:[#allocation3 + $0xd8] sm:$0xff] %vm1238_vm5, %v1197_v37 }
 0x253   : > { %v1964_v53 = vpop.permute.xlu1 %1963 }
 0x254   : > { %2036 = vst.msk [vmem:[#allocation3 + $0xc0] sm:$0xff] %vm2011_vm9, %v1964_v53  ;;  %v1966_v45 = vpop.permute.xlu0 %1965 }
 0x255   : > { %2037 = vst.msk [vmem:[#allocation3 + $0xc8] sm:$0xff] %vm2011_vm9, %v1966_v45 }
 0x257   : > { %v1388_v27 = vpop.permute.xlu1 %1387 }
 0x258   : > { %1458 = vst.msk [vmem:[#allocation3 + $0xd0] sm:$0xff] %vm1431_vm6, %v1388_v27  ;;  %v1582_v18 = vpop.permute.xlu0 %1581  ;;  %v2816_v40 = vpop.f32.mrb[6].mxu0 }
 0x259   : > { %1652 = vst.msk [vmem:[#allocation3 + $0xd0] sm:$0xff] %vm1625_vm7, %v1582_v18  ;;  %v2483_v22 = vmul.f32 %v2816_v40, %v2816_v40  ;;  %v2278_v21 = vpop.f32.mrb[7].mxu0  ;;  %v2420_v26 = vsel %vm346_vm0, %v2816_v40, 0.0 }
 0x25a   : > { %2587 = vst.msk [vmem:[%s3949_s7 + $0x38] sm:$0xff] %vm346_vm0, %v2816_v40  ;;  %v2418_v52 = vsel %vm346_vm0, %v2278_v21, 0.0  ;;  %v2482_v62 = vmul.f32 %v2278_v21, %v2278_v21  ;;  %2586 = vst.msk [vmem:[%s3949_s7 + $0x30] sm:$0xff] %vm346_vm0, %v2278_v21 }
 0x25b   : > { %v2419_v3 = vadd.f32 %v2418_v52, %v2417_v49  ;;  %v1390_v6 = vpop.permute.xlu1 %1389  ;;  %v2068_v9 = vld [vmem:[#allocation3 + $0xc0] sm:$0xff]  ;;  %v2521_v50 = vsel %vm346_vm0, %v2483_v22, 0.0 }
 0x25c   : > { %v2519_v10 = vsel %vm346_vm0, %v2482_v62, 0.0  ;;  %1459 = vst.msk [vmem:[#allocation3 + $0xd8] sm:$0xff] %vm1431_vm6, %v1390_v6  ;;  %v1584_v46 = vpop.permute.xlu0 %1583  ;;  %2841 = vmatprep.mubr.msk.f32.mxu1 %vm2085_vm10, %v2068_v9  ;;  %v2069_v55 = vld [vmem:[#allocation3 + $0xc8] sm:$0xff] }
 0x25d   : > { %v2520_v24 = vadd.f32 %v2519_v10, %v2518_v63  ;;  %1653 = vst.msk [vmem:[#allocation3 + $0xd8] sm:$0xff] %vm1625_vm7, %v1584_v46  ;;  %2842 = vmatmul.mubr.msk.f32.gmra.mrb[8].mxu1 %vm2085_vm10, %v2069_v55  ;;  %v2421_v39 = vadd.f32 %v2420_v26, %v2419_v3 }
 0x25f   : > { %v1006_v41 = vpop.permute.xlu1 %1005  ;;  %v2522_v25 = vadd.f32 %v2521_v50, %v2520_v24 }
 0x260   : > { %1074 = vst.msk [vmem:[#allocation3 + $0xe0] sm:$0xff] %vm1045_vm4, %v1006_v41  ;;  %v1008_v48 = vpop.permute.xlu0 %1007 }
 0x261   : > { %1075 = vst.msk [vmem:[#allocation3 + $0xe8] sm:$0xff] %vm1045_vm4, %v1008_v48 }
 0x263   : > { %v1775_v54 = vpop.permute.xlu1 %1774 }
 0x264   : > { %1845 = vst.msk [vmem:[#allocation3 + $0xd0] sm:$0xff] %vm1818_vm8, %v1775_v54  ;;  %v1777_v20 = vpop.permute.xlu0 %1776 }
 0x265   : > { %1846 = vst.msk [vmem:[#allocation3 + $0xd8] sm:$0xff] %vm1818_vm8, %v1777_v20 }
 0x267   : > { %v1199_v8 = vpop.permute.xlu1 %1198 }
 0x268   : > { %1267 = vst.msk [vmem:[#allocation3 + $0xe0] sm:$0xff] %vm1238_vm5, %v1199_v8  ;;  %v1201_v23 = vpop.permute.xlu0 %1200 }
 0x269   : > { %1268 = vst.msk [vmem:[#allocation3 + $0xe8] sm:$0xff] %vm1238_vm5, %v1201_v23 }
 0x26b   : > { %v1968_v60 = vpop.permute.xlu1 %1967 }
 0x26c   : > { %2038 = vst.msk [vmem:[#allocation3 + $0xd0] sm:$0xff] %vm2011_vm9, %v1968_v60  ;;  %v1970_v12 = vpop.permute.xlu0 %1969 }
 0x26d   : > { %2039 = vst.msk [vmem:[#allocation3 + $0xd8] sm:$0xff] %vm2011_vm9, %v1970_v12 }
 0x26f   : > { %v1392_v44 = vpop.permute.xlu1 %1391 }
 0x270   : > { %1460 = vst.msk [vmem:[#allocation3 + $0xe0] sm:$0xff] %vm1431_vm6, %v1392_v44  ;;  %v1586_v57 = vpop.permute.xlu0 %1585  ;;  %v2819_v13 = vpop.f32.mrb[8].mxu0 }
 0x271   : > { %1654 = vst.msk [vmem:[#allocation3 + $0xe0] sm:$0xff] %vm1625_vm7, %v1586_v57  ;;  %v2485_v0 = vmul.f32 %v2819_v13, %v2819_v13  ;;  %v2288_v5 = vpop.f32.mrb[9].mxu0  ;;  %v2424_v28 = vsel %vm346_vm0, %v2819_v13, 0.0 }
 0x272   : > { %2589 = vst.msk [vmem:[%s3949_s7 + $0x48] sm:$0xff] %vm346_vm0, %v2819_v13  ;;  %v2422_v2 = vsel %vm346_vm0, %v2288_v5, 0.0  ;;  %v2484_v43 = vmul.f32 %v2288_v5, %v2288_v5  ;;  %2588 = vst.msk [vmem:[%s3949_s7 + $0x40] sm:$0xff] %vm346_vm0, %v2288_v5 }
 0x273   : > { %v2423_v29 = vadd.f32 %v2422_v2, %v2421_v39  ;;  %v1394_v30 = vpop.permute.xlu1 %1393  ;;  %v2070_v11 = vld [vmem:[#allocation3 + $0xd0] sm:$0xff]  ;;  %v2525_v31 = vsel %vm346_vm0, %v2485_v0, 0.0 }
 0x274   : > { %v2523_v15 = vsel %vm346_vm0, %v2484_v43, 0.0  ;;  %1461 = vst.msk [vmem:[#allocation3 + $0xe8] sm:$0xff] %vm1431_vm6, %v1394_v30  ;;  %v1588_v51 = vpop.permute.xlu0 %1587  ;;  %2844 = vmatprep.mubr.msk.f32.mxu1 %vm2085_vm10, %v2070_v11  ;;  %v2071_v16 = vld [vmem:[#allocation3 + $0xd8] sm:$0xff] }
 0x275   : > { %v2524_v56 = vadd.f32 %v2523_v15, %v2522_v25  ;;  %1655 = vst.msk [vmem:[#allocation3 + $0xe8] sm:$0xff] %vm1625_vm7, %v1588_v51  ;;  %2845 = vmatmul.mubr.msk.f32.gmra.mrb[10].mxu1 %vm2085_vm10, %v2071_v16  ;;  %v2425_v61 = vadd.f32 %v2424_v28, %v2423_v29 }
 0x277   : > { %v1010_v42 = vpop.permute.xlu1 %1009  ;;  %v2526_v32 = vadd.f32 %v2525_v31, %v2524_v56 }
 0x278   : > { %1076 = vst.msk [vmem:[#allocation3 + $0xf0] sm:$0xff] %vm1045_vm4, %v1010_v42  ;;  %v1012_v47 = vpop.permute.xlu0 %1011 }
 0x279   : > { %1077 = vst.msk [vmem:[#allocation3 + $0xf8] sm:$0xff] %vm1045_vm4, %v1012_v47 }
 0x27b   : > { %v1779_v17 = vpop.permute.xlu1 %1778 }
 0x27c   : > { %1847 = vst.msk [vmem:[#allocation3 + $0xe0] sm:$0xff] %vm1818_vm8, %v1779_v17  ;;  %v1781_v38 = vpop.permute.xlu0 %1780 }
 0x27d   : > { %1848 = vst.msk [vmem:[#allocation3 + $0xe8] sm:$0xff] %vm1818_vm8, %v1781_v38 }
 0x27f   : > { %v1203_v33 = vpop.permute.xlu1 %1202 }
 0x280   : > { %1269 = vst.msk [vmem:[#allocation3 + $0xf0] sm:$0xff] %vm1238_vm5, %v1203_v33  ;;  %v1205_v14 = vpop.permute.xlu0 %1204 }
 0x281   : > { %1270 = vst.msk [vmem:[#allocation3 + $0xf8] sm:$0xff] %vm1238_vm5, %v1205_v14 }
 0x283   : > { %v1972_v34 = vpop.permute.xlu1 %1971 }
 0x284   : > { %2040 = vst.msk [vmem:[#allocation3 + $0xe0] sm:$0xff] %vm2011_vm9, %v1972_v34  ;;  %v1974_v19 = vpop.permute.xlu0 %1973 }
 0x285   : > { %2041 = vst.msk [vmem:[#allocation3 + $0xe8] sm:$0xff] %vm2011_vm9, %v1974_v19 }
 0x287   : > { %v1396_v36 = vpop.permute.xlu1 %1395 }
 0x288   : > { %1462 = vst.msk [vmem:[#allocation3 + $0xf0] sm:$0xff] %vm1431_vm6, %v1396_v36  ;;  %v2822_v4 = vpop.f32.mrb[10].mxu0  ;;  %v1590_v7 = vpop.permute.xlu0 %1589 }
 0x289   : > { %v2487_v35 = vmul.f32 %v2822_v4, %v2822_v4  ;;  %2591 = vst.msk [vmem:[%s3949_s7 + $0x58] sm:$0xff] %vm346_vm0, %v2822_v4  ;;  %v2298_v49 = vpop.f32.mrb[11].mxu0  ;;  %v2428_v58 = vsel %vm346_vm0, %v2822_v4, 0.0 }
 0x28a   : > { %1656 = vst.msk [vmem:[#allocation3 + $0xf0] sm:$0xff] %vm1625_vm7, %v1590_v7  ;;  %v2426_v63 = vsel %vm346_vm0, %v2298_v49, 0.0  ;;  %v2486_v1 = vmul.f32 %v2298_v49, %v2298_v49 }
 0x28b   : > { %2590 = vst.msk [vmem:[%s3949_s7 + $0x50] sm:$0xff] %vm346_vm0, %v2298_v49  ;;  %v2427_v59 = vadd.f32 %v2426_v63, %v2425_v61  ;;  %v1398_v37 = vpop.permute.xlu1 %1397  ;;  %v2072_v53 = vld [vmem:[#allocation3 + $0xe0] sm:$0xff]  ;;  %v2529_v45 = vsel %vm346_vm0, %v2487_v35, 0.0 }
 0x28c   : > { %v2527_v27 = vsel %vm346_vm0, %v2486_v1, 0.0  ;;  %1463 = vst.msk [vmem:[#allocation3 + $0xf8] sm:$0xff] %vm1431_vm6, %v1398_v37  ;;  %2847 = vmatprep.mubr.msk.f32.mxu1 %vm2085_vm10, %v2072_v53  ;;  %v2073_v18 = vld [vmem:[#allocation3 + $0xe8] sm:$0xff]  ;;  %v1783_v40 = vpop.permute.xlu0 %1782 }
 0x28d   : > { %v2528_v22 = vadd.f32 %v2527_v27, %v2526_v32  ;;  %2848 = vmatmul.mubr.msk.f32.gmra.mrb[12].mxu1 %vm2085_vm10, %v2073_v18  ;;  %1849 = vst.msk [vmem:[#allocation3 + $0xf0] sm:$0xff] %vm1818_vm8, %v1783_v40  ;;  %v2429_v21 = vadd.f32 %v2428_v58, %v2427_v59 }
 0x28f   : > { %v1592_v26 = vpop.permute.xlu1 %1591  ;;  %v2530_v52 = vadd.f32 %v2529_v45, %v2528_v22 }
 0x290   : > { %1657 = vst.msk [vmem:[#allocation3 + $0xf8] sm:$0xff] %vm1625_vm7, %v1592_v26  ;;  %v1976_v62 = vpop.permute.xlu0 %1975 }
 0x291   : > { %2042 = vst.msk [vmem:[#allocation3 + $0xf0] sm:$0xff] %vm2011_vm9, %v1976_v62 }
 0x293   : > { %v1785_v3 = vpop.permute.xlu1 %1784 }
 0x294   : > { %1850 = vst.msk [vmem:[#allocation3 + $0xf8] sm:$0xff] %vm1818_vm8, %v1785_v3 }
 0x297   : > { %v1978_v6 = vpop.permute.xlu1 %1977 }
 0x298   : > { %2043 = vst.msk [vmem:[#allocation3 + $0xf8] sm:$0xff] %vm2011_vm9, %v1978_v6  ;;  %v2074_v9 = vld [vmem:[#allocation3 + $0xf0] sm:$0xff] }
 0x299   : > { %2850 = vmatprep.mubr.msk.f32.mxu1 %vm2085_vm10, %v2074_v9 }
 0x29f   : > { %v2075_v50 = vld [vmem:[#allocation3 + $0xf8] sm:$0xff] }
 0x2a0   : > { %v2825_v10 = vpop.f32.mrb[12].mxu0  ;;  %2851 = vmatmul.mubr.msk.f32.gmra.mrb[14].mxu1 %vm2085_vm10, %v2075_v50 }
 0x2a1   : > { %v2489_v46 = vmul.f32 %v2825_v10, %v2825_v10  ;;  %2593 = vst.msk [vmem:[%s3949_s7 + $0x68] sm:$0xff] %vm346_vm0, %v2825_v10  ;;  %v2308_v55 = vpop.f32.mrb[13].mxu0  ;;  %v2432_v24 = vsel %vm346_vm0, %v2825_v10, 0.0 }
 0x2a2   : > { %v2430_v39 = vsel %vm346_vm0, %v2308_v55, 0.0  ;;  %v2488_v41 = vmul.f32 %v2308_v55, %v2308_v55  ;;  %2592 = vst.msk [vmem:[%s3949_s7 + $0x60] sm:$0xff] %vm346_vm0, %v2308_v55 }
 0x2a3   : > { %v2431_v25 = vadd.f32 %v2430_v39, %v2429_v21  ;;  %v2533_v48 = vsel %vm346_vm0, %v2489_v46, 0.0 }
 0x2a4   : > { %v2531_v54 = vsel %vm346_vm0, %v2488_v41, 0.0 }
 0x2a5   : > { %v2532_v20 = vadd.f32 %v2531_v54, %v2530_v52  ;;  %v2433_v8 = vadd.f32 %v2432_v24, %v2431_v25 }
 0x2a7   : > { %v2534_v23 = vadd.f32 %v2533_v48, %v2532_v20 }
 0x2b8   : > { %v2828_v60 = vpop.f32.mrb[14].mxu0 }
 0x2b9   : > { %v2491_v12 = vmul.f32 %v2828_v60, %v2828_v60  ;;  %2595 = vst.msk [vmem:[%s3949_s7 + $0x78] sm:$0xff] %vm346_vm0, %v2828_v60  ;;  %v2318_v44 = vpop.f32.mrb[15].mxu0  ;;  %v2436_v57 = vsel %vm346_vm0, %v2828_v60, 0.0 }
 0x2ba   : > { %v2434_v13 = vsel %vm346_vm0, %v2318_v44, 0.0  ;;  %v2490_v0 = vmul.f32 %v2318_v44, %v2318_v44  ;;  %2594 = vst.msk [vmem:[%s3949_s7 + $0x70] sm:$0xff] %vm346_vm0, %v2318_v44 }
 0x2bb   : > { %v2435_v5 = vadd.f32 %v2434_v13, %v2433_v8  ;;  %v2537_v28 = vsel %vm346_vm0, %v2491_v12, 0.0 }
 0x2bc   : > { %v2535_v2 = vsel %vm346_vm0, %v2490_v0, 0.0 }
 0x2bd   : > { %v2437_v43 = vadd.f32 %v2436_v57, %v2435_v5  ;;  %v2536_v29 = vadd.f32 %v2535_v2, %v2534_v23 }
 0x2bf   : > { %v2538_v30 = vadd.f32 %v2537_v28, %v2536_v29 }
 0x2d0   : > { %v2831_v11 = vpop.f32.mrb[0].mxu1 }
 0x2d1   : > { %v2493_v31 = vmul.f32 %v2831_v11, %v2831_v11  ;;  %2597 = vst.msk [vmem:[%s3949_s7 + $0x88] sm:$0xff] %vm346_vm0, %v2831_v11  ;;  %v2328_v15 = vpop.f32.mrb[1].mxu1  ;;  %v2440_v51 = vsel %vm346_vm0, %v2831_v11, 0.0 }
 0x2d2   : > { %v2438_v16 = vsel %vm346_vm0, %v2328_v15, 0.0  ;;  %v2492_v56 = vmul.f32 %v2328_v15, %v2328_v15  ;;  %2596 = vst.msk [vmem:[%s3949_s7 + $0x80] sm:$0xff] %vm346_vm0, %v2328_v15 }
 0x2d3   : > { %v2439_v61 = vadd.f32 %v2438_v16, %v2437_v43  ;;  %v2541_v42 = vsel %vm346_vm0, %v2493_v31, 0.0 }
 0x2d4   : > { %v2539_v32 = vsel %vm346_vm0, %v2492_v56, 0.0 }
 0x2d5   : > { %v2540_v47 = vadd.f32 %v2539_v32, %v2538_v30  ;;  %v2441_v17 = vadd.f32 %v2440_v51, %v2439_v61 }
 0x2d7   : > { %v2542_v38 = vadd.f32 %v2541_v42, %v2540_v47 }
 0x2e8   : > { %v2834_v33 = vpop.f32.mrb[2].mxu1 }
 0x2e9   : > { %v2495_v14 = vmul.f32 %v2834_v33, %v2834_v33  ;;  %2599 = vst.msk [vmem:[%s3949_s7 + $0x98] sm:$0xff] %vm346_vm0, %v2834_v33  ;;  %v2338_v34 = vpop.f32.mrb[3].mxu1  ;;  %v2444_v19 = vsel %vm346_vm0, %v2834_v33, 0.0 }
 0x2ea   : > { %v2442_v36 = vsel %vm346_vm0, %v2338_v34, 0.0  ;;  %v2494_v4 = vmul.f32 %v2338_v34, %v2338_v34  ;;  %2598 = vst.msk [vmem:[%s3949_s7 + $0x90] sm:$0xff] %vm346_vm0, %v2338_v34 }
 0x2eb   : > { %v2443_v7 = vadd.f32 %v2442_v36, %v2441_v17  ;;  %v2545_v35 = vsel %vm346_vm0, %v2495_v14, 0.0 }
 0x2ec   : > { %v2543_v49 = vsel %vm346_vm0, %v2494_v4, 0.0 }
 0x2ed   : > { %v2544_v58 = vadd.f32 %v2543_v49, %v2542_v38  ;;  %v2445_v63 = vadd.f32 %v2444_v19, %v2443_v7 }
 0x2ef   : > { %v2546_v1 = vadd.f32 %v2545_v35, %v2544_v58 }
 0x300   : > { %v2837_v59 = vpop.f32.mrb[4].mxu1 }
 0x301   : > { %v2497_v37 = vmul.f32 %v2837_v59, %v2837_v59  ;;  %2601 = vst.msk [vmem:[%s3949_s7 + $0xa8] sm:$0xff] %vm346_vm0, %v2837_v59  ;;  %v2348_v53 = vpop.f32.mrb[5].mxu1  ;;  %v2448_v45 = vsel %vm346_vm0, %v2837_v59, 0.0 }
 0x302   : > { %v2446_v27 = vsel %vm346_vm0, %v2348_v53, 0.0  ;;  %v2496_v18 = vmul.f32 %v2348_v53, %v2348_v53  ;;  %2600 = vst.msk [vmem:[%s3949_s7 + $0xa0] sm:$0xff] %vm346_vm0, %v2348_v53 }
 0x303   : > { %v2447_v40 = vadd.f32 %v2446_v27, %v2445_v63  ;;  %v2549_v22 = vsel %vm346_vm0, %v2497_v37, 0.0 }
 0x304   : > { %v2547_v21 = vsel %vm346_vm0, %v2496_v18, 0.0 }
 0x305   : > { %v2548_v26 = vadd.f32 %v2547_v21, %v2546_v1  ;;  %v2449_v52 = vadd.f32 %v2448_v45, %v2447_v40 }
 0x307   : > { %v2550_v62 = vadd.f32 %v2549_v22, %v2548_v26 }
 0x318   : > { %v2840_v3 = vpop.f32.mrb[6].mxu1 }
 0x319   : > { %v2499_v6 = vmul.f32 %v2840_v3, %v2840_v3  ;;  %2603 = vst.msk [vmem:[%s3949_s7 + $0xb8] sm:$0xff] %vm346_vm0, %v2840_v3  ;;  %v2358_v9 = vpop.f32.mrb[7].mxu1  ;;  %v2452_v50 = vsel %vm346_vm0, %v2840_v3, 0.0 }
 0x31a   : > { %v2450_v10 = vsel %vm346_vm0, %v2358_v9, 0.0  ;;  %v2498_v46 = vmul.f32 %v2358_v9, %v2358_v9  ;;  %2602 = vst.msk [vmem:[%s3949_s7 + $0xb0] sm:$0xff] %vm346_vm0, %v2358_v9 }
 0x31b   : > { %v2451_v55 = vadd.f32 %v2450_v10, %v2449_v52  ;;  %v2553_v24 = vsel %vm346_vm0, %v2499_v6, 0.0 }
 0x31c   : > { %v2551_v39 = vsel %vm346_vm0, %v2498_v46, 0.0 }
 0x31d   : > { %v2552_v41 = vadd.f32 %v2551_v39, %v2550_v62  ;;  %v2453_v25 = vadd.f32 %v2452_v50, %v2451_v55 }
 0x31f   : > { %v2554_v48 = vadd.f32 %v2553_v24, %v2552_v41 }
 0x330   : > { %v2843_v54 = vpop.f32.mrb[8].mxu1 }
 0x331   : > { %v2501_v20 = vmul.f32 %v2843_v54, %v2843_v54  ;;  %2605 = vst.msk [vmem:[%s3949_s7 + $0xc8] sm:$0xff] %vm346_vm0, %v2843_v54  ;;  %v2368_v8 = vpop.f32.mrb[9].mxu1  ;;  %v2456_v23 = vsel %vm346_vm0, %v2843_v54, 0.0 }
 0x332   : > { %v2454_v60 = vsel %vm346_vm0, %v2368_v8, 0.0  ;;  %v2500_v12 = vmul.f32 %v2368_v8, %v2368_v8  ;;  %2604 = vst.msk [vmem:[%s3949_s7 + $0xc0] sm:$0xff] %vm346_vm0, %v2368_v8 }
 0x333   : > { %v2455_v44 = vadd.f32 %v2454_v60, %v2453_v25  ;;  %v2557_v57 = vsel %vm346_vm0, %v2501_v20, 0.0 }
 0x334   : > { %v2555_v13 = vsel %vm346_vm0, %v2500_v12, 0.0 }
 0x335   : > { %v2556_v0 = vadd.f32 %v2555_v13, %v2554_v48  ;;  %v2457_v5 = vadd.f32 %v2456_v23, %v2455_v44 }
 0x337   : > { %v2558_v28 = vadd.f32 %v2557_v57, %v2556_v0 }
 0x348   : > { %v2846_v2 = vpop.f32.mrb[10].mxu1 }
 0x349   : > { %v2503_v43 = vmul.f32 %v2846_v2, %v2846_v2  ;;  %2607 = vst.msk [vmem:[%s3949_s7 + $0xd8] sm:$0xff] %vm346_vm0, %v2846_v2  ;;  %v2378_v29 = vpop.f32.mrb[11].mxu1  ;;  %v2460_v30 = vsel %vm346_vm0, %v2846_v2, 0.0 }
 0x34a   : > { %v2458_v11 = vsel %vm346_vm0, %v2378_v29, 0.0  ;;  %v2502_v31 = vmul.f32 %v2378_v29, %v2378_v29  ;;  %2606 = vst.msk [vmem:[%s3949_s7 + $0xd0] sm:$0xff] %vm346_vm0, %v2378_v29 }
 0x34b   : > { %v2459_v15 = vadd.f32 %v2458_v11, %v2457_v5  ;;  %v2561_v51 = vsel %vm346_vm0, %v2503_v43, 0.0 }
 0x34c   : > { %v2559_v16 = vsel %vm346_vm0, %v2502_v31, 0.0 }
 0x34d   : > { %v2560_v56 = vadd.f32 %v2559_v16, %v2558_v28  ;;  %v2461_v61 = vadd.f32 %v2460_v30, %v2459_v15 }
 0x34f   : > { %v2562_v42 = vadd.f32 %v2561_v51, %v2560_v56 }
 0x360   : > { %v2849_v32 = vpop.f32.mrb[12].mxu1 }
 0x361   : > { %v2505_v47 = vmul.f32 %v2849_v32, %v2849_v32  ;;  %2609 = vst.msk [vmem:[%s3949_s7 + $0xe8] sm:$0xff] %vm346_vm0, %v2849_v32  ;;  %v2388_v17 = vpop.f32.mrb[13].mxu1  ;;  %v2464_v38 = vsel %vm346_vm0, %v2849_v32, 0.0 }
 0x362   : > { %v2462_v33 = vsel %vm346_vm0, %v2388_v17, 0.0  ;;  %v2504_v14 = vmul.f32 %v2388_v17, %v2388_v17  ;;  %2608 = vst.msk [vmem:[%s3949_s7 + $0xe0] sm:$0xff] %vm346_vm0, %v2388_v17 }
 0x363   : > { %v2463_v34 = vadd.f32 %v2462_v33, %v2461_v61  ;;  %v2565_v19 = vsel %vm346_vm0, %v2505_v47, 0.0 }
 0x364   : > { %v2563_v36 = vsel %vm346_vm0, %v2504_v14, 0.0 }
 0x365   : > { %v2564_v4 = vadd.f32 %v2563_v36, %v2562_v42  ;;  %v2465_v7 = vadd.f32 %v2464_v38, %v2463_v34 }
 0x367   : > { %v2566_v35 = vadd.f32 %v2565_v19, %v2564_v4 }
 0x373   : > { %v2852_v49 = vpop.f32.mrb[14].mxu1 }
 0x374   : > { %2611 = vst.msk [vmem:[%s3949_s7 + $0xf8] sm:$0xff] %vm346_vm0, %v2852_v49  ;;  %v2398_v58 = vpop.f32.mrb[15].mxu1  ;;  %v2507_v63 = vmul.f32 %v2852_v49, %v2852_v49  ;;  %v2468_v53 = vsel %vm346_vm0, %v2852_v49, 0.0 }
 0x375   : > { %v2466_v1 = vsel %vm346_vm0, %v2398_v58, 0.0  ;;  %v2506_v59 = vmul.f32 %v2398_v58, %v2398_v58  ;;  %2610 = vst.msk [vmem:[%s3949_s7 + $0xf0] sm:$0xff] %vm346_vm0, %v2398_v58 }
 0x376   : > { %v2467_v37 = vadd.f32 %v2466_v1, %v2465_v7  ;;  %v2569_v40 = vsel %vm346_vm0, %v2507_v63, 0.0 }
 0x377   : > { %v2567_v45 = vsel %vm346_vm0, %v2506_v59, 0.0 }
 0x378   : > { %v2469_v27 = vadd.f32 %v2468_v53, %v2467_v37  ;;  %v2568_v18 = vadd.f32 %v2567_v45, %v2566_v35 }
 0x37a   : > { %v2470_v22 = vrot.slane %v2469_v27, 4  ;;  %v2570_v21 = vadd.f32 %v2569_v40, %v2568_v18 }
 0x37c   : > { %v2471_v26 = vadd.f32 %v2470_v22, %v2469_v27  ;;  %v2571_v52 = vrot.slane %v2570_v21, 4 }
 0x37e   : > { %v2472_v62 = vrot.slane %v2471_v26, 2  ;;  %v2572_v3 = vadd.f32 %v2571_v52, %v2570_v21 }
 0x380   : > { %v2473_v6 = vadd.f32 %v2472_v62, %v2471_v26  ;;  %v2573_v9 = vrot.slane %v2572_v3, 2 }
 0x382   : > { %v2474_v50 = vrot.slane %v2473_v6, 1  ;;  %v2574_v10 = vadd.f32 %v2573_v9, %v2572_v3 }
 0x384   : > { %v2575_v46 = vrot.slane %v2574_v10, 1  ;;  %v2475_v55 = vadd.f32 %v2474_v50, %v2473_v6 }
 0x386   : > { %v2576_v24 = vadd.f32 %v2575_v46, %v2574_v10 }
 0x388   : > { %v2578_v39 = vsel %vm2577_vm11, %v2475_v55, %v2576_v24 }
 0x389   : > { %2579 = vst.msk [vmem:[%s235_s17] sm:$0x3] %vm349_vm1, %v2578_v39 }
 0x38a PF: > { %s16_s18 = sadd.s32 1, %s2904_s18  }
 0x38b   : > { %p13_p4 = scmp.ge.s32.totalorder %s16_s18, 6  }
 0x38d   :  { %15 = sbr.rel (!%p13_p4) target bundleno = 1 (0x1), region = 80 }

// kernel: bottleneck_pallas_nhwc.9
= control target key start
LH: loop header
LB: loop body
LE: loop exit
PB: predicated region body
PF: predicated region fallthrough
CT: control target
= control target key end

     0   :  { %v51_v0 = vlaneseq  ;;  %s656_s2 = inlined_call_operand.vmem [shape: f32[1,512], index: 2, kind: input, shape index: {}]   ;;  %s657_s3 = inlined_call_operand.vmem [shape: f32[1,512], index: 3, kind: input, shape index: {}]   ;;  %s658_s0 = inlined_call_operand.vmem [shape: f32[64,512], index: 0, kind: input, shape index: {}]   ;;  %s659_s1 = inlined_call_operand.vmem [shape: f32[64,512], index: 1, kind: input, shape index: {}]   ;;  %s660_s4 = inlined_call_operand.vmem [shape: f32[64,512], index: 4, kind: output, shape index: {}]  }
   0x1   :  { %v49_v2 = vld [vmem:[%s656_s2] sm:$0xf]  ;;  %v18_v6 = vld [vmem:[%s658_s0 + $0x8] sm:$0xff]  ;;  %v19_v10 = vld [vmem:[%s658_s0 + $0x10] sm:$0xff] }
   0x2   :  { %v52_v1 = vshrl.u32 %v51_v0, 7  ;;  %v103_v3 = vld [vmem:[%s657_s3] sm:$0xf]  ;;  %v22_v12 = vld [vmem:[%s658_s0 + $0x28] sm:$0xff]  ;;  %v20_v17 = vld [vmem:[%s658_s0 + $0x18] sm:$0xff] }
   0x3   :  { %v17_v4 = vld [vmem:[%s658_s0] sm:$0xff]  ;;  %v23_v18 = vld [vmem:[%s658_s0 + $0x30] sm:$0xff]  ;;  %v24_v19 = vld [vmem:[%s658_s0 + $0x38] sm:$0xff] }
   0x4   :  { %v53_v5 = vsub.s32 0, %v52_v1  ;;  %v57_v7 = vsub.s32 1, %v52_v1  ;;  %v61_v8 = vsub.s32 2, %v52_v1  ;;  %v65_v9 = vsub.s32 3, %v52_v1  ;;  %v21_v11 = vld [vmem:[%s658_s0 + $0x20] sm:$0xff]  ;;  %v158_v27 = vld [vmem:[%s659_s1 + $0x8] sm:$0xff] }
   0x5   :  { %v157_v20 = vld [vmem:[%s659_s1] sm:$0xff]  ;;  %v159_v28 = vld [vmem:[%s659_s1 + $0x10] sm:$0xff]  ;;  %v160_v29 = vld [vmem:[%s659_s1 + $0x18] sm:$0xff] }
   0x6   :  { %v303_v13 = vrot.slane %v49_v2, %v53_v5  ;;  %v305_v14 = vrot.slane %v103_v3, %v53_v5  ;;  %v307_v15 = vrot.slane %v49_v2, %v57_v7  ;;  %v309_v16 = vrot.slane %v103_v3, %v57_v7  ;;  %v161_v34 = vld [vmem:[%s659_s1 + $0x20] sm:$0xff]  ;;  %v162_v35 = vld [vmem:[%s659_s1 + $0x28] sm:$0xff]  ;;  %v163_v37 = vld [vmem:[%s659_s1 + $0x30] sm:$0xff] }
   0x7   :  { %v323_v21 = vrot.slane %v49_v2, %v61_v8  ;;  %v325_v22 = vrot.slane %v103_v3, %v61_v8  ;;  %v327_v23 = vrot.slane %v49_v2, %v65_v9  ;;  %v329_v24 = vrot.slane %v103_v3, %v65_v9  ;;  %v164_v43 = vld [vmem:[%s659_s1 + $0x38] sm:$0xff]  ;;  %v25_v44 = vld [vmem:[%s658_s0 + $0x40] sm:$0xff]  ;;  %v26_v45 = vld [vmem:[%s658_s0 + $0x48] sm:$0xff] }
   0x8   :  { %v71_v25 = vmul.f32 %v303_v13, %v17_v4  ;;  %v72_v26 = vmul.f32 %v307_v15, %v18_v6  ;;  %v75_v30 = vmul.f32 %v303_v13, %v21_v11  ;;  %v76_v31 = vmul.f32 %v307_v15, %v22_v12  ;;  %v27_v50 = vld [vmem:[%s658_s0 + $0x50] sm:$0xff]  ;;  %v28_v51 = vld [vmem:[%s658_s0 + $0x58] sm:$0xff]  ;;  %v29_v52 = vld [vmem:[%s658_s0 + $0x60] sm:$0xff] }
   0x9   :  { %v73_v32 = vmul.f32 %v323_v21, %v19_v10  ;;  %v74_v33 = vmul.f32 %v327_v23, %v20_v17  ;;  %v77_v36 = vmul.f32 %v323_v21, %v23_v18  ;;  %v78_v38 = vmul.f32 %v327_v23, %v24_v19  ;;  %v30_v57 = vld [vmem:[%s658_s0 + $0x68] sm:$0xff]  ;;  %v31_v58 = vld [vmem:[%s658_s0 + $0x70] sm:$0xff]  ;;  %v32_v59 = vld [vmem:[%s658_s0 + $0x78] sm:$0xff] }
   0xa   :  { %v125_v39 = vadd.f32 %v305_v14, %v71_v25  ;;  %v126_v40 = vadd.f32 %v309_v16, %v72_v26  ;;  %v129_v41 = vadd.f32 %v305_v14, %v75_v30  ;;  %v130_v42 = vadd.f32 %v309_v16, %v76_v31  ;;  %v165_v0 = vld [vmem:[%s659_s1 + $0x40] sm:$0xff]  ;;  %v166_v3 = vld [vmem:[%s659_s1 + $0x48] sm:$0xff]  ;;  %v167_v5 = vld [vmem:[%s659_s1 + $0x50] sm:$0xff] }
   0xb   :  { %v127_v46 = vadd.f32 %v325_v22, %v73_v32  ;;  %v128_v47 = vadd.f32 %v329_v24, %v74_v33  ;;  %v131_v48 = vadd.f32 %v325_v22, %v77_v36  ;;  %v132_v49 = vadd.f32 %v329_v24, %v78_v38  ;;  %v168_v7 = vld [vmem:[%s659_s1 + $0x58] sm:$0xff]  ;;  %v169_v9 = vld [vmem:[%s659_s1 + $0x60] sm:$0xff]  ;;  %v170_v11 = vld [vmem:[%s659_s1 + $0x68] sm:$0xff] }
   0xc   :  { %v189_v53 = vadd.f32 %v157_v20, %v125_v39  ;;  %v190_v54 = vadd.f32 %v158_v27, %v126_v40  ;;  %v193_v55 = vadd.f32 %v161_v34, %v129_v41  ;;  %v194_v56 = vadd.f32 %v162_v35, %v130_v42  ;;  %v171_v17 = vld [vmem:[%s659_s1 + $0x70] sm:$0xff]  ;;  %v172_v27 = vld [vmem:[%s659_s1 + $0x78] sm:$0xff]  ;;  %v37_v36 = vld [vmem:[%s658_s0 + $0xa0] sm:$0xff] }
   0xd   :  { %v191_v60 = vadd.f32 %v159_v28, %v127_v46  ;;  %v192_v61 = vadd.f32 %v160_v29, %v128_v47  ;;  %v195_v62 = vadd.f32 %v163_v37, %v131_v48  ;;  %v196_v63 = vadd.f32 %v164_v43, %v132_v49  ;;  %v33_v28 = vld [vmem:[%s658_s0 + $0x80] sm:$0xff]  ;;  %v34_v29 = vld [vmem:[%s658_s0 + $0x88] sm:$0xff]  ;;  %v35_v34 = vld [vmem:[%s658_s0 + $0x90] sm:$0xff] }
   0xe   :  { %221 = vst [vmem:[%s660_s4] sm:$0xff] %v189_v53  ;;  %222 = vst [vmem:[%s660_s4 + $0x8] sm:$0xff] %v190_v54  ;;  %v79_v1 = vmul.f32 %v303_v13, %v25_v44  ;;  %v80_v2 = vmul.f32 %v307_v15, %v26_v45  ;;  %v81_v4 = vmul.f32 %v323_v21, %v27_v50  ;;  %v36_v35 = vld [vmem:[%s658_s0 + $0x98] sm:$0xff]  ;;  %v38_v41 = vld [vmem:[%s658_s0 + $0xa8] sm:$0xff] }
   0xf   :  { %225 = vst [vmem:[%s660_s4 + $0x20] sm:$0xff] %v193_v55  ;;  %226 = vst [vmem:[%s660_s4 + $0x28] sm:$0xff] %v194_v56  ;;  %v82_v6 = vmul.f32 %v327_v23, %v28_v51  ;;  %v83_v8 = vmul.f32 %v303_v13, %v29_v52  ;;  %v84_v10 = vmul.f32 %v307_v15, %v30_v57  ;;  %v39_v42 = vld [vmem:[%s658_s0 + $0xb0] sm:$0xff]  ;;  %v40_v43 = vld [vmem:[%s658_s0 + $0xb8] sm:$0xff] }
  0x10   :  { %223 = vst [vmem:[%s660_s4 + $0x10] sm:$0xff] %v191_v60  ;;  %224 = vst [vmem:[%s660_s4 + $0x18] sm:$0xff] %v192_v61  ;;  %v85_v12 = vmul.f32 %v323_v21, %v31_v58  ;;  %v86_v18 = vmul.f32 %v327_v23, %v32_v59  ;;  %v133_v19 = vadd.f32 %v305_v14, %v79_v1  ;;  %v173_v48 = vld [vmem:[%s659_s1 + $0x80] sm:$0xff]  ;;  %v174_v51 = vld [vmem:[%s659_s1 + $0x88] sm:$0xff] }
  0x11   :  { %227 = vst [vmem:[%s660_s4 + $0x30] sm:$0xff] %v195_v62  ;;  %228 = vst [vmem:[%s660_s4 + $0x38] sm:$0xff] %v196_v63  ;;  %v134_v20 = vadd.f32 %v309_v16, %v80_v2  ;;  %v135_v25 = vadd.f32 %v325_v22, %v81_v4  ;;  %v136_v26 = vadd.f32 %v329_v24, %v82_v6  ;;  %v175_v53 = vld [vmem:[%s659_s1 + $0x90] sm:$0xff]  ;;  %v176_v55 = vld [vmem:[%s659_s1 + $0x98] sm:$0xff] }
  0x12   :  { %v137_v30 = vadd.f32 %v305_v14, %v83_v8  ;;  %v138_v31 = vadd.f32 %v309_v16, %v84_v10  ;;  %v139_v32 = vadd.f32 %v325_v22, %v85_v12  ;;  %v140_v33 = vadd.f32 %v329_v24, %v86_v18  ;;  %v177_v57 = vld [vmem:[%s659_s1 + $0xa0] sm:$0xff]  ;;  %v178_v59 = vld [vmem:[%s659_s1 + $0xa8] sm:$0xff]  ;;  %v179_v61 = vld [vmem:[%s659_s1 + $0xb0] sm:$0xff] }
  0x13   :  { %v197_v37 = vadd.f32 %v165_v0, %v133_v19  ;;  %v198_v38 = vadd.f32 %v166_v3, %v134_v20  ;;  %v199_v39 = vadd.f32 %v167_v5, %v135_v25  ;;  %v200_v40 = vadd.f32 %v168_v7, %v136_v26  ;;  %v180_v3 = vld [vmem:[%s659_s1 + $0xb8] sm:$0xff]  ;;  %v41_v4 = vld [vmem:[%s658_s0 + $0xc0] sm:$0xff]  ;;  %v42_v5 = vld [vmem:[%s658_s0 + $0xc8] sm:$0xff] }
  0x14   :  { %v201_v44 = vadd.f32 %v169_v9, %v137_v30  ;;  %v202_v45 = vadd.f32 %v170_v11, %v138_v31  ;;  %v203_v46 = vadd.f32 %v171_v17, %v139_v32  ;;  %v204_v47 = vadd.f32 %v172_v27, %v140_v33  ;;  %v43_v10 = vld [vmem:[%s658_s0 + $0xd0] sm:$0xff]  ;;  %v44_v11 = vld [vmem:[%s658_s0 + $0xd8] sm:$0xff]  ;;  %v45_v12 = vld [vmem:[%s658_s0 + $0xe0] sm:$0xff] }
  0x15   :  { %229 = vst [vmem:[%s660_s4 + $0x40] sm:$0xff] %v197_v37  ;;  %230 = vst [vmem:[%s660_s4 + $0x48] sm:$0xff] %v198_v38  ;;  %v87_v49 = vmul.f32 %v303_v13, %v33_v28  ;;  %v88_v50 = vmul.f32 %v307_v15, %v34_v29  ;;  %v89_v52 = vmul.f32 %v323_v21, %v35_v34  ;;  %v46_v25 = vld [vmem:[%s658_s0 + $0xe8] sm:$0xff]  ;;  %v47_v26 = vld [vmem:[%s658_s0 + $0xf0] sm:$0xff] }
  0x16   :  { %231 = vst [vmem:[%s660_s4 + $0x50] sm:$0xff] %v199_v39  ;;  %232 = vst [vmem:[%s660_s4 + $0x58] sm:$0xff] %v200_v40  ;;  %v90_v54 = vmul.f32 %v327_v23, %v36_v35  ;;  %v91_v56 = vmul.f32 %v303_v13, %v37_v36  ;;  %v92_v58 = vmul.f32 %v307_v15, %v38_v41  ;;  %v48_v27 = vld [vmem:[%s658_s0 + $0xf8] sm:$0xff]  ;;  %v181_v33 = vld [vmem:[%s659_s1 + $0xc0] sm:$0xff] }
  0x17   :  { %233 = vst [vmem:[%s660_s4 + $0x60] sm:$0xff] %v201_v44  ;;  %234 = vst [vmem:[%s660_s4 + $0x68] sm:$0xff] %v202_v45  ;;  %v93_v60 = vmul.f32 %v323_v21, %v39_v42  ;;  %v94_v62 = vmul.f32 %v327_v23, %v40_v43  ;;  %v141_v63 = vadd.f32 %v305_v14, %v87_v49  ;;  %v182_v35 = vld [vmem:[%s659_s1 + $0xc8] sm:$0xff]  ;;  %v183_v38 = vld [vmem:[%s659_s1 + $0xd0] sm:$0xff] }
  0x18   :  { %235 = vst [vmem:[%s660_s4 + $0x70] sm:$0xff] %v203_v46  ;;  %236 = vst [vmem:[%s660_s4 + $0x78] sm:$0xff] %v204_v47  ;;  %v142_v0 = vadd.f32 %v309_v16, %v88_v50  ;;  %v143_v1 = vadd.f32 %v325_v22, %v89_v52  ;;  %v144_v2 = vadd.f32 %v329_v24, %v90_v54  ;;  %v184_v39 = vld [vmem:[%s659_s1 + $0xd8] sm:$0xff]  ;;  %v185_v41 = vld [vmem:[%s659_s1 + $0xe0] sm:$0xff] }
  0x19   :  { %v145_v6 = vadd.f32 %v305_v14, %v91_v56  ;;  %v146_v7 = vadd.f32 %v309_v16, %v92_v58  ;;  %v147_v8 = vadd.f32 %v325_v22, %v93_v60  ;;  %v148_v9 = vadd.f32 %v329_v24, %v94_v62 }
  0x1a   :  { %v205_v17 = vadd.f32 %v173_v48, %v141_v63  ;;  %v206_v18 = vadd.f32 %v174_v51, %v142_v0  ;;  %v207_v19 = vadd.f32 %v175_v53, %v143_v1  ;;  %v208_v20 = vadd.f32 %v176_v55, %v144_v2 }
  0x1b   :  { %v209_v28 = vadd.f32 %v177_v57, %v145_v6  ;;  %v210_v29 = vadd.f32 %v178_v59, %v146_v7  ;;  %v211_v30 = vadd.f32 %v179_v61, %v147_v8  ;;  %v212_v31 = vadd.f32 %v180_v3, %v148_v9 }
  0x1c   :  { %237 = vst [vmem:[%s660_s4 + $0x80] sm:$0xff] %v205_v17  ;;  %238 = vst [vmem:[%s660_s4 + $0x88] sm:$0xff] %v206_v18  ;;  %v95_v32 = vmul.f32 %v303_v13, %v41_v4  ;;  %v96_v34 = vmul.f32 %v307_v15, %v42_v5  ;;  %v97_v36 = vmul.f32 %v323_v21, %v43_v10 }
  0x1d   :  { %239 = vst [vmem:[%s660_s4 + $0x90] sm:$0xff] %v207_v19  ;;  %240 = vst [vmem:[%s660_s4 + $0x98] sm:$0xff] %v208_v20  ;;  %v98_v37 = vmul.f32 %v327_v23, %v44_v11  ;;  %v99_v40 = vmul.f32 %v303_v13, %v45_v12  ;;  %v100_v42 = vmul.f32 %v307_v15, %v46_v25  ;;  %v186_v13 = vld [vmem:[%s659_s1 + $0xe8] sm:$0xff]  ;;  %v187_v15 = vld [vmem:[%s659_s1 + $0xf0] sm:$0xff] }
  0x1e   :  { %241 = vst [vmem:[%s660_s4 + $0xa0] sm:$0xff] %v209_v28  ;;  %242 = vst [vmem:[%s660_s4 + $0xa8] sm:$0xff] %v210_v29  ;;  %v101_v43 = vmul.f32 %v323_v21, %v47_v26  ;;  %v102_v44 = vmul.f32 %v327_v23, %v48_v27  ;;  %v149_v45 = vadd.f32 %v305_v14, %v95_v32  ;;  %v188_v21 = vld [vmem:[%s659_s1 + $0xf8] sm:$0xff] }
  0x1f   :  { %243 = vst [vmem:[%s660_s4 + $0xb0] sm:$0xff] %v211_v30  ;;  %244 = vst [vmem:[%s660_s4 + $0xb8] sm:$0xff] %v212_v31  ;;  %v150_v46 = vadd.f32 %v309_v16, %v96_v34  ;;  %v151_v47 = vadd.f32 %v325_v22, %v97_v36  ;;  %v152_v48 = vadd.f32 %v329_v24, %v98_v37 }
  0x20   :  { %v153_v23 = vadd.f32 %v305_v14, %v99_v40  ;;  %v154_v49 = vadd.f32 %v309_v16, %v100_v42  ;;  %v155_v50 = vadd.f32 %v325_v22, %v101_v43  ;;  %v156_v51 = vadd.f32 %v329_v24, %v102_v44 }
  0x21   :  { %v213_v52 = vadd.f32 %v181_v33, %v149_v45  ;;  %v214_v53 = vadd.f32 %v182_v35, %v150_v46  ;;  %v215_v54 = vadd.f32 %v183_v38, %v151_v47  ;;  %v216_v55 = vadd.f32 %v184_v39, %v152_v48 }
  0x22   :  { %v217_v56 = vadd.f32 %v185_v41, %v153_v23  ;;  %v218_v57 = vadd.f32 %v186_v13, %v154_v49  ;;  %v219_v58 = vadd.f32 %v187_v15, %v155_v50  ;;  %v220_v59 = vadd.f32 %v188_v21, %v156_v51 }
  0x23   :  { %245 = vst [vmem:[%s660_s4 + $0xc0] sm:$0xff] %v213_v52  ;;  %246 = vst [vmem:[%s660_s4 + $0xc8] sm:$0xff] %v214_v53 }
  0x24   :  { %247 = vst [vmem:[%s660_s4 + $0xd0] sm:$0xff] %v215_v54  ;;  %248 = vst [vmem:[%s660_s4 + $0xd8] sm:$0xff] %v216_v55 }
  0x25   :  { %249 = vst [vmem:[%s660_s4 + $0xe0] sm:$0xff] %v217_v56  ;;  %250 = vst [vmem:[%s660_s4 + $0xe8] sm:$0xff] %v218_v57 }
  0x26   :  { %251 = vst [vmem:[%s660_s4 + $0xf0] sm:$0xff] %v219_v58  ;;  %252 = vst [vmem:[%s660_s4 + $0xf8] sm:$0xff] %v220_v59 }

</bundles_post_ra>
